<compile_context>
chip_gen: v6e
topology: v6e:2x2x1
jax: 0.10.0
libtpu: 0.0.40
codegen_flags: <defaults>
</compile_context>

<pallas_src>
import math

import jax
import jax.numpy as jnp
from jax import lax
from jax.experimental import pallas as pl
from jax.experimental.pallas import tpu as pltpu


TIME_CHUNK = 16                       # time steps per pipelined grid step
VMEM_LIMIT = 64 * 1024 * 1024         # fits v7x's 64 MiB physical VMEM


def _round_up(n, m):
    return ((n + m - 1) // m) * m


# ----------------------------------------------------------------------------
# Pallas kernels
# ----------------------------------------------------------------------------
def bi_lstm_last_kernel(x_ref, wih_ref, whh_ref, b_ref, h0_ref, c0_ref, li_ref,
                        hlast_ref, cglast_ref, h_sc, c_sc, xg_sc):
    """Bidirectional-encoder LSTM, grid = (direction, time_chunk).

    Per grid step the kernel sees one direction's weights and one time chunk.
    Only the hidden/candidate-gate state at t == last_idx[b] is kept (resident
    (B, H) output accumulators) -- the full (T,B,H) history is never written.

    x_ref  : (Tc, Bp, Ep)   wih_ref : (Ep, 4H)   whh_ref : (Hp, 4H)
    b_ref  : (1, 4H)        h0/c0   : (Bp, H)    li_ref  : (Bp, 1) int32
    """
    Tc, Bp, Ep = x_ref.shape
    Hh = h0_ref.shape[-1]
    ci = pl.program_id(1)

    @pl.when(ci == 0)
    def _():
        h_sc[...] = h0_ref[...]
        c_sc[...] = c0_ref[...]
        hlast_ref[...] = jnp.zeros_like(hlast_ref)
        cglast_ref[...] = jnp.zeros_like(cglast_ref)

    # Hoisted input projection: one large MXU matmul for the whole chunk.
    xg = jnp.dot(x_ref[...].reshape(Tc * Bp, Ep), wih_ref[...],
                 preferred_element_type=jnp.float32) + b_ref[...]
    xg_sc[...] = xg.reshape(Tc, Bp, 4 * Hh)

    t0 = ci * Tc

    def step(t, carry):
        gates = xg_sc[t] + jnp.dot(h_sc[...], whh_ref[...],
                                   preferred_element_type=jnp.float32)
        i_g = jax.nn.sigmoid(gates[:, 0 * Hh:1 * Hh])   # lane-aligned slices
        f_g = jax.nn.sigmoid(gates[:, 1 * Hh:2 * Hh])
        g_g = jnp.tanh(gates[:, 2 * Hh:3 * Hh])
        o_g = jax.nn.sigmoid(gates[:, 3 * Hh:4 * Hh])
        c_new = f_g * c_sc[...] + i_g * g_g
        h_new = o_g * jnp.tanh(c_new)
        c_sc[...] = c_new
        h_sc[...] = h_new
        # capture the state at the sequence-final step (t == lengths-1)
        sel = li_ref[...] == (t0 + t)                   # (Bp, 1)
        hlast_ref[...] = jnp.where(sel, h_new, hlast_ref[...])
        cglast_ref[...] = jnp.where(sel, g_g, cglast_ref[...])
        return carry

    lax.fori_loop(0, Tc, step, 0, unroll=True)


def dec_lstm_kernel(x_ref, wih_ref, whh_ref, b_ref, h0_ref, c0_ref,
                    hid_ref, h_sc, c_sc, xg_sc):
    """Decoder LSTM, grid = (time_chunk,); writes full (Tc,Bp,Hp) hiddens."""
    Tc, Bp, Ep = x_ref.shape
    Hp = h0_ref.shape[-1]

    @pl.when(pl.program_id(0) == 0)
    def _():
        h_sc[...] = h0_ref[...]
        c_sc[...] = c0_ref[...]

    xg = jnp.dot(x_ref[...].reshape(Tc * Bp, Ep), wih_ref[...],
                 preferred_element_type=jnp.float32) + b_ref[...]
    xg_sc[...] = xg.reshape(Tc, Bp, 4 * Hp)

    def step(t, carry):
        gates = xg_sc[t] + jnp.dot(h_sc[...], whh_ref[...],
                                   preferred_element_type=jnp.float32)
        i_g = jax.nn.sigmoid(gates[:, 0 * Hp:1 * Hp])
        f_g = jax.nn.sigmoid(gates[:, 1 * Hp:2 * Hp])
        g_g = jnp.tanh(gates[:, 2 * Hp:3 * Hp])
        o_g = jax.nn.sigmoid(gates[:, 3 * Hp:4 * Hp])
        c_new = f_g * c_sc[...] + i_g * g_g
        h_new = o_g * jnp.tanh(c_new)
        c_sc[...] = c_new
        h_sc[...] = h_new
        hid_ref[t] = h_new
        return carry

    lax.fori_loop(0, Tc, step, 0, unroll=True)


def linear_logsoftmax_kernel(h_ref, w_ref, b_ref, out_ref, m_sc, l_sc):
    """log_softmax(h @ W + b), grid = (rows, pass, vocab_tile).

    Pass 0 streams vocab tiles and accumulates the running max / sumexp in
    scratch; pass 1 re-streams the tiles and writes lane-dense output blocks.
    """
    p = pl.program_id(1)
    v = pl.program_id(2)

    logits = jnp.dot(h_ref[...], w_ref[...],
                     preferred_element_type=jnp.float32) + b_ref[...]

    @pl.when(jnp.logical_and(p == 0, v == 0))
    def _():
        m_sc[...] = jnp.full_like(m_sc, -jnp.inf)
        l_sc[...] = jnp.zeros_like(l_sc)

    @pl.when(p == 0)
    def _():
        m_prev = m_sc[...]
        m_new = jnp.maximum(m_prev, jnp.max(logits, axis=-1, keepdims=True))
        l_sc[...] = (l_sc[...] * jnp.exp(m_prev - m_new)
                     + jnp.sum(jnp.exp(logits - m_new), axis=-1, keepdims=True))
        m_sc[...] = m_new

    @pl.when(p == 1)
    def _():
        out_ref[...] = logits - m_sc[...] - jnp.log(l_sc[...])


# ----------------------------------------------------------------------------
# Pallas wrappers
# ----------------------------------------------------------------------------
def bi_encoder_lstm_pallas(x2, wih2, whh2, b2, h02, c02, last_idx, *, time_chunk):
    """x2: (2, Tp, Bp, Ep); weights stacked per direction; returns last states."""
    _, Tp, Bp, Ep = x2.shape
    Hh = h02.shape[-1]
    G = 4 * Hh
    Tc = time_chunk
    grid = (2, Tp // Tc)

    out_shape = (jax.ShapeDtypeStruct((2, Bp, Hh), jnp.float32),
                 jax.ShapeDtypeStruct((2, Bp, Hh), jnp.float32))
    return pl.pallas_call(
        bi_lstm_last_kernel,
        out_shape=out_shape,
        grid=grid,
        in_specs=[
            pl.BlockSpec((None, Tc, Bp, Ep), lambda d, c: (d, c, 0, 0)),
            pl.BlockSpec((None, Ep, G), lambda d, c: (d, 0, 0)),
            pl.BlockSpec((None, Hh, G), lambda d, c: (d, 0, 0)),
            pl.BlockSpec((None, 1, G), lambda d, c: (d, 0, 0)),
            pl.BlockSpec((None, Bp, Hh), lambda d, c: (d, 0, 0)),
            pl.BlockSpec((None, Bp, Hh), lambda d, c: (d, 0, 0)),
            pl.BlockSpec((Bp, 1), lambda d, c: (0, 0)),
        ],
        out_specs=(
            pl.BlockSpec((None, Bp, Hh), lambda d, c: (d, 0, 0)),
            pl.BlockSpec((None, Bp, Hh), lambda d, c: (d, 0, 0)),
        ),
        scratch_shapes=[
            pltpu.VMEM((Bp, Hh), jnp.float32),        # h carry
            pltpu.VMEM((Bp, Hh), jnp.float32),        # c carry
            pltpu.VMEM((Tc, Bp, G), jnp.float32),     # hoisted input projection
        ],
        compiler_params=pltpu.CompilerParams(
            dimension_semantics=("parallel", "arbitrary"),
            vmem_limit_bytes=VMEM_LIMIT),
    )(x2, wih2, whh2, b2, h02, c02, last_idx)


def decoder_lstm_pallas(x_tbe, wih_t, whh_t, b, h0, c0, *, time_chunk):
    """x_tbe: (Tp, Bp, Ep) -> hiddens (Tp, Bp, Hp)."""
    Tp, Bp, Ep = x_tbe.shape
    Hp = h0.shape[-1]
    G = 4 * Hp
    Tc = time_chunk
    grid = (Tp // Tc,)

    return pl.pallas_call(
        dec_lstm_kernel,
        out_shape=jax.ShapeDtypeStruct((Tp, Bp, Hp), jnp.float32),
        grid=grid,
        in_specs=[
            pl.BlockSpec((Tc, Bp, Ep), lambda c: (c, 0, 0)),
            pl.BlockSpec((Ep, G), lambda c: (0, 0)),
            pl.BlockSpec((Hp, G), lambda c: (0, 0)),
            pl.BlockSpec((1, G), lambda c: (0, 0)),
            pl.BlockSpec((Bp, Hp), lambda c: (0, 0)),
            pl.BlockSpec((Bp, Hp), lambda c: (0, 0)),
        ],
        out_specs=pl.BlockSpec((Tc, Bp, Hp), lambda c: (c, 0, 0)),
        scratch_shapes=[
            pltpu.VMEM((Bp, Hp), jnp.float32),
            pltpu.VMEM((Bp, Hp), jnp.float32),
            pltpu.VMEM((Tc, Bp, G), jnp.float32),
        ],
        compiler_params=pltpu.CompilerParams(
            dimension_semantics=("arbitrary",),
            vmem_limit_bytes=VMEM_LIMIT),
    )(x_tbe, wih_t, whh_t, b, h0, c0)


def linear_logsoftmax_pallas(h, w_t, b):
    """h: (N, Hp), w_t: (Hp, Vp), b: (1, Vp) -> (N, Vp) log-probs."""
    N, Hp = h.shape
    Vp = w_t.shape[1]

    N8 = _round_up(N, 8)
    if N8 <= 256:
        tn = N8
    else:
        tn = next(c for c in (256, 128, 64, 32, 16, 8) if N8 % c == 0)
    Np = _round_up(N, tn)
    if Np != N:
        h = jnp.pad(h, ((0, Np - N), (0, 0)))

    tv = next(c for c in (512, 256, 128) if Vp % c == 0)   # lane-dense V tiles
    grid = (Np // tn, 2, Vp // tv)

    out = pl.pallas_call(
        linear_logsoftmax_kernel,
        out_shape=jax.ShapeDtypeStruct((Np, Vp), jnp.float32),
        grid=grid,
        in_specs=[
            pl.BlockSpec((tn, Hp), lambda n, p, v: (n, 0)),
            pl.BlockSpec((Hp, tv), lambda n, p, v: (0, v)),
            pl.BlockSpec((1, tv), lambda n, p, v: (0, v)),
        ],
        # During pass 0 the output block index is pinned to (n, 0) so no
        # uninitialized blocks are ever written back; pass 1 writes every tile.
        out_specs=pl.BlockSpec((tn, tv), lambda n, p, v: (n, p * v)),
        scratch_shapes=[
            pltpu.VMEM((tn, 1), jnp.float32),   # running max
            pltpu.VMEM((tn, 1), jnp.float32),   # running sum-exp
        ],
        compiler_params=pltpu.CompilerParams(
            dimension_semantics=("parallel", "arbitrary", "arbitrary"),
            vmem_limit_bytes=VMEM_LIMIT),
    )(h, w_t, b)
    return out[:N]


# ----------------------------------------------------------------------------
# Parameters (deterministic init, mirrors the torch module shapes)
# ----------------------------------------------------------------------------
def init_lstm_params(key, input_size, hidden_size):
    stdv = 1.0 / math.sqrt(hidden_size)
    k1, k2, k3, k4 = jax.random.split(key, 4)
    gate = 4 * hidden_size
    w_ih = jax.random.uniform(k1, (gate, input_size), jnp.float32, -stdv, stdv)
    w_hh = jax.random.uniform(k2, (gate, hidden_size), jnp.float32, -stdv, stdv)
    b_ih = jax.random.uniform(k3, (gate,), jnp.float32, -stdv, stdv)
    b_hh = jax.random.uniform(k4, (gate,), jnp.float32, -stdv, stdv)
    return (w_ih, w_hh, (b_ih + b_hh).reshape(1, gate))


def init_params(key, vocab_size, embedding_size, hidden_size):
    k_emb, k_f, k_b, k_d, k_lin = jax.random.split(key, 5)
    return {
        "embed": jax.random.uniform(
            k_emb, (vocab_size, embedding_size), jnp.float32, -0.1, 0.1),
        "fenc": init_lstm_params(k_f, embedding_size, hidden_size // 2),
        "benc": init_lstm_params(k_b, embedding_size, hidden_size // 2),
        "dec": init_lstm_params(k_d, embedding_size, hidden_size),
        "lin_w": jax.random.uniform(
            k_lin, (vocab_size, hidden_size), jnp.float32, -0.1, 0.1),
        "lin_b": jnp.zeros((1, vocab_size), jnp.float32),
    }


# ----------------------------------------------------------------------------
# Padding helpers (gate-wise so the 4 gate blocks stay lane aligned)
# ----------------------------------------------------------------------------
def _pad_lstm_weights(w_ih, w_hh, b, in_p, hid_p):
    """(4H,In),(4H,H),(1,4H) -> transposed, zero-padded (In_p,4Hp),(Hp,4Hp),(1,4Hp)."""
    G, _ = w_ih.shape
    H = G // 4

    def pad_gatewise(w, cols_p):
        w4 = w.reshape(4, H, w.shape[1])
        w4 = jnp.pad(w4, ((0, 0), (0, hid_p - H), (0, cols_p - w.shape[1])))
        return w4.reshape(4 * hid_p, cols_p)

    wih_p = pad_gatewise(w_ih, in_p)
    whh_p = pad_gatewise(w_hh, hid_p)
    b_p = jnp.pad(b.reshape(4, H), ((0, 0), (0, hid_p - H))).reshape(1, 4 * hid_p)
    return wih_p.T, whh_p.T, b_p


def _build_backward_embedded(emb, x_embedded, lengths):
    """Reverse each valid prefix by *gathering* embedded rows (replaces the
    torch scatter + second embedding lookup); padded slots get emb[token 0]."""
    B, T, E = x_embedded.shape
    j = jnp.arange(T, dtype=jnp.int32)
    src = jnp.clip(lengths[:, None] - 1 - j[None, :], 0, T - 1)       # (B, T)
    gathered = jnp.take_along_axis(x_embedded, src[:, :, None], axis=1)
    return jnp.where(j[None, :, None] < lengths[:, None, None],
                     gathered, emb[0][None, None, :])


# ----------------------------------------------------------------------------
# Model forward (glue in JAX, hot loops in Pallas)
# ----------------------------------------------------------------------------
def encode(params, x, x_mask, hidden):
    emb = params["embed"]
    B, T = x.shape
    E = emb.shape[1]
    Hh = params["fenc"][0].shape[0] // 4          # hidden_size // 2

    Bp = _round_up(B, 8)
    Ep = _round_up(E, 128)
    Hhp = _round_up(Hh, 128)
    Tc = min(TIME_CHUNK, T)
    Tp = _round_up(T, Tc)

    x_embedded = emb[x]                                            # (B, T, E)
    lengths = jnp.sum(x_mask, axis=1).astype(jnp.int32)            # (B,)
    x_backward_embedded = _build_backward_embedded(emb, x_embedded, lengths)
    last_idx = jnp.maximum(lengths - 1, 0)                         # guard empty rows

    (h0f, c0f), (h0b, c0b) = hidden

    def prep_x(xe):                                                # -> (Tp,Bp,Ep)
        xe = jnp.transpose(xe, (1, 0, 2))
        return jnp.pad(xe, ((0, Tp - T), (0, Bp - B), (0, Ep - E)))

    x2 = jnp.stack([prep_x(x_embedded), prep_x(x_backward_embedded)])

    wih_f, whh_f, b_f = _pad_lstm_weights(*params["fenc"], Ep, Hhp)
    wih_b, whh_b, b_b = _pad_lstm_weights(*params["benc"], Ep, Hhp)
    wih2 = jnp.stack([wih_f, wih_b])
    whh2 = jnp.stack([whh_f, whh_b])
    b2 = jnp.stack([b_f, b_b])

    def prep_hc(h):
        return jnp.pad(h, ((0, Bp - B), (0, Hhp - Hh)))

    h02 = jnp.stack([prep_hc(h0f), prep_hc(h0b)])
    c02 = jnp.stack([prep_hc(c0f), prep_hc(c0b)])
    li = jnp.pad(last_idx, (0, Bp - B)).reshape(Bp, 1)

    h_last, cg_last = bi_encoder_lstm_pallas(
        x2, wih2, whh2, b2, h02, c02, li, time_chunk=Tc)           # (2,Bp,Hhp)

    hiddens = jnp.concatenate([h_last[0, :B, :Hh], h_last[1, :B, :Hh]], axis=1)
    cellgates = jnp.concatenate([cg_last[0, :B, :Hh], cg_last[1, :B, :Hh]], axis=1)
    return hiddens, cellgates


def forward(params, x, x_mask, y, hidden):
    emb = params["embed"]
    B, Ty = y.shape
    E = emb.shape[1]
    H = params["dec"][0].shape[0] // 4
    V = params["lin_w"].shape[0]

    Bp = _round_up(B, 8)
    Ep = _round_up(E, 128)
    Hp = _round_up(H, 128)
    Vp = _round_up(V, 128)
    Tc = min(TIME_CHUNK, Ty)
    Typ = _round_up(Ty, Tc)

    h_enc, c_enc = encode(params, x, x_mask, hidden)               # (B, H) each

    y_embedded = emb[y]                                            # (B, Ty, E)
    y_tme = jnp.transpose(y_embedded, (1, 0, 2))
    y_tme = jnp.pad(y_tme, ((0, Typ - Ty), (0, Bp - B), (0, Ep - E)))

    wih_d, whh_d, b_d = _pad_lstm_weights(*params["dec"], Ep, Hp)
    h0 = jnp.pad(h_enc, ((0, Bp - B), (0, Hp - H)))
    c0 = jnp.pad(c_enc, ((0, Bp - B), (0, Hp - H)))

    dec_h = decoder_lstm_pallas(y_tme, wih_d, whh_d, b_d, h0, c0,
                                time_chunk=Tc)                     # (Typ,Bp,Hp)

    # linear + log_softmax over vocab (padded vocab columns get -1e30 bias)
    flat = dec_h.reshape(Typ * Bp, Hp)
    w_t = jnp.pad(params["lin_w"], ((0, Vp - V), (0, Hp - H))).T   # (Hp, Vp)
    b_lin = jnp.pad(params["lin_b"], ((0, 0), (0, Vp - V)),
                    constant_values=-1e30)                         # (1, Vp)
    logp = linear_logsoftmax_pallas(flat, w_t, b_lin)              # (Typ*Bp, Vp)
    logp = logp.reshape(Typ, Bp, Vp)

    decoded = jnp.transpose(logp[:Ty, :B, :V], (1, 0, 2))          # (B, Ty, V)
    hiddens = jnp.transpose(dec_h[:Ty, :B, :H], (1, 0, 2))         # (B, Ty, H)
    return decoded, hiddens


# ----------------------------------------------------------------------------
# Pure-JAX reference (same semantics, unpadded) for a correctness check
# ----------------------------------------------------------------------------
def _lstm_ref(x_tbe, w_ih, w_hh, b, h0, c0):
    H = h0.shape[-1]

    def step(carry, x_t):
        h, c = carry
        gates = x_t @ w_ih.T + h @ w_hh.T + b
        i = jax.nn.sigmoid(gates[:, :H])
        f = jax.nn.sigmoid(gates[:, H:2 * H])
        g = jnp.tanh(gates[:, 2 * H:3 * H])
        o = jax.nn.sigmoid(gates[:, 3 * H:])
        c = f * c + i * g
        h = o * jnp.tanh(c)
        return (h, c), (h, g)

    _, (hs, gs) = lax.scan(step, (h0, c0), x_tbe)
    return hs, gs


def forward_ref(params, x, x_mask, y, hidden):
    emb = params["embed"]
    B, _ = x.shape
    x_embedded = emb[x]
    lengths = jnp.sum(x_mask, axis=1).astype(jnp.int32)
    x_backward_embedded = _build_backward_embedded(emb, x_embedded, lengths)
    (h0f, c0f), (h0b, c0b) = hidden
    f_h, f_g = _lstm_ref(jnp.transpose(x_embedded, (1, 0, 2)),
                         *params["fenc"], h0f, c0f)
    b_h, b_g = _lstm_ref(jnp.transpose(x_backward_embedded, (1, 0, 2)),
                         *params["benc"], h0b, c0b)
    last = jnp.maximum(lengths - 1, 0)
    bidx = jnp.arange(B)
    h_enc = jnp.concatenate([f_h[last, bidx], b_h[last, bidx]], axis=1)
    c_enc = jnp.concatenate([f_g[last, bidx], b_g[last, bidx]], axis=1)
    d_h, _ = _lstm_ref(jnp.transpose(emb[y], (1, 0, 2)),
                       *params["dec"], h_enc, c_enc)
    d_h = jnp.transpose(d_h, (1, 0, 2))
    logits = d_h @ params["lin_w"].T + params["lin_b"]
    return jax.nn.log_softmax(logits, axis=-1), d_h


# ----------------------------------------------------------------------------
# Main
# ----------------------------------------------------------------------------
if __name__ == "__main__":
    vocab_size = 64
    embedding_size = 16
    hidden_size = 32
    B, Tx, Ty = 2, 8, 6

    key = jax.random.PRNGKey(0)
    k_par, k_x, k_y = jax.random.split(key, 3)

    params = init_params(k_par, vocab_size, embedding_size, hidden_size)

    x = jax.random.randint(k_x, (B, Tx), 0, vocab_size, dtype=jnp.int32)
    y = jax.random.randint(k_y, (B, Ty), 0, vocab_size, dtype=jnp.int32)

    # right-padded mask with per-example valid lengths
    valid_lens = jnp.array([Tx, Tx - 3], dtype=jnp.int32)
    x_mask = (jnp.arange(Tx)[None, :] < valid_lens[:, None]).astype(jnp.float32)

    # init_hidden: ((h0, c0) forward, (h0, c0) backward), each (B, H/2) zeros
    zeros_half = jnp.zeros((B, hidden_size // 2), jnp.float32)
    hidden = ((zeros_half, zeros_half), (zeros_half, zeros_half))

    decoded, hiddens = jax.jit(forward)(params, x, x_mask, y, hidden)
    jax.block_until_ready((decoded, hiddens))

    assert decoded.shape == (B, Ty, vocab_size)
    assert hiddens.shape == (B, Ty, hidden_size)

    ref_dec, ref_hid = forward_ref(params, x, x_mask, y, hidden)
    err_d = float(jnp.max(jnp.abs(decoded - ref_dec)))
    err_h = float(jnp.max(jnp.abs(hiddens - ref_hid)))
    assert err_d < 2e-3 and err_h < 2e-3, (err_d, err_h)

    print("KERNEL_OK")
</pallas_src>

<mosaic_0001>
module attributes {stable_mosaic.version = 11 : i64} {
  func.func @bi_lstm_last_kernel(%arg0: i32, %arg1: i32, %arg2: memref<1x8x8x128xf32, #tpu.memory_space<vmem>>, %arg3: memref<1x128x512xf32, #tpu.memory_space<vmem>>, %arg4: memref<1x128x512xf32, #tpu.memory_space<vmem>>, %arg5: memref<1x1x512xf32, #tpu.memory_space<vmem>>, %arg6: memref<1x8x128xf32, #tpu.memory_space<vmem>>, %arg7: memref<1x8x128xf32, #tpu.memory_space<vmem>>, %arg8: memref<8x1xi32, #tpu.memory_space<vmem>>, %arg9: memref<1x8x128xf32, #tpu.memory_space<vmem>>, %arg10: memref<1x8x128xf32, #tpu.memory_space<vmem>>, %arg11: memref<8x128xf32, #tpu.memory_space<vmem>>, %arg12: memref<8x128xf32, #tpu.memory_space<vmem>>, %arg13: memref<8x8x512xf32, #tpu.memory_space<vmem>>) attributes {dimension_semantics = [#tpu.dimension_semantics<parallel>, #tpu.dimension_semantics<arbitrary>], iteration_bounds = array<i64: 2, 1>, scalar_prefetch = 0 : i64, scratch_operands = 3 : i64, tpu.core_type = #tpu.core_type<tc>, window_params = [{transform_indices = @transform_0, window_bounds = array<i64: 1, 8, 8, 128>}, {transform_indices = @transform_1, window_bounds = array<i64: 1, 128, 512>}, {transform_indices = @transform_2, window_bounds = array<i64: 1, 128, 512>}, {transform_indices = @transform_3, window_bounds = array<i64: 1, 1, 512>}, {transform_indices = @transform_4, window_bounds = array<i64: 1, 8, 128>}, {transform_indices = @transform_5, window_bounds = array<i64: 1, 8, 128>}, {pipeline_mode = #tpu.pipeline_mode<synchronous>, transform_indices = @transform_6, window_bounds = array<i64: 8, 1>}, {transform_indices = @transform_7, window_bounds = array<i64: 1, 8, 128>}, {transform_indices = @transform_8, window_bounds = array<i64: 1, 8, 128>}]} {
    %c0_i32 = arith.constant 0 : i32
    %0 = arith.cmpi eq, %arg1, %c0_i32 : i32
    %1 = arith.extui %0 : i1 to i32
    %c0_i32_0 = arith.constant 0 : i32
    %2 = arith.cmpi ne, %1, %c0_i32_0 : i32
    scf.if %2 {
      %c0_263 = arith.constant 0 : index
      %c0_264 = arith.constant 0 : index
      %c0_265 = arith.constant 0 : index
      %464 = vector.load %arg6[%c0_263, %c0_264, %c0_265] : memref<1x8x128xf32, #tpu.memory_space<vmem>>, vector<1x8x128xf32>
      %465 = vector.shape_cast %464 : vector<1x8x128xf32> to vector<8x128xf32>
      %c0_266 = arith.constant 0 : index
      %c0_267 = arith.constant 0 : index
      %466 = vector.load %arg11[%c0_266, %c0_267] : memref<8x128xf32, #tpu.memory_space<vmem>>, vector<8x128xf32>
      tpu.vector_store %arg11[%c0_266, %c0_267], %465 {strides = array<i32>} : memref<8x128xf32, #tpu.memory_space<vmem>>, vector<8x128xf32>,
      %c0_268 = arith.constant 0 : index
      %c0_269 = arith.constant 0 : index
      %c0_270 = arith.constant 0 : index
      %467 = vector.load %arg7[%c0_268, %c0_269, %c0_270] : memref<1x8x128xf32, #tpu.memory_space<vmem>>, vector<1x8x128xf32>
      %468 = vector.shape_cast %467 : vector<1x8x128xf32> to vector<8x128xf32>
      %c0_271 = arith.constant 0 : index
      %c0_272 = arith.constant 0 : index
      %469 = vector.load %arg12[%c0_271, %c0_272] : memref<8x128xf32, #tpu.memory_space<vmem>>, vector<8x128xf32>
      tpu.vector_store %arg12[%c0_271, %c0_272], %468 {strides = array<i32>} : memref<8x128xf32, #tpu.memory_space<vmem>>, vector<8x128xf32>,
      %cst_273 = arith.constant 0.000000e+00 : f32
      %470 = vector.broadcast %cst_273 : f32 to vector<8x128xf32>
      %c0_274 = arith.constant 0 : index
      %c0_275 = arith.constant 0 : index
      %c0_276 = arith.constant 0 : index
      %471 = vector.load %arg9[%c0_274, %c0_275, %c0_276] : memref<1x8x128xf32, #tpu.memory_space<vmem>>, vector<1x8x128xf32>
      %472 = vector.shape_cast %471 : vector<1x8x128xf32> to vector<8x128xf32>
      %473 = vector.shape_cast %470 : vector<8x128xf32> to vector<1x8x128xf32>
      tpu.vector_store %arg9[%c0_274, %c0_275, %c0_276], %473 {strides = array<i32>} : memref<1x8x128xf32, #tpu.memory_space<vmem>>, vector<1x8x128xf32>,
      %cst_277 = arith.constant 0.000000e+00 : f32
      %474 = vector.broadcast %cst_277 : f32 to vector<8x128xf32>
      %c0_278 = arith.constant 0 : index
      %c0_279 = arith.constant 0 : index
      %c0_280 = arith.constant 0 : index
      %475 = vector.load %arg10[%c0_278, %c0_279, %c0_280] : memref<1x8x128xf32, #tpu.memory_space<vmem>>, vector<1x8x128xf32>
      %476 = vector.shape_cast %475 : vector<1x8x128xf32> to vector<8x128xf32>
      %477 = vector.shape_cast %474 : vector<8x128xf32> to vector<1x8x128xf32>
      tpu.vector_store %arg10[%c0_278, %c0_279, %c0_280], %477 {strides = array<i32>} : memref<1x8x128xf32, #tpu.memory_space<vmem>>, vector<1x8x128xf32>,
    } else {
    }
    %c0 = arith.constant 0 : index
    %c0_1 = arith.constant 0 : index
    %c0_2 = arith.constant 0 : index
    %c0_3 = arith.constant 0 : index
    %3 = vector.load %arg2[%c0, %c0_1, %c0_2, %c0_3] : memref<1x8x8x128xf32, #tpu.memory_space<vmem>>, vector<1x8x8x128xf32>
    %4 = vector.shape_cast %3 : vector<1x8x8x128xf32> to vector<8x8x128xf32>
    %5 = vector.shape_cast %4 : vector<8x8x128xf32> to vector<64x128xf32>
    %c0_4 = arith.constant 0 : index
    %c0_5 = arith.constant 0 : index
    %c0_6 = arith.constant 0 : index
    %6 = vector.load %arg3[%c0_4, %c0_5, %c0_6] : memref<1x128x512xf32, #tpu.memory_space<vmem>>, vector<1x128x512xf32>
    %7 = vector.shape_cast %6 : vector<1x128x512xf32> to vector<128x512xf32>
    %cst = arith.constant dense<0.000000e+00> : vector<64x512xf32>
    %8 = tpu.matmul %5, %7, %cst {dimension_numbers = #tpu.dot_dimension_numbers<[1], [0], [0], [1], [0, 0, 1, 1], [], []>} : vector<64x128xf32>, vector<128x512xf32>, vector<64x512xf32> -> vector<64x512xf32>
    %c0_7 = arith.constant 0 : index
    %c0_8 = arith.constant 0 : index
    %c0_9 = arith.constant 0 : index
    %9 = vector.load %arg5[%c0_7, %c0_8, %c0_9] : memref<1x1x512xf32, #tpu.memory_space<vmem>>, vector<1x1x512xf32>
    %10 = vector.shape_cast %9 : vector<1x1x512xf32> to vector<1x512xf32>
    %11 = vector.broadcast %10 : vector<1x512xf32> to vector<64x512xf32>
    %12 = arith.addf %8, %11 : vector<64x512xf32>
    %13 = vector.shape_cast %12 : vector<64x512xf32> to vector<8x8x512xf32>
    %c0_10 = arith.constant 0 : index
    %c0_11 = arith.constant 0 : index
    %c0_12 = arith.constant 0 : index
    %14 = vector.load %arg13[%c0_10, %c0_11, %c0_12] : memref<8x8x512xf32, #tpu.memory_space<vmem>>, vector<8x8x512xf32>
    tpu.vector_store %arg13[%c0_10, %c0_11, %c0_12], %13 {strides = array<i32>} : memref<8x8x512xf32, #tpu.memory_space<vmem>>, vector<8x8x512xf32>,
    %c8_i32 = arith.constant 8 : i32
    %15 = arith.muli %arg1, %c8_i32 : i32
    %c0_i32_13 = arith.constant 0 : i32
    %16 = arith.index_cast %c0_i32_13 : i32 to index
    %c0_14 = arith.constant 0 : index
    %c0_15 = arith.constant 0 : index
    %17 = vector.load %arg13[%16, %c0_14, %c0_15] : memref<8x8x512xf32, #tpu.memory_space<vmem>>, vector<1x8x512xf32>
    %18 = vector.shape_cast %17 : vector<1x8x512xf32> to vector<8x512xf32>
    %c0_16 = arith.constant 0 : index
    %c0_17 = arith.constant 0 : index
    %19 = vector.load %arg11[%c0_16, %c0_17] : memref<8x128xf32, #tpu.memory_space<vmem>>, vector<8x128xf32>
    %c0_18 = arith.constant 0 : index
    %c0_19 = arith.constant 0 : index
    %c0_20 = arith.constant 0 : index
    %20 = vector.load %arg4[%c0_18, %c0_19, %c0_20] : memref<1x128x512xf32, #tpu.memory_space<vmem>>, vector<1x128x512xf32>
    %21 = vector.shape_cast %20 : vector<1x128x512xf32> to vector<128x512xf32>
    %cst_21 = arith.constant dense<0.000000e+00> : vector<8x512xf32>
    %22 = tpu.matmul %19, %21, %cst_21 {dimension_numbers = #tpu.dot_dimension_numbers<[1], [0], [0], [1], [0, 0, 1, 1], [], []>} : vector<8x128xf32>, vector<128x512xf32>, vector<8x512xf32> -> vector<8x512xf32>
    %23 = arith.addf %18, %22 : vector<8x512xf32>
    %24 = vector.extract_strided_slice %23 {offsets = [0, 0], sizes = [8, 128], strides = [1, 1]} : vector<8x512xf32> to vector<8x128xf32>
    %25 = arith.negf %24 : vector<8x128xf32>
    %26 = math.exp %25 : vector<8x128xf32>
    %cst_22 = arith.constant 1.000000e+00 : f32
    %27 = vector.broadcast %cst_22 : f32 to vector<8x128xf32>
    %28 = arith.addf %27, %26 : vector<8x128xf32>
    %29 = arith.divf %27, %28 : vector<8x128xf32>
    %30 = vector.extract_strided_slice %23 {offsets = [0, 128], sizes = [8, 128], strides = [1, 1]} : vector<8x512xf32> to vector<8x128xf32>
    %31 = arith.negf %30 : vector<8x128xf32>
    %32 = math.exp %31 : vector<8x128xf32>
    %cst_23 = arith.constant 1.000000e+00 : f32
    %33 = vector.broadcast %cst_23 : f32 to vector<8x128xf32>
    %34 = arith.addf %33, %32 : vector<8x128xf32>
    %35 = arith.divf %33, %34 : vector<8x128xf32>
    %36 = vector.extract_strided_slice %23 {offsets = [0, 256], sizes = [8, 128], strides = [1, 1]} : vector<8x512xf32> to vector<8x128xf32>
    %37 = math.tanh %36 : vector<8x128xf32>
    %38 = vector.extract_strided_slice %23 {offsets = [0, 384], sizes = [8, 128], strides = [1, 1]} : vector<8x512xf32> to vector<8x128xf32>
    %39 = arith.negf %38 : vector<8x128xf32>
    %40 = math.exp %39 : vector<8x128xf32>
    %cst_24 = arith.constant 1.000000e+00 : f32
    %41 = vector.broadcast %cst_24 : f32 to vector<8x128xf32>
    %42 = arith.addf %41, %40 : vector<8x128xf32>
    %43 = arith.divf %41, %42 : vector<8x128xf32>
    %c0_25 = arith.constant 0 : index
    %c0_26 = arith.constant 0 : index
    %44 = vector.load %arg12[%c0_25, %c0_26] : memref<8x128xf32, #tpu.memory_space<vmem>>, vector<8x128xf32>
    %45 = arith.mulf %35, %44 : vector<8x128xf32>
    %46 = arith.mulf %29, %37 : vector<8x128xf32>
    %47 = arith.addf %45, %46 : vector<8x128xf32>
    %48 = math.tanh %47 : vector<8x128xf32>
    %49 = arith.mulf %43, %48 : vector<8x128xf32>
    %c0_27 = arith.constant 0 : index
    %c0_28 = arith.constant 0 : index
    %50 = vector.load %arg12[%c0_27, %c0_28] : memref<8x128xf32, #tpu.memory_space<vmem>>, vector<8x128xf32>
    tpu.vector_store %arg12[%c0_27, %c0_28], %47 {strides = array<i32>} : memref<8x128xf32, #tpu.memory_space<vmem>>, vector<8x128xf32>,
    %c0_29 = arith.constant 0 : index
    %c0_30 = arith.constant 0 : index
    %51 = vector.load %arg11[%c0_29, %c0_30] : memref<8x128xf32, #tpu.memory_space<vmem>>, vector<8x128xf32>
    tpu.vector_store %arg11[%c0_29, %c0_30], %49 {strides = array<i32>} : memref<8x128xf32, #tpu.memory_space<vmem>>, vector<8x128xf32>,
    %c0_31 = arith.constant 0 : index
    %c0_32 = arith.constant 0 : index
    %52 = vector.load %arg8[%c0_31, %c0_32] : memref<8x1xi32, #tpu.memory_space<vmem>>, vector<8x1xi32>
    %53 = arith.addi %15, %c0_i32_13 : i32
    %54 = vector.broadcast %53 : i32 to vector<8x1xi32>
    %55 = arith.cmpi eq, %52, %54 : vector<8x1xi32>
    %c0_33 = arith.constant 0 : index
    %c0_34 = arith.constant 0 : index
    %c0_35 = arith.constant 0 : index
    %56 = vector.load %arg9[%c0_33, %c0_34, %c0_35] : memref<1x8x128xf32, #tpu.memory_space<vmem>>, vector<1x8x128xf32>
    %57 = vector.shape_cast %56 : vector<1x8x128xf32> to vector<8x128xf32>
    %58 = vector.shape_cast %55 : vector<8x1xi1> to vector<8x1xi1>
    %59 = vector.broadcast %58 : vector<8x1xi1> to vector<8x128xi1>
    %60 = arith.select %59, %49, %57 : vector<8x128xi1>, vector<8x128xf32>
    %c0_36 = arith.constant 0 : index
    %c0_37 = arith.constant 0 : index
    %c0_38 = arith.constant 0 : index
    %61 = vector.load %arg9[%c0_36, %c0_37, %c0_38] : memref<1x8x128xf32, #tpu.memory_space<vmem>>, vector<1x8x128xf32>
    %62 = vector.shape_cast %61 : vector<1x8x128xf32> to vector<8x128xf32>
    %63 = vector.shape_cast %60 : vector<8x128xf32> to vector<1x8x128xf32>
    tpu.vector_store %arg9[%c0_36, %c0_37, %c0_38], %63 {strides = array<i32>} : memref<1x8x128xf32, #tpu.memory_space<vmem>>, vector<1x8x128xf32>,
    %c0_39 = arith.constant 0 : index
    %c0_40 = arith.constant 0 : index
    %c0_41 = arith.constant 0 : index
    %64 = vector.load %arg10[%c0_39, %c0_40, %c0_41] : memref<1x8x128xf32, #tpu.memory_space<vmem>>, vector<1x8x128xf32>
    %65 = vector.shape_cast %64 : vector<1x8x128xf32> to vector<8x128xf32>
    %66 = vector.shape_cast %55 : vector<8x1xi1> to vector<8x1xi1>
    %67 = vector.broadcast %66 : vector<8x1xi1> to vector<8x128xi1>
    %68 = arith.select %67, %37, %65 : vector<8x128xi1>, vector<8x128xf32>
    %c0_42 = arith.constant 0 : index
    %c0_43 = arith.constant 0 : index
    %c0_44 = arith.constant 0 : index
    %69 = vector.load %arg10[%c0_42, %c0_43, %c0_44] : memref<1x8x128xf32, #tpu.memory_space<vmem>>, vector<1x8x128xf32>
    %70 = vector.shape_cast %69 : vector<1x8x128xf32> to vector<8x128xf32>
    %71 = vector.shape_cast %68 : vector<8x128xf32> to vector<1x8x128xf32>
    tpu.vector_store %arg10[%c0_42, %c0_43, %c0_44], %71 {strides = array<i32>} : memref<1x8x128xf32, #tpu.memory_space<vmem>>, vector<1x8x128xf32>,
    %c1_i32 = arith.constant 1 : i32
    %72 = arith.index_cast %c1_i32 : i32 to index
    %c0_45 = arith.constant 0 : index
    %c0_46 = arith.constant 0 : index
    %73 = vector.load %arg13[%72, %c0_45, %c0_46] : memref<8x8x512xf32, #tpu.memory_space<vmem>>, vector<1x8x512xf32>
    %74 = vector.shape_cast %73 : vector<1x8x512xf32> to vector<8x512xf32>
    %c0_47 = arith.constant 0 : index
    %c0_48 = arith.constant 0 : index
    %75 = vector.load %arg11[%c0_47, %c0_48] : memref<8x128xf32, #tpu.memory_space<vmem>>, vector<8x128xf32>
    %c0_49 = arith.constant 0 : index
    %c0_50 = arith.constant 0 : index
    %c0_51 = arith.constant 0 : index
    %76 = vector.load %arg4[%c0_49, %c0_50, %c0_51] : memref<1x128x512xf32, #tpu.memory_space<vmem>>, vector<1x128x512xf32>
    %77 = vector.shape_cast %76 : vector<1x128x512xf32> to vector<128x512xf32>
    %cst_52 = arith.constant dense<0.000000e+00> : vector<8x512xf32>
    %78 = tpu.matmul %75, %77, %cst_52 {dimension_numbers = #tpu.dot_dimension_numbers<[1], [0], [0], [1], [0, 0, 1, 1], [], []>} : vector<8x128xf32>, vector<128x512xf32>, vector<8x512xf32> -> vector<8x512xf32>
    %79 = arith.addf %74, %78 : vector<8x512xf32>
    %80 = vector.extract_strided_slice %79 {offsets = [0, 0], sizes = [8, 128], strides = [1, 1]} : vector<8x512xf32> to vector<8x128xf32>
    %81 = arith.negf %80 : vector<8x128xf32>
    %82 = math.exp %81 : vector<8x128xf32>
    %cst_53 = arith.constant 1.000000e+00 : f32
    %83 = vector.broadcast %cst_53 : f32 to vector<8x128xf32>
    %84 = arith.addf %83, %82 : vector<8x128xf32>
    %85 = arith.divf %83, %84 : vector<8x128xf32>
    %86 = vector.extract_strided_slice %79 {offsets = [0, 128], sizes = [8, 128], strides = [1, 1]} : vector<8x512xf32> to vector<8x128xf32>
    %87 = arith.negf %86 : vector<8x128xf32>
    %88 = math.exp %87 : vector<8x128xf32>
    %cst_54 = arith.constant 1.000000e+00 : f32
    %89 = vector.broadcast %cst_54 : f32 to vector<8x128xf32>
    %90 = arith.addf %89, %88 : vector<8x128xf32>
    %91 = arith.divf %89, %90 : vector<8x128xf32>
    %92 = vector.extract_strided_slice %79 {offsets = [0, 256], sizes = [8, 128], strides = [1, 1]} : vector<8x512xf32> to vector<8x128xf32>
    %93 = math.tanh %92 : vector<8x128xf32>
    %94 = vector.extract_strided_slice %79 {offsets = [0, 384], sizes = [8, 128], strides = [1, 1]} : vector<8x512xf32> to vector<8x128xf32>
    %95 = arith.negf %94 : vector<8x128xf32>
    %96 = math.exp %95 : vector<8x128xf32>
    %cst_55 = arith.constant 1.000000e+00 : f32
    %97 = vector.broadcast %cst_55 : f32 to vector<8x128xf32>
    %98 = arith.addf %97, %96 : vector<8x128xf32>
    %99 = arith.divf %97, %98 : vector<8x128xf32>
    %c0_56 = arith.constant 0 : index
    %c0_57 = arith.constant 0 : index
    %100 = vector.load %arg12[%c0_56, %c0_57] : memref<8x128xf32, #tpu.memory_space<vmem>>, vector<8x128xf32>
    %101 = arith.mulf %91, %100 : vector<8x128xf32>
    %102 = arith.mulf %85, %93 : vector<8x128xf32>
    %103 = arith.addf %101, %102 : vector<8x128xf32>
    %104 = math.tanh %103 : vector<8x128xf32>
    %105 = arith.mulf %99, %104 : vector<8x128xf32>
    %c0_58 = arith.constant 0 : index
    %c0_59 = arith.constant 0 : index
    %106 = vector.load %arg12[%c0_58, %c0_59] : memref<8x128xf32, #tpu.memory_space<vmem>>, vector<8x128xf32>
    tpu.vector_store %arg12[%c0_58, %c0_59], %103 {strides = array<i32>} : memref<8x128xf32, #tpu.memory_space<vmem>>, vector<8x128xf32>,
    %c0_60 = arith.constant 0 : index
    %c0_61 = arith.constant 0 : index
    %107 = vector.load %arg11[%c0_60, %c0_61] : memref<8x128xf32, #tpu.memory_space<vmem>>, vector<8x128xf32>
    tpu.vector_store %arg11[%c0_60, %c0_61], %105 {strides = array<i32>} : memref<8x128xf32, #tpu.memory_space<vmem>>, vector<8x128xf32>,
    %c0_62 = arith.constant 0 : index
    %c0_63 = arith.constant 0 : index
    %108 = vector.load %arg8[%c0_62, %c0_63] : memref<8x1xi32, #tpu.memory_space<vmem>>, vector<8x1xi32>
    %109 = arith.addi %15, %c1_i32 : i32
    %110 = vector.broadcast %109 : i32 to vector<8x1xi32>
    %111 = arith.cmpi eq, %108, %110 : vector<8x1xi32>
    %c0_64 = arith.constant 0 : index
    %c0_65 = arith.constant 0 : index
    %c0_66 = arith.constant 0 : index
    %112 = vector.load %arg9[%c0_64, %c0_65, %c0_66] : memref<1x8x128xf32, #tpu.memory_space<vmem>>, vector<1x8x128xf32>
    %113 = vector.shape_cast %112 : vector<1x8x128xf32> to vector<8x128xf32>
    %114 = vector.shape_cast %111 : vector<8x1xi1> to vector<8x1xi1>
    %115 = vector.broadcast %114 : vector<8x1xi1> to vector<8x128xi1>
    %116 = arith.select %115, %105, %113 : vector<8x128xi1>, vector<8x128xf32>
    %c0_67 = arith.constant 0 : index
    %c0_68 = arith.constant 0 : index
    %c0_69 = arith.constant 0 : index
    %117 = vector.load %arg9[%c0_67, %c0_68, %c0_69] : memref<1x8x128xf32, #tpu.memory_space<vmem>>, vector<1x8x128xf32>
    %118 = vector.shape_cast %117 : vector<1x8x128xf32> to vector<8x128xf32>
    %119 = vector.shape_cast %116 : vector<8x128xf32> to vector<1x8x128xf32>
    tpu.vector_store %arg9[%c0_67, %c0_68, %c0_69], %119 {strides = array<i32>} : memref<1x8x128xf32, #tpu.memory_space<vmem>>, vector<1x8x128xf32>,
    %c0_70 = arith.constant 0 : index
    %c0_71 = arith.constant 0 : index
    %c0_72 = arith.constant 0 : index
    %120 = vector.load %arg10[%c0_70, %c0_71, %c0_72] : memref<1x8x128xf32, #tpu.memory_space<vmem>>, vector<1x8x128xf32>
    %121 = vector.shape_cast %120 : vector<1x8x128xf32> to vector<8x128xf32>
    %122 = vector.shape_cast %111 : vector<8x1xi1> to vector<8x1xi1>
    %123 = vector.broadcast %122 : vector<8x1xi1> to vector<8x128xi1>
    %124 = arith.select %123, %93, %121 : vector<8x128xi1>, vector<8x128xf32>
    %c0_73 = arith.constant 0 : index
    %c0_74 = arith.constant 0 : index
    %c0_75 = arith.constant 0 : index
    %125 = vector.load %arg10[%c0_73, %c0_74, %c0_75] : memref<1x8x128xf32, #tpu.memory_space<vmem>>, vector<1x8x128xf32>
    %126 = vector.shape_cast %125 : vector<1x8x128xf32> to vector<8x128xf32>
    %127 = vector.shape_cast %124 : vector<8x128xf32> to vector<1x8x128xf32>
    tpu.vector_store %arg10[%c0_73, %c0_74, %c0_75], %127 {strides = array<i32>} : memref<1x8x128xf32, #tpu.memory_space<vmem>>, vector<1x8x128xf32>,
    %c2_i32 = arith.constant 2 : i32
    %128 = arith.index_cast %c2_i32 : i32 to index
    %c0_76 = arith.constant 0 : index
    %c0_77 = arith.constant 0 : index
    %129 = vector.load %arg13[%128, %c0_76, %c0_77] : memref<8x8x512xf32, #tpu.memory_space<vmem>>, vector<1x8x512xf32>
    %130 = vector.shape_cast %129 : vector<1x8x512xf32> to vector<8x512xf32>
    %c0_78 = arith.constant 0 : index
    %c0_79 = arith.constant 0 : index
    %131 = vector.load %arg11[%c0_78, %c0_79] : memref<8x128xf32, #tpu.memory_space<vmem>>, vector<8x128xf32>
    %c0_80 = arith.constant 0 : index
    %c0_81 = arith.constant 0 : index
    %c0_82 = arith.constant 0 : index
    %132 = vector.load %arg4[%c0_80, %c0_81, %c0_82] : memref<1x128x512xf32, #tpu.memory_space<vmem>>, vector<1x128x512xf32>
    %133 = vector.shape_cast %132 : vector<1x128x512xf32> to vector<128x512xf32>
    %cst_83 = arith.constant dense<0.000000e+00> : vector<8x512xf32>
    %134 = tpu.matmul %131, %133, %cst_83 {dimension_numbers = #tpu.dot_dimension_numbers<[1], [0], [0], [1], [0, 0, 1, 1], [], []>} : vector<8x128xf32>, vector<128x512xf32>, vector<8x512xf32> -> vector<8x512xf32>
    %135 = arith.addf %130, %134 : vector<8x512xf32>
    %136 = vector.extract_strided_slice %135 {offsets = [0, 0], sizes = [8, 128], strides = [1, 1]} : vector<8x512xf32> to vector<8x128xf32>
    %137 = arith.negf %136 : vector<8x128xf32>
    %138 = math.exp %137 : vector<8x128xf32>
    %cst_84 = arith.constant 1.000000e+00 : f32
    %139 = vector.broadcast %cst_84 : f32 to vector<8x128xf32>
    %140 = arith.addf %139, %138 : vector<8x128xf32>
    %141 = arith.divf %139, %140 : vector<8x128xf32>
    %142 = vector.extract_strided_slice %135 {offsets = [0, 128], sizes = [8, 128], strides = [1, 1]} : vector<8x512xf32> to vector<8x128xf32>
    %143 = arith.negf %142 : vector<8x128xf32>
    %144 = math.exp %143 : vector<8x128xf32>
    %cst_85 = arith.constant 1.000000e+00 : f32
    %145 = vector.broadcast %cst_85 : f32 to vector<8x128xf32>
    %146 = arith.addf %145, %144 : vector<8x128xf32>
    %147 = arith.divf %145, %146 : vector<8x128xf32>
    %148 = vector.extract_strided_slice %135 {offsets = [0, 256], sizes = [8, 128], strides = [1, 1]} : vector<8x512xf32> to vector<8x128xf32>
    %149 = math.tanh %148 : vector<8x128xf32>
    %150 = vector.extract_strided_slice %135 {offsets = [0, 384], sizes = [8, 128], strides = [1, 1]} : vector<8x512xf32> to vector<8x128xf32>
    %151 = arith.negf %150 : vector<8x128xf32>
    %152 = math.exp %151 : vector<8x128xf32>
    %cst_86 = arith.constant 1.000000e+00 : f32
    %153 = vector.broadcast %cst_86 : f32 to vector<8x128xf32>
    %154 = arith.addf %153, %152 : vector<8x128xf32>
    %155 = arith.divf %153, %154 : vector<8x128xf32>
    %c0_87 = arith.constant 0 : index
    %c0_88 = arith.constant 0 : index
    %156 = vector.load %arg12[%c0_87, %c0_88] : memref<8x128xf32, #tpu.memory_space<vmem>>, vector<8x128xf32>
    %157 = arith.mulf %147, %156 : vector<8x128xf32>
    %158 = arith.mulf %141, %149 : vector<8x128xf32>
    %159 = arith.addf %157, %158 : vector<8x128xf32>
    %160 = math.tanh %159 : vector<8x128xf32>
    %161 = arith.mulf %155, %160 : vector<8x128xf32>
    %c0_89 = arith.constant 0 : index
    %c0_90 = arith.constant 0 : index
    %162 = vector.load %arg12[%c0_89, %c0_90] : memref<8x128xf32, #tpu.memory_space<vmem>>, vector<8x128xf32>
    tpu.vector_store %arg12[%c0_89, %c0_90], %159 {strides = array<i32>} : memref<8x128xf32, #tpu.memory_space<vmem>>, vector<8x128xf32>,
    %c0_91 = arith.constant 0 : index
    %c0_92 = arith.constant 0 : index
    %163 = vector.load %arg11[%c0_91, %c0_92] : memref<8x128xf32, #tpu.memory_space<vmem>>, vector<8x128xf32>
    tpu.vector_store %arg11[%c0_91, %c0_92], %161 {strides = array<i32>} : memref<8x128xf32, #tpu.memory_space<vmem>>, vector<8x128xf32>,
    %c0_93 = arith.constant 0 : index
    %c0_94 = arith.constant 0 : index
    %164 = vector.load %arg8[%c0_93, %c0_94] : memref<8x1xi32, #tpu.memory_space<vmem>>, vector<8x1xi32>
    %165 = arith.addi %15, %c2_i32 : i32
    %166 = vector.broadcast %165 : i32 to vector<8x1xi32>
    %167 = arith.cmpi eq, %164, %166 : vector<8x1xi32>
    %c0_95 = arith.constant 0 : index
    %c0_96 = arith.constant 0 : index
    %c0_97 = arith.constant 0 : index
    %168 = vector.load %arg9[%c0_95, %c0_96, %c0_97] : memref<1x8x128xf32, #tpu.memory_space<vmem>>, vector<1x8x128xf32>
    %169 = vector.shape_cast %168 : vector<1x8x128xf32> to vector<8x128xf32>
    %170 = vector.shape_cast %167 : vector<8x1xi1> to vector<8x1xi1>
    %171 = vector.broadcast %170 : vector<8x1xi1> to vector<8x128xi1>
    %172 = arith.select %171, %161, %169 : vector<8x128xi1>, vector<8x128xf32>
    %c0_98 = arith.constant 0 : index
    %c0_99 = arith.constant 0 : index
    %c0_100 = arith.constant 0 : index
    %173 = vector.load %arg9[%c0_98, %c0_99, %c0_100] : memref<1x8x128xf32, #tpu.memory_space<vmem>>, vector<1x8x128xf32>
    %174 = vector.shape_cast %173 : vector<1x8x128xf32> to vector<8x128xf32>
    %175 = vector.shape_cast %172 : vector<8x128xf32> to vector<1x8x128xf32>
    tpu.vector_store %arg9[%c0_98, %c0_99, %c0_100], %175 {strides = array<i32>} : memref<1x8x128xf32, #tpu.memory_space<vmem>>, vector<1x8x128xf32>,
    %c0_101 = arith.constant 0 : index
    %c0_102 = arith.constant 0 : index
    %c0_103 = arith.constant 0 : index
    %176 = vector.load %arg10[%c0_101, %c0_102, %c0_103] : memref<1x8x128xf32, #tpu.memory_space<vmem>>, vector<1x8x128xf32>
    %177 = vector.shape_cast %176 : vector<1x8x128xf32> to vector<8x128xf32>
    %178 = vector.shape_cast %167 : vector<8x1xi1> to vector<8x1xi1>
    %179 = vector.broadcast %178 : vector<8x1xi1> to vector<8x128xi1>
    %180 = arith.select %179, %149, %177 : vector<8x128xi1>, vector<8x128xf32>
    %c0_104 = arith.constant 0 : index
    %c0_105 = arith.constant 0 : index
    %c0_106 = arith.constant 0 : index
    %181 = vector.load %arg10[%c0_104, %c0_105, %c0_106] : memref<1x8x128xf32, #tpu.memory_space<vmem>>, vector<1x8x128xf32>
    %182 = vector.shape_cast %181 : vector<1x8x128xf32> to vector<8x128xf32>
    %183 = vector.shape_cast %180 : vector<8x128xf32> to vector<1x8x128xf32>
    tpu.vector_store %arg10[%c0_104, %c0_105, %c0_106], %183 {strides = array<i32>} : memref<1x8x128xf32, #tpu.memory_space<vmem>>, vector<1x8x128xf32>,
    %c3_i32 = arith.constant 3 : i32
    %184 = arith.index_cast %c3_i32 : i32 to index
    %c0_107 = arith.constant 0 : index
    %c0_108 = arith.constant 0 : index
    %185 = vector.load %arg13[%184, %c0_107, %c0_108] : memref<8x8x512xf32, #tpu.memory_space<vmem>>, vector<1x8x512xf32>
    %186 = vector.shape_cast %185 : vector<1x8x512xf32> to vector<8x512xf32>
    %c0_109 = arith.constant 0 : index
    %c0_110 = arith.constant 0 : index
    %187 = vector.load %arg11[%c0_109, %c0_110] : memref<8x128xf32, #tpu.memory_space<vmem>>, vector<8x128xf32>
    %c0_111 = arith.constant 0 : index
    %c0_112 = arith.constant 0 : index
    %c0_113 = arith.constant 0 : index
    %188 = vector.load %arg4[%c0_111, %c0_112, %c0_113] : memref<1x128x512xf32, #tpu.memory_space<vmem>>, vector<1x128x512xf32>
    %189 = vector.shape_cast %188 : vector<1x128x512xf32> to vector<128x512xf32>
    %cst_114 = arith.constant dense<0.000000e+00> : vector<8x512xf32>
    %190 = tpu.matmul %187, %189, %cst_114 {dimension_numbers = #tpu.dot_dimension_numbers<[1], [0], [0], [1], [0, 0, 1, 1], [], []>} : vector<8x128xf32>, vector<128x512xf32>, vector<8x512xf32> -> vector<8x512xf32>
    %191 = arith.addf %186, %190 : vector<8x512xf32>
    %192 = vector.extract_strided_slice %191 {offsets = [0, 0], sizes = [8, 128], strides = [1, 1]} : vector<8x512xf32> to vector<8x128xf32>
    %193 = arith.negf %192 : vector<8x128xf32>
    %194 = math.exp %193 : vector<8x128xf32>
    %cst_115 = arith.constant 1.000000e+00 : f32
    %195 = vector.broadcast %cst_115 : f32 to vector<8x128xf32>
    %196 = arith.addf %195, %194 : vector<8x128xf32>
    %197 = arith.divf %195, %196 : vector<8x128xf32>
    %198 = vector.extract_strided_slice %191 {offsets = [0, 128], sizes = [8, 128], strides = [1, 1]} : vector<8x512xf32> to vector<8x128xf32>
    %199 = arith.negf %198 : vector<8x128xf32>
    %200 = math.exp %199 : vector<8x128xf32>
    %cst_116 = arith.constant 1.000000e+00 : f32
    %201 = vector.broadcast %cst_116 : f32 to vector<8x128xf32>
    %202 = arith.addf %201, %200 : vector<8x128xf32>
    %203 = arith.divf %201, %202 : vector<8x128xf32>
    %204 = vector.extract_strided_slice %191 {offsets = [0, 256], sizes = [8, 128], strides = [1, 1]} : vector<8x512xf32> to vector<8x128xf32>
    %205 = math.tanh %204 : vector<8x128xf32>
    %206 = vector.extract_strided_slice %191 {offsets = [0, 384], sizes = [8, 128], strides = [1, 1]} : vector<8x512xf32> to vector<8x128xf32>
    %207 = arith.negf %206 : vector<8x128xf32>
    %208 = math.exp %207 : vector<8x128xf32>
    %cst_117 = arith.constant 1.000000e+00 : f32
    %209 = vector.broadcast %cst_117 : f32 to vector<8x128xf32>
    %210 = arith.addf %209, %208 : vector<8x128xf32>
    %211 = arith.divf %209, %210 : vector<8x128xf32>
    %c0_118 = arith.constant 0 : index
    %c0_119 = arith.constant 0 : index
    %212 = vector.load %arg12[%c0_118, %c0_119] : memref<8x128xf32, #tpu.memory_space<vmem>>, vector<8x128xf32>
    %213 = arith.mulf %203, %212 : vector<8x128xf32>
    %214 = arith.mulf %197, %205 : vector<8x128xf32>
    %215 = arith.addf %213, %214 : vector<8x128xf32>
    %216 = math.tanh %215 : vector<8x128xf32>
    %217 = arith.mulf %211, %216 : vector<8x128xf32>
    %c0_120 = arith.constant 0 : index
    %c0_121 = arith.constant 0 : index
    %218 = vector.load %arg12[%c0_120, %c0_121] : memref<8x128xf32, #tpu.memory_space<vmem>>, vector<8x128xf32>
    tpu.vector_store %arg12[%c0_120, %c0_121], %215 {strides = array<i32>} : memref<8x128xf32, #tpu.memory_space<vmem>>, vector<8x128xf32>,
    %c0_122 = arith.constant 0 : index
    %c0_123 = arith.constant 0 : index
    %219 = vector.load %arg11[%c0_122, %c0_123] : memref<8x128xf32, #tpu.memory_space<vmem>>, vector<8x128xf32>
    tpu.vector_store %arg11[%c0_122, %c0_123], %217 {strides = array<i32>} : memref<8x128xf32, #tpu.memory_space<vmem>>, vector<8x128xf32>,
    %c0_124 = arith.constant 0 : index
    %c0_125 = arith.constant 0 : index
    %220 = vector.load %arg8[%c0_124, %c0_125] : memref<8x1xi32, #tpu.memory_space<vmem>>, vector<8x1xi32>
    %221 = arith.addi %15, %c3_i32 : i32
    %222 = vector.broadcast %221 : i32 to vector<8x1xi32>
    %223 = arith.cmpi eq, %220, %222 : vector<8x1xi32>
    %c0_126 = arith.constant 0 : index
    %c0_127 = arith.constant 0 : index
    %c0_128 = arith.constant 0 : index
    %224 = vector.load %arg9[%c0_126, %c0_127, %c0_128] : memref<1x8x128xf32, #tpu.memory_space<vmem>>, vector<1x8x128xf32>
    %225 = vector.shape_cast %224 : vector<1x8x128xf32> to vector<8x128xf32>
    %226 = vector.shape_cast %223 : vector<8x1xi1> to vector<8x1xi1>
    %227 = vector.broadcast %226 : vector<8x1xi1> to vector<8x128xi1>
    %228 = arith.select %227, %217, %225 : vector<8x128xi1>, vector<8x128xf32>
    %c0_129 = arith.constant 0 : index
    %c0_130 = arith.constant 0 : index
    %c0_131 = arith.constant 0 : index
    %229 = vector.load %arg9[%c0_129, %c0_130, %c0_131] : memref<1x8x128xf32, #tpu.memory_space<vmem>>, vector<1x8x128xf32>
    %230 = vector.shape_cast %229 : vector<1x8x128xf32> to vector<8x128xf32>
    %231 = vector.shape_cast %228 : vector<8x128xf32> to vector<1x8x128xf32>
    tpu.vector_store %arg9[%c0_129, %c0_130, %c0_131], %231 {strides = array<i32>} : memref<1x8x128xf32, #tpu.memory_space<vmem>>, vector<1x8x128xf32>,
    %c0_132 = arith.constant 0 : index
    %c0_133 = arith.constant 0 : index
    %c0_134 = arith.constant 0 : index
    %232 = vector.load %arg10[%c0_132, %c0_133, %c0_134] : memref<1x8x128xf32, #tpu.memory_space<vmem>>, vector<1x8x128xf32>
    %233 = vector.shape_cast %232 : vector<1x8x128xf32> to vector<8x128xf32>
    %234 = vector.shape_cast %223 : vector<8x1xi1> to vector<8x1xi1>
    %235 = vector.broadcast %234 : vector<8x1xi1> to vector<8x128xi1>
    %236 = arith.select %235, %205, %233 : vector<8x128xi1>, vector<8x128xf32>
    %c0_135 = arith.constant 0 : index
    %c0_136 = arith.constant 0 : index
    %c0_137 = arith.constant 0 : index
    %237 = vector.load %arg10[%c0_135, %c0_136, %c0_137] : memref<1x8x128xf32, #tpu.memory_space<vmem>>, vector<1x8x128xf32>
    %238 = vector.shape_cast %237 : vector<1x8x128xf32> to vector<8x128xf32>
    %239 = vector.shape_cast %236 : vector<8x128xf32> to vector<1x8x128xf32>
    tpu.vector_store %arg10[%c0_135, %c0_136, %c0_137], %239 {strides = array<i32>} : memref<1x8x128xf32, #tpu.memory_space<vmem>>, vector<1x8x128xf32>,
    %c4_i32 = arith.constant 4 : i32
    %240 = arith.index_cast %c4_i32 : i32 to index
    %c0_138 = arith.constant 0 : index
    %c0_139 = arith.constant 0 : index
    %241 = vector.load %arg13[%240, %c0_138, %c0_139] : memref<8x8x512xf32, #tpu.memory_space<vmem>>, vector<1x8x512xf32>
    %242 = vector.shape_cast %241 : vector<1x8x512xf32> to vector<8x512xf32>
    %c0_140 = arith.constant 0 : index
    %c0_141 = arith.constant 0 : index
    %243 = vector.load %arg11[%c0_140, %c0_141] : memref<8x128xf32, #tpu.memory_space<vmem>>, vector<8x128xf32>
    %c0_142 = arith.constant 0 : index
    %c0_143 = arith.constant 0 : index
    %c0_144 = arith.constant 0 : index
    %244 = vector.load %arg4[%c0_142, %c0_143, %c0_144] : memref<1x128x512xf32, #tpu.memory_space<vmem>>, vector<1x128x512xf32>
    %245 = vector.shape_cast %244 : vector<1x128x512xf32> to vector<128x512xf32>
    %cst_145 = arith.constant dense<0.000000e+00> : vector<8x512xf32>
    %246 = tpu.matmul %243, %245, %cst_145 {dimension_numbers = #tpu.dot_dimension_numbers<[1], [0], [0], [1], [0, 0, 1, 1], [], []>} : vector<8x128xf32>, vector<128x512xf32>, vector<8x512xf32> -> vector<8x512xf32>
    %247 = arith.addf %242, %246 : vector<8x512xf32>
    %248 = vector.extract_strided_slice %247 {offsets = [0, 0], sizes = [8, 128], strides = [1, 1]} : vector<8x512xf32> to vector<8x128xf32>
    %249 = arith.negf %248 : vector<8x128xf32>
    %250 = math.exp %249 : vector<8x128xf32>
    %cst_146 = arith.constant 1.000000e+00 : f32
    %251 = vector.broadcast %cst_146 : f32 to vector<8x128xf32>
    %252 = arith.addf %251, %250 : vector<8x128xf32>
    %253 = arith.divf %251, %252 : vector<8x128xf32>
    %254 = vector.extract_strided_slice %247 {offsets = [0, 128], sizes = [8, 128], strides = [1, 1]} : vector<8x512xf32> to vector<8x128xf32>
    %255 = arith.negf %254 : vector<8x128xf32>
    %256 = math.exp %255 : vector<8x128xf32>
    %cst_147 = arith.constant 1.000000e+00 : f32
    %257 = vector.broadcast %cst_147 : f32 to vector<8x128xf32>
    %258 = arith.addf %257, %256 : vector<8x128xf32>
    %259 = arith.divf %257, %258 : vector<8x128xf32>
    %260 = vector.extract_strided_slice %247 {offsets = [0, 256], sizes = [8, 128], strides = [1, 1]} : vector<8x512xf32> to vector<8x128xf32>
    %261 = math.tanh %260 : vector<8x128xf32>
    %262 = vector.extract_strided_slice %247 {offsets = [0, 384], sizes = [8, 128], strides = [1, 1]} : vector<8x512xf32> to vector<8x128xf32>
    %263 = arith.negf %262 : vector<8x128xf32>
    %264 = math.exp %263 : vector<8x128xf32>
    %cst_148 = arith.constant 1.000000e+00 : f32
    %265 = vector.broadcast %cst_148 : f32 to vector<8x128xf32>
    %266 = arith.addf %265, %264 : vector<8x128xf32>
    %267 = arith.divf %265, %266 : vector<8x128xf32>
    %c0_149 = arith.constant 0 : index
    %c0_150 = arith.constant 0 : index
    %268 = vector.load %arg12[%c0_149, %c0_150] : memref<8x128xf32, #tpu.memory_space<vmem>>, vector<8x128xf32>
    %269 = arith.mulf %259, %268 : vector<8x128xf32>
    %270 = arith.mulf %253, %261 : vector<8x128xf32>
    %271 = arith.addf %269, %270 : vector<8x128xf32>
    %272 = math.tanh %271 : vector<8x128xf32>
    %273 = arith.mulf %267, %272 : vector<8x128xf32>
    %c0_151 = arith.constant 0 : index
    %c0_152 = arith.constant 0 : index
    %274 = vector.load %arg12[%c0_151, %c0_152] : memref<8x128xf32, #tpu.memory_space<vmem>>, vector<8x128xf32>
    tpu.vector_store %arg12[%c0_151, %c0_152], %271 {strides = array<i32>} : memref<8x128xf32, #tpu.memory_space<vmem>>, vector<8x128xf32>,
    %c0_153 = arith.constant 0 : index
    %c0_154 = arith.constant 0 : index
    %275 = vector.load %arg11[%c0_153, %c0_154] : memref<8x128xf32, #tpu.memory_space<vmem>>, vector<8x128xf32>
    tpu.vector_store %arg11[%c0_153, %c0_154], %273 {strides = array<i32>} : memref<8x128xf32, #tpu.memory_space<vmem>>, vector<8x128xf32>,
    %c0_155 = arith.constant 0 : index
    %c0_156 = arith.constant 0 : index
    %276 = vector.load %arg8[%c0_155, %c0_156] : memref<8x1xi32, #tpu.memory_space<vmem>>, vector<8x1xi32>
    %277 = arith.addi %15, %c4_i32 : i32
    %278 = vector.broadcast %277 : i32 to vector<8x1xi32>
    %279 = arith.cmpi eq, %276, %278 : vector<8x1xi32>
    %c0_157 = arith.constant 0 : index
    %c0_158 = arith.constant 0 : index
    %c0_159 = arith.constant 0 : index
    %280 = vector.load %arg9[%c0_157, %c0_158, %c0_159] : memref<1x8x128xf32, #tpu.memory_space<vmem>>, vector<1x8x128xf32>
    %281 = vector.shape_cast %280 : vector<1x8x128xf32> to vector<8x128xf32>
    %282 = vector.shape_cast %279 : vector<8x1xi1> to vector<8x1xi1>
    %283 = vector.broadcast %282 : vector<8x1xi1> to vector<8x128xi1>
    %284 = arith.select %283, %273, %281 : vector<8x128xi1>, vector<8x128xf32>
    %c0_160 = arith.constant 0 : index
    %c0_161 = arith.constant 0 : index
    %c0_162 = arith.constant 0 : index
    %285 = vector.load %arg9[%c0_160, %c0_161, %c0_162] : memref<1x8x128xf32, #tpu.memory_space<vmem>>, vector<1x8x128xf32>
    %286 = vector.shape_cast %285 : vector<1x8x128xf32> to vector<8x128xf32>
    %287 = vector.shape_cast %284 : vector<8x128xf32> to vector<1x8x128xf32>
    tpu.vector_store %arg9[%c0_160, %c0_161, %c0_162], %287 {strides = array<i32>} : memref<1x8x128xf32, #tpu.memory_space<vmem>>, vector<1x8x128xf32>,
    %c0_163 = arith.constant 0 : index
    %c0_164 = arith.constant 0 : index
    %c0_165 = arith.constant 0 : index
    %288 = vector.load %arg10[%c0_163, %c0_164, %c0_165] : memref<1x8x128xf32, #tpu.memory_space<vmem>>, vector<1x8x128xf32>
    %289 = vector.shape_cast %288 : vector<1x8x128xf32> to vector<8x128xf32>
    %290 = vector.shape_cast %279 : vector<8x1xi1> to vector<8x1xi1>
    %291 = vector.broadcast %290 : vector<8x1xi1> to vector<8x128xi1>
    %292 = arith.select %291, %261, %289 : vector<8x128xi1>, vector<8x128xf32>
    %c0_166 = arith.constant 0 : index
    %c0_167 = arith.constant 0 : index
    %c0_168 = arith.constant 0 : index
    %293 = vector.load %arg10[%c0_166, %c0_167, %c0_168] : memref<1x8x128xf32, #tpu.memory_space<vmem>>, vector<1x8x128xf32>
    %294 = vector.shape_cast %293 : vector<1x8x128xf32> to vector<8x128xf32>
    %295 = vector.shape_cast %292 : vector<8x128xf32> to vector<1x8x128xf32>
    tpu.vector_store %arg10[%c0_166, %c0_167, %c0_168], %295 {strides = array<i32>} : memref<1x8x128xf32, #tpu.memory_space<vmem>>, vector<1x8x128xf32>,
    %c5_i32 = arith.constant 5 : i32
    %296 = arith.index_cast %c5_i32 : i32 to index
    %c0_169 = arith.constant 0 : index
    %c0_170 = arith.constant 0 : index
    %297 = vector.load %arg13[%296, %c0_169, %c0_170] : memref<8x8x512xf32, #tpu.memory_space<vmem>>, vector<1x8x512xf32>
    %298 = vector.shape_cast %297 : vector<1x8x512xf32> to vector<8x512xf32>
    %c0_171 = arith.constant 0 : index
    %c0_172 = arith.constant 0 : index
    %299 = vector.load %arg11[%c0_171, %c0_172] : memref<8x128xf32, #tpu.memory_space<vmem>>, vector<8x128xf32>
    %c0_173 = arith.constant 0 : index
    %c0_174 = arith.constant 0 : index
    %c0_175 = arith.constant 0 : index
    %300 = vector.load %arg4[%c0_173, %c0_174, %c0_175] : memref<1x128x512xf32, #tpu.memory_space<vmem>>, vector<1x128x512xf32>
    %301 = vector.shape_cast %300 : vector<1x128x512xf32> to vector<128x512xf32>
    %cst_176 = arith.constant dense<0.000000e+00> : vector<8x512xf32>
    %302 = tpu.matmul %299, %301, %cst_176 {dimension_numbers = #tpu.dot_dimension_numbers<[1], [0], [0], [1], [0, 0, 1, 1], [], []>} : vector<8x128xf32>, vector<128x512xf32>, vector<8x512xf32> -> vector<8x512xf32>
    %303 = arith.addf %298, %302 : vector<8x512xf32>
    %304 = vector.extract_strided_slice %303 {offsets = [0, 0], sizes = [8, 128], strides = [1, 1]} : vector<8x512xf32> to vector<8x128xf32>
    %305 = arith.negf %304 : vector<8x128xf32>
    %306 = math.exp %305 : vector<8x128xf32>
    %cst_177 = arith.constant 1.000000e+00 : f32
    %307 = vector.broadcast %cst_177 : f32 to vector<8x128xf32>
    %308 = arith.addf %307, %306 : vector<8x128xf32>
    %309 = arith.divf %307, %308 : vector<8x128xf32>
    %310 = vector.extract_strided_slice %303 {offsets = [0, 128], sizes = [8, 128], strides = [1, 1]} : vector<8x512xf32> to vector<8x128xf32>
    %311 = arith.negf %310 : vector<8x128xf32>
    %312 = math.exp %311 : vector<8x128xf32>
    %cst_178 = arith.constant 1.000000e+00 : f32
    %313 = vector.broadcast %cst_178 : f32 to vector<8x128xf32>
    %314 = arith.addf %313, %312 : vector<8x128xf32>
    %315 = arith.divf %313, %314 : vector<8x128xf32>
    %316 = vector.extract_strided_slice %303 {offsets = [0, 256], sizes = [8, 128], strides = [1, 1]} : vector<8x512xf32> to vector<8x128xf32>
    %317 = math.tanh %316 : vector<8x128xf32>
    %318 = vector.extract_strided_slice %303 {offsets = [0, 384], sizes = [8, 128], strides = [1, 1]} : vector<8x512xf32> to vector<8x128xf32>
    %319 = arith.negf %318 : vector<8x128xf32>
    %320 = math.exp %319 : vector<8x128xf32>
    %cst_179 = arith.constant 1.000000e+00 : f32
    %321 = vector.broadcast %cst_179 : f32 to vector<8x128xf32>
    %322 = arith.addf %321, %320 : vector<8x128xf32>
    %323 = arith.divf %321, %322 : vector<8x128xf32>
    %c0_180 = arith.constant 0 : index
    %c0_181 = arith.constant 0 : index
    %324 = vector.load %arg12[%c0_180, %c0_181] : memref<8x128xf32, #tpu.memory_space<vmem>>, vector<8x128xf32>
    %325 = arith.mulf %315, %324 : vector<8x128xf32>
    %326 = arith.mulf %309, %317 : vector<8x128xf32>
    %327 = arith.addf %325, %326 : vector<8x128xf32>
    %328 = math.tanh %327 : vector<8x128xf32>
    %329 = arith.mulf %323, %328 : vector<8x128xf32>
    %c0_182 = arith.constant 0 : index
    %c0_183 = arith.constant 0 : index
    %330 = vector.load %arg12[%c0_182, %c0_183] : memref<8x128xf32, #tpu.memory_space<vmem>>, vector<8x128xf32>
    tpu.vector_store %arg12[%c0_182, %c0_183], %327 {strides = array<i32>} : memref<8x128xf32, #tpu.memory_space<vmem>>, vector<8x128xf32>,
    %c0_184 = arith.constant 0 : index
    %c0_185 = arith.constant 0 : index
    %331 = vector.load %arg11[%c0_184, %c0_185] : memref<8x128xf32, #tpu.memory_space<vmem>>, vector<8x128xf32>
    tpu.vector_store %arg11[%c0_184, %c0_185], %329 {strides = array<i32>} : memref<8x128xf32, #tpu.memory_space<vmem>>, vector<8x128xf32>,
    %c0_186 = arith.constant 0 : index
    %c0_187 = arith.constant 0 : index
    %332 = vector.load %arg8[%c0_186, %c0_187] : memref<8x1xi32, #tpu.memory_space<vmem>>, vector<8x1xi32>
    %333 = arith.addi %15, %c5_i32 : i32
    %334 = vector.broadcast %333 : i32 to vector<8x1xi32>
    %335 = arith.cmpi eq, %332, %334 : vector<8x1xi32>
    %c0_188 = arith.constant 0 : index
    %c0_189 = arith.constant 0 : index
    %c0_190 = arith.constant 0 : index
    %336 = vector.load %arg9[%c0_188, %c0_189, %c0_190] : memref<1x8x128xf32, #tpu.memory_space<vmem>>, vector<1x8x128xf32>
    %337 = vector.shape_cast %336 : vector<1x8x128xf32> to vector<8x128xf32>
    %338 = vector.shape_cast %335 : vector<8x1xi1> to vector<8x1xi1>
    %339 = vector.broadcast %338 : vector<8x1xi1> to vector<8x128xi1>
    %340 = arith.select %339, %329, %337 : vector<8x128xi1>, vector<8x128xf32>
    %c0_191 = arith.constant 0 : index
    %c0_192 = arith.constant 0 : index
    %c0_193 = arith.constant 0 : index
    %341 = vector.load %arg9[%c0_191, %c0_192, %c0_193] : memref<1x8x128xf32, #tpu.memory_space<vmem>>, vector<1x8x128xf32>
    %342 = vector.shape_cast %341 : vector<1x8x128xf32> to vector<8x128xf32>
    %343 = vector.shape_cast %340 : vector<8x128xf32> to vector<1x8x128xf32>
    tpu.vector_store %arg9[%c0_191, %c0_192, %c0_193], %343 {strides = array<i32>} : memref<1x8x128xf32, #tpu.memory_space<vmem>>, vector<1x8x128xf32>,
    %c0_194 = arith.constant 0 : index
    %c0_195 = arith.constant 0 : index
    %c0_196 = arith.constant 0 : index
    %344 = vector.load %arg10[%c0_194, %c0_195, %c0_196] : memref<1x8x128xf32, #tpu.memory_space<vmem>>, vector<1x8x128xf32>
    %345 = vector.shape_cast %344 : vector<1x8x128xf32> to vector<8x128xf32>
    %346 = vector.shape_cast %335 : vector<8x1xi1> to vector<8x1xi1>
    %347 = vector.broadcast %346 : vector<8x1xi1> to vector<8x128xi1>
    %348 = arith.select %347, %317, %345 : vector<8x128xi1>, vector<8x128xf32>
    %c0_197 = arith.constant 0 : index
    %c0_198 = arith.constant 0 : index
    %c0_199 = arith.constant 0 : index
    %349 = vector.load %arg10[%c0_197, %c0_198, %c0_199] : memref<1x8x128xf32, #tpu.memory_space<vmem>>, vector<1x8x128xf32>
    %350 = vector.shape_cast %349 : vector<1x8x128xf32> to vector<8x128xf32>
    %351 = vector.shape_cast %348 : vector<8x128xf32> to vector<1x8x128xf32>
    tpu.vector_store %arg10[%c0_197, %c0_198, %c0_199], %351 {strides = array<i32>} : memref<1x8x128xf32, #tpu.memory_space<vmem>>, vector<1x8x128xf32>,
    %c6_i32 = arith.constant 6 : i32
    %352 = arith.index_cast %c6_i32 : i32 to index
    %c0_200 = arith.constant 0 : index
    %c0_201 = arith.constant 0 : index
    %353 = vector.load %arg13[%352, %c0_200, %c0_201] : memref<8x8x512xf32, #tpu.memory_space<vmem>>, vector<1x8x512xf32>
    %354 = vector.shape_cast %353 : vector<1x8x512xf32> to vector<8x512xf32>
    %c0_202 = arith.constant 0 : index
    %c0_203 = arith.constant 0 : index
    %355 = vector.load %arg11[%c0_202, %c0_203] : memref<8x128xf32, #tpu.memory_space<vmem>>, vector<8x128xf32>
    %c0_204 = arith.constant 0 : index
    %c0_205 = arith.constant 0 : index
    %c0_206 = arith.constant 0 : index
    %356 = vector.load %arg4[%c0_204, %c0_205, %c0_206] : memref<1x128x512xf32, #tpu.memory_space<vmem>>, vector<1x128x512xf32>
    %357 = vector.shape_cast %356 : vector<1x128x512xf32> to vector<128x512xf32>
    %cst_207 = arith.constant dense<0.000000e+00> : vector<8x512xf32>
    %358 = tpu.matmul %355, %357, %cst_207 {dimension_numbers = #tpu.dot_dimension_numbers<[1], [0], [0], [1], [0, 0, 1, 1], [], []>} : vector<8x128xf32>, vector<128x512xf32>, vector<8x512xf32> -> vector<8x512xf32>
    %359 = arith.addf %354, %358 : vector<8x512xf32>
    %360 = vector.extract_strided_slice %359 {offsets = [0, 0], sizes = [8, 128], strides = [1, 1]} : vector<8x512xf32> to vector<8x128xf32>
    %361 = arith.negf %360 : vector<8x128xf32>
    %362 = math.exp %361 : vector<8x128xf32>
    %cst_208 = arith.constant 1.000000e+00 : f32
    %363 = vector.broadcast %cst_208 : f32 to vector<8x128xf32>
    %364 = arith.addf %363, %362 : vector<8x128xf32>
    %365 = arith.divf %363, %364 : vector<8x128xf32>
    %366 = vector.extract_strided_slice %359 {offsets = [0, 128], sizes = [8, 128], strides = [1, 1]} : vector<8x512xf32> to vector<8x128xf32>
    %367 = arith.negf %366 : vector<8x128xf32>
    %368 = math.exp %367 : vector<8x128xf32>
    %cst_209 = arith.constant 1.000000e+00 : f32
    %369 = vector.broadcast %cst_209 : f32 to vector<8x128xf32>
    %370 = arith.addf %369, %368 : vector<8x128xf32>
    %371 = arith.divf %369, %370 : vector<8x128xf32>
    %372 = vector.extract_strided_slice %359 {offsets = [0, 256], sizes = [8, 128], strides = [1, 1]} : vector<8x512xf32> to vector<8x128xf32>
    %373 = math.tanh %372 : vector<8x128xf32>
    %374 = vector.extract_strided_slice %359 {offsets = [0, 384], sizes = [8, 128], strides = [1, 1]} : vector<8x512xf32> to vector<8x128xf32>
    %375 = arith.negf %374 : vector<8x128xf32>
    %376 = math.exp %375 : vector<8x128xf32>
    %cst_210 = arith.constant 1.000000e+00 : f32
    %377 = vector.broadcast %cst_210 : f32 to vector<8x128xf32>
    %378 = arith.addf %377, %376 : vector<8x128xf32>
    %379 = arith.divf %377, %378 : vector<8x128xf32>
    %c0_211 = arith.constant 0 : index
    %c0_212 = arith.constant 0 : index
    %380 = vector.load %arg12[%c0_211, %c0_212] : memref<8x128xf32, #tpu.memory_space<vmem>>, vector<8x128xf32>
    %381 = arith.mulf %371, %380 : vector<8x128xf32>
    %382 = arith.mulf %365, %373 : vector<8x128xf32>
    %383 = arith.addf %381, %382 : vector<8x128xf32>
    %384 = math.tanh %383 : vector<8x128xf32>
    %385 = arith.mulf %379, %384 : vector<8x128xf32>
    %c0_213 = arith.constant 0 : index
    %c0_214 = arith.constant 0 : index
    %386 = vector.load %arg12[%c0_213, %c0_214] : memref<8x128xf32, #tpu.memory_space<vmem>>, vector<8x128xf32>
    tpu.vector_store %arg12[%c0_213, %c0_214], %383 {strides = array<i32>} : memref<8x128xf32, #tpu.memory_space<vmem>>, vector<8x128xf32>,
    %c0_215 = arith.constant 0 : index
    %c0_216 = arith.constant 0 : index
    %387 = vector.load %arg11[%c0_215, %c0_216] : memref<8x128xf32, #tpu.memory_space<vmem>>, vector<8x128xf32>
    tpu.vector_store %arg11[%c0_215, %c0_216], %385 {strides = array<i32>} : memref<8x128xf32, #tpu.memory_space<vmem>>, vector<8x128xf32>,
    %c0_217 = arith.constant 0 : index
    %c0_218 = arith.constant 0 : index
    %388 = vector.load %arg8[%c0_217, %c0_218] : memref<8x1xi32, #tpu.memory_space<vmem>>, vector<8x1xi32>
    %389 = arith.addi %15, %c6_i32 : i32
    %390 = vector.broadcast %389 : i32 to vector<8x1xi32>
    %391 = arith.cmpi eq, %388, %390 : vector<8x1xi32>
    %c0_219 = arith.constant 0 : index
    %c0_220 = arith.constant 0 : index
    %c0_221 = arith.constant 0 : index
    %392 = vector.load %arg9[%c0_219, %c0_220, %c0_221] : memref<1x8x128xf32, #tpu.memory_space<vmem>>, vector<1x8x128xf32>
    %393 = vector.shape_cast %392 : vector<1x8x128xf32> to vector<8x128xf32>
    %394 = vector.shape_cast %391 : vector<8x1xi1> to vector<8x1xi1>
    %395 = vector.broadcast %394 : vector<8x1xi1> to vector<8x128xi1>
    %396 = arith.select %395, %385, %393 : vector<8x128xi1>, vector<8x128xf32>
    %c0_222 = arith.constant 0 : index
    %c0_223 = arith.constant 0 : index
    %c0_224 = arith.constant 0 : index
    %397 = vector.load %arg9[%c0_222, %c0_223, %c0_224] : memref<1x8x128xf32, #tpu.memory_space<vmem>>, vector<1x8x128xf32>
    %398 = vector.shape_cast %397 : vector<1x8x128xf32> to vector<8x128xf32>
    %399 = vector.shape_cast %396 : vector<8x128xf32> to vector<1x8x128xf32>
    tpu.vector_store %arg9[%c0_222, %c0_223, %c0_224], %399 {strides = array<i32>} : memref<1x8x128xf32, #tpu.memory_space<vmem>>, vector<1x8x128xf32>,
    %c0_225 = arith.constant 0 : index
    %c0_226 = arith.constant 0 : index
    %c0_227 = arith.constant 0 : index
    %400 = vector.load %arg10[%c0_225, %c0_226, %c0_227] : memref<1x8x128xf32, #tpu.memory_space<vmem>>, vector<1x8x128xf32>
    %401 = vector.shape_cast %400 : vector<1x8x128xf32> to vector<8x128xf32>
    %402 = vector.shape_cast %391 : vector<8x1xi1> to vector<8x1xi1>
    %403 = vector.broadcast %402 : vector<8x1xi1> to vector<8x128xi1>
    %404 = arith.select %403, %373, %401 : vector<8x128xi1>, vector<8x128xf32>
    %c0_228 = arith.constant 0 : index
    %c0_229 = arith.constant 0 : index
    %c0_230 = arith.constant 0 : index
    %405 = vector.load %arg10[%c0_228, %c0_229, %c0_230] : memref<1x8x128xf32, #tpu.memory_space<vmem>>, vector<1x8x128xf32>
    %406 = vector.shape_cast %405 : vector<1x8x128xf32> to vector<8x128xf32>
    %407 = vector.shape_cast %404 : vector<8x128xf32> to vector<1x8x128xf32>
    tpu.vector_store %arg10[%c0_228, %c0_229, %c0_230], %407 {strides = array<i32>} : memref<1x8x128xf32, #tpu.memory_space<vmem>>, vector<1x8x128xf32>,
    %c7_i32 = arith.constant 7 : i32
    %408 = arith.index_cast %c7_i32 : i32 to index
    %c0_231 = arith.constant 0 : index
    %c0_232 = arith.constant 0 : index
    %409 = vector.load %arg13[%408, %c0_231, %c0_232] : memref<8x8x512xf32, #tpu.memory_space<vmem>>, vector<1x8x512xf32>
    %410 = vector.shape_cast %409 : vector<1x8x512xf32> to vector<8x512xf32>
    %c0_233 = arith.constant 0 : index
    %c0_234 = arith.constant 0 : index
    %411 = vector.load %arg11[%c0_233, %c0_234] : memref<8x128xf32, #tpu.memory_space<vmem>>, vector<8x128xf32>
    %c0_235 = arith.constant 0 : index
    %c0_236 = arith.constant 0 : index
    %c0_237 = arith.constant 0 : index
    %412 = vector.load %arg4[%c0_235, %c0_236, %c0_237] : memref<1x128x512xf32, #tpu.memory_space<vmem>>, vector<1x128x512xf32>
    %413 = vector.shape_cast %412 : vector<1x128x512xf32> to vector<128x512xf32>
    %cst_238 = arith.constant dense<0.000000e+00> : vector<8x512xf32>
    %414 = tpu.matmul %411, %413, %cst_238 {dimension_numbers = #tpu.dot_dimension_numbers<[1], [0], [0], [1], [0, 0, 1, 1], [], []>} : vector<8x128xf32>, vector<128x512xf32>, vector<8x512xf32> -> vector<8x512xf32>
    %415 = arith.addf %410, %414 : vector<8x512xf32>
    %416 = vector.extract_strided_slice %415 {offsets = [0, 0], sizes = [8, 128], strides = [1, 1]} : vector<8x512xf32> to vector<8x128xf32>
    %417 = arith.negf %416 : vector<8x128xf32>
    %418 = math.exp %417 : vector<8x128xf32>
    %cst_239 = arith.constant 1.000000e+00 : f32
    %419 = vector.broadcast %cst_239 : f32 to vector<8x128xf32>
    %420 = arith.addf %419, %418 : vector<8x128xf32>
    %421 = arith.divf %419, %420 : vector<8x128xf32>
    %422 = vector.extract_strided_slice %415 {offsets = [0, 128], sizes = [8, 128], strides = [1, 1]} : vector<8x512xf32> to vector<8x128xf32>
    %423 = arith.negf %422 : vector<8x128xf32>
    %424 = math.exp %423 : vector<8x128xf32>
    %cst_240 = arith.constant 1.000000e+00 : f32
    %425 = vector.broadcast %cst_240 : f32 to vector<8x128xf32>
    %426 = arith.addf %425, %424 : vector<8x128xf32>
    %427 = arith.divf %425, %426 : vector<8x128xf32>
    %428 = vector.extract_strided_slice %415 {offsets = [0, 256], sizes = [8, 128], strides = [1, 1]} : vector<8x512xf32> to vector<8x128xf32>
    %429 = math.tanh %428 : vector<8x128xf32>
    %430 = vector.extract_strided_slice %415 {offsets = [0, 384], sizes = [8, 128], strides = [1, 1]} : vector<8x512xf32> to vector<8x128xf32>
    %431 = arith.negf %430 : vector<8x128xf32>
    %432 = math.exp %431 : vector<8x128xf32>
    %cst_241 = arith.constant 1.000000e+00 : f32
    %433 = vector.broadcast %cst_241 : f32 to vector<8x128xf32>
    %434 = arith.addf %433, %432 : vector<8x128xf32>
    %435 = arith.divf %433, %434 : vector<8x128xf32>
    %c0_242 = arith.constant 0 : index
    %c0_243 = arith.constant 0 : index
    %436 = vector.load %arg12[%c0_242, %c0_243] : memref<8x128xf32, #tpu.memory_space<vmem>>, vector<8x128xf32>
    %437 = arith.mulf %427, %436 : vector<8x128xf32>
    %438 = arith.mulf %421, %429 : vector<8x128xf32>
    %439 = arith.addf %437, %438 : vector<8x128xf32>
    %440 = math.tanh %439 : vector<8x128xf32>
    %441 = arith.mulf %435, %440 : vector<8x128xf32>
    %c0_244 = arith.constant 0 : index
    %c0_245 = arith.constant 0 : index
    %442 = vector.load %arg12[%c0_244, %c0_245] : memref<8x128xf32, #tpu.memory_space<vmem>>, vector<8x128xf32>
    tpu.vector_store %arg12[%c0_244, %c0_245], %439 {strides = array<i32>} : memref<8x128xf32, #tpu.memory_space<vmem>>, vector<8x128xf32>,
    %c0_246 = arith.constant 0 : index
    %c0_247 = arith.constant 0 : index
    %443 = vector.load %arg11[%c0_246, %c0_247] : memref<8x128xf32, #tpu.memory_space<vmem>>, vector<8x128xf32>
    tpu.vector_store %arg11[%c0_246, %c0_247], %441 {strides = array<i32>} : memref<8x128xf32, #tpu.memory_space<vmem>>, vector<8x128xf32>,
    %c0_248 = arith.constant 0 : index
    %c0_249 = arith.constant 0 : index
    %444 = vector.load %arg8[%c0_248, %c0_249] : memref<8x1xi32, #tpu.memory_space<vmem>>, vector<8x1xi32>
    %445 = arith.addi %15, %c7_i32 : i32
    %446 = vector.broadcast %445 : i32 to vector<8x1xi32>
    %447 = arith.cmpi eq, %444, %446 : vector<8x1xi32>
    %c0_250 = arith.constant 0 : index
    %c0_251 = arith.constant 0 : index
    %c0_252 = arith.constant 0 : index
    %448 = vector.load %arg9[%c0_250, %c0_251, %c0_252] : memref<1x8x128xf32, #tpu.memory_space<vmem>>, vector<1x8x128xf32>
    %449 = vector.shape_cast %448 : vector<1x8x128xf32> to vector<8x128xf32>
    %450 = vector.shape_cast %447 : vector<8x1xi1> to vector<8x1xi1>
    %451 = vector.broadcast %450 : vector<8x1xi1> to vector<8x128xi1>
    %452 = arith.select %451, %441, %449 : vector<8x128xi1>, vector<8x128xf32>
    %c0_253 = arith.constant 0 : index
    %c0_254 = arith.constant 0 : index
    %c0_255 = arith.constant 0 : index
    %453 = vector.load %arg9[%c0_253, %c0_254, %c0_255] : memref<1x8x128xf32, #tpu.memory_space<vmem>>, vector<1x8x128xf32>
    %454 = vector.shape_cast %453 : vector<1x8x128xf32> to vector<8x128xf32>
    %455 = vector.shape_cast %452 : vector<8x128xf32> to vector<1x8x128xf32>
    tpu.vector_store %arg9[%c0_253, %c0_254, %c0_255], %455 {strides = array<i32>} : memref<1x8x128xf32, #tpu.memory_space<vmem>>, vector<1x8x128xf32>,
    %c0_256 = arith.constant 0 : index
    %c0_257 = arith.constant 0 : index
    %c0_258 = arith.constant 0 : index
    %456 = vector.load %arg10[%c0_256, %c0_257, %c0_258] : memref<1x8x128xf32, #tpu.memory_space<vmem>>, vector<1x8x128xf32>
    %457 = vector.shape_cast %456 : vector<1x8x128xf32> to vector<8x128xf32>
    %458 = vector.shape_cast %447 : vector<8x1xi1> to vector<8x1xi1>
    %459 = vector.broadcast %458 : vector<8x1xi1> to vector<8x128xi1>
    %460 = arith.select %459, %429, %457 : vector<8x128xi1>, vector<8x128xf32>
    %c0_259 = arith.constant 0 : index
    %c0_260 = arith.constant 0 : index
    %c0_261 = arith.constant 0 : index
    %461 = vector.load %arg10[%c0_259, %c0_260, %c0_261] : memref<1x8x128xf32, #tpu.memory_space<vmem>>, vector<1x8x128xf32>
    %462 = vector.shape_cast %461 : vector<1x8x128xf32> to vector<8x128xf32>
    %463 = vector.shape_cast %460 : vector<8x128xf32> to vector<1x8x128xf32>
    tpu.vector_store %arg10[%c0_259, %c0_260, %c0_261], %463 {strides = array<i32>} : memref<1x8x128xf32, #tpu.memory_space<vmem>>, vector<1x8x128xf32>,
    %c8_i32_262 = arith.constant 8 : i32
    return
  }
  func.func @transform_0(%arg0: i32, %arg1: i32) -> (i32, i32, i32, i32) {
    %c0_i32 = arith.constant 0 : i32
    %c0_i32_0 = arith.constant 0 : i32
    %c0_i32_1 = arith.constant 0 : i32
    return %arg0, %arg1, %c0_i32, %c0_i32_0 : i32, i32, i32, i32
  }
  func.func @transform_1(%arg0: i32, %arg1: i32) -> (i32, i32, i32) {
    %c0_i32 = arith.constant 0 : i32
    %c0_i32_0 = arith.constant 0 : i32
    %c0_i32_1 = arith.constant 0 : i32
    return %arg0, %c0_i32, %c0_i32_0 : i32, i32, i32
  }
  func.func @transform_2(%arg0: i32, %arg1: i32) -> (i32, i32, i32) {
    %c0_i32 = arith.constant 0 : i32
    %c0_i32_0 = arith.constant 0 : i32
    %c0_i32_1 = arith.constant 0 : i32
    return %arg0, %c0_i32, %c0_i32_0 : i32, i32, i32
  }
  func.func @transform_3(%arg0: i32, %arg1: i32) -> (i32, i32, i32) {
    %c0_i32 = arith.constant 0 : i32
    %c0_i32_0 = arith.constant 0 : i32
    %c0_i32_1 = arith.constant 0 : i32
    return %arg0, %c0_i32, %c0_i32_0 : i32, i32, i32
  }
  func.func @transform_4(%arg0: i32, %arg1: i32) -> (i32, i32, i32) {
    %c0_i32 = arith.constant 0 : i32
    %c0_i32_0 = arith.constant 0 : i32
    %c0_i32_1 = arith.constant 0 : i32
    return %arg0, %c0_i32, %c0_i32_0 : i32, i32, i32
  }
  func.func @transform_5(%arg0: i32, %arg1: i32) -> (i32, i32, i32) {
    %c0_i32 = arith.constant 0 : i32
    %c0_i32_0 = arith.constant 0 : i32
    %c0_i32_1 = arith.constant 0 : i32
    return %arg0, %c0_i32, %c0_i32_0 : i32, i32, i32
  }
  func.func @transform_6(%arg0: i32, %arg1: i32) -> (i32, i32) {
    %c0_i32 = arith.constant 0 : i32
    %c0_i32_0 = arith.constant 0 : i32
    %c0_i32_1 = arith.constant 0 : i32
    return %c0_i32, %c0_i32_0 : i32, i32
  }
  func.func @transform_7(%arg0: i32, %arg1: i32) -> (i32, i32, i32) {
    %c0_i32 = arith.constant 0 : i32
    %c0_i32_0 = arith.constant 0 : i32
    %c0_i32_1 = arith.constant 0 : i32
    return %arg0, %c0_i32, %c0_i32_0 : i32, i32, i32
  }
  func.func @transform_8(%arg0: i32, %arg1: i32) -> (i32, i32, i32) {
    %c0_i32 = arith.constant 0 : i32
    %c0_i32_0 = arith.constant 0 : i32
    %c0_i32_1 = arith.constant 0 : i32
    return %arg0, %c0_i32, %c0_i32_0 : i32, i32, i32
  }
}

module attributes {stable_mosaic.version = 11 : i64} {
  func.func @linear_logsoftmax_kernel(%arg0: i32, %arg1: i32, %arg2: i32, %arg3: memref<48x128xf32, #tpu.memory_space<vmem>>, %arg4: memref<128x128xf32, #tpu.memory_space<vmem>>, %arg5: memref<1x128xf32, #tpu.memory_space<vmem>>, %arg6: memref<48x128xf32, #tpu.memory_space<vmem>>, %arg7: memref<48x1xf32, #tpu.memory_space<vmem>>, %arg8: memref<48x1xf32, #tpu.memory_space<vmem>>) attributes {dimension_semantics = [#tpu.dimension_semantics<parallel>, #tpu.dimension_semantics<arbitrary>, #tpu.dimension_semantics<arbitrary>], iteration_bounds = array<i64: 1, 2, 1>, scalar_prefetch = 0 : i64, scratch_operands = 2 : i64, tpu.core_type = #tpu.core_type<tc>, window_params = [{transform_indices = @transform_0, window_bounds = array<i64: 48, 128>}, {transform_indices = @transform_1, window_bounds = array<i64: 128, 128>}, {transform_indices = @transform_2, window_bounds = array<i64: 1, 128>}, {transform_indices = @transform_3, window_bounds = array<i64: 48, 128>}]} {
    %c0 = arith.constant 0 : index
    %c0_0 = arith.constant 0 : index
    %0 = vector.load %arg3[%c0, %c0_0] : memref<48x128xf32, #tpu.memory_space<vmem>>, vector<48x128xf32>
    %c0_1 = arith.constant 0 : index
    %c0_2 = arith.constant 0 : index
    %1 = vector.load %arg4[%c0_1, %c0_2] : memref<128x128xf32, #tpu.memory_space<vmem>>, vector<128x128xf32>
    %cst = arith.constant dense<0.000000e+00> : vector<48x128xf32>
    %2 = tpu.matmul %0, %1, %cst {dimension_numbers = #tpu.dot_dimension_numbers<[1], [0], [0], [1], [0, 0, 1, 1], [], []>} : vector<48x128xf32>, vector<128x128xf32>, vector<48x128xf32> -> vector<48x128xf32>
    %c0_3 = arith.constant 0 : index
    %c0_4 = arith.constant 0 : index
    %3 = vector.load %arg5[%c0_3, %c0_4] : memref<1x128xf32, #tpu.memory_space<vmem>>, vector<1x128xf32>
    %4 = vector.broadcast %3 : vector<1x128xf32> to vector<48x128xf32>
    %5 = arith.addf %2, %4 : vector<48x128xf32>
    %c0_i32 = arith.constant 0 : i32
    %6 = arith.cmpi eq, %arg1, %c0_i32 : i32
    %c0_i32_5 = arith.constant 0 : i32
    %7 = arith.cmpi eq, %arg2, %c0_i32_5 : i32
    %8 = arith.andi %6, %7 : i1
    %9 = arith.extui %8 : i1 to i32
    %c0_i32_6 = arith.constant 0 : i32
    %10 = arith.cmpi ne, %9, %c0_i32_6 : i32
    scf.if %10 {
      %cst_10 = arith.constant 0xFF800000 : f32
      %17 = vector.broadcast %cst_10 : f32 to vector<48x1xf32>
      %c0_11 = arith.constant 0 : index
      %c0_12 = arith.constant 0 : index
      %18 = vector.load %arg7[%c0_11, %c0_12] : memref<48x1xf32, #tpu.memory_space<vmem>>, vector<48x1xf32>
      tpu.vector_store %arg7[%c0_11, %c0_12], %17 {strides = array<i32>} : memref<48x1xf32, #tpu.memory_space<vmem>>, vector<48x1xf32>,
      %cst_13 = arith.constant 0.000000e+00 : f32
      %19 = vector.broadcast %cst_13 : f32 to vector<48x1xf32>
      %c0_14 = arith.constant 0 : index
      %c0_15 = arith.constant 0 : index
      %20 = vector.load %arg8[%c0_14, %c0_15] : memref<48x1xf32, #tpu.memory_space<vmem>>, vector<48x1xf32>
      tpu.vector_store %arg8[%c0_14, %c0_15], %19 {strides = array<i32>} : memref<48x1xf32, #tpu.memory_space<vmem>>, vector<48x1xf32>,
    } else {
    }
    %c0_i32_7 = arith.constant 0 : i32
    %11 = arith.cmpi eq, %arg1, %c0_i32_7 : i32
    %12 = arith.extui %11 : i1 to i32
    %c0_i32_8 = arith.constant 0 : i32
    %13 = arith.cmpi ne, %12, %c0_i32_8 : i32
    scf.if %13 {
      %c0_10 = arith.constant 0 : index
      %c0_11 = arith.constant 0 : index
      %17 = vector.load %arg7[%c0_10, %c0_11] : memref<48x1xf32, #tpu.memory_space<vmem>>, vector<48x1xf32>
      %cst_12 = arith.constant dense<0xFF800000> : vector<48xf32>
      %18 = vector.multi_reduction <maximumf>, %5, %cst_12 [1] : vector<48x128xf32> to vector<48xf32>
      %19 = vector.shape_cast %18 : vector<48xf32> to vector<48x1xf32>
      %20 = arith.maximumf %17, %19 : vector<48x1xf32>
      %c0_13 = arith.constant 0 : index
      %c0_14 = arith.constant 0 : index
      %21 = vector.load %arg8[%c0_13, %c0_14] : memref<48x1xf32, #tpu.memory_space<vmem>>, vector<48x1xf32>
      %22 = arith.subf %17, %20 : vector<48x1xf32>
      %23 = math.exp %22 : vector<48x1xf32>
      %24 = arith.mulf %21, %23 : vector<48x1xf32>
      %25 = vector.broadcast %20 : vector<48x1xf32> to vector<48x128xf32>
      %26 = arith.subf %5, %25 : vector<48x128xf32>
      %27 = math.exp %26 : vector<48x128xf32>
      %cst_15 = arith.constant dense<0.000000e+00> : vector<48xf32>
      %28 = vector.multi_reduction <add>, %27, %cst_15 [1] : vector<48x128xf32> to vector<48xf32>
      %29 = vector.shape_cast %28 : vector<48xf32> to vector<48x1xf32>
      %30 = arith.addf %24, %29 : vector<48x1xf32>
      %c0_16 = arith.constant 0 : index
      %c0_17 = arith.constant 0 : index
      %31 = vector.load %arg8[%c0_16, %c0_17] : memref<48x1xf32, #tpu.memory_space<vmem>>, vector<48x1xf32>
      tpu.vector_store %arg8[%c0_16, %c0_17], %30 {strides = array<i32>} : memref<48x1xf32, #tpu.memory_space<vmem>>, vector<48x1xf32>,
      %c0_18 = arith.constant 0 : index
      %c0_19 = arith.constant 0 : index
      %32 = vector.load %arg7[%c0_18, %c0_19] : memref<48x1xf32, #tpu.memory_space<vmem>>, vector<48x1xf32>
      tpu.vector_store %arg7[%c0_18, %c0_19], %20 {strides = array<i32>} : memref<48x1xf32, #tpu.memory_space<vmem>>, vector<48x1xf32>,
    } else {
    }
    %c1_i32 = arith.constant 1 : i32
    %14 = arith.cmpi eq, %arg1, %c1_i32 : i32
    %15 = arith.extui %14 : i1 to i32
    %c0_i32_9 = arith.constant 0 : i32
    %16 = arith.cmpi ne, %15, %c0_i32_9 : i32
    scf.if %16 {
      %c0_10 = arith.constant 0 : index
      %c0_11 = arith.constant 0 : index
      %17 = vector.load %arg7[%c0_10, %c0_11] : memref<48x1xf32, #tpu.memory_space<vmem>>, vector<48x1xf32>
      %18 = vector.broadcast %17 : vector<48x1xf32> to vector<48x128xf32>
      %19 = arith.subf %5, %18 : vector<48x128xf32>
      %c0_12 = arith.constant 0 : index
      %c0_13 = arith.constant 0 : index
      %20 = vector.load %arg8[%c0_12, %c0_13] : memref<48x1xf32, #tpu.memory_space<vmem>>, vector<48x1xf32>
      %21 = math.log %20 : vector<48x1xf32>
      %22 = vector.broadcast %21 : vector<48x1xf32> to vector<48x128xf32>
      %23 = arith.subf %19, %22 : vector<48x128xf32>
      %c0_14 = arith.constant 0 : index
      %c0_15 = arith.constant 0 : index
      %24 = vector.load %arg6[%c0_14, %c0_15] : memref<48x128xf32, #tpu.memory_space<vmem>>, vector<48x128xf32>
      tpu.vector_store %arg6[%c0_14, %c0_15], %23 {strides = array<i32>} : memref<48x128xf32, #tpu.memory_space<vmem>>, vector<48x128xf32>,
    } else {
    }
    return
  }
  func.func @transform_0(%arg0: i32, %arg1: i32, %arg2: i32) -> (i32, i32) {
    %c0_i32 = arith.constant 0 : i32
    %c0_i32_0 = arith.constant 0 : i32
    return %arg0, %c0_i32 : i32, i32
  }
  func.func @transform_1(%arg0: i32, %arg1: i32, %arg2: i32) -> (i32, i32) {
    %c0_i32 = arith.constant 0 : i32
    %c0_i32_0 = arith.constant 0 : i32
    return %c0_i32, %arg2 : i32, i32
  }
  func.func @transform_2(%arg0: i32, %arg1: i32, %arg2: i32) -> (i32, i32) {
    %c0_i32 = arith.constant 0 : i32
    %c0_i32_0 = arith.constant 0 : i32
    return %c0_i32, %arg2 : i32, i32
  }
  func.func @transform_3(%arg0: i32, %arg1: i32, %arg2: i32) -> (i32, i32) {
    %0 = arith.muli %arg1, %arg2 : i32
    %c0_i32 = arith.constant 0 : i32
    return %arg0, %0 : i32, i32
  }
}

module attributes {stable_mosaic.version = 11 : i64} {
  func.func @dec_lstm_kernel(%arg0: i32, %arg1: memref<6x8x128xf32, #tpu.memory_space<vmem>>, %arg2: memref<128x512xf32, #tpu.memory_space<vmem>>, %arg3: memref<128x512xf32, #tpu.memory_space<vmem>>, %arg4: memref<1x512xf32, #tpu.memory_space<vmem>>, %arg5: memref<8x128xf32, #tpu.memory_space<vmem>>, %arg6: memref<8x128xf32, #tpu.memory_space<vmem>>, %arg7: memref<6x8x128xf32, #tpu.memory_space<vmem>>, %arg8: memref<8x128xf32, #tpu.memory_space<vmem>>, %arg9: memref<8x128xf32, #tpu.memory_space<vmem>>, %arg10: memref<6x8x512xf32, #tpu.memory_space<vmem>>) attributes {dimension_semantics = [#tpu.dimension_semantics<arbitrary>], iteration_bounds = array<i64: 1>, scalar_prefetch = 0 : i64, scratch_operands = 3 : i64, tpu.core_type = #tpu.core_type<tc>, window_params = [{transform_indices = @transform_0, window_bounds = array<i64: 6, 8, 128>}, {pipeline_mode = #tpu.pipeline_mode<synchronous>, transform_indices = @transform_1, window_bounds = array<i64: 128, 512>}, {pipeline_mode = #tpu.pipeline_mode<synchronous>, transform_indices = @transform_2, window_bounds = array<i64: 128, 512>}, {pipeline_mode = #tpu.pipeline_mode<synchronous>, transform_indices = @transform_3, window_bounds = array<i64: 1, 512>}, {pipeline_mode = #tpu.pipeline_mode<synchronous>, transform_indices = @transform_4, window_bounds = array<i64: 8, 128>}, {pipeline_mode = #tpu.pipeline_mode<synchronous>, transform_indices = @transform_5, window_bounds = array<i64: 8, 128>}, {transform_indices = @transform_6, window_bounds = array<i64: 6, 8, 128>}]} {
    %c0_i32 = arith.constant 0 : i32
    %0 = arith.cmpi eq, %arg0, %c0_i32 : i32
    %1 = arith.extui %0 : i1 to i32
    %c0_i32_0 = arith.constant 0 : i32
    %2 = arith.cmpi ne, %1, %c0_i32_0 : i32
    scf.if %2 {
      %c0_119 = arith.constant 0 : index
      %c0_120 = arith.constant 0 : index
      %246 = vector.load %arg5[%c0_119, %c0_120] : memref<8x128xf32, #tpu.memory_space<vmem>>, vector<8x128xf32>
      %c0_121 = arith.constant 0 : index
      %c0_122 = arith.constant 0 : index
      %247 = vector.load %arg8[%c0_121, %c0_122] : memref<8x128xf32, #tpu.memory_space<vmem>>, vector<8x128xf32>
      tpu.vector_store %arg8[%c0_121, %c0_122], %246 {strides = array<i32>} : memref<8x128xf32, #tpu.memory_space<vmem>>, vector<8x128xf32>,
      %c0_123 = arith.constant 0 : index
      %c0_124 = arith.constant 0 : index
      %248 = vector.load %arg6[%c0_123, %c0_124] : memref<8x128xf32, #tpu.memory_space<vmem>>, vector<8x128xf32>
      %c0_125 = arith.constant 0 : index
      %c0_126 = arith.constant 0 : index
      %249 = vector.load %arg9[%c0_125, %c0_126] : memref<8x128xf32, #tpu.memory_space<vmem>>, vector<8x128xf32>
      tpu.vector_store %arg9[%c0_125, %c0_126], %248 {strides = array<i32>} : memref<8x128xf32, #tpu.memory_space<vmem>>, vector<8x128xf32>,
    } else {
    }
    %c0 = arith.constant 0 : index
    %c0_1 = arith.constant 0 : index
    %c0_2 = arith.constant 0 : index
    %3 = vector.load %arg1[%c0, %c0_1, %c0_2] : memref<6x8x128xf32, #tpu.memory_space<vmem>>, vector<6x8x128xf32>
    %4 = vector.shape_cast %3 : vector<6x8x128xf32> to vector<48x128xf32>
    %c0_3 = arith.constant 0 : index
    %c0_4 = arith.constant 0 : index
    %5 = vector.load %arg2[%c0_3, %c0_4] : memref<128x512xf32, #tpu.memory_space<vmem>>, vector<128x512xf32>
    %cst = arith.constant dense<0.000000e+00> : vector<48x512xf32>
    %6 = tpu.matmul %4, %5, %cst {dimension_numbers = #tpu.dot_dimension_numbers<[1], [0], [0], [1], [0, 0, 1, 1], [], []>} : vector<48x128xf32>, vector<128x512xf32>, vector<48x512xf32> -> vector<48x512xf32>
    %c0_5 = arith.constant 0 : index
    %c0_6 = arith.constant 0 : index
    %7 = vector.load %arg4[%c0_5, %c0_6] : memref<1x512xf32, #tpu.memory_space<vmem>>, vector<1x512xf32>
    %8 = vector.broadcast %7 : vector<1x512xf32> to vector<48x512xf32>
    %9 = arith.addf %6, %8 : vector<48x512xf32>
    %10 = vector.shape_cast %9 : vector<48x512xf32> to vector<6x8x512xf32>
    %c0_7 = arith.constant 0 : index
    %c0_8 = arith.constant 0 : index
    %c0_9 = arith.constant 0 : index
    %11 = vector.load %arg10[%c0_7, %c0_8, %c0_9] : memref<6x8x512xf32, #tpu.memory_space<vmem>>, vector<6x8x512xf32>
    tpu.vector_store %arg10[%c0_7, %c0_8, %c0_9], %10 {strides = array<i32>} : memref<6x8x512xf32, #tpu.memory_space<vmem>>, vector<6x8x512xf32>,
    %c0_i32_10 = arith.constant 0 : i32
    %12 = arith.index_cast %c0_i32_10 : i32 to index
    %c0_11 = arith.constant 0 : index
    %c0_12 = arith.constant 0 : index
    %13 = vector.load %arg10[%12, %c0_11, %c0_12] : memref<6x8x512xf32, #tpu.memory_space<vmem>>, vector<1x8x512xf32>
    %14 = vector.shape_cast %13 : vector<1x8x512xf32> to vector<8x512xf32>
    %c0_13 = arith.constant 0 : index
    %c0_14 = arith.constant 0 : index
    %15 = vector.load %arg8[%c0_13, %c0_14] : memref<8x128xf32, #tpu.memory_space<vmem>>, vector<8x128xf32>
    %c0_15 = arith.constant 0 : index
    %c0_16 = arith.constant 0 : index
    %16 = vector.load %arg3[%c0_15, %c0_16] : memref<128x512xf32, #tpu.memory_space<vmem>>, vector<128x512xf32>
    %cst_17 = arith.constant dense<0.000000e+00> : vector<8x512xf32>
    %17 = tpu.matmul %15, %16, %cst_17 {dimension_numbers = #tpu.dot_dimension_numbers<[1], [0], [0], [1], [0, 0, 1, 1], [], []>} : vector<8x128xf32>, vector<128x512xf32>, vector<8x512xf32> -> vector<8x512xf32>
    %18 = arith.addf %14, %17 : vector<8x512xf32>
    %19 = vector.extract_strided_slice %18 {offsets = [0, 0], sizes = [8, 128], strides = [1, 1]} : vector<8x512xf32> to vector<8x128xf32>
    %20 = arith.negf %19 : vector<8x128xf32>
    %21 = math.exp %20 : vector<8x128xf32>
    %cst_18 = arith.constant 1.000000e+00 : f32
    %22 = vector.broadcast %cst_18 : f32 to vector<8x128xf32>
    %23 = arith.addf %22, %21 : vector<8x128xf32>
    %24 = arith.divf %22, %23 : vector<8x128xf32>
    %25 = vector.extract_strided_slice %18 {offsets = [0, 128], sizes = [8, 128], strides = [1, 1]} : vector<8x512xf32> to vector<8x128xf32>
    %26 = arith.negf %25 : vector<8x128xf32>
    %27 = math.exp %26 : vector<8x128xf32>
    %cst_19 = arith.constant 1.000000e+00 : f32
    %28 = vector.broadcast %cst_19 : f32 to vector<8x128xf32>
    %29 = arith.addf %28, %27 : vector<8x128xf32>
    %30 = arith.divf %28, %29 : vector<8x128xf32>
    %31 = vector.extract_strided_slice %18 {offsets = [0, 256], sizes = [8, 128], strides = [1, 1]} : vector<8x512xf32> to vector<8x128xf32>
    %32 = math.tanh %31 : vector<8x128xf32>
    %33 = vector.extract_strided_slice %18 {offsets = [0, 384], sizes = [8, 128], strides = [1, 1]} : vector<8x512xf32> to vector<8x128xf32>
    %34 = arith.negf %33 : vector<8x128xf32>
    %35 = math.exp %34 : vector<8x128xf32>
    %cst_20 = arith.constant 1.000000e+00 : f32
    %36 = vector.broadcast %cst_20 : f32 to vector<8x128xf32>
    %37 = arith.addf %36, %35 : vector<8x128xf32>
    %38 = arith.divf %36, %37 : vector<8x128xf32>
    %c0_21 = arith.constant 0 : index
    %c0_22 = arith.constant 0 : index
    %39 = vector.load %arg9[%c0_21, %c0_22] : memref<8x128xf32, #tpu.memory_space<vmem>>, vector<8x128xf32>
    %40 = arith.mulf %30, %39 : vector<8x128xf32>
    %41 = arith.mulf %24, %32 : vector<8x128xf32>
    %42 = arith.addf %40, %41 : vector<8x128xf32>
    %43 = math.tanh %42 : vector<8x128xf32>
    %44 = arith.mulf %38, %43 : vector<8x128xf32>
    %c0_23 = arith.constant 0 : index
    %c0_24 = arith.constant 0 : index
    %45 = vector.load %arg9[%c0_23, %c0_24] : memref<8x128xf32, #tpu.memory_space<vmem>>, vector<8x128xf32>
    tpu.vector_store %arg9[%c0_23, %c0_24], %42 {strides = array<i32>} : memref<8x128xf32, #tpu.memory_space<vmem>>, vector<8x128xf32>,
    %c0_25 = arith.constant 0 : index
    %c0_26 = arith.constant 0 : index
    %46 = vector.load %arg8[%c0_25, %c0_26] : memref<8x128xf32, #tpu.memory_space<vmem>>, vector<8x128xf32>
    tpu.vector_store %arg8[%c0_25, %c0_26], %44 {strides = array<i32>} : memref<8x128xf32, #tpu.memory_space<vmem>>, vector<8x128xf32>,
    %47 = arith.index_cast %c0_i32_10 : i32 to index
    %c0_27 = arith.constant 0 : index
    %c0_28 = arith.constant 0 : index
    %48 = vector.load %arg7[%47, %c0_27, %c0_28] : memref<6x8x128xf32, #tpu.memory_space<vmem>>, vector<1x8x128xf32>
    %49 = vector.shape_cast %48 : vector<1x8x128xf32> to vector<8x128xf32>
    %50 = vector.shape_cast %44 : vector<8x128xf32> to vector<1x8x128xf32>
    tpu.vector_store %arg7[%47, %c0_27, %c0_28], %50 {strides = array<i32>} : memref<6x8x128xf32, #tpu.memory_space<vmem>>, vector<1x8x128xf32>,
    %c1_i32 = arith.constant 1 : i32
    %51 = arith.index_cast %c1_i32 : i32 to index
    %c0_29 = arith.constant 0 : index
    %c0_30 = arith.constant 0 : index
    %52 = vector.load %arg10[%51, %c0_29, %c0_30] : memref<6x8x512xf32, #tpu.memory_space<vmem>>, vector<1x8x512xf32>
    %53 = vector.shape_cast %52 : vector<1x8x512xf32> to vector<8x512xf32>
    %c0_31 = arith.constant 0 : index
    %c0_32 = arith.constant 0 : index
    %54 = vector.load %arg8[%c0_31, %c0_32] : memref<8x128xf32, #tpu.memory_space<vmem>>, vector<8x128xf32>
    %c0_33 = arith.constant 0 : index
    %c0_34 = arith.constant 0 : index
    %55 = vector.load %arg3[%c0_33, %c0_34] : memref<128x512xf32, #tpu.memory_space<vmem>>, vector<128x512xf32>
    %cst_35 = arith.constant dense<0.000000e+00> : vector<8x512xf32>
    %56 = tpu.matmul %54, %55, %cst_35 {dimension_numbers = #tpu.dot_dimension_numbers<[1], [0], [0], [1], [0, 0, 1, 1], [], []>} : vector<8x128xf32>, vector<128x512xf32>, vector<8x512xf32> -> vector<8x512xf32>
    %57 = arith.addf %53, %56 : vector<8x512xf32>
    %58 = vector.extract_strided_slice %57 {offsets = [0, 0], sizes = [8, 128], strides = [1, 1]} : vector<8x512xf32> to vector<8x128xf32>
    %59 = arith.negf %58 : vector<8x128xf32>
    %60 = math.exp %59 : vector<8x128xf32>
    %cst_36 = arith.constant 1.000000e+00 : f32
    %61 = vector.broadcast %cst_36 : f32 to vector<8x128xf32>
    %62 = arith.addf %61, %60 : vector<8x128xf32>
    %63 = arith.divf %61, %62 : vector<8x128xf32>
    %64 = vector.extract_strided_slice %57 {offsets = [0, 128], sizes = [8, 128], strides = [1, 1]} : vector<8x512xf32> to vector<8x128xf32>
    %65 = arith.negf %64 : vector<8x128xf32>
    %66 = math.exp %65 : vector<8x128xf32>
    %cst_37 = arith.constant 1.000000e+00 : f32
    %67 = vector.broadcast %cst_37 : f32 to vector<8x128xf32>
    %68 = arith.addf %67, %66 : vector<8x128xf32>
    %69 = arith.divf %67, %68 : vector<8x128xf32>
    %70 = vector.extract_strided_slice %57 {offsets = [0, 256], sizes = [8, 128], strides = [1, 1]} : vector<8x512xf32> to vector<8x128xf32>
    %71 = math.tanh %70 : vector<8x128xf32>
    %72 = vector.extract_strided_slice %57 {offsets = [0, 384], sizes = [8, 128], strides = [1, 1]} : vector<8x512xf32> to vector<8x128xf32>
    %73 = arith.negf %72 : vector<8x128xf32>
    %74 = math.exp %73 : vector<8x128xf32>
    %cst_38 = arith.constant 1.000000e+00 : f32
    %75 = vector.broadcast %cst_38 : f32 to vector<8x128xf32>
    %76 = arith.addf %75, %74 : vector<8x128xf32>
    %77 = arith.divf %75, %76 : vector<8x128xf32>
    %c0_39 = arith.constant 0 : index
    %c0_40 = arith.constant 0 : index
    %78 = vector.load %arg9[%c0_39, %c0_40] : memref<8x128xf32, #tpu.memory_space<vmem>>, vector<8x128xf32>
    %79 = arith.mulf %69, %78 : vector<8x128xf32>
    %80 = arith.mulf %63, %71 : vector<8x128xf32>
    %81 = arith.addf %79, %80 : vector<8x128xf32>
    %82 = math.tanh %81 : vector<8x128xf32>
    %83 = arith.mulf %77, %82 : vector<8x128xf32>
    %c0_41 = arith.constant 0 : index
    %c0_42 = arith.constant 0 : index
    %84 = vector.load %arg9[%c0_41, %c0_42] : memref<8x128xf32, #tpu.memory_space<vmem>>, vector<8x128xf32>
    tpu.vector_store %arg9[%c0_41, %c0_42], %81 {strides = array<i32>} : memref<8x128xf32, #tpu.memory_space<vmem>>, vector<8x128xf32>,
    %c0_43 = arith.constant 0 : index
    %c0_44 = arith.constant 0 : index
    %85 = vector.load %arg8[%c0_43, %c0_44] : memref<8x128xf32, #tpu.memory_space<vmem>>, vector<8x128xf32>
    tpu.vector_store %arg8[%c0_43, %c0_44], %83 {strides = array<i32>} : memref<8x128xf32, #tpu.memory_space<vmem>>, vector<8x128xf32>,
    %86 = arith.index_cast %c1_i32 : i32 to index
    %c0_45 = arith.constant 0 : index
    %c0_46 = arith.constant 0 : index
    %87 = vector.load %arg7[%86, %c0_45, %c0_46] : memref<6x8x128xf32, #tpu.memory_space<vmem>>, vector<1x8x128xf32>
    %88 = vector.shape_cast %87 : vector<1x8x128xf32> to vector<8x128xf32>
    %89 = vector.shape_cast %83 : vector<8x128xf32> to vector<1x8x128xf32>
    tpu.vector_store %arg7[%86, %c0_45, %c0_46], %89 {strides = array<i32>} : memref<6x8x128xf32, #tpu.memory_space<vmem>>, vector<1x8x128xf32>,
    %c2_i32 = arith.constant 2 : i32
    %90 = arith.index_cast %c2_i32 : i32 to index
    %c0_47 = arith.constant 0 : index
    %c0_48 = arith.constant 0 : index
    %91 = vector.load %arg10[%90, %c0_47, %c0_48] : memref<6x8x512xf32, #tpu.memory_space<vmem>>, vector<1x8x512xf32>
    %92 = vector.shape_cast %91 : vector<1x8x512xf32> to vector<8x512xf32>
    %c0_49 = arith.constant 0 : index
    %c0_50 = arith.constant 0 : index
    %93 = vector.load %arg8[%c0_49, %c0_50] : memref<8x128xf32, #tpu.memory_space<vmem>>, vector<8x128xf32>
    %c0_51 = arith.constant 0 : index
    %c0_52 = arith.constant 0 : index
    %94 = vector.load %arg3[%c0_51, %c0_52] : memref<128x512xf32, #tpu.memory_space<vmem>>, vector<128x512xf32>
    %cst_53 = arith.constant dense<0.000000e+00> : vector<8x512xf32>
    %95 = tpu.matmul %93, %94, %cst_53 {dimension_numbers = #tpu.dot_dimension_numbers<[1], [0], [0], [1], [0, 0, 1, 1], [], []>} : vector<8x128xf32>, vector<128x512xf32>, vector<8x512xf32> -> vector<8x512xf32>
    %96 = arith.addf %92, %95 : vector<8x512xf32>
    %97 = vector.extract_strided_slice %96 {offsets = [0, 0], sizes = [8, 128], strides = [1, 1]} : vector<8x512xf32> to vector<8x128xf32>
    %98 = arith.negf %97 : vector<8x128xf32>
    %99 = math.exp %98 : vector<8x128xf32>
    %cst_54 = arith.constant 1.000000e+00 : f32
    %100 = vector.broadcast %cst_54 : f32 to vector<8x128xf32>
    %101 = arith.addf %100, %99 : vector<8x128xf32>
    %102 = arith.divf %100, %101 : vector<8x128xf32>
    %103 = vector.extract_strided_slice %96 {offsets = [0, 128], sizes = [8, 128], strides = [1, 1]} : vector<8x512xf32> to vector<8x128xf32>
    %104 = arith.negf %103 : vector<8x128xf32>
    %105 = math.exp %104 : vector<8x128xf32>
    %cst_55 = arith.constant 1.000000e+00 : f32
    %106 = vector.broadcast %cst_55 : f32 to vector<8x128xf32>
    %107 = arith.addf %106, %105 : vector<8x128xf32>
    %108 = arith.divf %106, %107 : vector<8x128xf32>
    %109 = vector.extract_strided_slice %96 {offsets = [0, 256], sizes = [8, 128], strides = [1, 1]} : vector<8x512xf32> to vector<8x128xf32>
    %110 = math.tanh %109 : vector<8x128xf32>
    %111 = vector.extract_strided_slice %96 {offsets = [0, 384], sizes = [8, 128], strides = [1, 1]} : vector<8x512xf32> to vector<8x128xf32>
    %112 = arith.negf %111 : vector<8x128xf32>
    %113 = math.exp %112 : vector<8x128xf32>
    %cst_56 = arith.constant 1.000000e+00 : f32
    %114 = vector.broadcast %cst_56 : f32 to vector<8x128xf32>
    %115 = arith.addf %114, %113 : vector<8x128xf32>
    %116 = arith.divf %114, %115 : vector<8x128xf32>
    %c0_57 = arith.constant 0 : index
    %c0_58 = arith.constant 0 : index
    %117 = vector.load %arg9[%c0_57, %c0_58] : memref<8x128xf32, #tpu.memory_space<vmem>>, vector<8x128xf32>
    %118 = arith.mulf %108, %117 : vector<8x128xf32>
    %119 = arith.mulf %102, %110 : vector<8x128xf32>
    %120 = arith.addf %118, %119 : vector<8x128xf32>
    %121 = math.tanh %120 : vector<8x128xf32>
    %122 = arith.mulf %116, %121 : vector<8x128xf32>
    %c0_59 = arith.constant 0 : index
    %c0_60 = arith.constant 0 : index
    %123 = vector.load %arg9[%c0_59, %c0_60] : memref<8x128xf32, #tpu.memory_space<vmem>>, vector<8x128xf32>
    tpu.vector_store %arg9[%c0_59, %c0_60], %120 {strides = array<i32>} : memref<8x128xf32, #tpu.memory_space<vmem>>, vector<8x128xf32>,
    %c0_61 = arith.constant 0 : index
    %c0_62 = arith.constant 0 : index
    %124 = vector.load %arg8[%c0_61, %c0_62] : memref<8x128xf32, #tpu.memory_space<vmem>>, vector<8x128xf32>
    tpu.vector_store %arg8[%c0_61, %c0_62], %122 {strides = array<i32>} : memref<8x128xf32, #tpu.memory_space<vmem>>, vector<8x128xf32>,
    %125 = arith.index_cast %c2_i32 : i32 to index
    %c0_63 = arith.constant 0 : index
    %c0_64 = arith.constant 0 : index
    %126 = vector.load %arg7[%125, %c0_63, %c0_64] : memref<6x8x128xf32, #tpu.memory_space<vmem>>, vector<1x8x128xf32>
    %127 = vector.shape_cast %126 : vector<1x8x128xf32> to vector<8x128xf32>
    %128 = vector.shape_cast %122 : vector<8x128xf32> to vector<1x8x128xf32>
    tpu.vector_store %arg7[%125, %c0_63, %c0_64], %128 {strides = array<i32>} : memref<6x8x128xf32, #tpu.memory_space<vmem>>, vector<1x8x128xf32>,
    %c3_i32 = arith.constant 3 : i32
    %129 = arith.index_cast %c3_i32 : i32 to index
    %c0_65 = arith.constant 0 : index
    %c0_66 = arith.constant 0 : index
    %130 = vector.load %arg10[%129, %c0_65, %c0_66] : memref<6x8x512xf32, #tpu.memory_space<vmem>>, vector<1x8x512xf32>
    %131 = vector.shape_cast %130 : vector<1x8x512xf32> to vector<8x512xf32>
    %c0_67 = arith.constant 0 : index
    %c0_68 = arith.constant 0 : index
    %132 = vector.load %arg8[%c0_67, %c0_68] : memref<8x128xf32, #tpu.memory_space<vmem>>, vector<8x128xf32>
    %c0_69 = arith.constant 0 : index
    %c0_70 = arith.constant 0 : index
    %133 = vector.load %arg3[%c0_69, %c0_70] : memref<128x512xf32, #tpu.memory_space<vmem>>, vector<128x512xf32>
    %cst_71 = arith.constant dense<0.000000e+00> : vector<8x512xf32>
    %134 = tpu.matmul %132, %133, %cst_71 {dimension_numbers = #tpu.dot_dimension_numbers<[1], [0], [0], [1], [0, 0, 1, 1], [], []>} : vector<8x128xf32>, vector<128x512xf32>, vector<8x512xf32> -> vector<8x512xf32>
    %135 = arith.addf %131, %134 : vector<8x512xf32>
    %136 = vector.extract_strided_slice %135 {offsets = [0, 0], sizes = [8, 128], strides = [1, 1]} : vector<8x512xf32> to vector<8x128xf32>
    %137 = arith.negf %136 : vector<8x128xf32>
    %138 = math.exp %137 : vector<8x128xf32>
    %cst_72 = arith.constant 1.000000e+00 : f32
    %139 = vector.broadcast %cst_72 : f32 to vector<8x128xf32>
    %140 = arith.addf %139, %138 : vector<8x128xf32>
    %141 = arith.divf %139, %140 : vector<8x128xf32>
    %142 = vector.extract_strided_slice %135 {offsets = [0, 128], sizes = [8, 128], strides = [1, 1]} : vector<8x512xf32> to vector<8x128xf32>
    %143 = arith.negf %142 : vector<8x128xf32>
    %144 = math.exp %143 : vector<8x128xf32>
    %cst_73 = arith.constant 1.000000e+00 : f32
    %145 = vector.broadcast %cst_73 : f32 to vector<8x128xf32>
    %146 = arith.addf %145, %144 : vector<8x128xf32>
    %147 = arith.divf %145, %146 : vector<8x128xf32>
    %148 = vector.extract_strided_slice %135 {offsets = [0, 256], sizes = [8, 128], strides = [1, 1]} : vector<8x512xf32> to vector<8x128xf32>
    %149 = math.tanh %148 : vector<8x128xf32>
    %150 = vector.extract_strided_slice %135 {offsets = [0, 384], sizes = [8, 128], strides = [1, 1]} : vector<8x512xf32> to vector<8x128xf32>
    %151 = arith.negf %150 : vector<8x128xf32>
    %152 = math.exp %151 : vector<8x128xf32>
    %cst_74 = arith.constant 1.000000e+00 : f32
    %153 = vector.broadcast %cst_74 : f32 to vector<8x128xf32>
    %154 = arith.addf %153, %152 : vector<8x128xf32>
    %155 = arith.divf %153, %154 : vector<8x128xf32>
    %c0_75 = arith.constant 0 : index
    %c0_76 = arith.constant 0 : index
    %156 = vector.load %arg9[%c0_75, %c0_76] : memref<8x128xf32, #tpu.memory_space<vmem>>, vector<8x128xf32>
    %157 = arith.mulf %147, %156 : vector<8x128xf32>
    %158 = arith.mulf %141, %149 : vector<8x128xf32>
    %159 = arith.addf %157, %158 : vector<8x128xf32>
    %160 = math.tanh %159 : vector<8x128xf32>
    %161 = arith.mulf %155, %160 : vector<8x128xf32>
    %c0_77 = arith.constant 0 : index
    %c0_78 = arith.constant 0 : index
    %162 = vector.load %arg9[%c0_77, %c0_78] : memref<8x128xf32, #tpu.memory_space<vmem>>, vector<8x128xf32>
    tpu.vector_store %arg9[%c0_77, %c0_78], %159 {strides = array<i32>} : memref<8x128xf32, #tpu.memory_space<vmem>>, vector<8x128xf32>,
    %c0_79 = arith.constant 0 : index
    %c0_80 = arith.constant 0 : index
    %163 = vector.load %arg8[%c0_79, %c0_80] : memref<8x128xf32, #tpu.memory_space<vmem>>, vector<8x128xf32>
    tpu.vector_store %arg8[%c0_79, %c0_80], %161 {strides = array<i32>} : memref<8x128xf32, #tpu.memory_space<vmem>>, vector<8x128xf32>,
    %164 = arith.index_cast %c3_i32 : i32 to index
    %c0_81 = arith.constant 0 : index
    %c0_82 = arith.constant 0 : index
    %165 = vector.load %arg7[%164, %c0_81, %c0_82] : memref<6x8x128xf32, #tpu.memory_space<vmem>>, vector<1x8x128xf32>
    %166 = vector.shape_cast %165 : vector<1x8x128xf32> to vector<8x128xf32>
    %167 = vector.shape_cast %161 : vector<8x128xf32> to vector<1x8x128xf32>
    tpu.vector_store %arg7[%164, %c0_81, %c0_82], %167 {strides = array<i32>} : memref<6x8x128xf32, #tpu.memory_space<vmem>>, vector<1x8x128xf32>,
    %c4_i32 = arith.constant 4 : i32
    %168 = arith.index_cast %c4_i32 : i32 to index
    %c0_83 = arith.constant 0 : index
    %c0_84 = arith.constant 0 : index
    %169 = vector.load %arg10[%168, %c0_83, %c0_84] : memref<6x8x512xf32, #tpu.memory_space<vmem>>, vector<1x8x512xf32>
    %170 = vector.shape_cast %169 : vector<1x8x512xf32> to vector<8x512xf32>
    %c0_85 = arith.constant 0 : index
    %c0_86 = arith.constant 0 : index
    %171 = vector.load %arg8[%c0_85, %c0_86] : memref<8x128xf32, #tpu.memory_space<vmem>>, vector<8x128xf32>
    %c0_87 = arith.constant 0 : index
    %c0_88 = arith.constant 0 : index
    %172 = vector.load %arg3[%c0_87, %c0_88] : memref<128x512xf32, #tpu.memory_space<vmem>>, vector<128x512xf32>
    %cst_89 = arith.constant dense<0.000000e+00> : vector<8x512xf32>
    %173 = tpu.matmul %171, %172, %cst_89 {dimension_numbers = #tpu.dot_dimension_numbers<[1], [0], [0], [1], [0, 0, 1, 1], [], []>} : vector<8x128xf32>, vector<128x512xf32>, vector<8x512xf32> -> vector<8x512xf32>
    %174 = arith.addf %170, %173 : vector<8x512xf32>
    %175 = vector.extract_strided_slice %174 {offsets = [0, 0], sizes = [8, 128], strides = [1, 1]} : vector<8x512xf32> to vector<8x128xf32>
    %176 = arith.negf %175 : vector<8x128xf32>
    %177 = math.exp %176 : vector<8x128xf32>
    %cst_90 = arith.constant 1.000000e+00 : f32
    %178 = vector.broadcast %cst_90 : f32 to vector<8x128xf32>
    %179 = arith.addf %178, %177 : vector<8x128xf32>
    %180 = arith.divf %178, %179 : vector<8x128xf32>
    %181 = vector.extract_strided_slice %174 {offsets = [0, 128], sizes = [8, 128], strides = [1, 1]} : vector<8x512xf32> to vector<8x128xf32>
    %182 = arith.negf %181 : vector<8x128xf32>
    %183 = math.exp %182 : vector<8x128xf32>
    %cst_91 = arith.constant 1.000000e+00 : f32
    %184 = vector.broadcast %cst_91 : f32 to vector<8x128xf32>
    %185 = arith.addf %184, %183 : vector<8x128xf32>
    %186 = arith.divf %184, %185 : vector<8x128xf32>
    %187 = vector.extract_strided_slice %174 {offsets = [0, 256], sizes = [8, 128], strides = [1, 1]} : vector<8x512xf32> to vector<8x128xf32>
    %188 = math.tanh %187 : vector<8x128xf32>
    %189 = vector.extract_strided_slice %174 {offsets = [0, 384], sizes = [8, 128], strides = [1, 1]} : vector<8x512xf32> to vector<8x128xf32>
    %190 = arith.negf %189 : vector<8x128xf32>
    %191 = math.exp %190 : vector<8x128xf32>
    %cst_92 = arith.constant 1.000000e+00 : f32
    %192 = vector.broadcast %cst_92 : f32 to vector<8x128xf32>
    %193 = arith.addf %192, %191 : vector<8x128xf32>
    %194 = arith.divf %192, %193 : vector<8x128xf32>
    %c0_93 = arith.constant 0 : index
    %c0_94 = arith.constant 0 : index
    %195 = vector.load %arg9[%c0_93, %c0_94] : memref<8x128xf32, #tpu.memory_space<vmem>>, vector<8x128xf32>
    %196 = arith.mulf %186, %195 : vector<8x128xf32>
    %197 = arith.mulf %180, %188 : vector<8x128xf32>
    %198 = arith.addf %196, %197 : vector<8x128xf32>
    %199 = math.tanh %198 : vector<8x128xf32>
    %200 = arith.mulf %194, %199 : vector<8x128xf32>
    %c0_95 = arith.constant 0 : index
    %c0_96 = arith.constant 0 : index
    %201 = vector.load %arg9[%c0_95, %c0_96] : memref<8x128xf32, #tpu.memory_space<vmem>>, vector<8x128xf32>
    tpu.vector_store %arg9[%c0_95, %c0_96], %198 {strides = array<i32>} : memref<8x128xf32, #tpu.memory_space<vmem>>, vector<8x128xf32>,
    %c0_97 = arith.constant 0 : index
    %c0_98 = arith.constant 0 : index
    %202 = vector.load %arg8[%c0_97, %c0_98] : memref<8x128xf32, #tpu.memory_space<vmem>>, vector<8x128xf32>
    tpu.vector_store %arg8[%c0_97, %c0_98], %200 {strides = array<i32>} : memref<8x128xf32, #tpu.memory_space<vmem>>, vector<8x128xf32>,
    %203 = arith.index_cast %c4_i32 : i32 to index
    %c0_99 = arith.constant 0 : index
    %c0_100 = arith.constant 0 : index
    %204 = vector.load %arg7[%203, %c0_99, %c0_100] : memref<6x8x128xf32, #tpu.memory_space<vmem>>, vector<1x8x128xf32>
    %205 = vector.shape_cast %204 : vector<1x8x128xf32> to vector<8x128xf32>
    %206 = vector.shape_cast %200 : vector<8x128xf32> to vector<1x8x128xf32>
    tpu.vector_store %arg7[%203, %c0_99, %c0_100], %206 {strides = array<i32>} : memref<6x8x128xf32, #tpu.memory_space<vmem>>, vector<1x8x128xf32>,
    %c5_i32 = arith.constant 5 : i32
    %207 = arith.index_cast %c5_i32 : i32 to index
    %c0_101 = arith.constant 0 : index
    %c0_102 = arith.constant 0 : index
    %208 = vector.load %arg10[%207, %c0_101, %c0_102] : memref<6x8x512xf32, #tpu.memory_space<vmem>>, vector<1x8x512xf32>
    %209 = vector.shape_cast %208 : vector<1x8x512xf32> to vector<8x512xf32>
    %c0_103 = arith.constant 0 : index
    %c0_104 = arith.constant 0 : index
    %210 = vector.load %arg8[%c0_103, %c0_104] : memref<8x128xf32, #tpu.memory_space<vmem>>, vector<8x128xf32>
    %c0_105 = arith.constant 0 : index
    %c0_106 = arith.constant 0 : index
    %211 = vector.load %arg3[%c0_105, %c0_106] : memref<128x512xf32, #tpu.memory_space<vmem>>, vector<128x512xf32>
    %cst_107 = arith.constant dense<0.000000e+00> : vector<8x512xf32>
    %212 = tpu.matmul %210, %211, %cst_107 {dimension_numbers = #tpu.dot_dimension_numbers<[1], [0], [0], [1], [0, 0, 1, 1], [], []>} : vector<8x128xf32>, vector<128x512xf32>, vector<8x512xf32> -> vector<8x512xf32>
    %213 = arith.addf %209, %212 : vector<8x512xf32>
    %214 = vector.extract_strided_slice %213 {offsets = [0, 0], sizes = [8, 128], strides = [1, 1]} : vector<8x512xf32> to vector<8x128xf32>
    %215 = arith.negf %214 : vector<8x128xf32>
    %216 = math.exp %215 : vector<8x128xf32>
    %cst_108 = arith.constant 1.000000e+00 : f32
    %217 = vector.broadcast %cst_108 : f32 to vector<8x128xf32>
    %218 = arith.addf %217, %216 : vector<8x128xf32>
    %219 = arith.divf %217, %218 : vector<8x128xf32>
    %220 = vector.extract_strided_slice %213 {offsets = [0, 128], sizes = [8, 128], strides = [1, 1]} : vector<8x512xf32> to vector<8x128xf32>
    %221 = arith.negf %220 : vector<8x128xf32>
    %222 = math.exp %221 : vector<8x128xf32>
    %cst_109 = arith.constant 1.000000e+00 : f32
    %223 = vector.broadcast %cst_109 : f32 to vector<8x128xf32>
    %224 = arith.addf %223, %222 : vector<8x128xf32>
    %225 = arith.divf %223, %224 : vector<8x128xf32>
    %226 = vector.extract_strided_slice %213 {offsets = [0, 256], sizes = [8, 128], strides = [1, 1]} : vector<8x512xf32> to vector<8x128xf32>
    %227 = math.tanh %226 : vector<8x128xf32>
    %228 = vector.extract_strided_slice %213 {offsets = [0, 384], sizes = [8, 128], strides = [1, 1]} : vector<8x512xf32> to vector<8x128xf32>
    %229 = arith.negf %228 : vector<8x128xf32>
    %230 = math.exp %229 : vector<8x128xf32>
    %cst_110 = arith.constant 1.000000e+00 : f32
    %231 = vector.broadcast %cst_110 : f32 to vector<8x128xf32>
    %232 = arith.addf %231, %230 : vector<8x128xf32>
    %233 = arith.divf %231, %232 : vector<8x128xf32>
    %c0_111 = arith.constant 0 : index
    %c0_112 = arith.constant 0 : index
    %234 = vector.load %arg9[%c0_111, %c0_112] : memref<8x128xf32, #tpu.memory_space<vmem>>, vector<8x128xf32>
    %235 = arith.mulf %225, %234 : vector<8x128xf32>
    %236 = arith.mulf %219, %227 : vector<8x128xf32>
    %237 = arith.addf %235, %236 : vector<8x128xf32>
    %238 = math.tanh %237 : vector<8x128xf32>
    %239 = arith.mulf %233, %238 : vector<8x128xf32>
    %c0_113 = arith.constant 0 : index
    %c0_114 = arith.constant 0 : index
    %240 = vector.load %arg9[%c0_113, %c0_114] : memref<8x128xf32, #tpu.memory_space<vmem>>, vector<8x128xf32>
    tpu.vector_store %arg9[%c0_113, %c0_114], %237 {strides = array<i32>} : memref<8x128xf32, #tpu.memory_space<vmem>>, vector<8x128xf32>,
    %c0_115 = arith.constant 0 : index
    %c0_116 = arith.constant 0 : index
    %241 = vector.load %arg8[%c0_115, %c0_116] : memref<8x128xf32, #tpu.memory_space<vmem>>, vector<8x128xf32>
    tpu.vector_store %arg8[%c0_115, %c0_116], %239 {strides = array<i32>} : memref<8x128xf32, #tpu.memory_space<vmem>>, vector<8x128xf32>,
    %242 = arith.index_cast %c5_i32 : i32 to index
    %c0_117 = arith.constant 0 : index
    %c0_118 = arith.constant 0 : index
    %243 = vector.load %arg7[%242, %c0_117, %c0_118] : memref<6x8x128xf32, #tpu.memory_space<vmem>>, vector<1x8x128xf32>
    %244 = vector.shape_cast %243 : vector<1x8x128xf32> to vector<8x128xf32>
    %245 = vector.shape_cast %239 : vector<8x128xf32> to vector<1x8x128xf32>
    tpu.vector_store %arg7[%242, %c0_117, %c0_118], %245 {strides = array<i32>} : memref<6x8x128xf32, #tpu.memory_space<vmem>>, vector<1x8x128xf32>,
    %c6_i32 = arith.constant 6 : i32
    return
  }
  func.func @transform_0(%arg0: i32) -> (i32, i32, i32) {
    %c0_i32 = arith.constant 0 : i32
    %c0_i32_0 = arith.constant 0 : i32
    %c0_i32_1 = arith.constant 0 : i32
    return %arg0, %c0_i32, %c0_i32_0 : i32, i32, i32
  }
  func.func @transform_1(%arg0: i32) -> (i32, i32) {
    %c0_i32 = arith.constant 0 : i32
    %c0_i32_0 = arith.constant 0 : i32
    %c0_i32_1 = arith.constant 0 : i32
    return %c0_i32, %c0_i32_0 : i32, i32
  }
  func.func @transform_2(%arg0: i32) -> (i32, i32) {
    %c0_i32 = arith.constant 0 : i32
    %c0_i32_0 = arith.constant 0 : i32
    %c0_i32_1 = arith.constant 0 : i32
    return %c0_i32, %c0_i32_0 : i32, i32
  }
  func.func @transform_3(%arg0: i32) -> (i32, i32) {
    %c0_i32 = arith.constant 0 : i32
    %c0_i32_0 = arith.constant 0 : i32
    %c0_i32_1 = arith.constant 0 : i32
    return %c0_i32, %c0_i32_0 : i32, i32
  }
  func.func @transform_4(%arg0: i32) -> (i32, i32) {
    %c0_i32 = arith.constant 0 : i32
    %c0_i32_0 = arith.constant 0 : i32
    %c0_i32_1 = arith.constant 0 : i32
    return %c0_i32, %c0_i32_0 : i32, i32
  }
  func.func @transform_5(%arg0: i32) -> (i32, i32) {
    %c0_i32 = arith.constant 0 : i32
    %c0_i32_0 = arith.constant 0 : i32
    %c0_i32_1 = arith.constant 0 : i32
    return %c0_i32, %c0_i32_0 : i32, i32
  }
  func.func @transform_6(%arg0: i32) -> (i32, i32, i32) {
    %c0_i32 = arith.constant 0 : i32
    %c0_i32_0 = arith.constant 0 : i32
    %c0_i32_1 = arith.constant 0 : i32
    return %arg0, %c0_i32, %c0_i32_0 : i32, i32, i32
  }
}

</mosaic_0001>

<bundles_post_ra>
// kernel: forward.5
= control target key start
LH: loop header
LB: loop body
LE: loop exit
PB: predicated region body
PF: predicated region fallthrough
CT: control target
= control target key end

     0   :  { %s960_s12 = smov 0   ;;  %s962_s13 = smov 0   ;;  %s1163_s0 = inlined_call_operand.vmem [shape: f32[48,128], index: 0, kind: input, shape index: {}]   ;;  %s1164_s1 = inlined_call_operand.vmem [shape: f32[128,128], index: 1, kind: input, shape index: {}]   ;;  %s1165_s2 = inlined_call_operand.vmem [shape: f32[1,128], index: 2, kind: input, shape index: {}]   ;;  %s1166_s3 = inlined_call_operand.vmem [shape: f32[48,128], index: 3, kind: output, shape index: {}]  }
   0x1   :  { %s964_s14 = smov 0  }
   0x2 LB: > { %s28_s15 = sadd.s32 1, %s930_s13  ;;  %p739_p0 = scmp.ge.s32.totalorder %s934_s14, 1  ;;  %s934_s14 = sphi %s964_s14, %s13_s14   ;;  %s930_s13 = sphi %s962_s13, %s1168_s13   ;;  %s926_s12 = sphi %s960_s12, %s1167_s12  }
   0x3   : > { %p30_p1 = scmp.ge.s32.totalorder %s28_s15, 2  ;;  %p178_p2 = scmp.lt.s32.totalorder %s934_s14, 3 }
   0x5   : > { %s1170_s15 = smov (%p30_p1, %s28_s15), 0  ;;  %p179_p3 = pnand %p739_p0, %p178_p2 }
   0x6   : > { %p361_p4 = scmp.eq.s32.totalorder (!%p179_p3), %s926_s12, 0 }
   0x7   : > { %182 = sbr.rel (%p179_p3) target bundleno = 855 (0x357), region = 32 }
   0xc   : > { %v258_v0 = vld [vmem:[%s1164_s1 + $0x78] sm:$0xff]  ;;  %v257_v1 = vld [vmem:[%s1164_s1 + $0x70] sm:$0xff]  ;;  %v256_v2 = vld [vmem:[%s1164_s1 + $0x68] sm:$0xff]  ;;  %vm367_vm0 = vcmask (%p361_p4), 7168   ;;  %v936_v35 = vmov (%p361_p4), -inf   ;;  %v937_v36 = vmov (%p361_p4), 0.0  }
   0xd   : > { %812 = vmatprep.subr.mxu1 %v258_v0  ;;  %771 = vmatprep.subr.mxu0 %v258_v0  ;;  %v255_v3 = vld [vmem:[%s1164_s1 + $0x60] sm:$0xff]  ;;  %v254_v4 = vld [vmem:[%s1164_s1 + $0x58] sm:$0xff]  ;;  %v253_v5 = vld [vmem:[%s1164_s1 + $0x50] sm:$0xff]  ;;  %368 = vst.msk [vmem:[#allocation2] sm:$0xff] (%p361_p4), %vm367_vm0, %v936_v35 }
   0xe   : > { %828 = vmatpush3.msra.mxu1 %v258_v0  ;;  %772 = vmatpush3.msra.mxu0 %v258_v0  ;;  %v252_v6 = vld [vmem:[%s1164_s1 + $0x48] sm:$0xff]  ;;  %v251_v7 = vld [vmem:[%s1164_s1 + $0x40] sm:$0xff]  ;;  %v250_v8 = vld [vmem:[%s1164_s1 + $0x38] sm:$0xff]  ;;  %369 = vst.msk [vmem:[#allocation2 + $0x8] sm:$0xff] (%p361_p4), %vm367_vm0, %v936_v35 }
   0xf   : > { %813 = vmatprep.subr.mxu1 %v257_v1  ;;  %773 = vmatprep.subr.mxu0 %v257_v1  ;;  %v249_v9 = vld [vmem:[%s1164_s1 + $0x30] sm:$0xff]  ;;  %v248_v10 = vld [vmem:[%s1164_s1 + $0x28] sm:$0xff]  ;;  %v247_v11 = vld [vmem:[%s1164_s1 + $0x20] sm:$0xff]  ;;  %370 = vst.msk [vmem:[#allocation2 + $0x10] sm:$0xff] (%p361_p4), %vm367_vm0, %v936_v35 }
  0x10   : > { %829 = vmatpush3.msra.mxu1 %v257_v1  ;;  %774 = vmatpush3.msra.mxu0 %v257_v1  ;;  %v246_v12 = vld [vmem:[%s1164_s1 + $0x18] sm:$0xff]  ;;  %v245_v13 = vld [vmem:[%s1164_s1 + $0x10] sm:$0xff]  ;;  %v244_v14 = vld [vmem:[%s1164_s1 + $0x8] sm:$0xff]  ;;  %371 = vst.msk [vmem:[#allocation2 + $0x18] sm:$0xff] (%p361_p4), %vm367_vm0, %v936_v35 }
  0x11   : > { %814 = vmatprep.subr.mxu1 %v256_v2  ;;  %775 = vmatprep.subr.mxu0 %v256_v2  ;;  %v243_v15 = vld [vmem:[%s1164_s1] sm:$0xff]  ;;  %v239_v16 = vld [vmem:[%s1163_s0 + $0x10] sm:$0xff]  ;;  %v240_v17 = vld [vmem:[%s1163_s0 + $0x18] sm:$0xff]  ;;  %372 = vst.msk [vmem:[#allocation2 + $0x20] sm:$0xff] (%p361_p4), %vm367_vm0, %v936_v35 }
  0x12   : > { %830 = vmatpush3.msra.mxu1 %v256_v2  ;;  %776 = vmatpush3.msra.mxu0 %v256_v2  ;;  %v237_v18 = vld [vmem:[%s1163_s0] sm:$0xff]  ;;  %v238_v20 = vld [vmem:[%s1163_s0 + $0x8] sm:$0xff]  ;;  %373 = vst.msk [vmem:[#allocation2 + $0x28] sm:$0xff] (%p361_p4), %vm367_vm0, %v936_v35  ;;  %374 = vst.msk [vmem:[#allocation3] sm:$0xff] (%p361_p4), %vm367_vm0, %v937_v36 }
  0x13   : > { %815 = vmatprep.subr.mxu1 %v255_v3  ;;  %777 = vmatprep.subr.mxu0 %v255_v3  ;;  %v241_v19 = vld [vmem:[%s1163_s0 + $0x20] sm:$0xff]  ;;  %v242_v21 = vld [vmem:[%s1163_s0 + $0x28] sm:$0xff]  ;;  %375 = vst.msk [vmem:[#allocation3 + $0x8] sm:$0xff] (%p361_p4), %vm367_vm0, %v937_v36  ;;  %376 = vst.msk [vmem:[#allocation3 + $0x10] sm:$0xff] (%p361_p4), %vm367_vm0, %v937_v36 }
  0x14   : > { %831 = vmatpush3.msra.mxu1 %v255_v3  ;;  %778 = vmatpush3.msra.mxu0 %v255_v3  ;;  %v740_v22 = vld [vmem:[%s1165_s2] ss:$0 sm:$0xff]  ;;  %377 = vst.msk [vmem:[#allocation3 + $0x18] sm:$0xff] (%p361_p4), %vm367_vm0, %v937_v36  ;;  %378 = vst.msk [vmem:[#allocation3 + $0x20] sm:$0xff] (%p361_p4), %vm367_vm0, %v937_v36 }
  0x15   : > { %816 = vmatprep.subr.mxu1 %v254_v4  ;;  %779 = vmatprep.subr.mxu0 %v254_v4  ;;  %379 = vst.msk [vmem:[#allocation3 + $0x28] sm:$0xff] (%p361_p4), %vm367_vm0, %v937_v36 }
  0x16   : > { %832 = vmatpush3.msra.mxu1 %v254_v4  ;;  %780 = vmatpush3.msra.mxu0 %v254_v4 }
  0x17   : > { %817 = vmatprep.subr.mxu1 %v253_v5  ;;  %781 = vmatprep.subr.mxu0 %v253_v5 }
  0x18   : > { %833 = vmatpush3.msra.mxu1 %v253_v5  ;;  %782 = vmatpush3.msra.mxu0 %v253_v5 }
  0x19   : > { %818 = vmatprep.subr.mxu1 %v252_v6  ;;  %783 = vmatprep.subr.mxu0 %v252_v6 }
  0x1a   : > { %834 = vmatpush3.msra.mxu1 %v252_v6  ;;  %784 = vmatpush3.msra.mxu0 %v252_v6 }
  0x1b   : > { %819 = vmatprep.subr.mxu1 %v251_v7  ;;  %785 = vmatprep.subr.mxu0 %v251_v7 }
  0x1c   : > { %835 = vmatpush3.msra.mxu1 %v251_v7  ;;  %786 = vmatpush3.msra.mxu0 %v251_v7 }
  0x1d   : > { %820 = vmatprep.subr.mxu1 %v250_v8  ;;  %787 = vmatprep.subr.mxu0 %v250_v8 }
  0x1e   : > { %836 = vmatpush3.msra.mxu1 %v250_v8  ;;  %788 = vmatpush3.msra.mxu0 %v250_v8 }
  0x1f   : > { %821 = vmatprep.subr.mxu1 %v249_v9  ;;  %789 = vmatprep.subr.mxu0 %v249_v9 }
  0x20   : > { %837 = vmatpush3.msra.mxu1 %v249_v9  ;;  %790 = vmatpush3.msra.mxu0 %v249_v9 }
  0x21   : > { %822 = vmatprep.subr.mxu1 %v248_v10  ;;  %791 = vmatprep.subr.mxu0 %v248_v10 }
  0x22   : > { %838 = vmatpush3.msra.mxu1 %v248_v10  ;;  %792 = vmatpush3.msra.mxu0 %v248_v10 }
  0x23   : > { %823 = vmatprep.subr.mxu1 %v247_v11  ;;  %793 = vmatprep.subr.mxu0 %v247_v11 }
  0x24   : > { %839 = vmatpush3.msra.mxu1 %v247_v11  ;;  %794 = vmatpush3.msra.mxu0 %v247_v11 }
  0x25   : > { %824 = vmatprep.subr.mxu1 %v246_v12  ;;  %795 = vmatprep.subr.mxu0 %v246_v12 }
  0x26   : > { %840 = vmatpush3.msra.mxu1 %v246_v12  ;;  %796 = vmatpush3.msra.mxu0 %v246_v12 }
  0x27   : > { %825 = vmatprep.subr.mxu1 %v245_v13  ;;  %797 = vmatprep.subr.mxu0 %v245_v13 }
  0x28   : > { %841 = vmatpush3.msra.mxu1 %v245_v13  ;;  %798 = vmatpush3.msra.mxu0 %v245_v13 }
  0x29   : > { %826 = vmatprep.subr.mxu1 %v244_v14  ;;  %799 = vmatprep.subr.mxu0 %v244_v14 }
  0x2a   : > { %842 = vmatpush3.msra.mxu1 %v244_v14  ;;  %800 = vmatpush3.msra.mxu0 %v244_v14 }
  0x2b   : > { %827 = vmatprep.subr.mxu1 %v243_v15  ;;  %806 = vmatprep.mubr.f32.mxu1 %v239_v16 }
  0x2c   : > { %843 = vmatpush3.msra.mxu1 %v243_v15  ;;  %801 = vmatprep.subr.mxu0 %v243_v15 }
  0x2d   : > { %807 = vmatmul.mubr.f32.vlgmr.msra.gmra.mxu1 %v240_v17  ;;  %802 = vmatpush3.msra.mxu0 %v243_v15 }
  0x2e   : > { %803 = vmatprep.mubr.f32.mxu0 %v237_v18  ;;  %809 = vmatprep.mubr.f32.mxu1 %v241_v19 }
  0x2f   : > { %804 = vmatmul.mubr.f32.vlgmr.msra.gmra.mxu0 %v238_v20 }
  0x31   : > { %810 = vmatmul.mubr.f32.gmra.mxu1 %v242_v21 }
  0xed   : > { %v808_v23 = vpop.f32.mrf.mxu1 }
  0xee   : > { %v1050_v24 = vadd.f32 %v808_v23, %v740_v22 }
  0xef   : > { %v805_v25 = vpop.f32.mrf.mxu0  ;;  %v342_v26 = vpop.f32.mrf.mxu1 }
  0xf0   : > { %v1052_v27 = vadd.f32 %v805_v25, %v740_v22  ;;  %v1054_v28 = vadd.f32 %v740_v22, %v342_v26  ;;  %366 = sbr.rel (!%p361_p4) target bundleno = 245 (0xf5), region = 36 }
  0xf1   : > { %v332_v29 = vpop.f32.mrf.mxu0  ;;  %v811_v30 = vpop.f32.mrf.mxu1 }
  0xf2   : > { %v1056_v31 = vadd.f32 %v740_v22, %v332_v29  ;;  %v1058_v32 = vadd.f32 %v811_v30, %v740_v22 }
  0xf3   : > { %v352_v33 = vpop.f32.mrf.mxu1 }
  0xf4   : > { %v1060_v34 = vadd.f32 %v740_v22, %v352_v33 }
  0xf5 PF: > { %p742_p5 = scmp.ne.s32.totalorder %s926_s12, 0 }
  0xf7   : > { %382 = sbr.rel (%p742_p5) target bundleno = 695 (0x2b7), region = 40 }
  0xfc   : > { %389 = vmax.xlane.f32.xlu0 %v1056_v31  ;;  %393 = vmax.xlane.f32.xlu1 %v1054_v28  ;;  %v938_v37 = vmov 0   ;;  %v1071_v38 = vld [vmem:[#allocation2] sm:$0xff]  ;;  %v1073_v39 = vld [vmem:[#allocation2 + $0x10] sm:$0xff]  ;;  %vm503_vm1 = vcmask 7168   ;;  %v1081_v44 = vld [vmem:[#allocation2 + $0x8] sm:$0xff] }
  0xfd   : > { %872 = vset.pattern.permute.xlu0 %v938_v37  ;;  %873 = vset.pattern.permute.xlu1 %v938_v37  ;;  %v1083_v45 = vld [vmem:[#allocation2 + $0x18] sm:$0xff]  ;;  %v1096_v52 = vld [vmem:[#allocation2 + $0x20] sm:$0xff]  ;;  %v1098_v53 = vld [vmem:[#allocation2 + $0x28] sm:$0xff] }
  0xfe   : > { %v407_v33 = vld [vmem:[#allocation3] sm:$0xff] }
 0x100   : > { %391 = vmax.xlane.f32.xlu0 %v1052_v27  ;;  %395 = vmax.xlane.f32.xlu1 %v1050_v24 }
 0x104   : > { %397 = vmax.xlane.f32.xlu0 %v1060_v34  ;;  %399 = vmax.xlane.f32.xlu1 %v1058_v32 }
 0x185   : > { %v390_v40 = vpop.xlane.xlu0 %389  ;;  %v394_v41 = vpop.xlane.xlu1 %393 }
 0x186   : > { %v1076_v42 = vmax.f32 %v1071_v38, %v390_v40  ;;  %v1079_v43 = vmax.f32 %v1073_v39, %v394_v41 }
 0x188   : > { %v413_v46 = vsub.f32 %v1071_v38, %v1076_v42  ;;  %510 = vst.msk [vmem:[#allocation2] sm:$0xff] %vm503_vm1, %v1076_v42  ;;  %439 = vperm.xlu0 %872, %v1076_v42   ;;  %v415_v47 = vsub.f32 %v1073_v39, %v1079_v43  ;;  %512 = vst.msk [vmem:[#allocation2 + $0x10] sm:$0xff] %vm503_vm1, %v1079_v43  ;;  %v408_v38 = vld [vmem:[#allocation3 + $0x8] sm:$0xff] }
 0x189   : > { %v392_v48 = vpop.xlane.xlu0 %391  ;;  %v396_v49 = vpop.xlane.xlu1 %395 }
 0x18a   : > { %v402_v50 = vmax.f32 %v1081_v44, %v392_v48  ;;  %v404_v51 = vmax.f32 %v1083_v45, %v396_v49  ;;  %v419_v22 = vmul.f32 1.442695, %v413_v46  ;;  %v423_v25 = vmul.f32 1.442695, %v415_v47  ;;  %v410_v49 = vld [vmem:[#allocation3 + $0x18] sm:$0xff] }
 0x18c   : > { %v414_v54 = vsub.f32 %v1081_v44, %v402_v50  ;;  %511 = vst.msk [vmem:[#allocation2 + $0x8] sm:$0xff] %vm503_vm1, %v402_v50  ;;  %444 = vperm.xlu1 %873, %v402_v50   ;;  %v416_v55 = vsub.f32 %v1083_v45, %v404_v51  ;;  %513 = vst.msk [vmem:[#allocation2 + $0x18] sm:$0xff] %vm503_vm1, %v404_v51 }
 0x18d   : > { %v398_v56 = vpop.xlane.xlu0 %397  ;;  %v400_v57 = vpop.xlane.xlu1 %399 }
 0x18e   : > { %v405_v58 = vmax.f32 %v1096_v52, %v398_v56  ;;  %v406_v59 = vmax.f32 %v1098_v53, %v400_v57  ;;  %v421_v23 = vmul.f32 1.442695, %v414_v54  ;;  %v425_v26 = vmul.f32 1.442695, %v416_v55  ;;  %v411_v54 = vld [vmem:[#allocation3 + $0x20] sm:$0xff] }
 0x190   : > { %449 = vperm.xlu1 %873, %v1079_v43   ;;  %v417_v60 = vsub.f32 %v1096_v52, %v405_v58  ;;  %514 = vst.msk [vmem:[#allocation2 + $0x20] sm:$0xff] %vm503_vm1, %v405_v58  ;;  %v418_v61 = vsub.f32 %v1098_v53, %v406_v59  ;;  %515 = vst.msk [vmem:[#allocation2 + $0x28] sm:$0xff] %vm503_vm1, %v406_v59  ;;  %v409_v43 = vld [vmem:[#allocation3 + $0x10] sm:$0xff] }
 0x192   : > { %v427_v29 = vmul.f32 1.442695, %v417_v60  ;;  %v429_v35 = vmul.f32 1.442695, %v418_v61 }
 0x194   : > { %454 = vperm.xlu1 %873, %v404_v51  }
 0x198   : > { %459 = vperm.xlu1 %873, %v405_v58  }
 0x19c   : > { %464 = vperm.xlu1 %873, %v406_v59   ;;  %v412_v59 = vld [vmem:[#allocation3 + $0x28] sm:$0xff] }
 0x203   : > { %v440_v62 = vpop.permute.xlu0 %439 }
 0x204   : > { %v467_v63 = vsub.f32 %v1056_v31, %v440_v62 }
 0x206   : > { %v473_v0 = vmul.f32 1.442695, %v467_v63 }
 0x207   : > { %v445_v1 = vpop.permute.xlu1 %444 }
 0x208   : > { %874 = vpow2.f32 %v473_v0  ;;  %v468_v2 = vsub.f32 %v1052_v27, %v445_v1 }
 0x20a   : > { %v475_v3 = vmul.f32 1.442695, %v468_v2 }
 0x20b   : > { %v450_v4 = vpop.permute.xlu1 %449 }
 0x20c   : > { %876 = vpow2.f32 %v475_v3  ;;  %v469_v5 = vsub.f32 %v1054_v28, %v450_v4 }
 0x20e   : > { %v477_v6 = vmul.f32 1.442695, %v469_v5 }
 0x20f   : > { %v455_v7 = vpop.permute.xlu1 %454 }
 0x210   : > { %878 = vpow2.f32 %v477_v6  ;;  %v470_v8 = vsub.f32 %v1050_v24, %v455_v7 }
 0x212   : > { %v479_v9 = vmul.f32 1.442695, %v470_v8 }
 0x213   : > { %v460_v10 = vpop.permute.xlu1 %459 }
 0x214   : > { %880 = vpow2.f32 %v479_v9  ;;  %v471_v11 = vsub.f32 %v1060_v34, %v460_v10 }
 0x215   : > { %v875_v12 = vpop.eup %874 }
 0x216   : > { %v481_v13 = vmul.f32 1.442695, %v471_v11  ;;  %485 = vadd.xlane.f32.xlu1 %v875_v12 }
 0x217   : > { %v465_v14 = vpop.permute.xlu1 %464 }
 0x218   : > { %882 = vpow2.f32 %v481_v13  ;;  %v472_v15 = vsub.f32 %v1058_v32, %v465_v14 }
 0x219   : > { %v877_v16 = vpop.eup %876 }
 0x21a   : > { %v483_v17 = vmul.f32 1.442695, %v472_v15  ;;  %487 = vadd.xlane.f32.xlu0 %v877_v16 }
 0x21c   : > { %884 = vpow2.f32 %v483_v17 }
 0x21d   : > { %v879_v18 = vpop.eup %878  ;;  %886 = vpow2.f32 %v419_v22 }
 0x21e   : > { %489 = vadd.xlane.f32.xlu1 %v879_v18  ;;  %888 = vpow2.f32 %v421_v23 }
 0x21f   : > { %890 = vpow2.f32 %v423_v25 }
 0x220   : > { %892 = vpow2.f32 %v425_v26 }
 0x221   : > { %v881_v19 = vpop.eup %880  ;;  %894 = vpow2.f32 %v427_v29 }
 0x222   : > { %491 = vadd.xlane.f32.xlu1 %v881_v19  ;;  %896 = vpow2.f32 %v429_v35 }
 0x225   : > { %v883_v20 = vpop.eup %882 }
 0x226   : > { %493 = vadd.xlane.f32.xlu0 %v883_v20 }
 0x229   : > { %v885_v21 = vpop.eup %884 }
 0x22a   : > { %495 = vadd.xlane.f32.xlu1 %v885_v21  ;;  %v887_v30 = vpop.eup %886 }
 0x22b   : > { %v431_v36 = vmul.f32 %v887_v30, %v407_v33  ;;  %v889_v37 = vpop.eup %888 }
 0x22c   : > { %v432_v42 = vmul.f32 %v889_v37, %v408_v38  ;;  %v891_v44 = vpop.eup %890 }
 0x22d   : > { %v433_v46 = vmul.f32 %v891_v44, %v409_v43  ;;  %v893_v47 = vpop.eup %892 }
 0x22e   : > { %v434_v51 = vmul.f32 %v893_v47, %v410_v49  ;;  %v895_v52 = vpop.eup %894 }
 0x22f   : > { %v435_v56 = vmul.f32 %v895_v52, %v411_v54  ;;  %v897_v57 = vpop.eup %896 }
 0x230   : > { %v436_v61 = vmul.f32 %v897_v57, %v412_v59 }
 0x29f   : > { %v486_v40 = vpop.xlane.xlu1 %485 }
 0x2a0   : > { %v497_v41 = vadd.f32 %v486_v40, %v431_v36 }
 0x2a2   : > { %504 = vst.msk [vmem:[#allocation3] sm:$0xff] %vm503_vm1, %v497_v41 }
 0x2a3   : > { %v488_v39 = vpop.xlane.xlu0 %487 }
 0x2a4   : > { %v498_v45 = vadd.f32 %v488_v39, %v432_v42 }
 0x2a6   : > { %505 = vst.msk [vmem:[#allocation3 + $0x8] sm:$0xff] %vm503_vm1, %v498_v45 }
 0x2a7   : > { %v490_v48 = vpop.xlane.xlu1 %489 }
 0x2a8   : > { %v499_v50 = vadd.f32 %v490_v48, %v433_v46 }
 0x2aa   : > { %506 = vst.msk [vmem:[#allocation3 + $0x10] sm:$0xff] %vm503_vm1, %v499_v50 }
 0x2ab   : > { %v492_v53 = vpop.xlane.xlu1 %491 }
 0x2ac   : > { %v500_v55 = vadd.f32 %v492_v53, %v434_v51 }
 0x2ae   : > { %507 = vst.msk [vmem:[#allocation3 + $0x18] sm:$0xff] %vm503_vm1, %v500_v55 }
 0x2af   : > { %v494_v58 = vpop.xlane.xlu0 %493 }
 0x2b0   : > { %v501_v60 = vadd.f32 %v494_v58, %v435_v56 }
 0x2b2   : > { %508 = vst.msk [vmem:[#allocation3 + $0x20] sm:$0xff] %vm503_vm1, %v501_v60 }
 0x2b3   : > { %v496_v62 = vpop.xlane.xlu1 %495 }
 0x2b4   : > { %v502_v63 = vadd.f32 %v496_v62, %v436_v61 }
 0x2b6   : > { %509 = vst.msk [vmem:[#allocation3 + $0x28] sm:$0xff] %vm503_vm1, %v502_v63 }
 0x2b7 PF: > { %p743_p6 = scmp.ne.s32.totalorder %s926_s12, 1 }
 0x2b9   : > { %519 = sbr.rel (%p743_p6) target bundleno = 855 (0x357), region = 44 }
 0x2be   : > { %v522_v0 = vld [vmem:[#allocation2 + $0x10] sm:$0xff]  ;;  %v520_v1 = vld [vmem:[#allocation2] sm:$0xff]  ;;  %v939_v2 = vmov 0   ;;  %v563_v3 = vld [vmem:[#allocation3 + $0x8] sm:$0xff] }
 0x2bf   : > { %899 = vset.pattern.permute.xlu1 %v939_v2  ;;  %898 = vset.pattern.permute.xlu0 %v939_v2  ;;  %v562_v4 = vld [vmem:[#allocation3] sm:$0xff]  ;;  %v565_v5 = vld [vmem:[#allocation3 + $0x18] sm:$0xff]  ;;  %v523_v6 = vld [vmem:[#allocation2 + $0x18] sm:$0xff]  ;;  %900 = vlog2.f32 %v563_v3 }
 0x2c0   : > { %538 = vperm.xlu1 %899, %v522_v0   ;;  %528 = vperm.xlu0 %898, %v520_v1   ;;  %v521_v7 = vld [vmem:[#allocation2 + $0x8] sm:$0xff]  ;;  %v564_v8 = vld [vmem:[#allocation3 + $0x10] sm:$0xff]  ;;  %902 = vlog2.f32 %v562_v4  ;;  %v567_v9 = vld [vmem:[#allocation3 + $0x28] sm:$0xff] }
 0x2c1   : > { %904 = vlog2.f32 %v565_v5  ;;  %v566_v10 = vld [vmem:[#allocation3 + $0x20] sm:$0xff]  ;;  %v525_v11 = vld [vmem:[#allocation2 + $0x28] sm:$0xff]  ;;  %v524_v12 = vld [vmem:[#allocation2 + $0x20] sm:$0xff] }
 0x2c2   : > { %906 = vlog2.f32 %v564_v8 }
 0x2c3   : > { %908 = vlog2.f32 %v567_v9 }
 0x2c4   : > { %543 = vperm.xlu1 %899, %v523_v6   ;;  %533 = vperm.xlu0 %898, %v521_v7   ;;  %910 = vlog2.f32 %v566_v10 }
 0x2c8   : > { %553 = vperm.xlu1 %899, %v525_v11   ;;  %548 = vperm.xlu0 %898, %v524_v12  }
 0x2cc   : > { %v901_v13 = vpop.eup %900 }
 0x2cd   : > { %v903_v14 = vpop.eup %902  ;;  %v571_v15 = vmul.f32 0.6931472, %v901_v13 }
 0x2ce   : > { %v905_v16 = vpop.eup %904  ;;  %v569_v17 = vmul.f32 0.6931472, %v903_v14 }
 0x2cf   : > { %v907_v18 = vpop.eup %906  ;;  %587 = vperm.xlu1 %899, %v571_v15   ;;  %v575_v19 = vmul.f32 0.6931472, %v905_v16 }
 0x2d0   : > { %v909_v20 = vpop.eup %908  ;;  %582 = vperm.xlu0 %898, %v569_v17   ;;  %v573_v21 = vmul.f32 0.6931472, %v907_v18 }
 0x2d1   : > { %v911_v22 = vpop.eup %910  ;;  %v579_v23 = vmul.f32 0.6931472, %v909_v20 }
 0x2d2   : > { %v577_v25 = vmul.f32 0.6931472, %v911_v22 }
 0x2d3   : > { %597 = vperm.xlu1 %899, %v575_v19  }
 0x2d4   : > { %592 = vperm.xlu0 %898, %v573_v21  }
 0x2d7   : > { %607 = vperm.xlu1 %899, %v579_v23  }
 0x2d8   : > { %602 = vperm.xlu0 %898, %v577_v25  }
 0x33b   : > { %v539_v26 = vpop.permute.xlu1 %538  ;;  %v529_v29 = vpop.permute.xlu0 %528 }
 0x33c   : > { %v556_v40 = vsub.f32 %v1056_v31, %v529_v29  ;;  %v558_v43 = vsub.f32 %v1054_v28, %v539_v26 }
 0x33f   : > { %v544_v30 = vpop.permute.xlu1 %543  ;;  %v534_v33 = vpop.permute.xlu0 %533 }
 0x340   : > { %v557_v37 = vsub.f32 %v1052_v27, %v534_v33  ;;  %v559_v39 = vsub.f32 %v1050_v24, %v544_v30 }
 0x343   : > { %v554_v35 = vpop.permute.xlu1 %553  ;;  %v549_v36 = vpop.permute.xlu0 %548 }
 0x344   : > { %v561_v47 = vsub.f32 %v1058_v32, %v554_v35  ;;  %v560_v24 = vsub.f32 %v1060_v34, %v549_v36 }
 0x34a   : > { %v588_v38 = vpop.permute.xlu1 %587 }
 0x34b   : > { %v611_v41 = vsub.f32 %v557_v37, %v588_v38  ;;  %v583_v42 = vpop.permute.xlu0 %582 }
 0x34c   : > { %v610_v44 = vsub.f32 %v556_v40, %v583_v42 }
 0x34d   : > { %617 = vst [vmem:[%s1166_s3 + $0x8] sm:$0xff] %v611_v41 }
 0x34e   : > { %616 = vst [vmem:[%s1166_s3] sm:$0xff] %v610_v44  ;;  %v598_v45 = vpop.permute.xlu1 %597 }
 0x34f   : > { %v613_v27 = vsub.f32 %v559_v39, %v598_v45  ;;  %v593_v46 = vpop.permute.xlu0 %592 }
 0x350   : > { %v612_v31 = vsub.f32 %v558_v43, %v593_v46 }
 0x351   : > { %619 = vst [vmem:[%s1166_s3 + $0x18] sm:$0xff] %v613_v27 }
 0x352   : > { %618 = vst [vmem:[%s1166_s3 + $0x10] sm:$0xff] %v612_v31  ;;  %v608_v28 = vpop.permute.xlu1 %607 }
 0x353   : > { %v615_v48 = vsub.f32 %v561_v47, %v608_v28  ;;  %v603_v49 = vpop.permute.xlu0 %602 }
 0x354   : > { %v614_v50 = vsub.f32 %v560_v24, %v603_v49 }
 0x355   : > { %621 = vst [vmem:[%s1166_s3 + $0x28] sm:$0xff] %v615_v48 }
 0x356   : > { %620 = vst [vmem:[%s1166_s3 + $0x20] sm:$0xff] %v614_v50 }
 0x357 PF: > { %s13_s14 = sadd.s32 1, %s934_s14   ;;  %s1167_s12 = smov %s930_s13 }
 0x358   : > { %p10_p7 = scmp.ge.s32.totalorder %s13_s14, 4   ;;  %s1168_s13 = smov %s1170_s15 }
 0x35a   :  { %12 = sbr.rel (!%p10_p7) target bundleno = 2 (0x2), region = 80 }

// kernel: forward.4
= control target key start
LH: loop header
LB: loop body
LE: loop exit
PB: predicated region body
PF: predicated region fallthrough
CT: control target
= control target key end

     0   :  { %v3348_v3 = vmov 0.0   ;;  %s3341_s1 = inlined_call_operand.vmem [shape: f32[128,512], index: 1, kind: input, shape index: {}]   ;;  %s3342_s0 = inlined_call_operand.vmem [shape: f32[6,8,128], index: 0, kind: input, shape index: {}]   ;;  %s3343_s2 = inlined_call_operand.vmem [shape: f32[128,512], index: 2, kind: input, shape index: {}]   ;;  %s3344_s4 = inlined_call_operand.vmem [shape: f32[8,128], index: 4, kind: input, shape index: {}]   ;;  %s3345_s3 = inlined_call_operand.vmem [shape: f32[1,512], index: 3, kind: input, shape index: {}]   ;;  %s3346_s5 = inlined_call_operand.vmem [shape: f32[8,128], index: 5, kind: input, shape index: {}]   ;;  %s3347_s6 = inlined_call_operand.vmem [shape: f32[6,8,128], index: 6, kind: output, shape index: {}]  }
   0x1   :  { %v98_v0 = vld [vmem:[%s3341_s1 + $0x1e8] sm:$0xff]  ;;  %v100_v1 = vld [vmem:[%s3341_s1 + $0x1f8] sm:$0xff]  ;;  %v97_v2 = vld [vmem:[%s3341_s1 + $0x1e0] sm:$0xff]  ;;  %187 = vmatprep.mubr.f32.mxu0 %v3348_v3  ;;  %288 = vmatprep.mubr.f32.mxu1 %v3348_v3 }
   0x2   :  { %123 = vmatprep.subr.mxu0 %v98_v0  ;;  %224 = vmatprep.subr.mxu1 %v100_v1  ;;  %v99_v4 = vld [vmem:[%s3341_s1 + $0x1f0] sm:$0xff]  ;;  %v94_v5 = vld [vmem:[%s3341_s1 + $0x1c8] sm:$0xff]  ;;  %v96_v6 = vld [vmem:[%s3341_s1 + $0x1d8] sm:$0xff] }
   0x3   :  { %124 = vmatpush1.msra.mxu0 %v97_v2  ;;  %225 = vmatpush1.msra.mxu1 %v99_v4  ;;  %v93_v7 = vld [vmem:[%s3341_s1 + $0x1c0] sm:$0xff]  ;;  %v95_v8 = vld [vmem:[%s3341_s1 + $0x1d0] sm:$0xff]  ;;  %v90_v9 = vld [vmem:[%s3341_s1 + $0x1a8] sm:$0xff] }
   0x4   :  { %125 = vmatprep.subr.mxu0 %v94_v5  ;;  %226 = vmatprep.subr.mxu1 %v96_v6  ;;  %v92_v10 = vld [vmem:[%s3341_s1 + $0x1b8] sm:$0xff]  ;;  %v89_v11 = vld [vmem:[%s3341_s1 + $0x1a0] sm:$0xff]  ;;  %v91_v12 = vld [vmem:[%s3341_s1 + $0x1b0] sm:$0xff] }
   0x5   :  { %126 = vmatpush1.msra.mxu0 %v93_v7  ;;  %227 = vmatpush1.msra.mxu1 %v95_v8  ;;  %v86_v13 = vld [vmem:[%s3341_s1 + $0x188] sm:$0xff]  ;;  %v88_v14 = vld [vmem:[%s3341_s1 + $0x198] sm:$0xff]  ;;  %v85_v15 = vld [vmem:[%s3341_s1 + $0x180] sm:$0xff] }
   0x6   :  { %127 = vmatprep.subr.mxu0 %v90_v9  ;;  %228 = vmatprep.subr.mxu1 %v92_v10  ;;  %v87_v16 = vld [vmem:[%s3341_s1 + $0x190] sm:$0xff]  ;;  %v82_v17 = vld [vmem:[%s3341_s1 + $0x168] sm:$0xff]  ;;  %v84_v18 = vld [vmem:[%s3341_s1 + $0x178] sm:$0xff] }
   0x7   :  { %128 = vmatpush1.msra.mxu0 %v89_v11  ;;  %229 = vmatpush1.msra.mxu1 %v91_v12  ;;  %v81_v19 = vld [vmem:[%s3341_s1 + $0x160] sm:$0xff]  ;;  %v83_v20 = vld [vmem:[%s3341_s1 + $0x170] sm:$0xff]  ;;  %v78_v21 = vld [vmem:[%s3341_s1 + $0x148] sm:$0xff] }
   0x8   :  { %129 = vmatprep.subr.mxu0 %v86_v13  ;;  %230 = vmatprep.subr.mxu1 %v88_v14  ;;  %v80_v22 = vld [vmem:[%s3341_s1 + $0x158] sm:$0xff]  ;;  %v77_v23 = vld [vmem:[%s3341_s1 + $0x140] sm:$0xff]  ;;  %v79_v24 = vld [vmem:[%s3341_s1 + $0x150] sm:$0xff] }
   0x9   :  { %130 = vmatpush1.msra.mxu0 %v85_v15  ;;  %231 = vmatpush1.msra.mxu1 %v87_v16  ;;  %v74_v25 = vld [vmem:[%s3341_s1 + $0x128] sm:$0xff]  ;;  %v76_v26 = vld [vmem:[%s3341_s1 + $0x138] sm:$0xff]  ;;  %v73_v27 = vld [vmem:[%s3341_s1 + $0x120] sm:$0xff] }
   0xa   :  { %131 = vmatprep.subr.mxu0 %v82_v17  ;;  %232 = vmatprep.subr.mxu1 %v84_v18  ;;  %v75_v28 = vld [vmem:[%s3341_s1 + $0x130] sm:$0xff]  ;;  %v70_v29 = vld [vmem:[%s3341_s1 + $0x108] sm:$0xff]  ;;  %v72_v30 = vld [vmem:[%s3341_s1 + $0x118] sm:$0xff] }
   0xb   :  { %132 = vmatpush1.msra.mxu0 %v81_v19  ;;  %233 = vmatpush1.msra.mxu1 %v83_v20  ;;  %v69_v31 = vld [vmem:[%s3341_s1 + $0x100] sm:$0xff]  ;;  %v71_v32 = vld [vmem:[%s3341_s1 + $0x110] sm:$0xff]  ;;  %v66_v33 = vld [vmem:[%s3341_s1 + $0xe8] sm:$0xff] }
   0xc   :  { %133 = vmatprep.subr.mxu0 %v78_v21  ;;  %234 = vmatprep.subr.mxu1 %v80_v22  ;;  %v68_v34 = vld [vmem:[%s3341_s1 + $0xf8] sm:$0xff]  ;;  %v65_v35 = vld [vmem:[%s3341_s1 + $0xe0] sm:$0xff]  ;;  %v67_v36 = vld [vmem:[%s3341_s1 + $0xf0] sm:$0xff] }
   0xd   :  { %134 = vmatpush1.msra.mxu0 %v77_v23  ;;  %235 = vmatpush1.msra.mxu1 %v79_v24  ;;  %v62_v37 = vld [vmem:[%s3341_s1 + $0xc8] sm:$0xff]  ;;  %v64_v38 = vld [vmem:[%s3341_s1 + $0xd8] sm:$0xff]  ;;  %v61_v39 = vld [vmem:[%s3341_s1 + $0xc0] sm:$0xff] }
   0xe   :  { %135 = vmatprep.subr.mxu0 %v74_v25  ;;  %236 = vmatprep.subr.mxu1 %v76_v26  ;;  %v63_v40 = vld [vmem:[%s3341_s1 + $0xd0] sm:$0xff]  ;;  %v58_v41 = vld [vmem:[%s3341_s1 + $0xa8] sm:$0xff]  ;;  %v60_v42 = vld [vmem:[%s3341_s1 + $0xb8] sm:$0xff] }
   0xf   :  { %136 = vmatpush1.msra.mxu0 %v73_v27  ;;  %237 = vmatpush1.msra.mxu1 %v75_v28  ;;  %v57_v43 = vld [vmem:[%s3341_s1 + $0xa0] sm:$0xff]  ;;  %v59_v44 = vld [vmem:[%s3341_s1 + $0xb0] sm:$0xff]  ;;  %v54_v45 = vld [vmem:[%s3341_s1 + $0x88] sm:$0xff] }
  0x10   :  { %137 = vmatprep.subr.mxu0 %v70_v29  ;;  %238 = vmatprep.subr.mxu1 %v72_v30  ;;  %v56_v46 = vld [vmem:[%s3341_s1 + $0x98] sm:$0xff]  ;;  %v53_v47 = vld [vmem:[%s3341_s1 + $0x80] sm:$0xff]  ;;  %v55_v48 = vld [vmem:[%s3341_s1 + $0x90] sm:$0xff] }
  0x11   :  { %138 = vmatpush1.msra.mxu0 %v69_v31  ;;  %239 = vmatpush1.msra.mxu1 %v71_v32  ;;  %v50_v49 = vld [vmem:[%s3341_s1 + $0x68] sm:$0xff]  ;;  %v52_v50 = vld [vmem:[%s3341_s1 + $0x78] sm:$0xff]  ;;  %v49_v51 = vld [vmem:[%s3341_s1 + $0x60] sm:$0xff] }
  0x12   :  { %139 = vmatprep.subr.mxu0 %v66_v33  ;;  %240 = vmatprep.subr.mxu1 %v68_v34  ;;  %v51_v52 = vld [vmem:[%s3341_s1 + $0x70] sm:$0xff]  ;;  %v46_v53 = vld [vmem:[%s3341_s1 + $0x48] sm:$0xff]  ;;  %v48_v54 = vld [vmem:[%s3341_s1 + $0x58] sm:$0xff] }
  0x13   :  { %140 = vmatpush1.msra.mxu0 %v65_v35  ;;  %241 = vmatpush1.msra.mxu1 %v67_v36  ;;  %v45_v55 = vld [vmem:[%s3341_s1 + $0x40] sm:$0xff]  ;;  %v47_v56 = vld [vmem:[%s3341_s1 + $0x50] sm:$0xff]  ;;  %v42_v57 = vld [vmem:[%s3341_s1 + $0x28] sm:$0xff] }
  0x14   :  { %141 = vmatprep.subr.mxu0 %v62_v37  ;;  %242 = vmatprep.subr.mxu1 %v64_v38  ;;  %v44_v58 = vld [vmem:[%s3341_s1 + $0x38] sm:$0xff]  ;;  %v41_v59 = vld [vmem:[%s3341_s1 + $0x20] sm:$0xff]  ;;  %v43_v60 = vld [vmem:[%s3341_s1 + $0x30] sm:$0xff] }
  0x15   :  { %142 = vmatpush1.msra.mxu0 %v61_v39  ;;  %243 = vmatpush1.msra.mxu1 %v63_v40  ;;  %v38_v61 = vld [vmem:[%s3341_s1 + $0x8] sm:$0xff]  ;;  %v40_v62 = vld [vmem:[%s3341_s1 + $0x18] sm:$0xff]  ;;  %v37_v63 = vld [vmem:[%s3341_s1] sm:$0xff] }
  0x16   :  { %143 = vmatprep.subr.mxu0 %v58_v41  ;;  %244 = vmatprep.subr.mxu1 %v60_v42  ;;  %v39_v0 = vld [vmem:[%s3341_s1 + $0x10] sm:$0xff]  ;;  %v31_v1 = vld [vmem:[%s3342_s0] sm:$0xff]  ;;  %v2177_v2 = vld [vmem:[%s3343_s2 + $0x1e8] sm:$0xff] }
  0x17   :  { %144 = vmatpush1.msra.mxu0 %v57_v43  ;;  %245 = vmatpush1.msra.mxu1 %v59_v44  ;;  %v2182_v4 = vld [vmem:[%s3343_s2 + $0x1f8] sm:$0xff]  ;;  %v2187_v5 = vld [vmem:[%s3343_s2 + $0x1e0] sm:$0xff]  ;;  %v2192_v6 = vld [vmem:[%s3343_s2 + $0x1f0] sm:$0xff] }
  0x18   :  { %145 = vmatprep.subr.mxu0 %v54_v45  ;;  %246 = vmatprep.subr.mxu1 %v56_v46  ;;  %v2198_v7 = vld [vmem:[%s3343_s2 + $0x1c8] sm:$0xff]  ;;  %v2203_v8 = vld [vmem:[%s3343_s2 + $0x1d8] sm:$0xff]  ;;  %v2209_v9 = vld [vmem:[%s3343_s2 + $0x1c0] sm:$0xff] }
  0x19   :  { %146 = vmatpush1.msra.mxu0 %v53_v47  ;;  %247 = vmatpush1.msra.mxu1 %v55_v48  ;;  %v2214_v10 = vld [vmem:[%s3343_s2 + $0x1d0] sm:$0xff]  ;;  %v2221_v11 = vld [vmem:[%s3343_s2 + $0x1a8] sm:$0xff]  ;;  %v2226_v12 = vld [vmem:[%s3343_s2 + $0x1b8] sm:$0xff] }
  0x1a   :  { %147 = vmatprep.subr.mxu0 %v50_v49  ;;  %248 = vmatprep.subr.mxu1 %v52_v50  ;;  %v2233_v13 = vld [vmem:[%s3343_s2 + $0x1a0] sm:$0xff]  ;;  %v2238_v14 = vld [vmem:[%s3343_s2 + $0x1b0] sm:$0xff]  ;;  %v2245_v15 = vld [vmem:[%s3343_s2 + $0x188] sm:$0xff] }
  0x1b   :  { %148 = vmatpush1.msra.mxu0 %v49_v51  ;;  %249 = vmatpush1.msra.mxu1 %v51_v52  ;;  %v2250_v16 = vld [vmem:[%s3343_s2 + $0x198] sm:$0xff]  ;;  %v2257_v17 = vld [vmem:[%s3343_s2 + $0x180] sm:$0xff]  ;;  %v2262_v18 = vld [vmem:[%s3343_s2 + $0x190] sm:$0xff] }
  0x1c   :  { %149 = vmatprep.subr.mxu0 %v46_v53  ;;  %250 = vmatprep.subr.mxu1 %v48_v54  ;;  %v2269_v19 = vld [vmem:[%s3343_s2 + $0x168] sm:$0xff]  ;;  %v2274_v20 = vld [vmem:[%s3343_s2 + $0x178] sm:$0xff]  ;;  %v2281_v21 = vld [vmem:[%s3343_s2 + $0x160] sm:$0xff] }
  0x1d   :  { %150 = vmatpush1.msra.mxu0 %v45_v55  ;;  %251 = vmatpush1.msra.mxu1 %v47_v56  ;;  %v2288_v22 = vld [vmem:[%s3343_s2 + $0x170] sm:$0xff]  ;;  %v32_v23 = vld [vmem:[%s3342_s0 + $0x8] sm:$0xff]  ;;  %v2303_v25 = vld [vmem:[%s3343_s2 + $0x158] sm:$0xff] }
  0x1e   :  { %151 = vmatprep.subr.mxu0 %v42_v57  ;;  %252 = vmatprep.subr.mxu1 %v44_v58  ;;  %v2298_v24 = vld [vmem:[%s3343_s2 + $0x148] sm:$0xff]  ;;  %v2310_v26 = vld [vmem:[%s3343_s2 + $0x140] sm:$0xff]  ;;  %v2316_v27 = vld [vmem:[%s3343_s2 + $0x150] sm:$0xff] }
  0x1f   :  { %152 = vmatpush1.msra.mxu0 %v41_v59  ;;  %253 = vmatpush1.msra.mxu1 %v43_v60  ;;  %v2321_v28 = vld [vmem:[%s3343_s2 + $0x128] sm:$0xff]  ;;  %v2328_v29 = vld [vmem:[%s3343_s2 + $0x138] sm:$0xff]  ;;  %v2335_v30 = vld [vmem:[%s3343_s2 + $0x120] sm:$0xff] }
  0x20   :  { %153 = vmatprep.subr.mxu0 %v38_v61  ;;  %254 = vmatprep.subr.mxu1 %v40_v62  ;;  %v2342_v31 = vld [vmem:[%s3343_s2 + $0x130] sm:$0xff]  ;;  %v2351_v33 = vld [vmem:[%s3343_s2 + $0x108] sm:$0xff]  ;;  %v2356_v34 = vld [vmem:[%s3343_s2 + $0x118] sm:$0xff] }
  0x21   :  { %154 = vmatpush1.msra.mxu0 %v37_v63  ;;  %255 = vmatpush1.msra.mxu1 %v39_v0  ;;  %v33_v32 = vld [vmem:[%s3342_s0 + $0x10] sm:$0xff]  ;;  %v2363_v35 = vld [vmem:[%s3343_s2 + $0x100] sm:$0xff]  ;;  %v2374_v37 = vld [vmem:[%s3343_s2 + $0xe8] sm:$0xff] }
  0x22   :  { %188 = vmatmul.mubr.f32.vlgmr.msra.gmra.mxu0 %v31_v1  ;;  %418 = vmatprep.subr.mxu0 %v2177_v2  ;;  %v2369_v36 = vld [vmem:[%s3343_s2 + $0x110] sm:$0xff]  ;;  %v2381_v38 = vld [vmem:[%s3343_s2 + $0xf8] sm:$0xff]  ;;  %v2388_v39 = vld [vmem:[%s3343_s2 + $0xe0] sm:$0xff] }
  0x23   :  { %489 = vmatprep.subr.mxu1 %v2182_v4  ;;  %289 = vmatmul.mubr.f32.vlgmr.msra.gmra.mxu1 %v31_v1  ;;  %v2395_v40 = vld [vmem:[%s3343_s2 + $0xf0] sm:$0xff]  ;;  %v34_v41 = vld [vmem:[%s3342_s0 + $0x18] sm:$0xff]  ;;  %v2404_v42 = vld [vmem:[%s3343_s2 + $0xc8] sm:$0xff] }
  0x24   :  { %419 = vmatpush1.msra.mxu0 %v2187_v5  ;;  %490 = vmatpush1.msra.mxu1 %v2192_v6  ;;  %v2409_v43 = vld [vmem:[%s3343_s2 + $0xd8] sm:$0xff]  ;;  %v2416_v44 = vld [vmem:[%s3343_s2 + $0xc0] sm:$0xff]  ;;  %v2422_v45 = vld [vmem:[%s3343_s2 + $0xd0] sm:$0xff] }
  0x25   :  { %420 = vmatprep.subr.mxu0 %v2198_v7  ;;  %491 = vmatprep.subr.mxu1 %v2203_v8  ;;  %v2427_v46 = vld [vmem:[%s3343_s2 + $0xa8] sm:$0xff]  ;;  %v2434_v47 = vld [vmem:[%s3343_s2 + $0xb8] sm:$0xff]  ;;  %v2441_v48 = vld [vmem:[%s3343_s2 + $0xa0] sm:$0xff] }
  0x26   :  { %421 = vmatpush1.msra.mxu0 %v2209_v9  ;;  %492 = vmatpush1.msra.mxu1 %v2214_v10  ;;  %3414 = vst [vmem:[#allocation5_spill] sm:$0xff] %v2434_v47  ;;  %3415 = vst [vmem:[#allocation6_spill] sm:$0xff] %v2441_v48  ;;  %v2448_v49 = vld [vmem:[%s3343_s2 + $0xb0] sm:$0xff]  ;;  %v35_v50 = vld [vmem:[%s3342_s0 + $0x20] sm:$0xff] }
  0x27   :  { %422 = vmatprep.subr.mxu0 %v2221_v11  ;;  %493 = vmatprep.subr.mxu1 %v2226_v12  ;;  %3416 = vst [vmem:[#allocation7_spill] sm:$0xff] %v2448_v49  ;;  %v2457_v51 = vld [vmem:[%s3343_s2 + $0x88] sm:$0xff]  ;;  %v2462_v52 = vld [vmem:[%s3343_s2 + $0x98] sm:$0xff]  ;;  %v2469_v53 = vld [vmem:[%s3343_s2 + $0x80] sm:$0xff] }
  0x28   :  { %423 = vmatpush1.msra.mxu0 %v2233_v13  ;;  %494 = vmatpush1.msra.mxu1 %v2238_v14  ;;  %3417 = vst [vmem:[#allocation8_spill] sm:$0xff] %v2457_v51  ;;  %3418 = vst [vmem:[#allocation9_spill] sm:$0xff] %v2462_v52  ;;  %v2475_v54 = vld [vmem:[%s3343_s2 + $0x90] sm:$0xff]  ;;  %v2480_v55 = vld [vmem:[%s3343_s2 + $0x68] sm:$0xff] }
  0x29   :  { %424 = vmatprep.subr.mxu0 %v2245_v15  ;;  %495 = vmatprep.subr.mxu1 %v2250_v16  ;;  %3419 = vst [vmem:[#allocation10_spill] sm:$0xff] %v2469_v53  ;;  %3420 = vst [vmem:[#allocation11_spill] sm:$0xff] %v2475_v54  ;;  %v2487_v56 = vld [vmem:[%s3343_s2 + $0x78] sm:$0xff]  ;;  %v2494_v57 = vld [vmem:[%s3343_s2 + $0x60] sm:$0xff] }
  0x2a   :  { %425 = vmatpush1.msra.mxu0 %v2257_v17  ;;  %496 = vmatpush1.msra.mxu1 %v2262_v18  ;;  %3421 = vst [vmem:[#allocation12_spill] sm:$0xff] %v2480_v55  ;;  %3422 = vst [vmem:[#allocation13_spill] sm:$0xff] %v2487_v56  ;;  %v2501_v58 = vld [vmem:[%s3343_s2 + $0x70] sm:$0xff]  ;;  %v36_v59 = vld [vmem:[%s3342_s0 + $0x28] sm:$0xff] }
  0x2b   :  { %426 = vmatprep.subr.mxu0 %v2269_v19  ;;  %497 = vmatprep.subr.mxu1 %v2274_v20  ;;  %3423 = vst [vmem:[#allocation14_spill] sm:$0xff] %v2494_v57  ;;  %3424 = vst [vmem:[#allocation15_spill] sm:$0xff] %v2501_v58  ;;  %v2510_v60 = vld [vmem:[%s3343_s2 + $0x48] sm:$0xff]  ;;  %v2515_v61 = vld [vmem:[%s3343_s2 + $0x58] sm:$0xff] }
  0x2c   :  { %193 = vmatprep.mubr.f32.mxu0 %v3348_v3  ;;  %427 = vmatpush1.msra.mxu0 %v2281_v21  ;;  %3425 = vst [vmem:[#allocation16_spill] sm:$0xff] %v2510_v60  ;;  %3426 = vst [vmem:[#allocation17_spill] sm:$0xff] %v2515_v61  ;;  %v2522_v62 = vld [vmem:[%s3343_s2 + $0x40] sm:$0xff]  ;;  %v2528_v63 = vld [vmem:[%s3343_s2 + $0x50] sm:$0xff] }
  0x2d   :  { %498 = vmatpush1.msra.mxu1 %v2288_v22  ;;  %194 = vmatmul.mubr.f32.gmra.mxu0 %v32_v23  ;;  %3427 = vst [vmem:[#allocation18_spill] sm:$0xff] %v2522_v62  ;;  %3428 = vst [vmem:[#allocation19_spill] sm:$0xff] %v2528_v63  ;;  %v2533_v0 = vld [vmem:[%s3343_s2 + $0x28] sm:$0xff]  ;;  %v2540_v1 = vld [vmem:[%s3343_s2 + $0x38] sm:$0xff] }
  0x2e   :  { %428 = vmatprep.subr.mxu0 %v2298_v24  ;;  %499 = vmatprep.subr.mxu1 %v2303_v25  ;;  %3429 = vst [vmem:[#allocation20_spill] sm:$0xff] %v2533_v0  ;;  %3430 = vst [vmem:[#allocation21_spill] sm:$0xff] %v2540_v1 }
  0x2f   :  { %294 = vmatprep.mubr.f32.mxu1 %v3348_v3  ;;  %429 = vmatpush1.msra.mxu0 %v2310_v26 }
  0x30   :  { %500 = vmatpush1.msra.mxu1 %v2316_v27  ;;  %430 = vmatprep.subr.mxu0 %v2321_v28 }
  0x31   :  { %295 = vmatmul.mubr.f32.gmra.mxu1 %v32_v23  ;;  %501 = vmatprep.subr.mxu1 %v2328_v29  ;;  %v2547_v23 = vld [vmem:[%s3343_s2 + $0x20] sm:$0xff] }
  0x32   :  { %199 = vmatprep.mubr.f32.mxu0 %v3348_v3  ;;  %431 = vmatpush1.msra.mxu0 %v2335_v30  ;;  %3431 = vst [vmem:[#allocation22_spill] sm:$0xff] %v2547_v23 }
  0x33   :  { %502 = vmatpush1.msra.mxu1 %v2342_v31  ;;  %200 = vmatmul.mubr.f32.gmra.mxu0 %v33_v32 }
  0x34   :  { %432 = vmatprep.subr.mxu0 %v2351_v33  ;;  %503 = vmatprep.subr.mxu1 %v2356_v34 }
  0x35   :  { %300 = vmatprep.mubr.f32.mxu1 %v3348_v3  ;;  %433 = vmatpush1.msra.mxu0 %v2363_v35 }
  0x36   :  { %504 = vmatpush1.msra.mxu1 %v2369_v36  ;;  %434 = vmatprep.subr.mxu0 %v2374_v37 }
  0x37   :  { %301 = vmatmul.mubr.f32.gmra.mxu1 %v33_v32  ;;  %505 = vmatprep.subr.mxu1 %v2381_v38  ;;  %v2552_v32 = vld [vmem:[%s3343_s2 + $0x30] sm:$0xff] }
  0x38   :  { %205 = vmatprep.mubr.f32.mxu0 %v3348_v3  ;;  %435 = vmatpush1.msra.mxu0 %v2388_v39  ;;  %3432 = vst [vmem:[#allocation23_spill] sm:$0xff] %v2552_v32 }
  0x39   :  { %506 = vmatpush1.msra.mxu1 %v2395_v40  ;;  %206 = vmatmul.mubr.f32.gmra.mxu0 %v34_v41 }
  0x3a   :  { %436 = vmatprep.subr.mxu0 %v2404_v42  ;;  %507 = vmatprep.subr.mxu1 %v2409_v43 }
  0x3b   :  { %306 = vmatprep.mubr.f32.mxu1 %v3348_v3  ;;  %437 = vmatpush1.msra.mxu0 %v2416_v44 }
  0x3c   :  { %508 = vmatpush1.msra.mxu1 %v2422_v45  ;;  %438 = vmatprep.subr.mxu0 %v2427_v46 }
  0x3d   :  { %307 = vmatmul.mubr.f32.gmra.mxu1 %v34_v41  ;;  %509 = vmatprep.subr.mxu1 %v2434_v47  ;;  %v2559_v41 = vld [vmem:[%s3343_s2 + $0x8] sm:$0xff] }
  0x3e   :  { %211 = vmatprep.mubr.f32.mxu0 %v3348_v3  ;;  %439 = vmatpush1.msra.mxu0 %v2441_v48  ;;  %3433 = vst [vmem:[#allocation24_spill] sm:$0xff] %v2559_v41 }
  0x3f   :  { %510 = vmatpush1.msra.mxu1 %v2448_v49  ;;  %212 = vmatmul.mubr.f32.gmra.mxu0 %v35_v50 }
  0x40   :  { %440 = vmatprep.subr.mxu0 %v2457_v51  ;;  %511 = vmatprep.subr.mxu1 %v2462_v52 }
  0x41   :  { %312 = vmatprep.mubr.f32.mxu1 %v3348_v3  ;;  %441 = vmatpush1.msra.mxu0 %v2469_v53 }
  0x42   :  { %512 = vmatpush1.msra.mxu1 %v2475_v54  ;;  %442 = vmatprep.subr.mxu0 %v2480_v55 }
  0x43   :  { %313 = vmatmul.mubr.f32.gmra.mxu1 %v35_v50  ;;  %513 = vmatprep.subr.mxu1 %v2487_v56  ;;  %v2564_v50 = vld [vmem:[%s3343_s2 + $0x18] sm:$0xff] }
  0x44   :  { %217 = vmatprep.mubr.f32.mxu0 %v3348_v3  ;;  %443 = vmatpush1.msra.mxu0 %v2494_v57  ;;  %3434 = vst [vmem:[#allocation25_spill] sm:$0xff] %v2564_v50 }
  0x45   :  { %514 = vmatpush1.msra.mxu1 %v2501_v58  ;;  %218 = vmatmul.mubr.f32.gmra.mxu0 %v36_v59 }
  0x46   :  { %444 = vmatprep.subr.mxu0 %v2510_v60  ;;  %515 = vmatprep.subr.mxu1 %v2515_v61 }
  0x47   :  { %318 = vmatprep.mubr.f32.mxu1 %v3348_v3  ;;  %445 = vmatpush1.msra.mxu0 %v2522_v62  ;;  %v2570_v3 = vld [vmem:[%s3343_s2] sm:$0xff] }
  0x48   :  { %516 = vmatpush1.msra.mxu1 %v2528_v63  ;;  %446 = vmatprep.subr.mxu0 %v2533_v0  ;;  %3435 = vst [vmem:[#allocation26_spill] sm:$0xff] %v2570_v3  ;;  %v2577_v0 = vld [vmem:[%s3343_s2 + $0x10] sm:$0xff] }
  0x49   :  { %319 = vmatmul.mubr.f32.gmra.mxu1 %v36_v59  ;;  %517 = vmatprep.subr.mxu1 %v2540_v1  ;;  %3436 = vst [vmem:[#allocation27_spill] sm:$0xff] %v2577_v0  ;;  %v27_v59 = vld [vmem:[%s3344_s4] sm:$0xff]  ;;  %v3437_v1 = vmov 0.0  }
  0x4a   :  { %447 = vmatpush1.msra.mxu0 %v2547_v23  ;;  %518 = vmatpush1.msra.mxu1 %v2552_v32 }
  0x4b   :  { %448 = vmatprep.subr.mxu0 %v2559_v41  ;;  %519 = vmatprep.subr.mxu1 %v2564_v50 }
  0x4c   :  { %449 = vmatpush1.msra.mxu0 %v2570_v3  ;;  %482 = vmatprep.mubr.f32.mxu0 %v3437_v1 }
  0x4d   :  { %520 = vmatpush1.msra.mxu1 %v2577_v0  ;;  %553 = vmatprep.mubr.f32.mxu1 %v3437_v1 }
  0x4e   :  { %483 = vmatmul.mubr.f32.vlgmr.msra.gmra.mxu0 %v27_v59  ;;  %554 = vmatmul.mubr.f32.vlgmr.msra.gmra.mxu1 %v27_v59  ;;  %v3438_v59 = vld [vmem:[#allocation20_spill] sm:$0xff] }
  0x4f   :  { %662 = vmatprep.subr.mxu0 %v2177_v2  ;;  %733 = vmatprep.subr.mxu1 %v2182_v4 }
  0x50   :  { %663 = vmatpush1.msra.mxu0 %v2187_v5  ;;  %734 = vmatpush1.msra.mxu1 %v2192_v6 }
  0x51   :  { %664 = vmatprep.subr.mxu0 %v2198_v7  ;;  %735 = vmatprep.subr.mxu1 %v2203_v8 }
  0x52   :  { %665 = vmatpush1.msra.mxu0 %v2209_v9  ;;  %736 = vmatpush1.msra.mxu1 %v2214_v10 }
  0x53   :  { %666 = vmatprep.subr.mxu0 %v2221_v11  ;;  %737 = vmatprep.subr.mxu1 %v2226_v12 }
  0x54   :  { %667 = vmatpush1.msra.mxu0 %v2233_v13  ;;  %738 = vmatpush1.msra.mxu1 %v2238_v14 }
  0x55   :  { %668 = vmatprep.subr.mxu0 %v2245_v15  ;;  %739 = vmatprep.subr.mxu1 %v2250_v16 }
  0x56   :  { %669 = vmatpush1.msra.mxu0 %v2257_v17  ;;  %740 = vmatpush1.msra.mxu1 %v2262_v18 }
  0x57   :  { %670 = vmatprep.subr.mxu0 %v2269_v19  ;;  %741 = vmatprep.subr.mxu1 %v2274_v20 }
  0x58   :  { %671 = vmatpush1.msra.mxu0 %v2281_v21  ;;  %742 = vmatpush1.msra.mxu1 %v2288_v22 }
  0x59   :  { %672 = vmatprep.subr.mxu0 %v2298_v24  ;;  %743 = vmatprep.subr.mxu1 %v2303_v25 }
  0x5a   :  { %673 = vmatpush1.msra.mxu0 %v2310_v26  ;;  %744 = vmatpush1.msra.mxu1 %v2316_v27 }
  0x5b   :  { %674 = vmatprep.subr.mxu0 %v2321_v28  ;;  %745 = vmatprep.subr.mxu1 %v2328_v29 }
  0x5c   :  { %675 = vmatpush1.msra.mxu0 %v2335_v30  ;;  %746 = vmatpush1.msra.mxu1 %v2342_v31 }
  0x5d   :  { %676 = vmatprep.subr.mxu0 %v2351_v33  ;;  %747 = vmatprep.subr.mxu1 %v2356_v34 }
  0x5e   :  { %677 = vmatpush1.msra.mxu0 %v2363_v35  ;;  %748 = vmatpush1.msra.mxu1 %v2369_v36 }
  0x5f   :  { %678 = vmatprep.subr.mxu0 %v2374_v37  ;;  %749 = vmatprep.subr.mxu1 %v2381_v38 }
  0x60   :  { %679 = vmatpush1.msra.mxu0 %v2388_v39  ;;  %750 = vmatpush1.msra.mxu1 %v2395_v40 }
  0x61   :  { %680 = vmatprep.subr.mxu0 %v2404_v42  ;;  %751 = vmatprep.subr.mxu1 %v2409_v43 }
  0x62   :  { %681 = vmatpush1.msra.mxu0 %v2416_v44  ;;  %752 = vmatpush1.msra.mxu1 %v2422_v45 }
  0x63   :  { %682 = vmatprep.subr.mxu0 %v2427_v46  ;;  %753 = vmatprep.subr.mxu1 %v2434_v47 }
  0x64   :  { %683 = vmatpush1.msra.mxu0 %v2441_v48  ;;  %754 = vmatpush1.msra.mxu1 %v2448_v49 }
  0x65   :  { %684 = vmatprep.subr.mxu0 %v2457_v51  ;;  %755 = vmatprep.subr.mxu1 %v2462_v52 }
  0x66   :  { %685 = vmatpush1.msra.mxu0 %v2469_v53  ;;  %756 = vmatpush1.msra.mxu1 %v2475_v54  ;;  %v3439_v53 = vld [vmem:[#allocation21_spill] sm:$0xff] }
  0x67   :  { %686 = vmatprep.subr.mxu0 %v2480_v55  ;;  %757 = vmatprep.subr.mxu1 %v2487_v56 }
  0x68   :  { %687 = vmatpush1.msra.mxu0 %v2494_v57  ;;  %758 = vmatpush1.msra.mxu1 %v2501_v58 }
  0x69   :  { %688 = vmatprep.subr.mxu0 %v2510_v60  ;;  %759 = vmatprep.subr.mxu1 %v2515_v61 }
  0x6a   :  { %689 = vmatpush1.msra.mxu0 %v2522_v62  ;;  %760 = vmatpush1.msra.mxu1 %v2528_v63 }
  0x6b   :  { %690 = vmatprep.subr.mxu0 %v3438_v59  ;;  %761 = vmatprep.subr.mxu1 %v3439_v53  ;;  %v103_v53 = vlaneseq }
  0x6c   :  { %691 = vmatpush1.msra.mxu0 %v2547_v23  ;;  %762 = vmatpush1.msra.mxu1 %v2552_v32 }
  0x6d   :  { %692 = vmatprep.subr.mxu0 %v2559_v41  ;;  %763 = vmatprep.subr.mxu1 %v2564_v50  ;;  %v104_v23 = vshrl.u32 %v103_v53, 7  ;;  %v101_v50 = vld [vmem:[%s3345_s3] sm:$0xf] }
  0x6e   :  { %693 = vmatpush1.msra.mxu0 %v2570_v3  ;;  %726 = vmatprep.mubr.f32.mxu0 %v3437_v1 }
  0x6f   :  { %764 = vmatpush1.msra.mxu1 %v2577_v0  ;;  %797 = vmatprep.mubr.f32.mxu1 %v3437_v1  ;;  %v105_v32 = vsub.s32 0, %v104_v23  ;;  %v109_v3 = vsub.s32 1, %v104_v23  ;;  %v113_v0 = vsub.s32 2, %v104_v23 }
  0x70   :  { %907 = vmatprep.subr.mxu0 %v2177_v2  ;;  %978 = vmatprep.subr.mxu1 %v2182_v4  ;;  %v117_v4 = vsub.s32 3, %v104_v23 }
  0x71   :  { %v106_v62 = vrot.slane %v101_v50, %v105_v32  ;;  %v110_v60 = vrot.slane %v101_v50, %v109_v3  ;;  %v114_v53 = vrot.slane %v101_v50, %v113_v0 }
  0x72   :  { %v118_v55 = vrot.slane %v101_v50, %v117_v4 }
  0xe2   :  { %v189_v59 = vpop.f32.mrf.mxu0 }
  0xe3   :  { %v2659_v41 = vpop.f32.mrf.mxu1 }
  0xe4   :  { %v191_v63 = vpop.f32.mrf.mxu0 }
  0xe5   :  { %v292_v1 = vpop.f32.mrf.mxu1 }
  0xed   :  { %v195_v61 = vpop.f32.mrf.mxu0 }
  0xee   :  { %v2661_v2 = vadd.f32 %v195_v61, %v106_v62 }
  0xef   :  { %v197_v58 = vpop.f32.mrf.mxu0 }
  0xf0   :  { %3440 = vst [vmem:[#allocation28_spill] sm:$0xff] %v2661_v2  ;;  %v2663_v57 = vadd.f32 %v197_v58, %v110_v60 }
  0xf1   :  { %v296_v56 = vpop.f32.mrf.mxu1 }
  0xf2   :  { %3441 = vst [vmem:[#allocation29_spill] sm:$0xff] %v2663_v57  ;;  %v2665_v54 = vadd.f32 %v296_v56, %v114_v53 }
  0xf3   :  { %v201_v52 = vpop.f32.mrf.mxu0  ;;  %v298_v51 = vpop.f32.mrf.mxu1 }
  0xf4   :  { %3442 = vst [vmem:[#allocation30_spill] sm:$0xff] %v2665_v54  ;;  %v2667_v49 = vadd.f32 %v201_v52, %v106_v62  ;;  %v2669_v32 = vadd.f32 %v298_v51, %v118_v55 }
  0xf5   :  { %v203_v48 = vpop.f32.mrf.mxu0 }
  0xf6   :  { %3443 = vst [vmem:[#allocation31_spill] sm:$0xff] %v2667_v49  ;;  %3444 = vst [vmem:[#allocation32_spill] sm:$0xff] %v2669_v32  ;;  %v2671_v47 = vadd.f32 %v203_v48, %v110_v60 }
  0xf7   :  { %v302_v3 = vpop.f32.mrf.mxu1 }
  0xf8   :  { %3445 = vst [vmem:[#allocation33_spill] sm:$0xff] %v2671_v47  ;;  %v2673_v61 = vadd.f32 %v302_v3, %v114_v53 }
  0xf9   :  { %v207_v23 = vpop.f32.mrf.mxu0  ;;  %v304_v0 = vpop.f32.mrf.mxu1 }
  0xfa   :  { %3446 = vst [vmem:[#allocation34_spill] sm:$0xff] %v2673_v61  ;;  %v2675_v58 = vadd.f32 %v207_v23, %v106_v62  ;;  %v2677_v57 = vadd.f32 %v304_v0, %v118_v55 }
  0xfb   :  { %v209_v56 = vpop.f32.mrf.mxu0 }
  0xfc   :  { %3447 = vst [vmem:[#allocation35_spill] sm:$0xff] %v2675_v58  ;;  %3448 = vst [vmem:[#allocation36_spill] sm:$0xff] %v2677_v57  ;;  %v2679_v50 = vadd.f32 %v209_v56, %v110_v60 }
  0xfd   :  { %v308_v4 = vpop.f32.mrf.mxu1 }
  0xfe   :  { %3449 = vst [vmem:[#allocation37_spill] sm:$0xff] %v2679_v50  ;;  %v2681_v52 = vadd.f32 %v308_v4, %v114_v53 }
  0xff   :  { %v213_v51 = vpop.f32.mrf.mxu0  ;;  %v310_v49 = vpop.f32.mrf.mxu1 }
 0x100   :  { %3450 = vst [vmem:[#allocation38_spill] sm:$0xff] %v2681_v52  ;;  %v2683_v54 = vadd.f32 %v213_v51, %v106_v62  ;;  %v2685_v48 = vadd.f32 %v310_v49, %v118_v55 }
 0x101   :  { %v215_v3 = vpop.f32.mrf.mxu0 }
 0x102   :  { %3451 = vst [vmem:[#allocation39_spill] sm:$0xff] %v2683_v54  ;;  %3452 = vst [vmem:[#allocation40_spill] sm:$0xff] %v2685_v48  ;;  %v2687_v61 = vadd.f32 %v215_v3, %v110_v60  ;;  %v190_v3 = vadd.f32 %v189_v59, %v106_v62  ;;  %v192_v48 = vadd.f32 %v191_v63, %v110_v60 }
 0x103   :  { %v314_v47 = vpop.f32.mrf.mxu1 }
 0x104   :  { %3453 = vst [vmem:[#allocation41_spill] sm:$0xff] %v2687_v61  ;;  %v2689_v23 = vadd.f32 %v314_v47, %v114_v53 }
 0x105   :  { %v219_v0 = vpop.f32.mrf.mxu0  ;;  %v316_v58 = vpop.f32.mrf.mxu1 }
 0x106   :  { %3454 = vst [vmem:[#allocation42_spill] sm:$0xff] %v2689_v23  ;;  %v2691_v57 = vadd.f32 %v219_v0, %v106_v62  ;;  %v2693_v56 = vadd.f32 %v316_v58, %v118_v55 }
 0x107   :  { %v221_v4 = vpop.f32.mrf.mxu0 }
 0x108   :  { %3455 = vst [vmem:[#allocation43_spill] sm:$0xff] %v2691_v57  ;;  %3456 = vst [vmem:[#allocation44_spill] sm:$0xff] %v2693_v56  ;;  %v2695_v52 = vadd.f32 %v221_v4, %v110_v60  ;;  %v293_v4 = vadd.f32 %v292_v1, %v118_v55 }
 0x109   :  { %v320_v50 = vpop.f32.mrf.mxu1 }
 0x10a   :  { %3457 = vst [vmem:[#allocation45_spill] sm:$0xff] %v2695_v52  ;;  %v2697_v51 = vadd.f32 %v320_v50, %v114_v53  ;;  %v291_v50 = vadd.f32 %v2659_v41, %v114_v53 }
 0x10b   :  { %v322_v49 = vpop.f32.mrf.mxu1 }
 0x10c   :  { %3458 = vst [vmem:[#allocation46_spill] sm:$0xff] %v2697_v51  ;;  %v2699_v54 = vadd.f32 %v322_v49, %v118_v55 }
 0x10e   :  { %3459 = vst [vmem:[#allocation47_spill] sm:$0xff] %v2699_v54  ;;  %v484_v61 = vpop.f32.mrf.mxu0  ;;  %v555_v0 = vpop.f32.mrf.mxu1 }
 0x10f   :  { %v560_v47 = vadd.f32 %v484_v61, %v190_v3  ;;  %v562_v49 = vadd.f32 %v555_v0, %v291_v50 }
 0x110   :  { %v486_v23 = vpop.f32.mrf.mxu0  ;;  %v557_v57 = vpop.f32.mrf.mxu1 }
 0x111   :  { %v1821_v32 = vmul.f32 -1.442695, %v560_v47  ;;  %v561_v2 = vadd.f32 %v486_v23, %v192_v48  ;;  %v563_v52 = vadd.f32 %v557_v57, %v293_v4 }
 0x113   :  { %1845 = vpow2.f32 %v1821_v32  ;;  %v1822_v58 = vmul.f32 -1.442695, %v561_v2  ;;  %v1823_v51 = vmul.f32 -1.442695, %v563_v52  ;;  %v29_v2 = vld [vmem:[%s3346_s5] sm:$0xff] }
 0x115   :  { %1847 = vpow2.f32 %v1822_v58 }
 0x116   :  { %1849 = vpow2.f32 %v1823_v51 }
 0x120   :  { %v1846_v56 = vpop.eup %1845 }
 0x121   :  { %v567_v54 = vadd.f32 1.0, %v1846_v56 }
 0x122   :  { %v1848_v62 = vpop.eup %1847 }
 0x123   :  { %1851 = vrcp.f32 %v567_v54  ;;  %v573_v60 = vadd.f32 1.0, %v1848_v62  ;;  %v1850_v63 = vpop.eup %1849 }
 0x124   :  { %1853 = vtanh.f32 %v562_v49  ;;  %v580_v1 = vadd.f32 1.0, %v1850_v63 }
 0x125   :  { %1855 = vrcp.f32 %v573_v60 }
 0x126   :  { %1857 = vrcp.f32 %v580_v1  ;;  %v2808_v1 = vld [vmem:[%s3343_s2 + $0x1f0] sm:$0xff] }
 0x130   :  { %v1852_v59 = vpop.eup %1851 }
 0x131   :  { %v1854_v55 = vpop.eup %1853 }
 0x132   :  { %v1856_v57 = vpop.eup %1855  ;;  %v585_v41 = vmul.f32 %v1854_v55, %v1852_v59  ;;  %v2796_v55 = vld [vmem:[%s3343_s2 + $0x1f8] sm:$0xff] }
 0x133   :  { %v584_v53 = vmul.f32 %v1856_v57, %v29_v2  ;;  %v1858_v54 = vpop.eup %1857  ;;  %v2791_v2 = vld [vmem:[%s3343_s2 + $0x1e8] sm:$0xff]  ;;  %v2803_v57 = vld [vmem:[%s3343_s2 + $0x1e0] sm:$0xff] }
 0x135   :  { %v2705_v32 = vadd.f32 %v585_v41, %v584_v53  ;;  %v2815_v41 = vld [vmem:[%s3343_s2 + $0x1c8] sm:$0xff]  ;;  %v2820_v53 = vld [vmem:[%s3343_s2 + $0x1d8] sm:$0xff] }
 0x137   :  { %1859 = vtanh.f32 %v2705_v32 }
 0x144   :  { %v1860_v61 = vpop.eup %1859 }
 0x145   :  { %v588_v52 = vmul.f32 %v1860_v61, %v1858_v54  ;;  %v2832_v54 = vld [vmem:[%s3343_s2 + $0x1d0] sm:$0xff]  ;;  %v2839_v61 = vld [vmem:[%s3343_s2 + $0x1a8] sm:$0xff] }
 0x147   :  { %591 = vst [vmem:[%s3347_s6] sm:$0xff] %v588_v52  ;;  %727 = vmatmul.mubr.f32.vlgmr.msra.gmra.mxu0 %v588_v52  ;;  %798 = vmatmul.mubr.f32.vlgmr.msra.gmra.mxu1 %v588_v52  ;;  %v2844_v52 = vld [vmem:[%s3343_s2 + $0x1b8] sm:$0xff] }
 0x148   :  { %908 = vmatpush1.msra.mxu0 %v2187_v5  ;;  %979 = vmatpush1.msra.mxu1 %v2192_v6  ;;  %v3460_v5 = vld [vmem:[#allocation5_spill] sm:$0xff]  ;;  %v3461_v6 = vld [vmem:[#allocation6_spill] sm:$0xff] }
 0x149   :  { %909 = vmatprep.subr.mxu0 %v2198_v7  ;;  %980 = vmatprep.subr.mxu1 %v2203_v8  ;;  %v3462_v7 = vld [vmem:[#allocation7_spill] sm:$0xff]  ;;  %v3463_v8 = vld [vmem:[#allocation8_spill] sm:$0xff]  ;;  %3488 = vst [vmem:[#allocation5_spill] sm:$0xff] %v2791_v2  ;;  %3489 = vst [vmem:[#allocation6_spill] sm:$0xff] %v2796_v55 }
 0x14a   :  { %910 = vmatpush1.msra.mxu0 %v2209_v9  ;;  %981 = vmatpush1.msra.mxu1 %v2214_v10  ;;  %v3464_v9 = vld [vmem:[#allocation9_spill] sm:$0xff]  ;;  %v3465_v10 = vld [vmem:[#allocation10_spill] sm:$0xff] }
 0x14b   :  { %911 = vmatprep.subr.mxu0 %v2221_v11  ;;  %982 = vmatprep.subr.mxu1 %v2226_v12  ;;  %v3466_v11 = vld [vmem:[#allocation11_spill] sm:$0xff]  ;;  %v3467_v12 = vld [vmem:[#allocation12_spill] sm:$0xff] }
 0x14c   :  { %912 = vmatpush1.msra.mxu0 %v2233_v13  ;;  %983 = vmatpush1.msra.mxu1 %v2238_v14  ;;  %v3468_v13 = vld [vmem:[#allocation13_spill] sm:$0xff]  ;;  %v3469_v14 = vld [vmem:[#allocation14_spill] sm:$0xff] }
 0x14d   :  { %913 = vmatprep.subr.mxu0 %v2245_v15  ;;  %984 = vmatprep.subr.mxu1 %v2250_v16  ;;  %v3470_v15 = vld [vmem:[#allocation15_spill] sm:$0xff]  ;;  %v3471_v16 = vld [vmem:[#allocation16_spill] sm:$0xff] }
 0x14e   :  { %914 = vmatpush1.msra.mxu0 %v2257_v17  ;;  %985 = vmatpush1.msra.mxu1 %v2262_v18  ;;  %v3472_v17 = vld [vmem:[#allocation17_spill] sm:$0xff]  ;;  %v3473_v18 = vld [vmem:[#allocation18_spill] sm:$0xff] }
 0x14f   :  { %915 = vmatprep.subr.mxu0 %v2269_v19  ;;  %986 = vmatprep.subr.mxu1 %v2274_v20  ;;  %v3474_v19 = vld [vmem:[#allocation19_spill] sm:$0xff]  ;;  %v3475_v20 = vld [vmem:[#allocation20_spill] sm:$0xff] }
 0x150   :  { %916 = vmatpush1.msra.mxu0 %v2281_v21  ;;  %987 = vmatpush1.msra.mxu1 %v2288_v22  ;;  %v3476_v21 = vld [vmem:[#allocation21_spill] sm:$0xff]  ;;  %v3477_v22 = vld [vmem:[#allocation22_spill] sm:$0xff] }
 0x151   :  { %917 = vmatprep.subr.mxu0 %v2298_v24  ;;  %988 = vmatprep.subr.mxu1 %v2303_v25  ;;  %v3478_v24 = vld [vmem:[#allocation23_spill] sm:$0xff]  ;;  %v3479_v25 = vld [vmem:[#allocation24_spill] sm:$0xff] }
 0x152   :  { %918 = vmatpush1.msra.mxu0 %v2310_v26  ;;  %989 = vmatpush1.msra.mxu1 %v2316_v27  ;;  %v3480_v26 = vld [vmem:[#allocation25_spill] sm:$0xff]  ;;  %v3481_v27 = vld [vmem:[#allocation26_spill] sm:$0xff] }
 0x153   :  { %919 = vmatprep.subr.mxu0 %v2321_v28  ;;  %990 = vmatprep.subr.mxu1 %v2328_v29  ;;  %v3482_v28 = vmov 0.0   ;;  %v3483_v29 = vld [vmem:[#allocation27_spill] sm:$0xff] }
 0x154   :  { %920 = vmatpush1.msra.mxu0 %v2335_v30  ;;  %991 = vmatpush1.msra.mxu1 %v2342_v31  ;;  %v3484_v31 = vld [vmem:[#allocation28_spill] sm:$0xff] }
 0x155   :  { %921 = vmatprep.subr.mxu0 %v2351_v33  ;;  %992 = vmatprep.subr.mxu1 %v2356_v34 }
 0x156   :  { %922 = vmatpush1.msra.mxu0 %v2363_v35  ;;  %993 = vmatpush1.msra.mxu1 %v2369_v36  ;;  %v3485_v36 = vld [vmem:[#allocation29_spill] sm:$0xff] }
 0x157   :  { %923 = vmatprep.subr.mxu0 %v2374_v37  ;;  %994 = vmatprep.subr.mxu1 %v2381_v38 }
 0x158   :  { %924 = vmatpush1.msra.mxu0 %v2388_v39  ;;  %995 = vmatpush1.msra.mxu1 %v2395_v40 }
 0x159   :  { %925 = vmatprep.subr.mxu0 %v2404_v42  ;;  %996 = vmatprep.subr.mxu1 %v2409_v43  ;;  %v3486_v42 = vld [vmem:[#allocation32_spill] sm:$0xff] }
 0x15a   :  { %926 = vmatpush1.msra.mxu0 %v2416_v44  ;;  %997 = vmatpush1.msra.mxu1 %v2422_v45  ;;  %v3487_v44 = vld [vmem:[#allocation30_spill] sm:$0xff] }
 0x15b   :  { %927 = vmatprep.subr.mxu0 %v2427_v46  ;;  %998 = vmatprep.subr.mxu1 %v3460_v5  ;;  %v2851_v5 = vld [vmem:[%s3343_s2 + $0x1a0] sm:$0xff] }
 0x15c   :  { %928 = vmatpush1.msra.mxu0 %v3461_v6  ;;  %999 = vmatpush1.msra.mxu1 %v3462_v7  ;;  %v2856_v6 = vld [vmem:[%s3343_s2 + $0x1b0] sm:$0xff]  ;;  %v2863_v7 = vld [vmem:[%s3343_s2 + $0x188] sm:$0xff] }
 0x15d   :  { %929 = vmatprep.subr.mxu0 %v3463_v8  ;;  %1000 = vmatprep.subr.mxu1 %v3464_v9  ;;  %v2868_v8 = vld [vmem:[%s3343_s2 + $0x198] sm:$0xff]  ;;  %v2875_v9 = vld [vmem:[%s3343_s2 + $0x180] sm:$0xff] }
 0x15e   :  { %930 = vmatpush1.msra.mxu0 %v3465_v10  ;;  %1001 = vmatpush1.msra.mxu1 %v3466_v11  ;;  %v2880_v10 = vld [vmem:[%s3343_s2 + $0x190] sm:$0xff]  ;;  %v2887_v11 = vld [vmem:[%s3343_s2 + $0x168] sm:$0xff] }
 0x15f   :  { %931 = vmatprep.subr.mxu0 %v3467_v12  ;;  %1002 = vmatprep.subr.mxu1 %v3468_v13  ;;  %v2892_v12 = vld [vmem:[%s3343_s2 + $0x178] sm:$0xff]  ;;  %v2899_v13 = vld [vmem:[%s3343_s2 + $0x160] sm:$0xff] }
 0x160   :  { %932 = vmatpush1.msra.mxu0 %v3469_v14  ;;  %1003 = vmatpush1.msra.mxu1 %v3470_v15  ;;  %v2904_v14 = vld [vmem:[%s3343_s2 + $0x170] sm:$0xff]  ;;  %v2911_v15 = vld [vmem:[%s3343_s2 + $0x148] sm:$0xff] }
 0x161   :  { %933 = vmatprep.subr.mxu0 %v3471_v16  ;;  %1004 = vmatprep.subr.mxu1 %v3472_v17  ;;  %v2916_v16 = vld [vmem:[%s3343_s2 + $0x158] sm:$0xff]  ;;  %v2923_v17 = vld [vmem:[%s3343_s2 + $0x140] sm:$0xff] }
 0x162   :  { %934 = vmatpush1.msra.mxu0 %v3473_v18  ;;  %1005 = vmatpush1.msra.mxu1 %v3474_v19  ;;  %v2928_v18 = vld [vmem:[%s3343_s2 + $0x150] sm:$0xff]  ;;  %v2935_v19 = vld [vmem:[%s3343_s2 + $0x128] sm:$0xff] }
 0x163   :  { %935 = vmatprep.subr.mxu0 %v3475_v20  ;;  %1006 = vmatprep.subr.mxu1 %v3476_v21  ;;  %v2940_v20 = vld [vmem:[%s3343_s2 + $0x138] sm:$0xff]  ;;  %v2947_v21 = vld [vmem:[%s3343_s2 + $0x120] sm:$0xff] }
 0x164   :  { %936 = vmatpush1.msra.mxu0 %v3477_v22  ;;  %1007 = vmatpush1.msra.mxu1 %v3478_v24  ;;  %v2952_v22 = vld [vmem:[%s3343_s2 + $0x130] sm:$0xff]  ;;  %v2959_v24 = vld [vmem:[%s3343_s2 + $0x108] sm:$0xff] }
 0x165   :  { %937 = vmatprep.subr.mxu0 %v3479_v25  ;;  %1008 = vmatprep.subr.mxu1 %v3480_v26  ;;  %v2964_v25 = vld [vmem:[%s3343_s2 + $0x118] sm:$0xff]  ;;  %v2969_v26 = vld [vmem:[%s3343_s2 + $0x100] sm:$0xff] }
 0x166   :  { %938 = vmatpush1.msra.mxu0 %v3481_v27  ;;  %971 = vmatprep.mubr.f32.mxu0 %v3482_v28  ;;  %v2976_v27 = vld [vmem:[%s3343_s2 + $0x110] sm:$0xff] }
 0x167   :  { %1009 = vmatpush1.msra.mxu1 %v3483_v29  ;;  %1042 = vmatprep.mubr.f32.mxu1 %v3482_v28  ;;  %v2981_v29 = vld [vmem:[%s3343_s2 + $0xe8] sm:$0xff] }
 0x168   :  { %1152 = vmatprep.subr.mxu0 %v2791_v2  ;;  %1223 = vmatprep.subr.mxu1 %v2796_v55 }
 0x207   :  { %v728_v30 = vpop.f32.mrf.mxu0  ;;  %v799_v38 = vpop.f32.mrf.mxu1 }
 0x208   :  { %v804_v33 = vadd.f32 %v728_v30, %v3484_v31  ;;  %v806_v45 = vadd.f32 %v799_v38, %v3487_v44  ;;  %v2986_v30 = vld [vmem:[%s3343_s2 + $0xf8] sm:$0xff]  ;;  %v2993_v31 = vld [vmem:[%s3343_s2 + $0xe0] sm:$0xff]  ;;  %v3027_v38 = vld [vmem:[%s3343_s2 + $0xa8] sm:$0xff] }
 0x209   :  { %v730_v34 = vpop.f32.mrf.mxu0  ;;  %v801_v40 = vpop.f32.mrf.mxu1  ;;  %v3056_v44 = vld [vmem:[%s3343_s2 + $0x98] sm:$0xff] }
 0x20a   :  { %v1824_v35 = vmul.f32 -1.442695, %v804_v33  ;;  %v805_v37 = vadd.f32 %v730_v34, %v3485_v36  ;;  %v807_v43 = vadd.f32 %v801_v40, %v3486_v42  ;;  %v2998_v33 = vld [vmem:[%s3343_s2 + $0xf0] sm:$0xff]  ;;  %v3003_v34 = vld [vmem:[%s3343_s2 + $0xc8] sm:$0xff]  ;;  %v3015_v36 = vld [vmem:[%s3343_s2 + $0xc0] sm:$0xff] }
 0x20b   :  { %v3039_v40 = vld [vmem:[%s3343_s2 + $0xa0] sm:$0xff]  ;;  %v3044_v42 = vld [vmem:[%s3343_s2 + $0xb0] sm:$0xff] }
 0x20c   :  { %1861 = vpow2.f32 %v1824_v35  ;;  %v1825_v39 = vmul.f32 -1.442695, %v805_v37  ;;  %v1826_v46 = vmul.f32 -1.442695, %v807_v43  ;;  %v3010_v35 = vld [vmem:[%s3343_s2 + $0xd8] sm:$0xff]  ;;  %v3020_v37 = vld [vmem:[%s3343_s2 + $0xd0] sm:$0xff] }
 0x20d   :  { %v3051_v43 = vld [vmem:[%s3343_s2 + $0x88] sm:$0xff] }
 0x20e   :  { %1863 = vpow2.f32 %v1825_v39  ;;  %v3032_v39 = vld [vmem:[%s3343_s2 + $0xb8] sm:$0xff] }
 0x20f   :  { %1865 = vtanh.f32 %v806_v45  ;;  %v3063_v45 = vld [vmem:[%s3343_s2 + $0x80] sm:$0xff] }
 0x210   :  { %1867 = vpow2.f32 %v1826_v46  ;;  %v3068_v46 = vld [vmem:[%s3343_s2 + $0x90] sm:$0xff] }
 0x211   :  { %3490 = vst [vmem:[#allocation7_spill] sm:$0xff] %v3068_v46 }
 0x219   :  { %v1862_v48 = vpop.eup %1861 }
 0x21a   :  { %v811_v23 = vadd.f32 1.0, %v1862_v48  ;;  %v3075_v48 = vld [vmem:[%s3343_s2 + $0x68] sm:$0xff] }
 0x21b   :  { %v1864_v56 = vpop.eup %1863  ;;  %3491 = vst [vmem:[#allocation8_spill] sm:$0xff] %v3075_v48 }
 0x21c   :  { %1869 = vrcp.f32 %v811_v23  ;;  %v817_v51 = vadd.f32 1.0, %v1864_v56  ;;  %v1866_v3 = vpop.eup %1865  ;;  %v3080_v23 = vld [vmem:[%s3343_s2 + $0x78] sm:$0xff]  ;;  %v3087_v56 = vld [vmem:[%s3343_s2 + $0x60] sm:$0xff] }
 0x21d   :  { %v1868_v47 = vpop.eup %1867  ;;  %3492 = vst [vmem:[#allocation9_spill] sm:$0xff] %v3080_v23  ;;  %3493 = vst [vmem:[#allocation10_spill] sm:$0xff] %v3087_v56 }
 0x21e   :  { %1871 = vrcp.f32 %v817_v51  ;;  %v824_v50 = vadd.f32 1.0, %v1868_v47  ;;  %v3092_v51 = vld [vmem:[%s3343_s2 + $0x70] sm:$0xff]  ;;  %v3104_v47 = vld [vmem:[%s3343_s2 + $0x58] sm:$0xff] }
 0x21f   :  { %3494 = vst [vmem:[#allocation11_spill] sm:$0xff] %v3092_v51  ;;  %3496 = vst [vmem:[#allocation13_spill] sm:$0xff] %v3104_v47 }
 0x220   :  { %1873 = vrcp.f32 %v824_v50  ;;  %v3128_v50 = vld [vmem:[%s3343_s2 + $0x38] sm:$0xff] }
 0x221   :  { %3500 = vst [vmem:[#allocation17_spill] sm:$0xff] %v3128_v50 }
 0x229   :  { %v1870_v0 = vpop.eup %1869 }
 0x22a   :  { %v829_v58 = vmul.f32 %v1870_v0, %v1866_v3  ;;  %v3099_v3 = vld [vmem:[%s3343_s2 + $0x48] sm:$0xff]  ;;  %v3111_v0 = vld [vmem:[%s3343_s2 + $0x40] sm:$0xff] }
 0x22b   :  { %v1872_v4 = vpop.eup %1871  ;;  %3495 = vst [vmem:[#allocation12_spill] sm:$0xff] %v3099_v3  ;;  %3497 = vst [vmem:[#allocation14_spill] sm:$0xff] %v3111_v0 }
 0x22c   :  { %v828_v49 = vmul.f32 %v1872_v4, %v2705_v32  ;;  %v2827_v32 = vld [vmem:[%s3343_s2 + $0x1c0] sm:$0xff]  ;;  %v3123_v4 = vld [vmem:[%s3343_s2 + $0x28] sm:$0xff] }
 0x22d   :  { %v1874_v60 = vpop.eup %1873  ;;  %3499 = vst [vmem:[#allocation16_spill] sm:$0xff] %v3123_v4 }
 0x22e   :  { %v2780_v62 = vadd.f32 %v829_v58, %v828_v49  ;;  %v3116_v58 = vld [vmem:[%s3343_s2 + $0x50] sm:$0xff]  ;;  %v3135_v49 = vld [vmem:[%s3343_s2 + $0x20] sm:$0xff] }
 0x22f   :  { %3498 = vst [vmem:[#allocation15_spill] sm:$0xff] %v3116_v58  ;;  %3501 = vst [vmem:[#allocation18_spill] sm:$0xff] %v3135_v49 }
 0x230   :  { %1875 = vtanh.f32 %v2780_v62 }
 0x23d   :  { %v1876_v63 = vpop.eup %1875 }
 0x23e   :  { %v832_v59 = vmul.f32 %v1876_v63, %v1874_v60  ;;  %v3140_v60 = vld [vmem:[%s3343_s2 + $0x30] sm:$0xff]  ;;  %v3147_v63 = vld [vmem:[%s3343_s2 + $0x8] sm:$0xff] }
 0x23f   :  { %3502 = vst [vmem:[#allocation19_spill] sm:$0xff] %v3140_v60  ;;  %3503 = vst [vmem:[#allocation20_spill] sm:$0xff] %v3147_v63 }
 0x240   :  { %1827 = vst [vmem:[%s3347_s6 + $0x8] sm:$0xff] %v832_v59  ;;  %972 = vmatmul.mubr.f32.vlgmr.msra.gmra.mxu0 %v832_v59  ;;  %1043 = vmatmul.mubr.f32.vlgmr.msra.gmra.mxu1 %v832_v59  ;;  %v3152_v59 = vld [vmem:[%s3343_s2 + $0x18] sm:$0xff] }
 0x241   :  { %1216 = vmatprep.mubr.f32.mxu0 %v3482_v28  ;;  %1287 = vmatprep.mubr.f32.mxu1 %v3482_v28  ;;  %3504 = vst [vmem:[#allocation21_spill] sm:$0xff] %v3152_v59  ;;  %v3159_v28 = vld [vmem:[%s3343_s2] sm:$0xff] }
 0x242   :  { %1153 = vmatpush1.msra.mxu0 %v2803_v57  ;;  %1224 = vmatpush1.msra.mxu1 %v2808_v1  ;;  %3505 = vst [vmem:[#allocation22_spill] sm:$0xff] %v3159_v28 }
 0x243   :  { %1154 = vmatprep.subr.mxu0 %v2815_v41  ;;  %1225 = vmatprep.subr.mxu1 %v2820_v53 }
 0x244   :  { %1155 = vmatpush1.msra.mxu0 %v2827_v32  ;;  %1226 = vmatpush1.msra.mxu1 %v2832_v54 }
 0x245   :  { %1156 = vmatprep.subr.mxu0 %v2839_v61  ;;  %1227 = vmatprep.subr.mxu1 %v2844_v52 }
 0x246   :  { %1157 = vmatpush1.msra.mxu0 %v2851_v5  ;;  %1228 = vmatpush1.msra.mxu1 %v2856_v6 }
 0x247   :  { %1158 = vmatprep.subr.mxu0 %v2863_v7  ;;  %1229 = vmatprep.subr.mxu1 %v2868_v8 }
 0x248   :  { %1159 = vmatpush1.msra.mxu0 %v2875_v9  ;;  %1230 = vmatpush1.msra.mxu1 %v2880_v10 }
 0x249   :  { %1160 = vmatprep.subr.mxu0 %v2887_v11  ;;  %1231 = vmatprep.subr.mxu1 %v2892_v12 }
 0x24a   :  { %1161 = vmatpush1.msra.mxu0 %v2899_v13  ;;  %1232 = vmatpush1.msra.mxu1 %v2904_v14 }
 0x24b   :  { %1162 = vmatprep.subr.mxu0 %v2911_v15  ;;  %1233 = vmatprep.subr.mxu1 %v2916_v16 }
 0x24c   :  { %1163 = vmatpush1.msra.mxu0 %v2923_v17  ;;  %1234 = vmatpush1.msra.mxu1 %v2928_v18 }
 0x24d   :  { %1164 = vmatprep.subr.mxu0 %v2935_v19  ;;  %1235 = vmatprep.subr.mxu1 %v2940_v20 }
 0x24e   :  { %1165 = vmatpush1.msra.mxu0 %v2947_v21  ;;  %1236 = vmatpush1.msra.mxu1 %v2952_v22 }
 0x24f   :  { %1166 = vmatprep.subr.mxu0 %v2959_v24  ;;  %1237 = vmatprep.subr.mxu1 %v2964_v25 }
 0x250   :  { %1167 = vmatpush1.msra.mxu0 %v2969_v26  ;;  %1238 = vmatpush1.msra.mxu1 %v2976_v27 }
 0x251   :  { %1168 = vmatprep.subr.mxu0 %v2981_v29  ;;  %1239 = vmatprep.subr.mxu1 %v2986_v30 }
 0x252   :  { %1169 = vmatpush1.msra.mxu0 %v2993_v31  ;;  %1240 = vmatpush1.msra.mxu1 %v2998_v33 }
 0x253   :  { %1170 = vmatprep.subr.mxu0 %v3003_v34  ;;  %1241 = vmatprep.subr.mxu1 %v3010_v35 }
 0x254   :  { %1171 = vmatpush1.msra.mxu0 %v3015_v36  ;;  %1242 = vmatpush1.msra.mxu1 %v3020_v37 }
 0x255   :  { %1172 = vmatprep.subr.mxu0 %v3027_v38  ;;  %1243 = vmatprep.subr.mxu1 %v3032_v39 }
 0x256   :  { %1173 = vmatpush1.msra.mxu0 %v3039_v40  ;;  %1244 = vmatpush1.msra.mxu1 %v3044_v42 }
 0x257   :  { %1174 = vmatprep.subr.mxu0 %v3051_v43  ;;  %1245 = vmatprep.subr.mxu1 %v3056_v44 }
 0x258   :  { %1175 = vmatpush1.msra.mxu0 %v3063_v45  ;;  %1246 = vmatpush1.msra.mxu1 %v3068_v46 }
 0x259   :  { %1176 = vmatprep.subr.mxu0 %v3075_v48  ;;  %1247 = vmatprep.subr.mxu1 %v3080_v23  ;;  %v3510_v23 = vld [vmem:[#allocation34_spill] sm:$0xff] }
 0x25a   :  { %1177 = vmatpush1.msra.mxu0 %v3087_v56  ;;  %1248 = vmatpush1.msra.mxu1 %v3092_v51  ;;  %v3509_v56 = vld [vmem:[#allocation36_spill] sm:$0xff] }
 0x25b   :  { %1178 = vmatprep.subr.mxu0 %v3099_v3  ;;  %1249 = vmatprep.subr.mxu1 %v3104_v47 }
 0x25c   :  { %1179 = vmatpush1.msra.mxu0 %v3111_v0  ;;  %1250 = vmatpush1.msra.mxu1 %v3116_v58  ;;  %v3164_v58 = vld [vmem:[%s3343_s2 + $0x10] sm:$0xff] }
 0x25d   :  { %1180 = vmatprep.subr.mxu0 %v3123_v4  ;;  %1251 = vmatprep.subr.mxu1 %v3128_v50  ;;  %3506 = vst [vmem:[#allocation23_spill] sm:$0xff] %v3164_v58  ;;  %v3507_v4 = vld [vmem:[#allocation31_spill] sm:$0xff] }
 0x25e   :  { %1181 = vmatpush1.msra.mxu0 %v3135_v49  ;;  %1252 = vmatpush1.msra.mxu1 %v3140_v60  ;;  %v3508_v49 = vld [vmem:[#allocation33_spill] sm:$0xff] }
 0x25f   :  { %1182 = vmatprep.subr.mxu0 %v3147_v63  ;;  %1253 = vmatprep.subr.mxu1 %v3152_v59 }
 0x260   :  { %1183 = vmatpush1.msra.mxu0 %v3159_v28  ;;  %1254 = vmatpush1.msra.mxu1 %v3164_v58 }
 0x261   :  { %1397 = vmatprep.subr.mxu0 %v2791_v2  ;;  %1468 = vmatprep.subr.mxu1 %v2796_v55 }
 0x300   :  { %v973_v50 = vpop.f32.mrf.mxu0  ;;  %v1044_v60 = vpop.f32.mrf.mxu1 }
 0x301   :  { %v1049_v0 = vadd.f32 %v973_v50, %v3507_v4  ;;  %v1051_v58 = vadd.f32 %v1044_v60, %v3510_v23  ;;  %v3516_v60 = vld [vmem:[#allocation12_spill] sm:$0xff] }
 0x302   :  { %v975_v47 = vpop.f32.mrf.mxu0  ;;  %v1046_v59 = vpop.f32.mrf.mxu1 }
 0x303   :  { %v1828_v3 = vmul.f32 -1.442695, %v1049_v0  ;;  %v1050_v51 = vadd.f32 %v975_v47, %v3508_v49  ;;  %v1052_v28 = vadd.f32 %v1046_v59, %v3509_v56  ;;  %v3517_v59 = vld [vmem:[#allocation13_spill] sm:$0xff] }
 0x305   :  { %1877 = vpow2.f32 %v1828_v3  ;;  %v1829_v63 = vmul.f32 -1.442695, %v1050_v51  ;;  %v1830_v48 = vmul.f32 -1.442695, %v1052_v28 }
 0x307   :  { %1879 = vpow2.f32 %v1829_v63 }
 0x308   :  { %1881 = vtanh.f32 %v1051_v58  ;;  %v3515_v58 = vld [vmem:[#allocation11_spill] sm:$0xff] }
 0x309   :  { %1883 = vpow2.f32 %v1830_v48  ;;  %v3514_v48 = vld [vmem:[#allocation10_spill] sm:$0xff] }
 0x312   :  { %v1878_v2 = vpop.eup %1877 }
 0x313   :  { %v1056_v46 = vadd.f32 1.0, %v1878_v2 }
 0x314   :  { %v1880_v55 = vpop.eup %1879 }
 0x315   :  { %1885 = vrcp.f32 %v1056_v46  ;;  %v1062_v4 = vadd.f32 1.0, %v1880_v55  ;;  %v1882_v0 = vpop.eup %1881  ;;  %v3512_v55 = vld [vmem:[#allocation8_spill] sm:$0xff]  ;;  %v3513_v46 = vld [vmem:[#allocation9_spill] sm:$0xff] }
 0x316   :  { %v1884_v47 = vpop.eup %1883 }
 0x317   :  { %1887 = vrcp.f32 %v1062_v4  ;;  %v1069_v49 = vadd.f32 1.0, %v1884_v47  ;;  %v3518_v4 = vld [vmem:[#allocation14_spill] sm:$0xff]  ;;  %v3520_v47 = vld [vmem:[#allocation16_spill] sm:$0xff] }
 0x319   :  { %1889 = vrcp.f32 %v1069_v49  ;;  %v3524_v49 = vld [vmem:[#allocation20_spill] sm:$0xff] }
 0x322   :  { %v1886_v3 = vpop.eup %1885 }
 0x323   :  { %v1074_v50 = vmul.f32 %v1886_v3, %v1882_v0  ;;  %v3519_v0 = vld [vmem:[#allocation15_spill] sm:$0xff]  ;;  %v3521_v3 = vld [vmem:[#allocation17_spill] sm:$0xff] }
 0x324   :  { %v1888_v51 = vpop.eup %1887 }
 0x325   :  { %v1073_v63 = vmul.f32 %v1888_v51, %v2780_v62  ;;  %v3511_v62 = vld [vmem:[#allocation7_spill] sm:$0xff] }
 0x326   :  { %v1890_v28 = vpop.eup %1889  ;;  %v3523_v51 = vld [vmem:[#allocation19_spill] sm:$0xff] }
 0x327   :  { %v3179_v56 = vadd.f32 %v1074_v50, %v1073_v63  ;;  %v3522_v50 = vld [vmem:[#allocation18_spill] sm:$0xff]  ;;  %v3525_v63 = vld [vmem:[#allocation21_spill] sm:$0xff] }
 0x329   :  { %1891 = vtanh.f32 %v3179_v56 }
 0x336   :  { %v1892_v2 = vpop.eup %1891 }
 0x337   :  { %v1077_v23 = vmul.f32 %v1892_v2, %v1890_v28  ;;  %v3526_v28 = vld [vmem:[#allocation22_spill] sm:$0xff]  ;;  %v3527_v2 = vmov 0.0  }
 0x339   :  { %1831 = vst [vmem:[%s3347_s6 + $0x10] sm:$0xff] %v1077_v23  ;;  %1217 = vmatmul.mubr.f32.vlgmr.msra.gmra.mxu0 %v1077_v23  ;;  %1288 = vmatmul.mubr.f32.vlgmr.msra.gmra.mxu1 %v1077_v23  ;;  %v3528_v23 = vld [vmem:[#allocation23_spill] sm:$0xff] }
 0x33a   :  { %1398 = vmatpush1.msra.mxu0 %v2803_v57  ;;  %1469 = vmatpush1.msra.mxu1 %v2808_v1 }
 0x33b   :  { %1399 = vmatprep.subr.mxu0 %v2815_v41  ;;  %1470 = vmatprep.subr.mxu1 %v2820_v53 }
 0x33c   :  { %1400 = vmatpush1.msra.mxu0 %v2827_v32  ;;  %1471 = vmatpush1.msra.mxu1 %v2832_v54 }
 0x33d   :  { %1401 = vmatprep.subr.mxu0 %v2839_v61  ;;  %1472 = vmatprep.subr.mxu1 %v2844_v52 }
 0x33e   :  { %1402 = vmatpush1.msra.mxu0 %v2851_v5  ;;  %1473 = vmatpush1.msra.mxu1 %v2856_v6 }
 0x33f   :  { %1403 = vmatprep.subr.mxu0 %v2863_v7  ;;  %1474 = vmatprep.subr.mxu1 %v2868_v8 }
 0x340   :  { %1404 = vmatpush1.msra.mxu0 %v2875_v9  ;;  %1475 = vmatpush1.msra.mxu1 %v2880_v10 }
 0x341   :  { %1405 = vmatprep.subr.mxu0 %v2887_v11  ;;  %1476 = vmatprep.subr.mxu1 %v2892_v12 }
 0x342   :  { %1406 = vmatpush1.msra.mxu0 %v2899_v13  ;;  %1477 = vmatpush1.msra.mxu1 %v2904_v14 }
 0x343   :  { %1407 = vmatprep.subr.mxu0 %v2911_v15  ;;  %1478 = vmatprep.subr.mxu1 %v2916_v16 }
 0x344   :  { %1408 = vmatpush1.msra.mxu0 %v2923_v17  ;;  %1479 = vmatpush1.msra.mxu1 %v2928_v18 }
 0x345   :  { %1409 = vmatprep.subr.mxu0 %v2935_v19  ;;  %1480 = vmatprep.subr.mxu1 %v2940_v20 }
 0x346   :  { %1410 = vmatpush1.msra.mxu0 %v2947_v21  ;;  %1481 = vmatpush1.msra.mxu1 %v2952_v22 }
 0x347   :  { %1411 = vmatprep.subr.mxu0 %v2959_v24  ;;  %1482 = vmatprep.subr.mxu1 %v2964_v25 }
 0x348   :  { %1412 = vmatpush1.msra.mxu0 %v2969_v26  ;;  %1483 = vmatpush1.msra.mxu1 %v2976_v27 }
 0x349   :  { %1413 = vmatprep.subr.mxu0 %v2981_v29  ;;  %1484 = vmatprep.subr.mxu1 %v2986_v30 }
 0x34a   :  { %1414 = vmatpush1.msra.mxu0 %v2993_v31  ;;  %1485 = vmatpush1.msra.mxu1 %v2998_v33 }
 0x34b   :  { %1415 = vmatprep.subr.mxu0 %v3003_v34  ;;  %1486 = vmatprep.subr.mxu1 %v3010_v35 }
 0x34c   :  { %1416 = vmatpush1.msra.mxu0 %v3015_v36  ;;  %1487 = vmatpush1.msra.mxu1 %v3020_v37 }
 0x34d   :  { %1417 = vmatprep.subr.mxu0 %v3027_v38  ;;  %1488 = vmatprep.subr.mxu1 %v3032_v39 }
 0x34e   :  { %1418 = vmatpush1.msra.mxu0 %v3039_v40  ;;  %1489 = vmatpush1.msra.mxu1 %v3044_v42 }
 0x34f   :  { %1419 = vmatprep.subr.mxu0 %v3051_v43  ;;  %1490 = vmatprep.subr.mxu1 %v3056_v44 }
 0x350   :  { %1420 = vmatpush1.msra.mxu0 %v3063_v45  ;;  %1491 = vmatpush1.msra.mxu1 %v3511_v62 }
 0x351   :  { %1421 = vmatprep.subr.mxu0 %v3512_v55  ;;  %1492 = vmatprep.subr.mxu1 %v3513_v46  ;;  %v3534_v46 = vld [vmem:[#allocation38_spill] sm:$0xff] }
 0x352   :  { %1422 = vmatpush1.msra.mxu0 %v3514_v48  ;;  %1493 = vmatpush1.msra.mxu1 %v3515_v58  ;;  %v3533_v48 = vld [vmem:[#allocation40_spill] sm:$0xff] }
 0x353   :  { %1423 = vmatprep.subr.mxu0 %v3516_v60  ;;  %1494 = vmatprep.subr.mxu1 %v3517_v59 }
 0x354   :  { %1424 = vmatpush1.msra.mxu0 %v3518_v4  ;;  %1495 = vmatpush1.msra.mxu1 %v3519_v0  ;;  %v3529_v0 = vld [vmem:[#allocation5_spill] sm:$0xff] }
 0x355   :  { %1425 = vmatprep.subr.mxu0 %v3520_v47  ;;  %1496 = vmatprep.subr.mxu1 %v3521_v3  ;;  %v3530_v47 = vld [vmem:[#allocation6_spill] sm:$0xff] }
 0x356   :  { %1426 = vmatpush1.msra.mxu0 %v3522_v50  ;;  %1497 = vmatpush1.msra.mxu1 %v3523_v51  ;;  %v3531_v50 = vld [vmem:[#allocation35_spill] sm:$0xff] }
 0x357   :  { %1427 = vmatprep.subr.mxu0 %v3524_v49  ;;  %1498 = vmatprep.subr.mxu1 %v3525_v63  ;;  %v3532_v49 = vld [vmem:[#allocation37_spill] sm:$0xff] }
 0x358   :  { %1428 = vmatpush1.msra.mxu0 %v3526_v28  ;;  %1461 = vmatprep.mubr.f32.mxu0 %v3527_v2 }
 0x359   :  { %1499 = vmatpush1.msra.mxu1 %v3528_v23  ;;  %1532 = vmatprep.mubr.f32.mxu1 %v3527_v2 }
 0x35a   :  { %1642 = vmatprep.subr.mxu0 %v3529_v0  ;;  %1713 = vmatprep.subr.mxu1 %v3530_v47 }
 0x3f9   :  { %v1218_v3 = vpop.f32.mrf.mxu0  ;;  %v1289_v63 = vpop.f32.mrf.mxu1 }
 0x3fa   :  { %v1294_v4 = vadd.f32 %v1218_v3, %v3531_v50  ;;  %v1296_v2 = vadd.f32 %v1289_v63, %v3534_v46 }
 0x3fb   :  { %v1220_v51 = vpop.f32.mrf.mxu0  ;;  %v1291_v58 = vpop.f32.mrf.mxu1 }
 0x3fc   :  { %v1832_v59 = vmul.f32 -1.442695, %v1294_v4  ;;  %v1295_v60 = vadd.f32 %v1220_v51, %v3532_v49  ;;  %v1297_v23 = vadd.f32 %v1291_v58, %v3533_v48 }
 0x3fe   :  { %1893 = vpow2.f32 %v1832_v59  ;;  %v1833_v28 = vmul.f32 -1.442695, %v1295_v60  ;;  %v1834_v55 = vmul.f32 -1.442695, %v1297_v23  ;;  %v3557_v23 = vld [vmem:[#allocation43_spill] sm:$0xff] }
 0x400   :  { %1895 = vpow2.f32 %v1833_v28 }
 0x401   :  { %1897 = vtanh.f32 %v1296_v2 }
 0x402   :  { %1899 = vpow2.f32 %v1834_v55 }
 0x40b   :  { %v1894_v0 = vpop.eup %1893 }
 0x40c   :  { %v1301_v62 = vadd.f32 1.0, %v1894_v0 }
 0x40d   :  { %v1896_v47 = vpop.eup %1895 }
 0x40e   :  { %1901 = vrcp.f32 %v1301_v62  ;;  %v1307_v3 = vadd.f32 1.0, %v1896_v47  ;;  %v1898_v4 = vpop.eup %1897 }
 0x40f   :  { %v1900_v50 = vpop.eup %1899 }
 0x410   :  { %1903 = vrcp.f32 %v1307_v3  ;;  %v1314_v49 = vadd.f32 1.0, %v1900_v50 }
 0x412   :  { %1905 = vrcp.f32 %v1314_v49  ;;  %v3559_v49 = vld [vmem:[#allocation47_spill] sm:$0xff] }
 0x41b   :  { %v1902_v59 = vpop.eup %1901 }
 0x41c   :  { %v1319_v51 = vmul.f32 %v1902_v59, %v1898_v4  ;;  %v3558_v4 = vld [vmem:[#allocation45_spill] sm:$0xff] }
 0x41d   :  { %v1904_v60 = vpop.eup %1903 }
 0x41e   :  { %v1318_v28 = vmul.f32 %v1904_v60, %v3179_v56 }
 0x41f   :  { %v1906_v46 = vpop.eup %1905 }
 0x420   :  { %v3256_v48 = vadd.f32 %v1319_v51, %v1318_v28 }
 0x422   :  { %1907 = vtanh.f32 %v3256_v48 }
 0x42f   :  { %v1908_v58 = vpop.eup %1907 }
 0x430   :  { %v1322_v63 = vmul.f32 %v1908_v58, %v1906_v46 }
 0x432   :  { %1835 = vst [vmem:[%s3347_s6 + $0x18] sm:$0xff] %v1322_v63  ;;  %1462 = vmatmul.mubr.f32.vlgmr.msra.gmra.mxu0 %v1322_v63  ;;  %1533 = vmatmul.mubr.f32.vlgmr.msra.gmra.mxu1 %v1322_v63 }
 0x433   :  { %1643 = vmatpush1.msra.mxu0 %v2803_v57  ;;  %1714 = vmatpush1.msra.mxu1 %v2808_v1  ;;  %v3535_v57 = vld [vmem:[#allocation7_spill] sm:$0xff]  ;;  %v3536_v1 = vld [vmem:[#allocation8_spill] sm:$0xff] }
 0x434   :  { %1644 = vmatprep.subr.mxu0 %v2815_v41  ;;  %1715 = vmatprep.subr.mxu1 %v2820_v53  ;;  %v3537_v41 = vld [vmem:[#allocation9_spill] sm:$0xff]  ;;  %v3538_v53 = vld [vmem:[#allocation10_spill] sm:$0xff] }
 0x435   :  { %1645 = vmatpush1.msra.mxu0 %v2827_v32  ;;  %1716 = vmatpush1.msra.mxu1 %v2832_v54  ;;  %v3539_v32 = vld [vmem:[#allocation11_spill] sm:$0xff]  ;;  %v3540_v54 = vld [vmem:[#allocation12_spill] sm:$0xff] }
 0x436   :  { %1646 = vmatprep.subr.mxu0 %v2839_v61  ;;  %1717 = vmatprep.subr.mxu1 %v2844_v52  ;;  %v3541_v61 = vld [vmem:[#allocation13_spill] sm:$0xff]  ;;  %v3542_v52 = vld [vmem:[#allocation14_spill] sm:$0xff] }
 0x437   :  { %1647 = vmatpush1.msra.mxu0 %v2851_v5  ;;  %1718 = vmatpush1.msra.mxu1 %v2856_v6  ;;  %v3543_v5 = vld [vmem:[#allocation15_spill] sm:$0xff]  ;;  %v3544_v6 = vld [vmem:[#allocation16_spill] sm:$0xff] }
 0x438   :  { %1648 = vmatprep.subr.mxu0 %v2863_v7  ;;  %1719 = vmatprep.subr.mxu1 %v2868_v8  ;;  %v3545_v7 = vld [vmem:[#allocation17_spill] sm:$0xff]  ;;  %v3546_v8 = vld [vmem:[#allocation18_spill] sm:$0xff] }
 0x439   :  { %1649 = vmatpush1.msra.mxu0 %v2875_v9  ;;  %1720 = vmatpush1.msra.mxu1 %v2880_v10  ;;  %v3547_v9 = vld [vmem:[#allocation19_spill] sm:$0xff]  ;;  %v3548_v10 = vld [vmem:[#allocation20_spill] sm:$0xff] }
 0x43a   :  { %1650 = vmatprep.subr.mxu0 %v2887_v11  ;;  %1721 = vmatprep.subr.mxu1 %v2892_v12  ;;  %v3549_v11 = vld [vmem:[#allocation21_spill] sm:$0xff]  ;;  %v3550_v12 = vld [vmem:[#allocation22_spill] sm:$0xff] }
 0x43b   :  { %1651 = vmatpush1.msra.mxu0 %v2899_v13  ;;  %1722 = vmatpush1.msra.mxu1 %v2904_v14  ;;  %v3551_v13 = vmov 0.0   ;;  %v3552_v14 = vld [vmem:[#allocation23_spill] sm:$0xff] }
 0x43c   :  { %1652 = vmatprep.subr.mxu0 %v2911_v15  ;;  %1723 = vmatprep.subr.mxu1 %v2916_v16  ;;  %v3553_v16 = vld [vmem:[#allocation39_spill] sm:$0xff] }
 0x43d   :  { %1653 = vmatpush1.msra.mxu0 %v2923_v17  ;;  %1724 = vmatpush1.msra.mxu1 %v2928_v18 }
 0x43e   :  { %1654 = vmatprep.subr.mxu0 %v2935_v19  ;;  %1725 = vmatprep.subr.mxu1 %v2940_v20  ;;  %v3554_v20 = vld [vmem:[#allocation41_spill] sm:$0xff] }
 0x43f   :  { %1655 = vmatpush1.msra.mxu0 %v2947_v21  ;;  %1726 = vmatpush1.msra.mxu1 %v2952_v22 }
 0x440   :  { %1656 = vmatprep.subr.mxu0 %v2959_v24  ;;  %1727 = vmatprep.subr.mxu1 %v2964_v25 }
 0x441   :  { %1657 = vmatpush1.msra.mxu0 %v2969_v26  ;;  %1728 = vmatpush1.msra.mxu1 %v2976_v27  ;;  %v3555_v26 = vld [vmem:[#allocation44_spill] sm:$0xff] }
 0x442   :  { %1658 = vmatprep.subr.mxu0 %v2981_v29  ;;  %1729 = vmatprep.subr.mxu1 %v2986_v30  ;;  %v3556_v29 = vld [vmem:[#allocation42_spill] sm:$0xff] }
 0x443   :  { %1659 = vmatpush1.msra.mxu0 %v2993_v31  ;;  %1730 = vmatpush1.msra.mxu1 %v2998_v33 }
 0x444   :  { %1660 = vmatprep.subr.mxu0 %v3003_v34  ;;  %1731 = vmatprep.subr.mxu1 %v3010_v35 }
 0x445   :  { %1661 = vmatpush1.msra.mxu0 %v3015_v36  ;;  %1732 = vmatpush1.msra.mxu1 %v3020_v37 }
 0x446   :  { %1662 = vmatprep.subr.mxu0 %v3027_v38  ;;  %1733 = vmatprep.subr.mxu1 %v3032_v39 }
 0x447   :  { %1663 = vmatpush1.msra.mxu0 %v3039_v40  ;;  %1734 = vmatpush1.msra.mxu1 %v3044_v42 }
 0x448   :  { %1664 = vmatprep.subr.mxu0 %v3051_v43  ;;  %1735 = vmatprep.subr.mxu1 %v3056_v44 }
 0x449   :  { %1665 = vmatpush1.msra.mxu0 %v3063_v45  ;;  %1736 = vmatpush1.msra.mxu1 %v3535_v57 }
 0x44a   :  { %1666 = vmatprep.subr.mxu0 %v3536_v1  ;;  %1737 = vmatprep.subr.mxu1 %v3537_v41 }
 0x44b   :  { %1667 = vmatpush1.msra.mxu0 %v3538_v53  ;;  %1738 = vmatpush1.msra.mxu1 %v3539_v32 }
 0x44c   :  { %1668 = vmatprep.subr.mxu0 %v3540_v54  ;;  %1739 = vmatprep.subr.mxu1 %v3541_v61 }
 0x44d   :  { %1669 = vmatpush1.msra.mxu0 %v3542_v52  ;;  %1740 = vmatpush1.msra.mxu1 %v3543_v5 }
 0x44e   :  { %1670 = vmatprep.subr.mxu0 %v3544_v6  ;;  %1741 = vmatprep.subr.mxu1 %v3545_v7 }
 0x44f   :  { %1671 = vmatpush1.msra.mxu0 %v3546_v8  ;;  %1742 = vmatpush1.msra.mxu1 %v3547_v9 }
 0x450   :  { %1672 = vmatprep.subr.mxu0 %v3548_v10  ;;  %1743 = vmatprep.subr.mxu1 %v3549_v11 }
 0x451   :  { %1673 = vmatpush1.msra.mxu0 %v3550_v12  ;;  %1706 = vmatprep.mubr.f32.mxu0 %v3551_v13 }
 0x452   :  { %1744 = vmatpush1.msra.mxu1 %v3552_v14  ;;  %1777 = vmatprep.mubr.f32.mxu1 %v3551_v13 }
 0x4f2   :  { %v1463_v15 = vpop.f32.mrf.mxu0  ;;  %v1534_v22 = vpop.f32.mrf.mxu1 }
 0x4f3   :  { %v1539_v17 = vadd.f32 %v1463_v15, %v3553_v16  ;;  %v1541_v30 = vadd.f32 %v1534_v22, %v3556_v29 }
 0x4f4   :  { %v1465_v18 = vpop.f32.mrf.mxu0  ;;  %v1536_v25 = vpop.f32.mrf.mxu1 }
 0x4f5   :  { %v1836_v19 = vmul.f32 -1.442695, %v1539_v17  ;;  %v1540_v21 = vadd.f32 %v1465_v18, %v3554_v20  ;;  %v1542_v27 = vadd.f32 %v1536_v25, %v3555_v26 }
 0x4f7   :  { %1909 = vpow2.f32 %v1836_v19  ;;  %v1837_v24 = vmul.f32 -1.442695, %v1540_v21  ;;  %v1838_v31 = vmul.f32 -1.442695, %v1542_v27 }
 0x4f9   :  { %1911 = vpow2.f32 %v1837_v24 }
 0x4fa   :  { %1913 = vtanh.f32 %v1541_v30 }
 0x4fb   :  { %1915 = vpow2.f32 %v1838_v31 }
 0x504   :  { %v1910_v33 = vpop.eup %1909 }
 0x505   :  { %v1546_v34 = vadd.f32 1.0, %v1910_v33 }
 0x506   :  { %v1912_v35 = vpop.eup %1911 }
 0x507   :  { %1917 = vrcp.f32 %v1546_v34  ;;  %v1552_v36 = vadd.f32 1.0, %v1912_v35  ;;  %v1914_v37 = vpop.eup %1913 }
 0x508   :  { %v1916_v38 = vpop.eup %1915 }
 0x509   :  { %1919 = vrcp.f32 %v1552_v36  ;;  %v1559_v43 = vadd.f32 1.0, %v1916_v38 }
 0x50b   :  { %1921 = vrcp.f32 %v1559_v43 }
 0x514   :  { %v1918_v39 = vpop.eup %1917 }
 0x515   :  { %v1564_v40 = vmul.f32 %v1918_v39, %v1914_v37 }
 0x516   :  { %v1920_v42 = vpop.eup %1919 }
 0x517   :  { %v1563_v44 = vmul.f32 %v1920_v42, %v3256_v48  ;;  %v3560_v48 = vld [vmem:[#allocation46_spill] sm:$0xff] }
 0x518   :  { %v1922_v56 = vpop.eup %1921 }
 0x519   :  { %v1565_v45 = vadd.f32 %v1564_v40, %v1563_v44 }
 0x51b   :  { %1923 = vtanh.f32 %v1565_v45 }
 0x528   :  { %v1924_v62 = vpop.eup %1923 }
 0x529   :  { %v1567_v55 = vmul.f32 %v1924_v62, %v1922_v56 }
 0x52b   :  { %1839 = vst [vmem:[%s3347_s6 + $0x20] sm:$0xff] %v1567_v55  ;;  %1707 = vmatmul.mubr.f32.vlgmr.msra.gmra.mxu0 %v1567_v55  ;;  %1778 = vmatmul.mubr.f32.vlgmr.msra.gmra.mxu1 %v1567_v55 }
 0x5eb   :  { %v1708_v2 = vpop.f32.mrf.mxu0  ;;  %v1779_v59 = vpop.f32.mrf.mxu1 }
 0x5ec   :  { %v1784_v0 = vadd.f32 %v1708_v2, %v3557_v23  ;;  %v1786_v46 = vadd.f32 %v1779_v59, %v3560_v48 }
 0x5ed   :  { %v1710_v47 = vpop.f32.mrf.mxu0  ;;  %v1781_v60 = vpop.f32.mrf.mxu1 }
 0x5ee   :  { %v1840_v3 = vmul.f32 -1.442695, %v1784_v0  ;;  %v1785_v50 = vadd.f32 %v1710_v47, %v3558_v4  ;;  %v1787_v28 = vadd.f32 %v1781_v60, %v3559_v49 }
 0x5f0   :  { %1925 = vpow2.f32 %v1840_v3  ;;  %v1841_v51 = vmul.f32 -1.442695, %v1785_v50  ;;  %v1842_v58 = vmul.f32 -1.442695, %v1787_v28 }
 0x5f2   :  { %1927 = vpow2.f32 %v1841_v51 }
 0x5f3   :  { %1929 = vtanh.f32 %v1786_v46 }
 0x5f4   :  { %1931 = vpow2.f32 %v1842_v58 }
 0x5fd   :  { %v1926_v63 = vpop.eup %1925 }
 0x5fe   :  { %v1791_v57 = vadd.f32 1.0, %v1926_v63 }
 0x5ff   :  { %v1928_v1 = vpop.eup %1927 }
 0x600   :  { %1933 = vrcp.f32 %v1791_v57  ;;  %v1797_v41 = vadd.f32 1.0, %v1928_v1  ;;  %v1930_v53 = vpop.eup %1929 }
 0x601   :  { %v1932_v32 = vpop.eup %1931 }
 0x602   :  { %1935 = vrcp.f32 %v1797_v41  ;;  %v1804_v5 = vadd.f32 1.0, %v1932_v32 }
 0x604   :  { %1937 = vrcp.f32 %v1804_v5 }
 0x60d   :  { %v1934_v54 = vpop.eup %1933 }
 0x60e   :  { %v1809_v61 = vmul.f32 %v1934_v54, %v1930_v53 }
 0x60f   :  { %v1936_v52 = vpop.eup %1935 }
 0x610   :  { %v1808_v6 = vmul.f32 %v1936_v52, %v1565_v45 }
 0x611   :  { %v1938_v8 = vpop.eup %1937 }
 0x612   :  { %v1810_v7 = vadd.f32 %v1809_v61, %v1808_v6 }
 0x614   :  { %1939 = vtanh.f32 %v1810_v7 }
 0x621   :  { %v1940_v9 = vpop.eup %1939 }
 0x622   :  { %v1812_v10 = vmul.f32 %v1940_v9, %v1938_v8 }
 0x624   :  { %1843 = vst [vmem:[%s3347_s6 + $0x28] sm:$0xff] %v1812_v10 }

// kernel: forward.3
= control target key start
LH: loop header
LB: loop body
LE: loop exit
PB: predicated region body
PF: predicated region fallthrough
CT: control target
= control target key end

     0   :  { %s3290_s27 = smov 0   ;;  %s3292_s28 = smov 0   ;;  %s4590_s0 = inlined_call_operand.vmem [shape: f32[2,8,8,128], index: 0, kind: input, shape index: {}]   ;;  %s4591_s1 = inlined_call_operand.vmem [shape: f32[2,128,512], index: 1, kind: input, shape index: {}]   ;;  %s4592_s2 = inlined_call_operand.vmem [shape: f32[2,128,512], index: 2, kind: input, shape index: {}]   ;;  %s4593_s3 = inlined_call_operand.vmem [shape: f32[2,1,512], index: 3, kind: input, shape index: {}]   ;;  %s4594_s4 = inlined_call_operand.vmem [shape: f32[2,8,128], index: 4, kind: input, shape index: {}]   ;;  %s4595_s5 = inlined_call_operand.vmem [shape: f32[2,8,128], index: 5, kind: input, shape index: {}]   ;;  %s4596_s6 = inlined_call_operand.vmem [shape: s32[8,1], index: 6, kind: input, shape index: {}]   ;;  %s4597_s7 = inlined_call_operand.vmem [shape: f32[2,8,128], index: 7, kind: output, shape index: {0}]   ;;  %s4598_s8 = inlined_call_operand.vmem [shape: f32[2,8,128], index: 8, kind: output, shape index: {1}]  }
   0x1   :  { %s3294_s29 = smov 0  }
   0x2 LB: > { %s31_s30 = sadd.s32 1, %s3237_s28  ;;  %p3021_p0 = scmp.ge.s32.totalorder %s3241_s29, 1  ;;  %s3241_s29 = sphi %s3294_s29, %s19_s29   ;;  %s3237_s28 = sphi %s3292_s28, %s4866_s28   ;;  %s3233_s27 = sphi %s3290_s27, %s4865_s27  }
   0x3   : > { %p33_p1 = scmp.ge.s32.totalorder %s31_s30, 2  ;;  %p331_p2 = scmp.lt.s32.totalorder %s3241_s29, 3 }
   0x5   : > { %s4868_s30 = smov (%p33_p1, %s31_s30), 0  ;;  %p332_p3 = pnand %p3021_p0, %p331_p2 }
   0x7   : > { %335 = sbr.rel (%p332_p3) target bundleno = 2092 (0x82c), region = 48 }
   0xc   : > { %p395_p4 = scmp.lt.s32.totalorder %s3233_s27, 1  ;;  %v3311_v0 = vld [vmem:[%s4596_s6] sm:$0xff]  ;;  %v4602_v1 = vmov 0.0   ;;  %v4599_v2 = vmov 0  }
   0xd   : > { %4673 = vst [vmem:[#allocation5_spill] sm:$0xff] %v3311_v0  ;;  %602 = vmatprep.mubr.f32.mxu0 %v4602_v1  ;;  %715 = vmatprep.mubr.f32.mxu1 %v4602_v1  ;;  %vm1041_vm0 = vcmp.eq.s32.totalorder %v3311_v0, 0 }
   0xe   : > { %s4870_s27 = smov (!%p395_p4, %s3233_s27), 1  ;;  %3088 = vset.pattern.permute.xlu0 %v4599_v2  ;;  %v1043_v3 = vsel %vm1041_vm0, 1, %v4599_v2  ;;  %3089 = vset.pattern.permute.xlu1 %v4599_v2 }
   0xf   : > { %1045 = vperm.xlu0 %3088, %v1043_v3   ;;  %s3060_s11 = sshll.u32 %s4870_s27, 9  ;;  %s3059_s15 = sshll.u32 %s4870_s27, 6 }
  0x10   : > { %s3327_s14 = scalar_lea.vmem %s4591_s1, %s3060_s11  ;;  %s3393_s18 = scalar_lea.vmem %s4590_s0, %s3059_s15 }
  0x11   : > { %v513_v4 = vld [vmem:[%s3327_s14 + $0x1e8] sm:$0xff]  ;;  %v515_v5 = vld [vmem:[%s3327_s14 + $0x1f8] sm:$0xff]  ;;  %v512_v6 = vld [vmem:[%s3327_s14 + $0x1e0] sm:$0xff]  ;;  %s3400_s21 = scalar_lea.vmem %s4592_s2, %s3060_s11  ;;  %s3649_s22 = sshll.u32 %s4870_s27, 3 }
  0x12   : > { %538 = vmatprep.subr.mxu0 %v513_v4  ;;  %651 = vmatprep.subr.mxu1 %v515_v5  ;;  %v514_v7 = vld [vmem:[%s3327_s14 + $0x1f0] sm:$0xff]  ;;  %v509_v8 = vld [vmem:[%s3327_s14 + $0x1c8] sm:$0xff]  ;;  %v511_v9 = vld [vmem:[%s3327_s14 + $0x1d8] sm:$0xff]  ;;  %s421_s25 = scalar_lea.vmem %s4594_s4, %s3649_s22  ;;  %s3028_s26 = sshll.u32 %s4870_s27, 2 }
  0x13   : > { %539 = vmatpush1.msra.mxu0 %v512_v6  ;;  %652 = vmatpush1.msra.mxu1 %v514_v7  ;;  %v508_v10 = vld [vmem:[%s3327_s14 + $0x1c0] sm:$0xff]  ;;  %v510_v11 = vld [vmem:[%s3327_s14 + $0x1d0] sm:$0xff]  ;;  %v505_v12 = vld [vmem:[%s3327_s14 + $0x1a8] sm:$0xff]  ;;  %s417_s11 = scalar_lea.vmem %s4593_s3, %s3028_s26  ;;  %s425_s13 = scalar_lea.vmem %s4595_s5, %s3649_s22 }
  0x14   : > { %540 = vmatprep.subr.mxu0 %v509_v8  ;;  %653 = vmatprep.subr.mxu1 %v511_v9  ;;  %v507_v13 = vld [vmem:[%s3327_s14 + $0x1b8] sm:$0xff]  ;;  %v504_v14 = vld [vmem:[%s3327_s14 + $0x1a0] sm:$0xff]  ;;  %v506_v15 = vld [vmem:[%s3327_s14 + $0x1b0] sm:$0xff]  ;;  %s433_s23 = scalar_lea.vmem %s4598_s8, %s3649_s22  ;;  %s429_s26 = scalar_lea.vmem %s4597_s7, %s3649_s22 }
  0x15   : > { %541 = vmatpush1.msra.mxu0 %v508_v10  ;;  %654 = vmatpush1.msra.mxu1 %v510_v11  ;;  %v501_v16 = vld [vmem:[%s3327_s14 + $0x188] sm:$0xff]  ;;  %v503_v17 = vld [vmem:[%s3327_s14 + $0x198] sm:$0xff]  ;;  %v500_v18 = vld [vmem:[%s3327_s14 + $0x180] sm:$0xff] }
  0x16   : > { %542 = vmatprep.subr.mxu0 %v505_v12  ;;  %655 = vmatprep.subr.mxu1 %v507_v13  ;;  %v502_v19 = vld [vmem:[%s3327_s14 + $0x190] sm:$0xff]  ;;  %v497_v20 = vld [vmem:[%s3327_s14 + $0x168] sm:$0xff]  ;;  %v499_v21 = vld [vmem:[%s3327_s14 + $0x178] sm:$0xff] }
  0x17   : > { %543 = vmatpush1.msra.mxu0 %v504_v14  ;;  %656 = vmatpush1.msra.mxu1 %v506_v15  ;;  %v496_v22 = vld [vmem:[%s3327_s14 + $0x160] sm:$0xff]  ;;  %v498_v23 = vld [vmem:[%s3327_s14 + $0x170] sm:$0xff]  ;;  %v493_v24 = vld [vmem:[%s3327_s14 + $0x148] sm:$0xff] }
  0x18   : > { %544 = vmatprep.subr.mxu0 %v501_v16  ;;  %657 = vmatprep.subr.mxu1 %v503_v17  ;;  %v495_v25 = vld [vmem:[%s3327_s14 + $0x158] sm:$0xff]  ;;  %v492_v26 = vld [vmem:[%s3327_s14 + $0x140] sm:$0xff]  ;;  %v494_v27 = vld [vmem:[%s3327_s14 + $0x150] sm:$0xff] }
  0x19   : > { %545 = vmatpush1.msra.mxu0 %v500_v18  ;;  %658 = vmatpush1.msra.mxu1 %v502_v19  ;;  %v489_v28 = vld [vmem:[%s3327_s14 + $0x128] sm:$0xff]  ;;  %v491_v29 = vld [vmem:[%s3327_s14 + $0x138] sm:$0xff]  ;;  %v488_v30 = vld [vmem:[%s3327_s14 + $0x120] sm:$0xff] }
  0x1a   : > { %546 = vmatprep.subr.mxu0 %v497_v20  ;;  %659 = vmatprep.subr.mxu1 %v499_v21  ;;  %v490_v31 = vld [vmem:[%s3327_s14 + $0x130] sm:$0xff]  ;;  %v485_v32 = vld [vmem:[%s3327_s14 + $0x108] sm:$0xff]  ;;  %v487_v33 = vld [vmem:[%s3327_s14 + $0x118] sm:$0xff] }
  0x1b   : > { %547 = vmatpush1.msra.mxu0 %v496_v22  ;;  %660 = vmatpush1.msra.mxu1 %v498_v23  ;;  %v484_v34 = vld [vmem:[%s3327_s14 + $0x100] sm:$0xff]  ;;  %v486_v35 = vld [vmem:[%s3327_s14 + $0x110] sm:$0xff]  ;;  %v481_v36 = vld [vmem:[%s3327_s14 + $0xe8] sm:$0xff] }
  0x1c   : > { %548 = vmatprep.subr.mxu0 %v493_v24  ;;  %661 = vmatprep.subr.mxu1 %v495_v25  ;;  %v483_v37 = vld [vmem:[%s3327_s14 + $0xf8] sm:$0xff]  ;;  %v480_v38 = vld [vmem:[%s3327_s14 + $0xe0] sm:$0xff]  ;;  %v482_v39 = vld [vmem:[%s3327_s14 + $0xf0] sm:$0xff] }
  0x1d   : > { %549 = vmatpush1.msra.mxu0 %v492_v26  ;;  %662 = vmatpush1.msra.mxu1 %v494_v27  ;;  %v477_v40 = vld [vmem:[%s3327_s14 + $0xc8] sm:$0xff]  ;;  %v479_v41 = vld [vmem:[%s3327_s14 + $0xd8] sm:$0xff]  ;;  %v476_v42 = vld [vmem:[%s3327_s14 + $0xc0] sm:$0xff] }
  0x1e   : > { %550 = vmatprep.subr.mxu0 %v489_v28  ;;  %663 = vmatprep.subr.mxu1 %v491_v29  ;;  %v478_v43 = vld [vmem:[%s3327_s14 + $0xd0] sm:$0xff]  ;;  %v473_v44 = vld [vmem:[%s3327_s14 + $0xa8] sm:$0xff]  ;;  %v475_v45 = vld [vmem:[%s3327_s14 + $0xb8] sm:$0xff] }
  0x1f   : > { %551 = vmatpush1.msra.mxu0 %v488_v30  ;;  %664 = vmatpush1.msra.mxu1 %v490_v31  ;;  %v472_v46 = vld [vmem:[%s3327_s14 + $0xa0] sm:$0xff]  ;;  %v474_v47 = vld [vmem:[%s3327_s14 + $0xb0] sm:$0xff]  ;;  %v469_v48 = vld [vmem:[%s3327_s14 + $0x88] sm:$0xff] }
  0x20   : > { %552 = vmatprep.subr.mxu0 %v485_v32  ;;  %665 = vmatprep.subr.mxu1 %v487_v33  ;;  %v471_v49 = vld [vmem:[%s3327_s14 + $0x98] sm:$0xff]  ;;  %v468_v50 = vld [vmem:[%s3327_s14 + $0x80] sm:$0xff]  ;;  %v470_v51 = vld [vmem:[%s3327_s14 + $0x90] sm:$0xff] }
  0x21   : > { %553 = vmatpush1.msra.mxu0 %v484_v34  ;;  %666 = vmatpush1.msra.mxu1 %v486_v35  ;;  %v465_v52 = vld [vmem:[%s3327_s14 + $0x68] sm:$0xff]  ;;  %v467_v53 = vld [vmem:[%s3327_s14 + $0x78] sm:$0xff]  ;;  %v464_v54 = vld [vmem:[%s3327_s14 + $0x60] sm:$0xff] }
  0x22   : > { %554 = vmatprep.subr.mxu0 %v481_v36  ;;  %667 = vmatprep.subr.mxu1 %v483_v37  ;;  %v466_v55 = vld [vmem:[%s3327_s14 + $0x70] sm:$0xff]  ;;  %v461_v56 = vld [vmem:[%s3327_s14 + $0x48] sm:$0xff]  ;;  %v463_v57 = vld [vmem:[%s3327_s14 + $0x58] sm:$0xff] }
  0x23   : > { %555 = vmatpush1.msra.mxu0 %v480_v38  ;;  %668 = vmatpush1.msra.mxu1 %v482_v39  ;;  %v460_v58 = vld [vmem:[%s3327_s14 + $0x40] sm:$0xff]  ;;  %v462_v59 = vld [vmem:[%s3327_s14 + $0x50] sm:$0xff]  ;;  %v457_v60 = vld [vmem:[%s3327_s14 + $0x28] sm:$0xff] }
  0x24   : > { %556 = vmatprep.subr.mxu0 %v477_v40  ;;  %669 = vmatprep.subr.mxu1 %v479_v41  ;;  %v459_v61 = vld [vmem:[%s3327_s14 + $0x38] sm:$0xff]  ;;  %v456_v62 = vld [vmem:[%s3327_s14 + $0x20] sm:$0xff]  ;;  %v458_v63 = vld [vmem:[%s3327_s14 + $0x30] sm:$0xff] }
  0x25   : > { %557 = vmatpush1.msra.mxu0 %v476_v42  ;;  %670 = vmatpush1.msra.mxu1 %v478_v43  ;;  %v453_v3 = vld [vmem:[%s3327_s14 + $0x8] sm:$0xff]  ;;  %v455_v4 = vld [vmem:[%s3327_s14 + $0x18] sm:$0xff]  ;;  %v452_v5 = vld [vmem:[%s3327_s14] sm:$0xff] }
  0x26   : > { %558 = vmatprep.subr.mxu0 %v473_v44  ;;  %671 = vmatprep.subr.mxu1 %v475_v45  ;;  %v454_v6 = vld [vmem:[%s3327_s14 + $0x10] sm:$0xff]  ;;  %v444_v7 = vld [vmem:[%s3393_s18] sm:$0xff]  ;;  %v3408_v8 = vld [vmem:[%s3400_s21 + $0x1e8] sm:$0xff] }
  0x27   : > { %559 = vmatpush1.msra.mxu0 %v472_v46  ;;  %672 = vmatpush1.msra.mxu1 %v474_v47  ;;  %v3411_v9 = vld [vmem:[%s3400_s21 + $0x1f8] sm:$0xff]  ;;  %v3414_v10 = vld [vmem:[%s3400_s21 + $0x1e0] sm:$0xff]  ;;  %v3417_v11 = vld [vmem:[%s3400_s21 + $0x1f0] sm:$0xff] }
  0x28   : > { %560 = vmatprep.subr.mxu0 %v469_v48  ;;  %673 = vmatprep.subr.mxu1 %v471_v49  ;;  %v3420_v12 = vld [vmem:[%s3400_s21 + $0x1c8] sm:$0xff]  ;;  %v3423_v13 = vld [vmem:[%s3400_s21 + $0x1d8] sm:$0xff]  ;;  %v3430_v14 = vld [vmem:[%s3400_s21 + $0x1c0] sm:$0xff] }
  0x29   : > { %561 = vmatpush1.msra.mxu0 %v468_v50  ;;  %674 = vmatpush1.msra.mxu1 %v470_v51  ;;  %v3433_v15 = vld [vmem:[%s3400_s21 + $0x1d0] sm:$0xff]  ;;  %v445_v16 = vld [vmem:[%s3393_s18 + $0x8] sm:$0xff]  ;;  %v3444_v18 = vld [vmem:[%s3400_s21 + $0x1b8] sm:$0xff] }
  0x2a   : > { %562 = vmatprep.subr.mxu0 %v465_v52  ;;  %675 = vmatprep.subr.mxu1 %v467_v53  ;;  %v3441_v17 = vld [vmem:[%s3400_s21 + $0x1a8] sm:$0xff]  ;;  %v3449_v19 = vld [vmem:[%s3400_s21 + $0x1a0] sm:$0xff]  ;;  %v3452_v20 = vld [vmem:[%s3400_s21 + $0x1b0] sm:$0xff] }
  0x2b   : > { %563 = vmatpush1.msra.mxu0 %v464_v54  ;;  %676 = vmatpush1.msra.mxu1 %v466_v55  ;;  %v3455_v21 = vld [vmem:[%s3400_s21 + $0x188] sm:$0xff]  ;;  %v3458_v22 = vld [vmem:[%s3400_s21 + $0x198] sm:$0xff]  ;;  %v3465_v23 = vld [vmem:[%s3400_s21 + $0x180] sm:$0xff] }
  0x2c   : > { %564 = vmatprep.subr.mxu0 %v461_v56  ;;  %677 = vmatprep.subr.mxu1 %v463_v57  ;;  %v3468_v24 = vld [vmem:[%s3400_s21 + $0x190] sm:$0xff]  ;;  %v3476_v26 = vld [vmem:[%s3400_s21 + $0x168] sm:$0xff]  ;;  %v3479_v27 = vld [vmem:[%s3400_s21 + $0x178] sm:$0xff] }
  0x2d   : > { %565 = vmatpush1.msra.mxu0 %v460_v58  ;;  %678 = vmatpush1.msra.mxu1 %v462_v59  ;;  %v446_v25 = vld [vmem:[%s3393_s18 + $0x10] sm:$0xff]  ;;  %v3484_v28 = vld [vmem:[%s3400_s21 + $0x160] sm:$0xff]  ;;  %v3490_v30 = vld [vmem:[%s3400_s21 + $0x148] sm:$0xff] }
  0x2e   : > { %566 = vmatprep.subr.mxu0 %v457_v60  ;;  %679 = vmatprep.subr.mxu1 %v459_v61  ;;  %v3487_v29 = vld [vmem:[%s3400_s21 + $0x170] sm:$0xff]  ;;  %v3493_v31 = vld [vmem:[%s3400_s21 + $0x158] sm:$0xff]  ;;  %v3500_v32 = vld [vmem:[%s3400_s21 + $0x140] sm:$0xff] }
  0x2f   : > { %567 = vmatpush1.msra.mxu0 %v456_v62  ;;  %680 = vmatpush1.msra.mxu1 %v458_v63  ;;  %v3503_v33 = vld [vmem:[%s3400_s21 + $0x150] sm:$0xff]  ;;  %v447_v34 = vld [vmem:[%s3393_s18 + $0x18] sm:$0xff]  ;;  %v3511_v35 = vld [vmem:[%s3400_s21 + $0x128] sm:$0xff] }
  0x30   : > { %568 = vmatprep.subr.mxu0 %v453_v3  ;;  %681 = vmatprep.subr.mxu1 %v455_v4  ;;  %v3514_v36 = vld [vmem:[%s3400_s21 + $0x138] sm:$0xff]  ;;  %v3519_v37 = vld [vmem:[%s3400_s21 + $0x120] sm:$0xff]  ;;  %v3522_v38 = vld [vmem:[%s3400_s21 + $0x130] sm:$0xff] }
  0x31   : > { %569 = vmatpush1.msra.mxu0 %v452_v5  ;;  %682 = vmatpush1.msra.mxu1 %v454_v6  ;;  %v3525_v39 = vld [vmem:[%s3400_s21 + $0x108] sm:$0xff]  ;;  %v3528_v40 = vld [vmem:[%s3400_s21 + $0x118] sm:$0xff]  ;;  %v3535_v41 = vld [vmem:[%s3400_s21 + $0x100] sm:$0xff] }
  0x32   : > { %603 = vmatmul.mubr.f32.vlgmr.msra.gmra.mxu0 %v444_v7  ;;  %716 = vmatmul.mubr.f32.vlgmr.msra.gmra.mxu1 %v444_v7  ;;  %v3538_v42 = vld [vmem:[%s3400_s21 + $0x110] sm:$0xff]  ;;  %v448_v43 = vld [vmem:[%s3393_s18 + $0x20] sm:$0xff]  ;;  %v3546_v44 = vld [vmem:[%s3400_s21 + $0xe8] sm:$0xff] }
  0x33   : > { %866 = vmatprep.subr.mxu0 %v3408_v8  ;;  %937 = vmatprep.subr.mxu1 %v3411_v9  ;;  %v3549_v45 = vld [vmem:[%s3400_s21 + $0xf8] sm:$0xff]  ;;  %v3554_v46 = vld [vmem:[%s3400_s21 + $0xe0] sm:$0xff]  ;;  %v3557_v47 = vld [vmem:[%s3400_s21 + $0xf0] sm:$0xff] }
  0x34   : > { %867 = vmatpush1.msra.mxu0 %v3414_v10  ;;  %938 = vmatpush1.msra.mxu1 %v3417_v11  ;;  %v3560_v48 = vld [vmem:[%s3400_s21 + $0xc8] sm:$0xff]  ;;  %v3563_v49 = vld [vmem:[%s3400_s21 + $0xd8] sm:$0xff]  ;;  %v3570_v50 = vld [vmem:[%s3400_s21 + $0xc0] sm:$0xff] }
  0x35   : > { %868 = vmatprep.subr.mxu0 %v3420_v12  ;;  %939 = vmatprep.subr.mxu1 %v3423_v13  ;;  %v3573_v51 = vld [vmem:[%s3400_s21 + $0xd0] sm:$0xff]  ;;  %v449_v52 = vld [vmem:[%s3393_s18 + $0x28] sm:$0xff]  ;;  %v3584_v54 = vld [vmem:[%s3400_s21 + $0xb8] sm:$0xff] }
  0x36   : > { %608 = vmatprep.mubr.f32.mxu0 %v4602_v1  ;;  %721 = vmatprep.mubr.f32.mxu1 %v4602_v1  ;;  %v3581_v53 = vld [vmem:[%s3400_s21 + $0xa8] sm:$0xff]  ;;  %v3589_v55 = vld [vmem:[%s3400_s21 + $0xa0] sm:$0xff]  ;;  %v3592_v56 = vld [vmem:[%s3400_s21 + $0xb0] sm:$0xff] }
  0x37   : > { %869 = vmatpush1.msra.mxu0 %v3430_v14  ;;  %940 = vmatpush1.msra.mxu1 %v3433_v15  ;;  %v3595_v57 = vld [vmem:[%s3400_s21 + $0x88] sm:$0xff]  ;;  %v3598_v58 = vld [vmem:[%s3400_s21 + $0x98] sm:$0xff]  ;;  %v3605_v59 = vld [vmem:[%s3400_s21 + $0x80] sm:$0xff] }
  0x38   : > { %609 = vmatmul.mubr.f32.gmra.mxu0 %v445_v16  ;;  %722 = vmatmul.mubr.f32.gmra.mxu1 %v445_v16  ;;  %4674 = vst [vmem:[#allocation6_spill] sm:$0xff] %v3595_v57  ;;  %4675 = vst [vmem:[#allocation7_spill] sm:$0xff] %v3598_v58  ;;  %v3608_v60 = vld [vmem:[%s3400_s21 + $0x90] sm:$0xff]  ;;  %v3616_v62 = vld [vmem:[%s3400_s21 + $0x68] sm:$0xff] }
  0x39   : > { %870 = vmatprep.subr.mxu0 %v3441_v17  ;;  %941 = vmatprep.subr.mxu1 %v3444_v18  ;;  %4676 = vst [vmem:[#allocation8_spill] sm:$0xff] %v3605_v59  ;;  %4677 = vst [vmem:[#allocation9_spill] sm:$0xff] %v3608_v60  ;;  %v450_v61 = vld [vmem:[%s3393_s18 + $0x30] sm:$0xff]  ;;  %v3619_v63 = vld [vmem:[%s3400_s21 + $0x78] sm:$0xff] }
  0x3a   : > { %871 = vmatpush1.msra.mxu0 %v3449_v19  ;;  %942 = vmatpush1.msra.mxu1 %v3452_v20  ;;  %4678 = vst [vmem:[#allocation10_spill] sm:$0xff] %v3616_v62  ;;  %4679 = vst [vmem:[#allocation11_spill] sm:$0xff] %v3619_v63  ;;  %v3624_v3 = vld [vmem:[%s3400_s21 + $0x60] sm:$0xff]  ;;  %v3627_v4 = vld [vmem:[%s3400_s21 + $0x70] sm:$0xff] }
  0x3b   : > { %872 = vmatprep.subr.mxu0 %v3455_v21  ;;  %943 = vmatprep.subr.mxu1 %v3458_v22  ;;  %4680 = vst [vmem:[#allocation12_spill] sm:$0xff] %v3624_v3  ;;  %4681 = vst [vmem:[#allocation13_spill] sm:$0xff] %v3627_v4  ;;  %v3630_v5 = vld [vmem:[%s3400_s21 + $0x48] sm:$0xff]  ;;  %v3633_v6 = vld [vmem:[%s3400_s21 + $0x58] sm:$0xff] }
  0x3c   : > { %614 = vmatprep.mubr.f32.mxu0 %v4602_v1  ;;  %727 = vmatprep.mubr.f32.mxu1 %v4602_v1  ;;  %4682 = vst [vmem:[#allocation14_spill] sm:$0xff] %v3630_v5  ;;  %4683 = vst [vmem:[#allocation15_spill] sm:$0xff] %v3633_v6  ;;  %v3640_v7 = vld [vmem:[%s3400_s21 + $0x40] sm:$0xff]  ;;  %v3643_v16 = vld [vmem:[%s3400_s21 + $0x50] sm:$0xff] }
  0x3d   : > { %873 = vmatpush1.msra.mxu0 %v3465_v23  ;;  %944 = vmatpush1.msra.mxu1 %v3468_v24  ;;  %4684 = vst [vmem:[#allocation16_spill] sm:$0xff] %v3640_v7  ;;  %4685 = vst [vmem:[#allocation17_spill] sm:$0xff] %v3643_v16  ;;  %v3668_v2 = vld [vmem:[%s3400_s21 + $0x8] sm:$0xff]  ;;  %v3671_v0 = vld [vmem:[%s3400_s21 + $0x18] sm:$0xff] }
  0x3e   : > { %615 = vmatmul.mubr.f32.gmra.mxu0 %v446_v25  ;;  %728 = vmatmul.mubr.f32.gmra.mxu1 %v446_v25  ;;  %v451_v25 = vld [vmem:[%s3393_s18 + $0x38] sm:$0xff]  ;;  %4690 = vst [vmem:[#allocation22_spill] sm:$0xff] %v3668_v2  ;;  %4691 = vst [vmem:[#allocation23_spill] sm:$0xff] %v3671_v0 }
  0x3f   : > { %874 = vmatprep.subr.mxu0 %v3476_v26  ;;  %945 = vmatprep.subr.mxu1 %v3479_v27 }
  0x40   : > { %875 = vmatpush1.msra.mxu0 %v3484_v28  ;;  %946 = vmatpush1.msra.mxu1 %v3487_v29 }
  0x41   : > { %876 = vmatprep.subr.mxu0 %v3490_v30  ;;  %947 = vmatprep.subr.mxu1 %v3493_v31 }
  0x42   : > { %620 = vmatprep.mubr.f32.mxu0 %v4602_v1  ;;  %733 = vmatprep.mubr.f32.mxu1 %v4602_v1 }
  0x43   : > { %877 = vmatpush1.msra.mxu0 %v3500_v32  ;;  %948 = vmatpush1.msra.mxu1 %v3503_v33 }
  0x44   : > { %621 = vmatmul.mubr.f32.gmra.mxu0 %v447_v34  ;;  %734 = vmatmul.mubr.f32.gmra.mxu1 %v447_v34  ;;  %v3654_v34 = vld [vmem:[%s3400_s21 + $0x28] sm:$0xff] }
  0x45   : > { %878 = vmatprep.subr.mxu0 %v3511_v35  ;;  %949 = vmatprep.subr.mxu1 %v3514_v36  ;;  %4686 = vst [vmem:[#allocation18_spill] sm:$0xff] %v3654_v34 }
  0x46   : > { %879 = vmatpush1.msra.mxu0 %v3519_v37  ;;  %950 = vmatpush1.msra.mxu1 %v3522_v38 }
  0x47   : > { %880 = vmatprep.subr.mxu0 %v3525_v39  ;;  %951 = vmatprep.subr.mxu1 %v3528_v40 }
  0x48   : > { %626 = vmatprep.mubr.f32.mxu0 %v4602_v1  ;;  %739 = vmatprep.mubr.f32.mxu1 %v4602_v1 }
  0x49   : > { %881 = vmatpush1.msra.mxu0 %v3535_v41  ;;  %952 = vmatpush1.msra.mxu1 %v3538_v42 }
  0x4a   : > { %627 = vmatmul.mubr.f32.gmra.mxu0 %v448_v43  ;;  %740 = vmatmul.mubr.f32.gmra.mxu1 %v448_v43  ;;  %v3657_v43 = vld [vmem:[%s3400_s21 + $0x38] sm:$0xff] }
  0x4b   : > { %882 = vmatprep.subr.mxu0 %v3546_v44  ;;  %953 = vmatprep.subr.mxu1 %v3549_v45  ;;  %4687 = vst [vmem:[#allocation19_spill] sm:$0xff] %v3657_v43 }
  0x4c   : > { %883 = vmatpush1.msra.mxu0 %v3554_v46  ;;  %954 = vmatpush1.msra.mxu1 %v3557_v47 }
  0x4d   : > { %884 = vmatprep.subr.mxu0 %v3560_v48  ;;  %955 = vmatprep.subr.mxu1 %v3563_v49 }
  0x4e   : > { %632 = vmatprep.mubr.f32.mxu0 %v4602_v1  ;;  %745 = vmatprep.mubr.f32.mxu1 %v4602_v1 }
  0x4f   : > { %885 = vmatpush1.msra.mxu0 %v3570_v50  ;;  %956 = vmatpush1.msra.mxu1 %v3573_v51 }
  0x50   : > { %633 = vmatmul.mubr.f32.gmra.mxu0 %v449_v52  ;;  %746 = vmatmul.mubr.f32.gmra.mxu1 %v449_v52  ;;  %v3662_v52 = vld [vmem:[%s3400_s21 + $0x20] sm:$0xff] }
  0x51   : > { %886 = vmatprep.subr.mxu0 %v3581_v53  ;;  %957 = vmatprep.subr.mxu1 %v3584_v54  ;;  %4688 = vst [vmem:[#allocation20_spill] sm:$0xff] %v3662_v52 }
  0x52   : > { %887 = vmatpush1.msra.mxu0 %v3589_v55  ;;  %958 = vmatpush1.msra.mxu1 %v3592_v56 }
  0x53   : > { %888 = vmatprep.subr.mxu0 %v3595_v57  ;;  %959 = vmatprep.subr.mxu1 %v3598_v58 }
  0x54   : > { %638 = vmatprep.mubr.f32.mxu0 %v4602_v1  ;;  %751 = vmatprep.mubr.f32.mxu1 %v4602_v1 }
  0x55   : > { %889 = vmatpush1.msra.mxu0 %v3605_v59  ;;  %960 = vmatpush1.msra.mxu1 %v3608_v60 }
  0x56   : > { %639 = vmatmul.mubr.f32.gmra.mxu0 %v450_v61  ;;  %752 = vmatmul.mubr.f32.gmra.mxu1 %v450_v61  ;;  %v3665_v61 = vld [vmem:[%s3400_s21 + $0x30] sm:$0xff] }
  0x57   : > { %890 = vmatprep.subr.mxu0 %v3616_v62  ;;  %961 = vmatprep.subr.mxu1 %v3619_v63  ;;  %4689 = vst [vmem:[#allocation21_spill] sm:$0xff] %v3665_v61 }
  0x58   : > { %891 = vmatpush1.msra.mxu0 %v3624_v3  ;;  %962 = vmatpush1.msra.mxu1 %v3627_v4 }
  0x59   : > { %892 = vmatprep.subr.mxu0 %v3630_v5  ;;  %963 = vmatprep.subr.mxu1 %v3633_v6 }
  0x5a   : > { %644 = vmatprep.mubr.f32.mxu0 %v4602_v1  ;;  %757 = vmatprep.mubr.f32.mxu1 %v4602_v1  ;;  %v3680_v1 = vld [vmem:[%s3400_s21] sm:$0xff] }
  0x5b   : > { %893 = vmatpush1.msra.mxu0 %v3640_v7  ;;  %964 = vmatpush1.msra.mxu1 %v3643_v16  ;;  %4692 = vst [vmem:[#allocation24_spill] sm:$0xff] %v3680_v1  ;;  %v3685_v16 = vld [vmem:[%s3400_s21 + $0x10] sm:$0xff]  ;;  %v4694_v7 = vmov 0.0  }
  0x5c   : > { %645 = vmatmul.mubr.f32.gmra.mxu0 %v451_v25  ;;  %758 = vmatmul.mubr.f32.gmra.mxu1 %v451_v25  ;;  %4693 = vst [vmem:[#allocation25_spill] sm:$0xff] %v3685_v16  ;;  %v438_v25 = vld [vmem:[%s421_s25] sm:$0xff] }
  0x5d   : > { %894 = vmatprep.subr.mxu0 %v3654_v34  ;;  %965 = vmatprep.subr.mxu1 %v3657_v43 }
  0x5e   : > { %895 = vmatpush1.msra.mxu0 %v3662_v52  ;;  %966 = vmatpush1.msra.mxu1 %v3665_v61 }
  0x5f   : > { %896 = vmatprep.subr.mxu0 %v3668_v2  ;;  %967 = vmatprep.subr.mxu1 %v3671_v0 }
  0x60   : > { %897 = vmatpush1.msra.mxu0 %v3680_v1  ;;  %930 = vmatprep.mubr.f32.mxu0 %v4694_v7 }
  0x61   : > { %968 = vmatpush1.msra.mxu1 %v3685_v16  ;;  %1001 = vmatprep.mubr.f32.mxu1 %v4694_v7 }
  0x62   : > { %931 = vmatmul.mubr.f32.vlgmr.msra.gmra.mxu0 %v438_v25  ;;  %1002 = vmatmul.mubr.f32.vlgmr.msra.gmra.mxu1 %v438_v25  ;;  %v4695_v25 = vld [vmem:[#allocation16_spill] sm:$0xff] }
  0x63   : > { %1123 = vmatprep.subr.mxu0 %v3408_v8  ;;  %1194 = vmatprep.subr.mxu1 %v3411_v9 }
  0x64   : > { %1124 = vmatpush1.msra.mxu0 %v3414_v10  ;;  %1195 = vmatpush1.msra.mxu1 %v3417_v11 }
  0x65   : > { %1125 = vmatprep.subr.mxu0 %v3420_v12  ;;  %1196 = vmatprep.subr.mxu1 %v3423_v13 }
  0x66   : > { %1126 = vmatpush1.msra.mxu0 %v3430_v14  ;;  %1197 = vmatpush1.msra.mxu1 %v3433_v15 }
  0x67   : > { %1127 = vmatprep.subr.mxu0 %v3441_v17  ;;  %1198 = vmatprep.subr.mxu1 %v3444_v18 }
  0x68   : > { %1128 = vmatpush1.msra.mxu0 %v3449_v19  ;;  %1199 = vmatpush1.msra.mxu1 %v3452_v20 }
  0x69   : > { %1129 = vmatprep.subr.mxu0 %v3455_v21  ;;  %1200 = vmatprep.subr.mxu1 %v3458_v22 }
  0x6a   : > { %1130 = vmatpush1.msra.mxu0 %v3465_v23  ;;  %1201 = vmatpush1.msra.mxu1 %v3468_v24 }
  0x6b   : > { %1131 = vmatprep.subr.mxu0 %v3476_v26  ;;  %1202 = vmatprep.subr.mxu1 %v3479_v27 }
  0x6c   : > { %1132 = vmatpush1.msra.mxu0 %v3484_v28  ;;  %1203 = vmatpush1.msra.mxu1 %v3487_v29 }
  0x6d   : > { %1133 = vmatprep.subr.mxu0 %v3490_v30  ;;  %1204 = vmatprep.subr.mxu1 %v3493_v31 }
  0x6e   : > { %1134 = vmatpush1.msra.mxu0 %v3500_v32  ;;  %1205 = vmatpush1.msra.mxu1 %v3503_v33 }
  0x6f   : > { %1135 = vmatprep.subr.mxu0 %v3511_v35  ;;  %1206 = vmatprep.subr.mxu1 %v3514_v36 }
  0x70   : > { %1136 = vmatpush1.msra.mxu0 %v3519_v37  ;;  %1207 = vmatpush1.msra.mxu1 %v3522_v38 }
  0x71   : > { %1137 = vmatprep.subr.mxu0 %v3525_v39  ;;  %1208 = vmatprep.subr.mxu1 %v3528_v40 }
  0x72   : > { %1138 = vmatpush1.msra.mxu0 %v3535_v41  ;;  %1209 = vmatpush1.msra.mxu1 %v3538_v42 }
  0x73   : > { %1139 = vmatprep.subr.mxu0 %v3546_v44  ;;  %1210 = vmatprep.subr.mxu1 %v3549_v45 }
  0x74   : > { %1140 = vmatpush1.msra.mxu0 %v3554_v46  ;;  %1211 = vmatpush1.msra.mxu1 %v3557_v47 }
  0x75   : > { %1141 = vmatprep.subr.mxu0 %v3560_v48  ;;  %1212 = vmatprep.subr.mxu1 %v3563_v49 }
  0x76   : > { %1142 = vmatpush1.msra.mxu0 %v3570_v50  ;;  %1213 = vmatpush1.msra.mxu1 %v3573_v51 }
  0x77   : > { %1143 = vmatprep.subr.mxu0 %v3581_v53  ;;  %1214 = vmatprep.subr.mxu1 %v3584_v54 }
  0x78   : > { %1144 = vmatpush1.msra.mxu0 %v3589_v55  ;;  %1215 = vmatpush1.msra.mxu1 %v3592_v56 }
  0x79   : > { %1145 = vmatprep.subr.mxu0 %v3595_v57  ;;  %1216 = vmatprep.subr.mxu1 %v3598_v58  ;;  %v4696_v57 = vld [vmem:[#allocation17_spill] sm:$0xff] }
  0x7a   : > { %1146 = vmatpush1.msra.mxu0 %v3605_v59  ;;  %1217 = vmatpush1.msra.mxu1 %v3608_v60 }
  0x7b   : > { %1147 = vmatprep.subr.mxu0 %v3616_v62  ;;  %1218 = vmatprep.subr.mxu1 %v3619_v63 }
  0x7c   : > { %1148 = vmatpush1.msra.mxu0 %v3624_v3  ;;  %1219 = vmatpush1.msra.mxu1 %v3627_v4 }
  0x7d   : > { %1149 = vmatprep.subr.mxu0 %v3630_v5  ;;  %1220 = vmatprep.subr.mxu1 %v3633_v6 }
  0x7e   : > { %1150 = vmatpush1.msra.mxu0 %v4695_v25  ;;  %1221 = vmatpush1.msra.mxu1 %v4696_v57 }
  0x7f   : > { %1151 = vmatprep.subr.mxu0 %v3654_v34  ;;  %1222 = vmatprep.subr.mxu1 %v3657_v43  ;;  %v4697_v43 = vld [vmem:[#allocation5_spill] sm:$0xff] }
  0x80   : > { %1152 = vmatpush1.msra.mxu0 %v3662_v52  ;;  %1223 = vmatpush1.msra.mxu1 %v3665_v61  ;;  %vm1299_vm1 = vcmp.eq.s32.totalorder %v4697_v43, 1  ;;  %v4698_v52 = vmov 0   ;;  %v516_v34 = vld [vmem:[%s417_s11] sm:$0xf] }
  0x81   : > { %1153 = vmatprep.subr.mxu0 %v3668_v2  ;;  %1224 = vmatprep.subr.mxu1 %v3671_v0  ;;  %v1301_v61 = vsel %vm1299_vm1, 1, %v4698_v52  ;;  %v518_v2 = vlaneseq }
  0x82   : > { %1154 = vmatpush1.msra.mxu0 %v3680_v1  ;;  %1187 = vmatprep.mubr.f32.mxu0 %v4694_v7 }
  0x83   : > { %1225 = vmatpush1.msra.mxu1 %v3685_v16  ;;  %1258 = vmatprep.mubr.f32.mxu1 %v4694_v7  ;;  %v519_v0 = vshrl.u32 %v518_v2, 7 }
  0x84   : > { %1381 = vmatprep.subr.mxu0 %v3408_v8  ;;  %1452 = vmatprep.subr.mxu1 %v3411_v9 }
  0x85   : > { %1303 = vperm.xlu0 %3088, %v1301_v61   ;;  %v520_v7 = vsub.s32 0, %v519_v0  ;;  %v528_v8 = vsub.s32 2, %v519_v0  ;;  %v524_v52 = vsub.s32 1, %v519_v0  ;;  %v532_v61 = vsub.s32 3, %v519_v0 }
  0x87   : > { %v521_v57 = vrot.slane %v516_v34, %v520_v7  ;;  %v3775_v25 = vrot.slane %v516_v34, %v528_v8  ;;  %v525_v5 = vrot.slane %v516_v34, %v524_v52  ;;  %v3777_v4 = vrot.slane %v516_v34, %v532_v61 }
  0xf2   : > { %v3767_v1 = vpop.f32.mrf.mxu0  ;;  %v3769_v16 = vpop.f32.mrf.mxu1 }
  0xf4   : > { %v3771_v9 = vpop.f32.mrf.mxu0  ;;  %v3773_v43 = vpop.f32.mrf.mxu1 }
  0xf8   : > { %v610_v2 = vpop.f32.mrf.mxu0  ;;  %v723_v6 = vpop.f32.mrf.mxu1 }
  0xf9   : > { %v3779_v3 = vadd.f32 %v610_v2, %v521_v57  ;;  %v3782_v63 = vadd.f32 %v723_v6, %v3775_v25 }
  0xfa   : > { %v612_v62 = vpop.f32.mrf.mxu0  ;;  %v725_v60 = vpop.f32.mrf.mxu1 }
  0xfb   : > { %4699 = vst [vmem:[#allocation5_spill] sm:$0xff] %v3779_v3  ;;  %4700 = vst [vmem:[#allocation26_spill] sm:$0xff] %v3782_v63  ;;  %v3784_v59 = vadd.f32 %v612_v62, %v525_v5  ;;  %v3787_v58 = vadd.f32 %v725_v60, %v3777_v4 }
  0xfd   : > { %4701 = vst [vmem:[#allocation27_spill] sm:$0xff] %v3784_v59  ;;  %4702 = vst [vmem:[#allocation28_spill] sm:$0xff] %v3787_v58 }
  0xfe   : > { %v616_v0 = vpop.f32.mrf.mxu0  ;;  %v729_v7 = vpop.f32.mrf.mxu1 }
  0xff   : > { %v3789_v8 = vadd.f32 %v616_v0, %v521_v57  ;;  %v3792_v52 = vadd.f32 %v729_v7, %v3775_v25 }
 0x100   : > { %v618_v34 = vpop.f32.mrf.mxu0  ;;  %v731_v61 = vpop.f32.mrf.mxu1 }
 0x101   : > { %4703 = vst [vmem:[#allocation29_spill] sm:$0xff] %v3789_v8  ;;  %4704 = vst [vmem:[#allocation30_spill] sm:$0xff] %v3792_v52  ;;  %v3794_v2 = vadd.f32 %v618_v34, %v525_v5  ;;  %v3797_v6 = vadd.f32 %v731_v61, %v3777_v4 }
 0x103   : > { %4705 = vst [vmem:[#allocation31_spill] sm:$0xff] %v3794_v2  ;;  %4706 = vst [vmem:[#allocation32_spill] sm:$0xff] %v3797_v6 }
 0x104   : > { %v622_v63 = vpop.f32.mrf.mxu0  ;;  %v735_v62 = vpop.f32.mrf.mxu1 }
 0x105   : > { %v3799_v59 = vadd.f32 %v622_v63, %v521_v57  ;;  %v3802_v60 = vadd.f32 %v735_v62, %v3775_v25 }
 0x106   : > { %v624_v58 = vpop.f32.mrf.mxu0  ;;  %v737_v0 = vpop.f32.mrf.mxu1 }
 0x107   : > { %4707 = vst [vmem:[#allocation33_spill] sm:$0xff] %v3799_v59  ;;  %4708 = vst [vmem:[#allocation34_spill] sm:$0xff] %v3802_v60  ;;  %v3804_v8 = vadd.f32 %v624_v58, %v525_v5  ;;  %v3807_v7 = vadd.f32 %v737_v0, %v3777_v4 }
 0x109   : > { %4709 = vst [vmem:[#allocation35_spill] sm:$0xff] %v3804_v8  ;;  %4710 = vst [vmem:[#allocation36_spill] sm:$0xff] %v3807_v7 }
 0x10a   : > { %v628_v52 = vpop.f32.mrf.mxu0  ;;  %v741_v34 = vpop.f32.mrf.mxu1 }
 0x10b   : > { %v3809_v2 = vadd.f32 %v628_v52, %v521_v57  ;;  %v3812_v61 = vadd.f32 %v741_v34, %v3775_v25 }
 0x10c   : > { %v630_v6 = vpop.f32.mrf.mxu0  ;;  %v743_v63 = vpop.f32.mrf.mxu1 }
 0x10d   : > { %4711 = vst [vmem:[#allocation37_spill] sm:$0xff] %v3809_v2  ;;  %4712 = vst [vmem:[#allocation38_spill] sm:$0xff] %v3812_v61  ;;  %v3814_v59 = vadd.f32 %v630_v6, %v525_v5  ;;  %v3817_v62 = vadd.f32 %v743_v63, %v3777_v4 }
 0x10f   : > { %4713 = vst [vmem:[#allocation39_spill] sm:$0xff] %v3814_v59  ;;  %4714 = vst [vmem:[#allocation40_spill] sm:$0xff] %v3817_v62 }
 0x110   : > { %v634_v60 = vpop.f32.mrf.mxu0  ;;  %v747_v58 = vpop.f32.mrf.mxu1 }
 0x111   : > { %v3819_v8 = vadd.f32 %v634_v60, %v521_v57  ;;  %v3822_v0 = vadd.f32 %v747_v58, %v3775_v25 }
 0x112   : > { %v636_v7 = vpop.f32.mrf.mxu0  ;;  %v749_v52 = vpop.f32.mrf.mxu1 }
 0x113   : > { %4715 = vst [vmem:[#allocation41_spill] sm:$0xff] %v3819_v8  ;;  %4716 = vst [vmem:[#allocation42_spill] sm:$0xff] %v3822_v0  ;;  %v3824_v2 = vadd.f32 %v636_v7, %v525_v5  ;;  %v3827_v34 = vadd.f32 %v749_v52, %v3777_v4 }
 0x115   : > { %4717 = vst [vmem:[#allocation43_spill] sm:$0xff] %v3824_v2  ;;  %4718 = vst [vmem:[#allocation44_spill] sm:$0xff] %v3827_v34 }
 0x116   : > { %v640_v61 = vpop.f32.mrf.mxu0  ;;  %v753_v6 = vpop.f32.mrf.mxu1 }
 0x117   : > { %v3829_v59 = vadd.f32 %v640_v61, %v521_v57  ;;  %v3832_v63 = vadd.f32 %v753_v6, %v3775_v25 }
 0x118   : > { %v642_v62 = vpop.f32.mrf.mxu0  ;;  %v755_v60 = vpop.f32.mrf.mxu1 }
 0x119   : > { %4719 = vst [vmem:[#allocation45_spill] sm:$0xff] %v3829_v59  ;;  %4720 = vst [vmem:[#allocation46_spill] sm:$0xff] %v3832_v63  ;;  %v3834_v8 = vadd.f32 %v642_v62, %v525_v5  ;;  %v3837_v58 = vadd.f32 %v755_v60, %v3777_v4  ;;  %v605_v62 = vadd.f32 %v3767_v1, %v521_v57 }
 0x11a   : > { %v607_v60 = vadd.f32 %v3771_v9, %v525_v5  ;;  %v718_v1 = vadd.f32 %v3769_v16, %v3775_v25 }
 0x11b   : > { %4721 = vst [vmem:[#allocation47_spill] sm:$0xff] %v3834_v8  ;;  %4722 = vst [vmem:[#allocation48_spill] sm:$0xff] %v3837_v58 }
 0x11c   : > { %v646_v0 = vpop.f32.mrf.mxu0  ;;  %v759_v7 = vpop.f32.mrf.mxu1 }
 0x11d   : > { %v3839_v2 = vadd.f32 %v646_v0, %v521_v57  ;;  %v3842_v52 = vadd.f32 %v759_v7, %v3775_v25 }
 0x11e   : > { %v648_v34 = vpop.f32.mrf.mxu0  ;;  %v761_v61 = vpop.f32.mrf.mxu1 }
 0x11f   : > { %4723 = vst [vmem:[#allocation49_spill] sm:$0xff] %v3839_v2  ;;  %4724 = vst [vmem:[#allocation50_spill] sm:$0xff] %v3842_v52  ;;  %v3844_v59 = vadd.f32 %v648_v34, %v525_v5  ;;  %v3847_v6 = vadd.f32 %v761_v61, %v3777_v4  ;;  %v720_v34 = vadd.f32 %v3773_v43, %v3777_v4  ;;  %v440_v43 = vld [vmem:[%s425_s13] sm:$0xff] }
 0x121   : > { %4725 = vst [vmem:[#allocation51_spill] sm:$0xff] %v3844_v59  ;;  %4726 = vst [vmem:[#allocation52_spill] sm:$0xff] %v3847_v6  ;;  %v4190_v59 = vld [vmem:[%s3400_s21 + $0x20] sm:$0xff] }
 0x122   : > { %v932_v8 = vpop.f32.mrf.mxu0  ;;  %v1003_v2 = vpop.f32.mrf.mxu1 }
 0x123   : > { %v1008_v58 = vadd.f32 %v932_v8, %v605_v62  ;;  %v1010_v5 = vadd.f32 %v1003_v2, %v718_v1 }
 0x124   : > { %v934_v63 = vpop.f32.mrf.mxu0  ;;  %v1005_v52 = vpop.f32.mrf.mxu1 }
 0x125   : > { %v3033_v3 = vmul.f32 -1.442695, %v1008_v58  ;;  %v1009_v0 = vadd.f32 %v934_v63, %v607_v60  ;;  %v1011_v61 = vadd.f32 %v1005_v52, %v720_v34 }
 0x127   : > { %3090 = vpow2.f32 %v3033_v3  ;;  %v3034_v7 = vmul.f32 -1.442695, %v1009_v0  ;;  %v3035_v57 = vmul.f32 -1.442695, %v1011_v61 }
 0x129   : > { %3092 = vpow2.f32 %v3034_v7 }
 0x12a   : > { %3094 = vpow2.f32 %v3035_v57 }
 0x134   : > { %v3091_v6 = vpop.eup %3090 }
 0x135   : > { %v1015_v9 = vadd.f32 1.0, %v3091_v6 }
 0x136   : > { %v3093_v8 = vpop.eup %3092 }
 0x137   : > { %3096 = vrcp.f32 %v1015_v9  ;;  %v1021_v3 = vadd.f32 1.0, %v3093_v8  ;;  %v3095_v63 = vpop.eup %3094 }
 0x138   : > { %3098 = vtanh.f32 %v1010_v5  ;;  %v1028_v25 = vadd.f32 1.0, %v3095_v63 }
 0x139   : > { %3100 = vrcp.f32 %v1021_v3 }
 0x13a   : > { %3102 = vrcp.f32 %v1028_v25 }
 0x144   : > { %v3097_v4 = vpop.eup %3096 }
 0x145   : > { %v3859_v58 = vpop.eup %3098 }
 0x146   : > { %v3101_v16 = vpop.eup %3100  ;;  %v1033_v2 = vmul.f32 %v3859_v58, %v3097_v4 }
 0x147   : > { %v1032_v52 = vmul.f32 %v3101_v16, %v440_v43  ;;  %v3103_v62 = vpop.eup %3102 }
 0x149   : > { %v3862_v6 = vadd.f32 %v1033_v2, %v1032_v52 }
 0x14b   : > { %3104 = vtanh.f32 %v3862_v6 }
 0x158   : > { %v3105_v60 = vpop.eup %3104 }
 0x159   : > { %v3865_v0 = vmul.f32 %v3105_v60, %v3103_v62  ;;  %v3961_v60 = vld [vmem:[%s3400_s21 + $0x1f8] sm:$0xff] }
 0x15b   : > { %1188 = vmatmul.mubr.f32.vlgmr.msra.gmra.mxu0 %v3865_v0  ;;  %1259 = vmatmul.mubr.f32.vlgmr.msra.gmra.mxu1 %v3865_v0 }
 0x15c   : > { %1382 = vmatpush1.msra.mxu0 %v3414_v10  ;;  %1453 = vmatpush1.msra.mxu1 %v3417_v11  ;;  %v4727_v10 = vld [vmem:[#allocation6_spill] sm:$0xff]  ;;  %v4728_v11 = vld [vmem:[#allocation7_spill] sm:$0xff] }
 0x15d   : > { %1383 = vmatprep.subr.mxu0 %v3420_v12  ;;  %1454 = vmatprep.subr.mxu1 %v3423_v13  ;;  %v4729_v12 = vld [vmem:[#allocation8_spill] sm:$0xff]  ;;  %v4730_v13 = vld [vmem:[#allocation9_spill] sm:$0xff]  ;;  %4754 = vst [vmem:[#allocation7_spill] sm:$0xff] %v3961_v60 }
 0x15e   : > { %1384 = vmatpush1.msra.mxu0 %v3430_v14  ;;  %1455 = vmatpush1.msra.mxu1 %v3433_v15  ;;  %v4731_v14 = vld [vmem:[#allocation10_spill] sm:$0xff]  ;;  %v4732_v15 = vld [vmem:[#allocation11_spill] sm:$0xff] }
 0x15f   : > { %1385 = vmatprep.subr.mxu0 %v3441_v17  ;;  %1456 = vmatprep.subr.mxu1 %v3444_v18  ;;  %v4733_v17 = vld [vmem:[#allocation12_spill] sm:$0xff]  ;;  %v4734_v18 = vld [vmem:[#allocation13_spill] sm:$0xff] }
 0x160   : > { %1386 = vmatpush1.msra.mxu0 %v3449_v19  ;;  %1457 = vmatpush1.msra.mxu1 %v3452_v20  ;;  %v4735_v19 = vld [vmem:[#allocation14_spill] sm:$0xff]  ;;  %v4736_v20 = vld [vmem:[#allocation15_spill] sm:$0xff] }
 0x161   : > { %1387 = vmatprep.subr.mxu0 %v3455_v21  ;;  %1458 = vmatprep.subr.mxu1 %v3458_v22  ;;  %v4737_v21 = vld [vmem:[#allocation16_spill] sm:$0xff]  ;;  %v4738_v22 = vld [vmem:[#allocation17_spill] sm:$0xff] }
 0x162   : > { %1388 = vmatpush1.msra.mxu0 %v3465_v23  ;;  %1459 = vmatpush1.msra.mxu1 %v3468_v24  ;;  %v4739_v23 = vld [vmem:[#allocation18_spill] sm:$0xff]  ;;  %v4740_v24 = vld [vmem:[#allocation19_spill] sm:$0xff] }
 0x163   : > { %1389 = vmatprep.subr.mxu0 %v3476_v26  ;;  %1460 = vmatprep.subr.mxu1 %v3479_v27  ;;  %v4741_v26 = vld [vmem:[#allocation20_spill] sm:$0xff]  ;;  %v4742_v27 = vld [vmem:[#allocation21_spill] sm:$0xff] }
 0x164   : > { %1390 = vmatpush1.msra.mxu0 %v3484_v28  ;;  %1461 = vmatpush1.msra.mxu1 %v3487_v29  ;;  %v4743_v28 = vld [vmem:[#allocation22_spill] sm:$0xff]  ;;  %v4744_v29 = vld [vmem:[#allocation23_spill] sm:$0xff]  ;;  %4767 = vst [vmem:[#allocation20_spill] sm:$0xff] %v4190_v59 }
 0x165   : > { %1391 = vmatprep.subr.mxu0 %v3490_v30  ;;  %1462 = vmatprep.subr.mxu1 %v3493_v31  ;;  %v4745_v30 = vld [vmem:[#allocation24_spill] sm:$0xff]  ;;  %v4746_v31 = vmov 0.0  }
 0x166   : > { %1392 = vmatpush1.msra.mxu0 %v3500_v32  ;;  %1463 = vmatpush1.msra.mxu1 %v3503_v33  ;;  %v4747_v32 = vld [vmem:[#allocation25_spill] sm:$0xff] }
 0x167   : > { %1393 = vmatprep.subr.mxu0 %v3511_v35  ;;  %1464 = vmatprep.subr.mxu1 %v3514_v36  ;;  %v3218_v33 = vld [vmem:[%s4596_s6] sm:$0xff]  ;;  %v4748_v35 = vmov 0  }
 0x168   : > { %1394 = vmatpush1.msra.mxu0 %v3519_v37  ;;  %1465 = vmatpush1.msra.mxu1 %v3522_v38  ;;  %vm1557_vm2 = vcmp.eq.s32.totalorder %v3218_v33, 2  ;;  %v4049_v33 = vld [vmem:[%s3400_s21 + $0x150] sm:$0xff] }
 0x169   : > { %1395 = vmatprep.subr.mxu0 %v3525_v39  ;;  %1466 = vmatprep.subr.mxu1 %v3528_v40  ;;  %v1559_v36 = vsel %vm1557_vm2, 1, %v4748_v35  ;;  %v4749_v39 = vld [vmem:[#allocation5_spill] sm:$0xff] }
 0x16a   : > { %1396 = vmatpush1.msra.mxu0 %v3535_v41  ;;  %1467 = vmatpush1.msra.mxu1 %v3538_v42  ;;  %v4750_v41 = vld [vmem:[#allocation26_spill] sm:$0xff] }
 0x16b   : > { %1397 = vmatprep.subr.mxu0 %v3546_v44  ;;  %1468 = vmatprep.subr.mxu1 %v3549_v45 }
 0x16c   : > { %1398 = vmatpush1.msra.mxu0 %v3554_v46  ;;  %1469 = vmatpush1.msra.mxu1 %v3557_v47  ;;  %v4751_v46 = vld [vmem:[#allocation27_spill] sm:$0xff] }
 0x16d   : > { %1399 = vmatprep.subr.mxu0 %v3560_v48  ;;  %1470 = vmatprep.subr.mxu1 %v3563_v49  ;;  %v1046_v49 = vpop.permute.xlu0 %1045 }
 0x16e   : > { %1400 = vmatpush1.msra.mxu0 %v3570_v50  ;;  %1471 = vmatpush1.msra.mxu1 %v3573_v51  ;;  %vm1047_vm3 = vcmp.eq.s32.totalorder %v1046_v49, 1  ;;  %v4102_v49 = vld [vmem:[%s3400_s21 + $0xc8] sm:$0xff] }
 0x16f   : > { %1401 = vmatprep.subr.mxu0 %v3581_v53  ;;  %1472 = vmatprep.subr.mxu1 %v3584_v54  ;;  %v4752_v53 = vld [vmem:[#allocation28_spill] sm:$0xff]  ;;  %v1048_v52 = vsel %vm1047_vm3, %v3865_v0, 0.0  ;;  %v3966_v0 = vld [vmem:[%s3400_s21 + $0x1e0] sm:$0xff] }
 0x170   : > { %1402 = vmatpush1.msra.mxu0 %v3589_v55  ;;  %1473 = vmatpush1.msra.mxu1 %v3592_v56  ;;  %v1051_v56 = vsel %vm1047_vm3, %v3859_v58, 0.0 }
 0x171   : > { %1403 = vmatprep.subr.mxu0 %v4727_v10  ;;  %1474 = vmatprep.subr.mxu1 %v4728_v11  ;;  %v1304_v51 = vpop.permute.xlu0 %1303  ;;  %v3969_v10 = vld [vmem:[%s3400_s21 + $0x1f0] sm:$0xff]  ;;  %v3974_v11 = vld [vmem:[%s3400_s21 + $0x1c8] sm:$0xff] }
 0x172   : > { %1404 = vmatpush1.msra.mxu0 %v4729_v12  ;;  %1475 = vmatpush1.msra.mxu1 %v4730_v13  ;;  %vm1305_vm4 = vcmp.eq.s32.totalorder %v1304_v51, 1  ;;  %v3977_v12 = vld [vmem:[%s3400_s21 + $0x1d8] sm:$0xff]  ;;  %v3982_v13 = vld [vmem:[%s3400_s21 + $0x1c0] sm:$0xff] }
 0x173   : > { %1405 = vmatprep.subr.mxu0 %v4731_v14  ;;  %1476 = vmatprep.subr.mxu1 %v4732_v15  ;;  %v3985_v14 = vld [vmem:[%s3400_s21 + $0x1d0] sm:$0xff]  ;;  %v3990_v15 = vld [vmem:[%s3400_s21 + $0x1a8] sm:$0xff]  ;;  %v4110_v51 = vld [vmem:[%s3400_s21 + $0xc0] sm:$0xff] }
 0x174   : > { %1406 = vmatpush1.msra.mxu0 %v4733_v17  ;;  %1477 = vmatpush1.msra.mxu1 %v4734_v18  ;;  %v3993_v17 = vld [vmem:[%s3400_s21 + $0x1b8] sm:$0xff]  ;;  %v3998_v18 = vld [vmem:[%s3400_s21 + $0x1a0] sm:$0xff] }
 0x175   : > { %1407 = vmatprep.subr.mxu0 %v4735_v19  ;;  %1478 = vmatprep.subr.mxu1 %v4736_v20  ;;  %v4001_v19 = vld [vmem:[%s3400_s21 + $0x1b0] sm:$0xff]  ;;  %v4006_v20 = vld [vmem:[%s3400_s21 + $0x188] sm:$0xff] }
 0x176   : > { %1408 = vmatpush1.msra.mxu0 %v4737_v21  ;;  %1479 = vmatpush1.msra.mxu1 %v4738_v22  ;;  %v4009_v21 = vld [vmem:[%s3400_s21 + $0x198] sm:$0xff]  ;;  %v4014_v22 = vld [vmem:[%s3400_s21 + $0x180] sm:$0xff] }
 0x177   : > { %1409 = vmatprep.subr.mxu0 %v4739_v23  ;;  %1480 = vmatprep.subr.mxu1 %v4740_v24  ;;  %v4017_v23 = vld [vmem:[%s3400_s21 + $0x190] sm:$0xff]  ;;  %v4022_v24 = vld [vmem:[%s3400_s21 + $0x168] sm:$0xff] }
 0x178   : > { %1410 = vmatpush1.msra.mxu0 %v4741_v26  ;;  %1481 = vmatpush1.msra.mxu1 %v4742_v27  ;;  %v4025_v26 = vld [vmem:[%s3400_s21 + $0x178] sm:$0xff]  ;;  %v4030_v27 = vld [vmem:[%s3400_s21 + $0x160] sm:$0xff] }
 0x179   : > { %1411 = vmatprep.subr.mxu0 %v4743_v28  ;;  %1482 = vmatprep.subr.mxu1 %v4744_v29  ;;  %v4033_v28 = vld [vmem:[%s3400_s21 + $0x170] sm:$0xff]  ;;  %v4038_v29 = vld [vmem:[%s3400_s21 + $0x148] sm:$0xff] }
 0x17a   : > { %1412 = vmatpush1.msra.mxu0 %v4745_v30  ;;  %1445 = vmatprep.mubr.f32.mxu0 %v4746_v31  ;;  %v4041_v30 = vld [vmem:[%s3400_s21 + $0x158] sm:$0xff] }
 0x17b   : > { %1483 = vmatpush1.msra.mxu1 %v4747_v32  ;;  %1516 = vmatprep.mubr.f32.mxu1 %v4746_v31  ;;  %v4046_v32 = vld [vmem:[%s3400_s21 + $0x140] sm:$0xff] }
 0x17c   : > { %1561 = vperm.xlu1 %3089, %v1559_v36   ;;  %1710 = vmatprep.subr.mxu1 %v3961_v60  ;;  %v4054_v36 = vld [vmem:[%s3400_s21 + $0x128] sm:$0xff] }
 0x21b   : > { %v1189_v37 = vpop.f32.mrf.mxu0  ;;  %v1260_v38 = vpop.f32.mrf.mxu1 }
 0x21c   : > { %v1265_v40 = vadd.f32 %v1189_v37, %v4749_v39  ;;  %v1267_v42 = vadd.f32 %v1260_v38, %v4750_v41  ;;  %v4057_v37 = vld [vmem:[%s3400_s21 + $0x138] sm:$0xff]  ;;  %v4062_v38 = vld [vmem:[%s3400_s21 + $0x120] sm:$0xff]  ;;  %v4065_v39 = vld [vmem:[%s3400_s21 + $0x130] sm:$0xff] }
 0x21d   : > { %v1191_v44 = vpop.f32.mrf.mxu0  ;;  %v1262_v50 = vpop.f32.mrf.mxu1  ;;  %v4073_v41 = vld [vmem:[%s3400_s21 + $0x118] sm:$0xff] }
 0x21e   : > { %v3036_v45 = vmul.f32 -1.442695, %v1265_v40  ;;  %3106 = vtanh.f32 %v1267_v42  ;;  %v1266_v47 = vadd.f32 %v1191_v44, %v4751_v46  ;;  %v1268_v54 = vadd.f32 %v1262_v50, %v4752_v53  ;;  %v4070_v40 = vld [vmem:[%s3400_s21 + $0x108] sm:$0xff]  ;;  %v4078_v42 = vld [vmem:[%s3400_s21 + $0x100] sm:$0xff]  ;;  %v4081_v44 = vld [vmem:[%s3400_s21 + $0x110] sm:$0xff] }
 0x21f   : > { %v4089_v46 = vld [vmem:[%s3400_s21 + $0xf8] sm:$0xff]  ;;  %v4113_v53 = vld [vmem:[%s3400_s21 + $0xd0] sm:$0xff] }
 0x220   : > { %3108 = vpow2.f32 %v3036_v45  ;;  %v3037_v48 = vmul.f32 -1.442695, %v1266_v47  ;;  %v3038_v7 = vmul.f32 -1.442695, %v1268_v54  ;;  %v4086_v45 = vld [vmem:[%s3400_s21 + $0xe8] sm:$0xff]  ;;  %v4094_v47 = vld [vmem:[%s3400_s21 + $0xe0] sm:$0xff] }
 0x221   : > { %v4105_v50 = vld [vmem:[%s3400_s21 + $0xd8] sm:$0xff]  ;;  %v4118_v54 = vld [vmem:[%s3400_s21 + $0xa8] sm:$0xff] }
 0x222   : > { %3110 = vpow2.f32 %v3037_v48  ;;  %v4097_v48 = vld [vmem:[%s3400_s21 + $0xf0] sm:$0xff] }
 0x223   : > { %3112 = vpow2.f32 %v3038_v7  ;;  %v4129_v7 = vld [vmem:[%s3400_s21 + $0xb0] sm:$0xff] }
 0x22b   : > { %v3107_v55 = vpop.eup %3106 }
 0x22c   : > { %v3944_v34 = vsel %vm1305_vm4, %v3107_v55, %v1051_v56  ;;  %v4126_v56 = vld [vmem:[%s3400_s21 + $0xa0] sm:$0xff] }
 0x22d   : > { %v3109_v61 = vpop.eup %3108 }
 0x22e   : > { %v1272_v1 = vadd.f32 1.0, %v3109_v61  ;;  %v4134_v61 = vld [vmem:[%s3400_s21 + $0x88] sm:$0xff] }
 0x22f   : > { %v3111_v57 = vpop.eup %3110 }
 0x230   : > { %3114 = vrcp.f32 %v1272_v1  ;;  %v1278_v5 = vadd.f32 1.0, %v3111_v57  ;;  %v3113_v9 = vpop.eup %3112  ;;  %v4137_v1 = vld [vmem:[%s3400_s21 + $0x98] sm:$0xff]  ;;  %v4142_v57 = vld [vmem:[%s3400_s21 + $0x80] sm:$0xff] }
 0x231   : > { %v1285_v4 = vadd.f32 1.0, %v3113_v9  ;;  %4755 = vst [vmem:[#allocation8_spill] sm:$0xff] %v4142_v57  ;;  %v4150_v9 = vld [vmem:[%s3400_s21 + $0x68] sm:$0xff] }
 0x232   : > { %3116 = vrcp.f32 %v1278_v5  ;;  %v4145_v5 = vld [vmem:[%s3400_s21 + $0x90] sm:$0xff]  ;;  %4757 = vst [vmem:[#allocation10_spill] sm:$0xff] %v4150_v9 }
 0x233   : > { %3118 = vrcp.f32 %v1285_v4  ;;  %4756 = vst [vmem:[#allocation9_spill] sm:$0xff] %v4145_v5  ;;  %v4166_v4 = vld [vmem:[%s3400_s21 + $0x48] sm:$0xff] }
 0x234   : > { %4761 = vst [vmem:[#allocation14_spill] sm:$0xff] %v4166_v4 }
 0x23d   : > { %v3115_v8 = vpop.eup %3114 }
 0x23e   : > { %v1290_v3 = vmul.f32 %v3115_v8, %v3107_v55  ;;  %v4121_v55 = vld [vmem:[%s3400_s21 + $0xb8] sm:$0xff] }
 0x23f   : > { %v3117_v63 = vpop.eup %3116  ;;  %v4153_v8 = vld [vmem:[%s3400_s21 + $0x78] sm:$0xff] }
 0x240   : > { %v1289_v43 = vmul.f32 %v3117_v63, %v3862_v6  ;;  %v3119_v16 = vpop.eup %3118  ;;  %v3958_v6 = vld [vmem:[%s3400_s21 + $0x1e8] sm:$0xff]  ;;  %4758 = vst [vmem:[#allocation11_spill] sm:$0xff] %v4153_v8  ;;  %v4161_v63 = vld [vmem:[%s3400_s21 + $0x70] sm:$0xff] }
 0x241   : > { %4753 = vst [vmem:[#allocation6_spill] sm:$0xff] %v3958_v6  ;;  %1639 = vmatprep.subr.mxu0 %v3958_v6  ;;  %4760 = vst [vmem:[#allocation13_spill] sm:$0xff] %v4161_v63 }
 0x242   : > { %v3947_v58 = vadd.f32 %v1290_v3, %v1289_v43  ;;  %v4158_v3 = vld [vmem:[%s3400_s21 + $0x60] sm:$0xff]  ;;  %v4169_v43 = vld [vmem:[%s3400_s21 + $0x58] sm:$0xff] }
 0x243   : > { %4759 = vst [vmem:[#allocation12_spill] sm:$0xff] %v4158_v3  ;;  %4762 = vst [vmem:[#allocation15_spill] sm:$0xff] %v4169_v43 }
 0x244   : > { %3120 = vtanh.f32 %v3947_v58 }
 0x251   : > { %v3121_v25 = vpop.eup %3120 }
 0x252   : > { %v1293_v2 = vmul.f32 %v3121_v25, %v3119_v16  ;;  %v4174_v16 = vld [vmem:[%s3400_s21 + $0x40] sm:$0xff]  ;;  %v4177_v25 = vld [vmem:[%s3400_s21 + $0x50] sm:$0xff] }
 0x253   : > { %4763 = vst [vmem:[#allocation16_spill] sm:$0xff] %v4174_v16  ;;  %4764 = vst [vmem:[#allocation17_spill] sm:$0xff] %v4177_v25 }
 0x254   : > { %v3953_v62 = vsel %vm1305_vm4, %v1293_v2, %v1048_v52  ;;  %1446 = vmatmul.mubr.f32.vlgmr.msra.gmra.mxu0 %v1293_v2  ;;  %1517 = vmatmul.mubr.f32.vlgmr.msra.gmra.mxu1 %v1293_v2  ;;  %v4182_v2 = vld [vmem:[%s3400_s21 + $0x28] sm:$0xff]  ;;  %v4185_v52 = vld [vmem:[%s3400_s21 + $0x38] sm:$0xff] }
 0x255   : > { %1703 = vmatprep.mubr.f32.mxu0 %v4746_v31  ;;  %1774 = vmatprep.mubr.f32.mxu1 %v4746_v31  ;;  %4765 = vst [vmem:[#allocation18_spill] sm:$0xff] %v4182_v2  ;;  %4766 = vst [vmem:[#allocation19_spill] sm:$0xff] %v4185_v52  ;;  %v4193_v31 = vld [vmem:[%s3400_s21 + $0x30] sm:$0xff] }
 0x256   : > { %1640 = vmatpush1.msra.mxu0 %v3966_v0  ;;  %1711 = vmatpush1.msra.mxu1 %v3969_v10  ;;  %4768 = vst [vmem:[#allocation21_spill] sm:$0xff] %v4193_v31 }
 0x257   : > { %1641 = vmatprep.subr.mxu0 %v3974_v11  ;;  %1712 = vmatprep.subr.mxu1 %v3977_v12 }
 0x258   : > { %1642 = vmatpush1.msra.mxu0 %v3982_v13  ;;  %1713 = vmatpush1.msra.mxu1 %v3985_v14 }
 0x259   : > { %1643 = vmatprep.subr.mxu0 %v3990_v15  ;;  %1714 = vmatprep.subr.mxu1 %v3993_v17 }
 0x25a   : > { %1644 = vmatpush1.msra.mxu0 %v3998_v18  ;;  %1715 = vmatpush1.msra.mxu1 %v4001_v19 }
 0x25b   : > { %1645 = vmatprep.subr.mxu0 %v4006_v20  ;;  %1716 = vmatprep.subr.mxu1 %v4009_v21 }
 0x25c   : > { %1646 = vmatpush1.msra.mxu0 %v4014_v22  ;;  %1717 = vmatpush1.msra.mxu1 %v4017_v23 }
 0x25d   : > { %1647 = vmatprep.subr.mxu0 %v4022_v24  ;;  %1718 = vmatprep.subr.mxu1 %v4025_v26 }
 0x25e   : > { %1648 = vmatpush1.msra.mxu0 %v4030_v27  ;;  %1719 = vmatpush1.msra.mxu1 %v4033_v28 }
 0x25f   : > { %1649 = vmatprep.subr.mxu0 %v4038_v29  ;;  %1720 = vmatprep.subr.mxu1 %v4041_v30 }
 0x260   : > { %1650 = vmatpush1.msra.mxu0 %v4046_v32  ;;  %1721 = vmatpush1.msra.mxu1 %v4049_v33 }
 0x261   : > { %1651 = vmatprep.subr.mxu0 %v4054_v36  ;;  %1722 = vmatprep.subr.mxu1 %v4057_v37 }
 0x262   : > { %1652 = vmatpush1.msra.mxu0 %v4062_v38  ;;  %1723 = vmatpush1.msra.mxu1 %v4065_v39 }
 0x263   : > { %1653 = vmatprep.subr.mxu0 %v4070_v40  ;;  %1724 = vmatprep.subr.mxu1 %v4073_v41 }
 0x264   : > { %1654 = vmatpush1.msra.mxu0 %v4078_v42  ;;  %1725 = vmatpush1.msra.mxu1 %v4081_v44 }
 0x265   : > { %1655 = vmatprep.subr.mxu0 %v4086_v45  ;;  %1726 = vmatprep.subr.mxu1 %v4089_v46 }
 0x266   : > { %1656 = vmatpush1.msra.mxu0 %v4094_v47  ;;  %1727 = vmatpush1.msra.mxu1 %v4097_v48 }
 0x267   : > { %1657 = vmatprep.subr.mxu0 %v4102_v49  ;;  %1728 = vmatprep.subr.mxu1 %v4105_v50 }
 0x268   : > { %1658 = vmatpush1.msra.mxu0 %v4110_v51  ;;  %1729 = vmatpush1.msra.mxu1 %v4113_v53 }
 0x269   : > { %1659 = vmatprep.subr.mxu0 %v4118_v54  ;;  %1730 = vmatprep.subr.mxu1 %v4121_v55 }
 0x26a   : > { %1660 = vmatpush1.msra.mxu0 %v4126_v56  ;;  %1731 = vmatpush1.msra.mxu1 %v4129_v7 }
 0x26b   : > { %1661 = vmatprep.subr.mxu0 %v4134_v61  ;;  %1732 = vmatprep.subr.mxu1 %v4137_v1 }
 0x26c   : > { %1662 = vmatpush1.msra.mxu0 %v4142_v57  ;;  %1733 = vmatpush1.msra.mxu1 %v4145_v5  ;;  %v1562_v5 = vpop.permute.xlu1 %1561 }
 0x26d   : > { %1663 = vmatprep.subr.mxu0 %v4150_v9  ;;  %1734 = vmatprep.subr.mxu1 %v4153_v8  ;;  %v4776_v8 = vld [vmem:[#allocation31_spill] sm:$0xff]  ;;  %vm1563_vm6 = vcmp.eq.s32.totalorder %v1562_v5, 1  ;;  %v4780_v5 = vld [vmem:[#allocation10_spill] sm:$0xff] }
 0x26e   : > { %1664 = vmatpush1.msra.mxu0 %v4158_v3  ;;  %1735 = vmatpush1.msra.mxu1 %v4161_v63 }
 0x26f   : > { %1665 = vmatprep.subr.mxu0 %v4166_v4  ;;  %1736 = vmatprep.subr.mxu1 %v4169_v43  ;;  %v4198_v43 = vld [vmem:[%s3400_s21 + $0x8] sm:$0xff] }
 0x270   : > { %1666 = vmatpush1.msra.mxu0 %v4174_v16  ;;  %1737 = vmatpush1.msra.mxu1 %v4177_v25  ;;  %4769 = vst [vmem:[#allocation22_spill] sm:$0xff] %v4198_v43  ;;  %v4201_v16 = vld [vmem:[%s3400_s21 + $0x18] sm:$0xff]  ;;  %v4206_v25 = vld [vmem:[%s3400_s21] sm:$0xff]  ;;  %v4775_v4 = vld [vmem:[#allocation30_spill] sm:$0xff] }
 0x271   : > { %1667 = vmatprep.subr.mxu0 %v4182_v2  ;;  %1738 = vmatprep.subr.mxu1 %v4185_v52  ;;  %4770 = vst [vmem:[#allocation23_spill] sm:$0xff] %v4201_v16  ;;  %4771 = vst [vmem:[#allocation24_spill] sm:$0xff] %v4206_v25  ;;  %v4209_v2 = vld [vmem:[%s3400_s21 + $0x10] sm:$0xff]  ;;  %v4774_v52 = vld [vmem:[#allocation29_spill] sm:$0xff] }
 0x272   : > { %1668 = vmatpush1.msra.mxu0 %v4190_v59  ;;  %1739 = vmatpush1.msra.mxu1 %v4193_v31  ;;  %4772 = vst [vmem:[#allocation25_spill] sm:$0xff] %v4209_v2  ;;  %v4216_v31 = vld [vmem:[%s4596_s6] sm:$0xff] }
 0x273   : > { %1669 = vmatprep.subr.mxu0 %v4198_v43  ;;  %1740 = vmatprep.subr.mxu1 %v4201_v16  ;;  %4773 = vst [vmem:[#allocation5_spill] sm:$0xff] %v4216_v31  ;;  %vm1815_vm5 = vcmp.eq.s32.totalorder %v4216_v31, 3 }
 0x274   : > { %1670 = vmatpush1.msra.mxu0 %v4206_v25  ;;  %1741 = vmatpush1.msra.mxu1 %v4209_v2  ;;  %v1817_v16 = vsel %vm1815_vm5, 1, %v4748_v35 }
 0x275   : > { %1897 = vmatprep.subr.mxu0 %v3958_v6  ;;  %1968 = vmatprep.subr.mxu1 %v3961_v60  ;;  %v4777_v60 = vld [vmem:[#allocation32_spill] sm:$0xff] }
 0x276   : > { %1819 = vperm.xlu1 %3089, %v1817_v16  }
 0x314   : > { %v1447_v43 = vpop.f32.mrf.mxu0  ;;  %v1518_v59 = vpop.f32.mrf.mxu1 }
 0x315   : > { %v1523_v25 = vadd.f32 %v1447_v43, %v4774_v52  ;;  %v1525_v2 = vadd.f32 %v1518_v59, %v4775_v4 }
 0x316   : > { %v1449_v63 = vpop.f32.mrf.mxu0  ;;  %v1520_v6 = vpop.f32.mrf.mxu1 }
 0x317   : > { %v3039_v3 = vmul.f32 -1.442695, %v1523_v25  ;;  %3122 = vtanh.f32 %v1525_v2  ;;  %v1524_v9 = vadd.f32 %v1449_v63, %v4776_v8  ;;  %v1526_v57 = vadd.f32 %v1520_v6, %v4777_v60 }
 0x319   : > { %3124 = vpow2.f32 %v3039_v3  ;;  %v3040_v31 = vmul.f32 -1.442695, %v1524_v9  ;;  %v3041_v35 = vmul.f32 -1.442695, %v1526_v57 }
 0x31b   : > { %3126 = vpow2.f32 %v3040_v31 }
 0x31c   : > { %3128 = vpow2.f32 %v3041_v35 }
 0x324   : > { %v3123_v16 = vpop.eup %3122 }
 0x325   : > { %v4228_v43 = vsel %vm1563_vm6, %v3123_v16, %v3944_v34 }
 0x326   : > { %v3125_v59 = vpop.eup %3124 }
 0x327   : > { %v1530_v4 = vadd.f32 1.0, %v3125_v59  ;;  %v4782_v59 = vld [vmem:[#allocation12_spill] sm:$0xff] }
 0x328   : > { %v3127_v25 = vpop.eup %3126 }
 0x329   : > { %3130 = vrcp.f32 %v1530_v4  ;;  %v1536_v8 = vadd.f32 1.0, %v3127_v25  ;;  %v3129_v9 = vpop.eup %3128  ;;  %v4783_v4 = vld [vmem:[#allocation13_spill] sm:$0xff]  ;;  %v4784_v25 = vld [vmem:[#allocation14_spill] sm:$0xff] }
 0x32a   : > { %v1543_v2 = vadd.f32 1.0, %v3129_v9  ;;  %v4786_v9 = vld [vmem:[#allocation16_spill] sm:$0xff] }
 0x32b   : > { %3132 = vrcp.f32 %v1536_v8  ;;  %v4785_v8 = vld [vmem:[#allocation15_spill] sm:$0xff] }
 0x32c   : > { %3134 = vrcp.f32 %v1543_v2  ;;  %v4790_v2 = vld [vmem:[#allocation20_spill] sm:$0xff] }
 0x336   : > { %v3131_v31 = vpop.eup %3130 }
 0x337   : > { %v1548_v3 = vmul.f32 %v3131_v31, %v3123_v16  ;;  %v4781_v16 = vld [vmem:[#allocation11_spill] sm:$0xff]  ;;  %v4787_v31 = vld [vmem:[#allocation17_spill] sm:$0xff] }
 0x338   : > { %v3133_v63 = vpop.eup %3132 }
 0x339   : > { %v1547_v6 = vmul.f32 %v3133_v63, %v3947_v58  ;;  %v3135_v34 = vpop.eup %3134  ;;  %v4778_v58 = vld [vmem:[#allocation8_spill] sm:$0xff]  ;;  %v4789_v63 = vld [vmem:[#allocation19_spill] sm:$0xff] }
 0x33b   : > { %v4231_v60 = vadd.f32 %v1548_v3, %v1547_v6  ;;  %v4788_v3 = vld [vmem:[#allocation18_spill] sm:$0xff]  ;;  %v4791_v6 = vld [vmem:[#allocation21_spill] sm:$0xff] }
 0x33d   : > { %3136 = vtanh.f32 %v4231_v60 }
 0x34a   : > { %v3137_v57 = vpop.eup %3136 }
 0x34b   : > { %v1551_v52 = vmul.f32 %v3137_v57, %v3135_v34  ;;  %v4792_v34 = vld [vmem:[#allocation22_spill] sm:$0xff]  ;;  %v4793_v57 = vld [vmem:[#allocation23_spill] sm:$0xff] }
 0x34d   : > { %v4236_v35 = vsel %vm1563_vm6, %v1551_v52, %v3953_v62  ;;  %1704 = vmatmul.mubr.f32.vlgmr.msra.gmra.mxu0 %v1551_v52  ;;  %1775 = vmatmul.mubr.f32.vlgmr.msra.gmra.mxu1 %v1551_v52  ;;  %v4779_v62 = vld [vmem:[#allocation9_spill] sm:$0xff]  ;;  %v4794_v52 = vld [vmem:[#allocation24_spill] sm:$0xff] }
 0x34e   : > { %1898 = vmatpush1.msra.mxu0 %v3966_v0  ;;  %1969 = vmatpush1.msra.mxu1 %v3969_v10 }
 0x34f   : > { %1899 = vmatprep.subr.mxu0 %v3974_v11  ;;  %1970 = vmatprep.subr.mxu1 %v3977_v12 }
 0x350   : > { %1900 = vmatpush1.msra.mxu0 %v3982_v13  ;;  %1971 = vmatpush1.msra.mxu1 %v3985_v14 }
 0x351   : > { %1901 = vmatprep.subr.mxu0 %v3990_v15  ;;  %1972 = vmatprep.subr.mxu1 %v3993_v17 }
 0x352   : > { %1902 = vmatpush1.msra.mxu0 %v3998_v18  ;;  %1973 = vmatpush1.msra.mxu1 %v4001_v19 }
 0x353   : > { %1903 = vmatprep.subr.mxu0 %v4006_v20  ;;  %1974 = vmatprep.subr.mxu1 %v4009_v21 }
 0x354   : > { %1904 = vmatpush1.msra.mxu0 %v4014_v22  ;;  %1975 = vmatpush1.msra.mxu1 %v4017_v23 }
 0x355   : > { %1905 = vmatprep.subr.mxu0 %v4022_v24  ;;  %1976 = vmatprep.subr.mxu1 %v4025_v26 }
 0x356   : > { %1906 = vmatpush1.msra.mxu0 %v4030_v27  ;;  %1977 = vmatpush1.msra.mxu1 %v4033_v28 }
 0x357   : > { %1907 = vmatprep.subr.mxu0 %v4038_v29  ;;  %1978 = vmatprep.subr.mxu1 %v4041_v30 }
 0x358   : > { %1908 = vmatpush1.msra.mxu0 %v4046_v32  ;;  %1979 = vmatpush1.msra.mxu1 %v4049_v33 }
 0x359   : > { %1909 = vmatprep.subr.mxu0 %v4054_v36  ;;  %1980 = vmatprep.subr.mxu1 %v4057_v37 }
 0x35a   : > { %1910 = vmatpush1.msra.mxu0 %v4062_v38  ;;  %1981 = vmatpush1.msra.mxu1 %v4065_v39 }
 0x35b   : > { %1911 = vmatprep.subr.mxu0 %v4070_v40  ;;  %1982 = vmatprep.subr.mxu1 %v4073_v41 }
 0x35c   : > { %1912 = vmatpush1.msra.mxu0 %v4078_v42  ;;  %1983 = vmatpush1.msra.mxu1 %v4081_v44 }
 0x35d   : > { %1913 = vmatprep.subr.mxu0 %v4086_v45  ;;  %1984 = vmatprep.subr.mxu1 %v4089_v46 }
 0x35e   : > { %1914 = vmatpush1.msra.mxu0 %v4094_v47  ;;  %1985 = vmatpush1.msra.mxu1 %v4097_v48 }
 0x35f   : > { %1915 = vmatprep.subr.mxu0 %v4102_v49  ;;  %1986 = vmatprep.subr.mxu1 %v4105_v50 }
 0x360   : > { %1916 = vmatpush1.msra.mxu0 %v4110_v51  ;;  %1987 = vmatpush1.msra.mxu1 %v4113_v53 }
 0x361   : > { %1917 = vmatprep.subr.mxu0 %v4118_v54  ;;  %1988 = vmatprep.subr.mxu1 %v4121_v55 }
 0x362   : > { %1918 = vmatpush1.msra.mxu0 %v4126_v56  ;;  %1989 = vmatpush1.msra.mxu1 %v4129_v7 }
 0x363   : > { %1919 = vmatprep.subr.mxu0 %v4134_v61  ;;  %1990 = vmatprep.subr.mxu1 %v4137_v1 }
 0x364   : > { %1920 = vmatpush1.msra.mxu0 %v4778_v58  ;;  %1991 = vmatpush1.msra.mxu1 %v4779_v62  ;;  %v1820_v62 = vpop.permute.xlu1 %1819 }
 0x365   : > { %1921 = vmatprep.subr.mxu0 %v4780_v5  ;;  %1992 = vmatprep.subr.mxu1 %v4781_v16  ;;  %vm1821_vm8 = vcmp.eq.s32.totalorder %v1820_v62, 1  ;;  %v4807_v62 = vld [vmem:[#allocation10_spill] sm:$0xff] }
 0x366   : > { %1922 = vmatpush1.msra.mxu0 %v4782_v59  ;;  %1993 = vmatpush1.msra.mxu1 %v4783_v4 }
 0x367   : > { %1923 = vmatprep.subr.mxu0 %v4784_v25  ;;  %1994 = vmatprep.subr.mxu1 %v4785_v8  ;;  %v4795_v25 = vmov 0.0   ;;  %v4796_v8 = vld [vmem:[#allocation25_spill] sm:$0xff] }
 0x368   : > { %1924 = vmatpush1.msra.mxu0 %v4786_v9  ;;  %1995 = vmatpush1.msra.mxu1 %v4787_v31  ;;  %v4797_v31 = vld [vmem:[#allocation6_spill] sm:$0xff] }
 0x369   : > { %1925 = vmatprep.subr.mxu0 %v4788_v3  ;;  %1996 = vmatprep.subr.mxu1 %v4789_v63  ;;  %v4798_v3 = vld [vmem:[#allocation7_spill] sm:$0xff]  ;;  %v4799_v63 = vld [vmem:[#allocation5_spill] sm:$0xff] }
 0x36a   : > { %1926 = vmatpush1.msra.mxu0 %v4790_v2  ;;  %1997 = vmatpush1.msra.mxu1 %v4791_v6  ;;  %vm2073_vm7 = vcmp.eq.s32.totalorder %v4799_v63, 4  ;;  %v4800_v2 = vmov 0   ;;  %v4804_v63 = vld [vmem:[#allocation36_spill] sm:$0xff] }
 0x36b   : > { %1927 = vmatprep.subr.mxu0 %v4792_v34  ;;  %1998 = vmatprep.subr.mxu1 %v4793_v57  ;;  %v2075_v6 = vsel %vm2073_vm7, 1, %v4800_v2  ;;  %v4801_v57 = vld [vmem:[#allocation33_spill] sm:$0xff] }
 0x36c   : > { %1928 = vmatpush1.msra.mxu0 %v4794_v52  ;;  %1961 = vmatprep.mubr.f32.mxu0 %v4795_v25  ;;  %v4802_v52 = vld [vmem:[#allocation34_spill] sm:$0xff] }
 0x36d   : > { %1999 = vmatpush1.msra.mxu1 %v4796_v8  ;;  %2032 = vmatprep.mubr.f32.mxu1 %v4795_v25  ;;  %v4803_v8 = vld [vmem:[#allocation35_spill] sm:$0xff] }
 0x36e   : > { %2155 = vmatprep.subr.mxu0 %v4797_v31  ;;  %2226 = vmatprep.subr.mxu1 %v4798_v3 }
 0x36f   : > { %2077 = vperm.xlu0 %3088, %v2075_v6  }
 0x40d   : > { %v1705_v34 = vpop.f32.mrf.mxu0  ;;  %v1776_v9 = vpop.f32.mrf.mxu1 }
 0x40e   : > { %v1781_v4 = vadd.f32 %v1705_v34, %v4801_v57  ;;  %v1783_v59 = vadd.f32 %v1776_v9, %v4802_v52 }
 0x40f   : > { %v1707_v16 = vpop.f32.mrf.mxu0  ;;  %v1778_v3 = vpop.f32.mrf.mxu1 }
 0x410   : > { %v3042_v5 = vmul.f32 -1.442695, %v1781_v4  ;;  %3138 = vtanh.f32 %v1783_v59  ;;  %v1782_v25 = vadd.f32 %v1707_v16, %v4803_v8  ;;  %v1784_v58 = vadd.f32 %v1778_v3, %v4804_v63 }
 0x412   : > { %3140 = vpow2.f32 %v3042_v5  ;;  %v3043_v31 = vmul.f32 -1.442695, %v1782_v25  ;;  %v3044_v2 = vmul.f32 -1.442695, %v1784_v58 }
 0x414   : > { %3142 = vpow2.f32 %v3043_v31 }
 0x415   : > { %3144 = vpow2.f32 %v3044_v2 }
 0x41d   : > { %v3139_v6 = vpop.eup %3138 }
 0x41e   : > { %v4312_v34 = vsel %vm1821_vm8, %v3139_v6, %v4228_v43 }
 0x41f   : > { %v3141_v9 = vpop.eup %3140 }
 0x420   : > { %v1788_v57 = vadd.f32 1.0, %v3141_v9  ;;  %v4809_v9 = vld [vmem:[#allocation12_spill] sm:$0xff] }
 0x421   : > { %v3143_v4 = vpop.eup %3142 }
 0x422   : > { %3146 = vrcp.f32 %v1788_v57  ;;  %v1794_v16 = vadd.f32 1.0, %v3143_v4  ;;  %v3145_v5 = vpop.eup %3144  ;;  %v4810_v57 = vld [vmem:[#allocation13_spill] sm:$0xff]  ;;  %v4811_v4 = vld [vmem:[#allocation14_spill] sm:$0xff] }
 0x423   : > { %v1801_v31 = vadd.f32 1.0, %v3145_v5  ;;  %v4813_v5 = vld [vmem:[#allocation16_spill] sm:$0xff] }
 0x424   : > { %3148 = vrcp.f32 %v1794_v16  ;;  %v4812_v16 = vld [vmem:[#allocation15_spill] sm:$0xff] }
 0x425   : > { %3150 = vrcp.f32 %v1801_v31  ;;  %v4817_v31 = vld [vmem:[#allocation20_spill] sm:$0xff] }
 0x42f   : > { %v3147_v59 = vpop.eup %3146 }
 0x430   : > { %v1806_v25 = vmul.f32 %v3147_v59, %v3139_v6  ;;  %v4808_v6 = vld [vmem:[#allocation11_spill] sm:$0xff]  ;;  %v4814_v59 = vld [vmem:[#allocation17_spill] sm:$0xff] }
 0x431   : > { %v3149_v8 = vpop.eup %3148 }
 0x432   : > { %v1805_v3 = vmul.f32 %v3149_v8, %v4231_v60  ;;  %v3151_v43 = vpop.eup %3150  ;;  %v4805_v60 = vld [vmem:[#allocation8_spill] sm:$0xff]  ;;  %v4816_v8 = vld [vmem:[#allocation19_spill] sm:$0xff] }
 0x434   : > { %v4315_v63 = vadd.f32 %v1806_v25, %v1805_v3  ;;  %v4815_v25 = vld [vmem:[#allocation18_spill] sm:$0xff]  ;;  %v4818_v3 = vld [vmem:[#allocation21_spill] sm:$0xff] }
 0x436   : > { %3152 = vtanh.f32 %v4315_v63 }
 0x443   : > { %v3153_v58 = vpop.eup %3152 }
 0x444   : > { %v1809_v52 = vmul.f32 %v3153_v58, %v3151_v43  ;;  %v4819_v43 = vld [vmem:[#allocation22_spill] sm:$0xff]  ;;  %v4820_v58 = vld [vmem:[#allocation23_spill] sm:$0xff] }
 0x446   : > { %v4320_v2 = vsel %vm1821_vm8, %v1809_v52, %v4236_v35  ;;  %1962 = vmatmul.mubr.f32.vlgmr.msra.gmra.mxu0 %v1809_v52  ;;  %2033 = vmatmul.mubr.f32.vlgmr.msra.gmra.mxu1 %v1809_v52  ;;  %v4806_v35 = vld [vmem:[#allocation9_spill] sm:$0xff]  ;;  %v4821_v52 = vld [vmem:[#allocation24_spill] sm:$0xff] }
 0x447   : > { %2156 = vmatpush1.msra.mxu0 %v3966_v0  ;;  %2227 = vmatpush1.msra.mxu1 %v3969_v10 }
 0x448   : > { %2157 = vmatprep.subr.mxu0 %v3974_v11  ;;  %2228 = vmatprep.subr.mxu1 %v3977_v12 }
 0x449   : > { %2158 = vmatpush1.msra.mxu0 %v3982_v13  ;;  %2229 = vmatpush1.msra.mxu1 %v3985_v14 }
 0x44a   : > { %2159 = vmatprep.subr.mxu0 %v3990_v15  ;;  %2230 = vmatprep.subr.mxu1 %v3993_v17 }
 0x44b   : > { %2160 = vmatpush1.msra.mxu0 %v3998_v18  ;;  %2231 = vmatpush1.msra.mxu1 %v4001_v19 }
 0x44c   : > { %2161 = vmatprep.subr.mxu0 %v4006_v20  ;;  %2232 = vmatprep.subr.mxu1 %v4009_v21 }
 0x44d   : > { %2162 = vmatpush1.msra.mxu0 %v4014_v22  ;;  %2233 = vmatpush1.msra.mxu1 %v4017_v23 }
 0x44e   : > { %2163 = vmatprep.subr.mxu0 %v4022_v24  ;;  %2234 = vmatprep.subr.mxu1 %v4025_v26 }
 0x44f   : > { %2164 = vmatpush1.msra.mxu0 %v4030_v27  ;;  %2235 = vmatpush1.msra.mxu1 %v4033_v28 }
 0x450   : > { %2165 = vmatprep.subr.mxu0 %v4038_v29  ;;  %2236 = vmatprep.subr.mxu1 %v4041_v30 }
 0x451   : > { %2166 = vmatpush1.msra.mxu0 %v4046_v32  ;;  %2237 = vmatpush1.msra.mxu1 %v4049_v33 }
 0x452   : > { %2167 = vmatprep.subr.mxu0 %v4054_v36  ;;  %2238 = vmatprep.subr.mxu1 %v4057_v37 }
 0x453   : > { %2168 = vmatpush1.msra.mxu0 %v4062_v38  ;;  %2239 = vmatpush1.msra.mxu1 %v4065_v39 }
 0x454   : > { %2169 = vmatprep.subr.mxu0 %v4070_v40  ;;  %2240 = vmatprep.subr.mxu1 %v4073_v41 }
 0x455   : > { %2170 = vmatpush1.msra.mxu0 %v4078_v42  ;;  %2241 = vmatpush1.msra.mxu1 %v4081_v44 }
 0x456   : > { %2171 = vmatprep.subr.mxu0 %v4086_v45  ;;  %2242 = vmatprep.subr.mxu1 %v4089_v46 }
 0x457   : > { %2172 = vmatpush1.msra.mxu0 %v4094_v47  ;;  %2243 = vmatpush1.msra.mxu1 %v4097_v48 }
 0x458   : > { %2173 = vmatprep.subr.mxu0 %v4102_v49  ;;  %2244 = vmatprep.subr.mxu1 %v4105_v50 }
 0x459   : > { %2174 = vmatpush1.msra.mxu0 %v4110_v51  ;;  %2245 = vmatpush1.msra.mxu1 %v4113_v53 }
 0x45a   : > { %2175 = vmatprep.subr.mxu0 %v4118_v54  ;;  %2246 = vmatprep.subr.mxu1 %v4121_v55 }
 0x45b   : > { %2176 = vmatpush1.msra.mxu0 %v4126_v56  ;;  %2247 = vmatpush1.msra.mxu1 %v4129_v7 }
 0x45c   : > { %2177 = vmatprep.subr.mxu0 %v4134_v61  ;;  %2248 = vmatprep.subr.mxu1 %v4137_v1 }
 0x45d   : > { %2178 = vmatpush1.msra.mxu0 %v4805_v60  ;;  %2249 = vmatpush1.msra.mxu1 %v4806_v35  ;;  %v2078_v35 = vpop.permute.xlu0 %2077 }
 0x45e   : > { %2179 = vmatprep.subr.mxu0 %v4807_v62  ;;  %2250 = vmatprep.subr.mxu1 %v4808_v6  ;;  %vm2079_vm10 = vcmp.eq.s32.totalorder %v2078_v35, 1 }
 0x45f   : > { %2180 = vmatpush1.msra.mxu0 %v4809_v9  ;;  %2251 = vmatpush1.msra.mxu1 %v4810_v57 }
 0x460   : > { %2181 = vmatprep.subr.mxu0 %v4811_v4  ;;  %2252 = vmatprep.subr.mxu1 %v4812_v16  ;;  %v4822_v4 = vmov 0.0   ;;  %v4823_v16 = vld [vmem:[#allocation25_spill] sm:$0xff] }
 0x461   : > { %2182 = vmatpush1.msra.mxu0 %v4813_v5  ;;  %2253 = vmatpush1.msra.mxu1 %v4814_v59  ;;  %v4824_v59 = vld [vmem:[#allocation6_spill] sm:$0xff] }
 0x462   : > { %2183 = vmatprep.subr.mxu0 %v4815_v25  ;;  %2254 = vmatprep.subr.mxu1 %v4816_v8  ;;  %v4825_v25 = vld [vmem:[#allocation7_spill] sm:$0xff]  ;;  %v4826_v8 = vld [vmem:[#allocation5_spill] sm:$0xff] }
 0x463   : > { %2184 = vmatpush1.msra.mxu0 %v4817_v31  ;;  %2255 = vmatpush1.msra.mxu1 %v4818_v3  ;;  %vm2331_vm9 = vcmp.eq.s32.totalorder %v4826_v8, 5  ;;  %v4827_v31 = vmov 0   ;;  %v4831_v8 = vld [vmem:[#allocation40_spill] sm:$0xff] }
 0x464   : > { %2185 = vmatprep.subr.mxu0 %v4819_v43  ;;  %2256 = vmatprep.subr.mxu1 %v4820_v58  ;;  %v2333_v3 = vsel %vm2331_vm9, 1, %v4827_v31  ;;  %v4828_v58 = vld [vmem:[#allocation37_spill] sm:$0xff] }
 0x465   : > { %2186 = vmatpush1.msra.mxu0 %v4821_v52  ;;  %2219 = vmatprep.mubr.f32.mxu0 %v4822_v4  ;;  %v4829_v52 = vld [vmem:[#allocation38_spill] sm:$0xff] }
 0x466   : > { %2257 = vmatpush1.msra.mxu1 %v4823_v16  ;;  %2290 = vmatprep.mubr.f32.mxu1 %v4822_v4  ;;  %v4830_v16 = vld [vmem:[#allocation39_spill] sm:$0xff] }
 0x467   : > { %2413 = vmatprep.subr.mxu0 %v4824_v59  ;;  %2484 = vmatprep.subr.mxu1 %v4825_v25 }
 0x468   : > { %2335 = vperm.xlu1 %3089, %v2333_v3  }
 0x506   : > { %v1963_v43 = vpop.f32.mrf.mxu0  ;;  %v2034_v5 = vpop.f32.mrf.mxu1 }
 0x507   : > { %v2039_v57 = vadd.f32 %v1963_v43, %v4828_v58  ;;  %v2041_v9 = vadd.f32 %v2034_v5, %v4829_v52 }
 0x508   : > { %v1965_v6 = vpop.f32.mrf.mxu0  ;;  %v2036_v25 = vpop.f32.mrf.mxu1 }
 0x509   : > { %v3045_v62 = vmul.f32 -1.442695, %v2039_v57  ;;  %3154 = vtanh.f32 %v2041_v9  ;;  %v2040_v4 = vadd.f32 %v1965_v6, %v4830_v16  ;;  %v2042_v60 = vadd.f32 %v2036_v25, %v4831_v8 }
 0x50b   : > { %3156 = vpow2.f32 %v3045_v62  ;;  %v3046_v59 = vmul.f32 -1.442695, %v2040_v4  ;;  %v3047_v31 = vmul.f32 -1.442695, %v2042_v60 }
 0x50d   : > { %3158 = vpow2.f32 %v3046_v59 }
 0x50e   : > { %3160 = vpow2.f32 %v3047_v31 }
 0x516   : > { %v3155_v3 = vpop.eup %3154 }
 0x517   : > { %v4396_v43 = vsel %vm2079_vm10, %v3155_v3, %v4312_v34 }
 0x518   : > { %v3157_v5 = vpop.eup %3156 }
 0x519   : > { %v2046_v58 = vadd.f32 1.0, %v3157_v5 }
 0x51a   : > { %v3159_v57 = vpop.eup %3158 }
 0x51b   : > { %3162 = vrcp.f32 %v2046_v58  ;;  %v2052_v6 = vadd.f32 1.0, %v3159_v57  ;;  %v3161_v62 = vpop.eup %3160 }
 0x51c   : > { %v2059_v52 = vadd.f32 1.0, %v3161_v62 }
 0x51d   : > { %3164 = vrcp.f32 %v2052_v6 }
 0x51e   : > { %3166 = vrcp.f32 %v2059_v52  ;;  %v2667_v52 = vld [vmem:[%s3400_s21 + $0x1e0] sm:$0xff] }
 0x528   : > { %v3163_v9 = vpop.eup %3162 }
 0x529   : > { %v2064_v4 = vmul.f32 %v3163_v9, %v3155_v3 }
 0x52a   : > { %v3165_v16 = vpop.eup %3164 }
 0x52b   : > { %v2063_v8 = vmul.f32 %v3165_v16, %v4315_v63  ;;  %v3167_v34 = vpop.eup %3166  ;;  %v2670_v16 = vld [vmem:[%s3400_s21 + $0x1f8] sm:$0xff] }
 0x52d   : > { %v4399_v59 = vadd.f32 %v2064_v4, %v2063_v8  ;;  %v2668_v4 = vld [vmem:[%s3400_s21 + $0x1e8] sm:$0xff]  ;;  %v2669_v8 = vld [vmem:[%s3400_s21 + $0x1f0] sm:$0xff] }
 0x52f   : > { %3168 = vtanh.f32 %v4399_v59 }
 0x53c   : > { %v3169_v60 = vpop.eup %3168 }
 0x53d   : > { %v2067_v25 = vmul.f32 %v3169_v60, %v3167_v34  ;;  %v2666_v34 = vld [vmem:[%s3400_s21 + $0x1d8] sm:$0xff]  ;;  %v2663_v60 = vld [vmem:[%s3400_s21 + $0x1c0] sm:$0xff] }
 0x53f   : > { %v4404_v31 = vsel %vm2079_vm10, %v2067_v25, %v4320_v2  ;;  %2220 = vmatmul.mubr.f32.vlgmr.msra.gmra.mxu0 %v2067_v25  ;;  %2291 = vmatmul.mubr.f32.vlgmr.msra.gmra.mxu1 %v2067_v25  ;;  %v2665_v25 = vld [vmem:[%s3400_s21 + $0x1d0] sm:$0xff] }
 0x540   : > { %2414 = vmatpush1.msra.mxu0 %v3966_v0  ;;  %2485 = vmatpush1.msra.mxu1 %v3969_v10  ;;  %v4832_v0 = vld [vmem:[#allocation8_spill] sm:$0xff]  ;;  %v4833_v10 = vld [vmem:[#allocation9_spill] sm:$0xff] }
 0x541   : > { %2415 = vmatprep.subr.mxu0 %v3974_v11  ;;  %2486 = vmatprep.subr.mxu1 %v3977_v12  ;;  %v4834_v11 = vld [vmem:[#allocation10_spill] sm:$0xff]  ;;  %v4835_v12 = vld [vmem:[#allocation11_spill] sm:$0xff] }
 0x542   : > { %2416 = vmatpush1.msra.mxu0 %v3982_v13  ;;  %2487 = vmatpush1.msra.mxu1 %v3985_v14  ;;  %v4836_v13 = vld [vmem:[#allocation12_spill] sm:$0xff]  ;;  %v4837_v14 = vld [vmem:[#allocation13_spill] sm:$0xff] }
 0x543   : > { %2417 = vmatprep.subr.mxu0 %v3990_v15  ;;  %2488 = vmatprep.subr.mxu1 %v3993_v17  ;;  %v4838_v15 = vld [vmem:[#allocation14_spill] sm:$0xff]  ;;  %v4839_v17 = vld [vmem:[#allocation15_spill] sm:$0xff] }
 0x544   : > { %2418 = vmatpush1.msra.mxu0 %v3998_v18  ;;  %2489 = vmatpush1.msra.mxu1 %v4001_v19  ;;  %v4840_v18 = vld [vmem:[#allocation16_spill] sm:$0xff]  ;;  %v4841_v19 = vld [vmem:[#allocation17_spill] sm:$0xff] }
 0x545   : > { %2419 = vmatprep.subr.mxu0 %v4006_v20  ;;  %2490 = vmatprep.subr.mxu1 %v4009_v21  ;;  %v4842_v20 = vld [vmem:[#allocation18_spill] sm:$0xff]  ;;  %v4843_v21 = vld [vmem:[#allocation19_spill] sm:$0xff] }
 0x546   : > { %2420 = vmatpush1.msra.mxu0 %v4014_v22  ;;  %2491 = vmatpush1.msra.mxu1 %v4017_v23  ;;  %v4844_v22 = vld [vmem:[#allocation20_spill] sm:$0xff]  ;;  %v4845_v23 = vld [vmem:[#allocation21_spill] sm:$0xff] }
 0x547   : > { %2421 = vmatprep.subr.mxu0 %v4022_v24  ;;  %2492 = vmatprep.subr.mxu1 %v4025_v26  ;;  %v4846_v24 = vld [vmem:[#allocation22_spill] sm:$0xff]  ;;  %v4847_v26 = vld [vmem:[#allocation23_spill] sm:$0xff] }
 0x548   : > { %2422 = vmatpush1.msra.mxu0 %v4030_v27  ;;  %2493 = vmatpush1.msra.mxu1 %v4033_v28  ;;  %v4848_v27 = vld [vmem:[#allocation24_spill] sm:$0xff]  ;;  %v4849_v28 = vmov 0.0  }
 0x549   : > { %2423 = vmatprep.subr.mxu0 %v4038_v29  ;;  %2494 = vmatprep.subr.mxu1 %v4041_v30  ;;  %v4850_v29 = vld [vmem:[#allocation25_spill] sm:$0xff] }
 0x54a   : > { %2424 = vmatpush1.msra.mxu0 %v4046_v32  ;;  %2495 = vmatpush1.msra.mxu1 %v4049_v33  ;;  %v4851_v30 = vld [vmem:[#allocation5_spill] sm:$0xff]  ;;  %v4852_v32 = vmov 0  }
 0x54b   : > { %2425 = vmatprep.subr.mxu0 %v4054_v36  ;;  %2496 = vmatprep.subr.mxu1 %v4057_v37  ;;  %vm2589_vm11 = vcmp.eq.s32.totalorder %v4851_v30, 6  ;;  %v2640_v30 = vld [vmem:[%s3400_s21 + $0x108] sm:$0xff] }
 0x54c   : > { %2426 = vmatpush1.msra.mxu0 %v4062_v38  ;;  %2497 = vmatpush1.msra.mxu1 %v4065_v39  ;;  %v2591_v33 = vsel %vm2589_vm11, 1, %v4852_v32  ;;  %v4853_v38 = vld [vmem:[#allocation41_spill] sm:$0xff] }
 0x54d   : > { %2427 = vmatprep.subr.mxu0 %v4070_v40  ;;  %2498 = vmatprep.subr.mxu1 %v4073_v41  ;;  %v4854_v40 = vld [vmem:[#allocation42_spill] sm:$0xff] }
 0x54e   : > { %2428 = vmatpush1.msra.mxu0 %v4078_v42  ;;  %2499 = vmatpush1.msra.mxu1 %v4081_v44 }
 0x54f   : > { %2429 = vmatprep.subr.mxu0 %v4086_v45  ;;  %2500 = vmatprep.subr.mxu1 %v4089_v46  ;;  %v4855_v45 = vld [vmem:[#allocation43_spill] sm:$0xff] }
 0x550   : > { %2430 = vmatpush1.msra.mxu0 %v4094_v47  ;;  %2501 = vmatpush1.msra.mxu1 %v4097_v48 }
 0x551   : > { %2431 = vmatprep.subr.mxu0 %v4102_v49  ;;  %2502 = vmatprep.subr.mxu1 %v4105_v50  ;;  %v2336_v49 = vpop.permute.xlu1 %2335  ;;  %v4856_v50 = vld [vmem:[#allocation44_spill] sm:$0xff] }
 0x552   : > { %2432 = vmatpush1.msra.mxu0 %v4110_v51  ;;  %2503 = vmatpush1.msra.mxu1 %v4113_v53  ;;  %vm2337_vm12 = vcmp.eq.s32.totalorder %v2336_v49, 1  ;;  %v2627_v49 = vld [vmem:[%s3400_s21 + $0xa0] sm:$0xff] }
 0x553   : > { %2433 = vmatprep.subr.mxu0 %v4118_v54  ;;  %2504 = vmatprep.subr.mxu1 %v4121_v55 }
 0x554   : > { %2434 = vmatpush1.msra.mxu0 %v4126_v56  ;;  %2505 = vmatpush1.msra.mxu1 %v4129_v7 }
 0x555   : > { %2435 = vmatprep.subr.mxu0 %v4134_v61  ;;  %2506 = vmatprep.subr.mxu1 %v4137_v1 }
 0x556   : > { %2436 = vmatpush1.msra.mxu0 %v4832_v0  ;;  %2507 = vmatpush1.msra.mxu1 %v4833_v10  ;;  %v2662_v0 = vld [vmem:[%s3400_s21 + $0x1b8] sm:$0xff]  ;;  %v2659_v10 = vld [vmem:[%s3400_s21 + $0x1a0] sm:$0xff] }
 0x557   : > { %2437 = vmatprep.subr.mxu0 %v4834_v11  ;;  %2508 = vmatprep.subr.mxu1 %v4835_v12  ;;  %v2661_v11 = vld [vmem:[%s3400_s21 + $0x1b0] sm:$0xff]  ;;  %v2656_v12 = vld [vmem:[%s3400_s21 + $0x188] sm:$0xff] }
 0x558   : > { %2438 = vmatpush1.msra.mxu0 %v4836_v13  ;;  %2509 = vmatpush1.msra.mxu1 %v4837_v14  ;;  %v2658_v13 = vld [vmem:[%s3400_s21 + $0x198] sm:$0xff]  ;;  %v2655_v14 = vld [vmem:[%s3400_s21 + $0x180] sm:$0xff] }
 0x559   : > { %2439 = vmatprep.subr.mxu0 %v4838_v15  ;;  %2510 = vmatprep.subr.mxu1 %v4839_v17  ;;  %v2657_v15 = vld [vmem:[%s3400_s21 + $0x190] sm:$0xff]  ;;  %v2652_v17 = vld [vmem:[%s3400_s21 + $0x168] sm:$0xff] }
 0x55a   : > { %2440 = vmatpush1.msra.mxu0 %v4840_v18  ;;  %2511 = vmatpush1.msra.mxu1 %v4841_v19  ;;  %v2654_v18 = vld [vmem:[%s3400_s21 + $0x178] sm:$0xff]  ;;  %v2651_v19 = vld [vmem:[%s3400_s21 + $0x160] sm:$0xff] }
 0x55b   : > { %2441 = vmatprep.subr.mxu0 %v4842_v20  ;;  %2512 = vmatprep.subr.mxu1 %v4843_v21  ;;  %v2653_v20 = vld [vmem:[%s3400_s21 + $0x170] sm:$0xff]  ;;  %v2648_v21 = vld [vmem:[%s3400_s21 + $0x148] sm:$0xff] }
 0x55c   : > { %2442 = vmatpush1.msra.mxu0 %v4844_v22  ;;  %2513 = vmatpush1.msra.mxu1 %v4845_v23  ;;  %v2650_v22 = vld [vmem:[%s3400_s21 + $0x158] sm:$0xff]  ;;  %v2647_v23 = vld [vmem:[%s3400_s21 + $0x140] sm:$0xff] }
 0x55d   : > { %2443 = vmatprep.subr.mxu0 %v4846_v24  ;;  %2514 = vmatprep.subr.mxu1 %v4847_v26  ;;  %v2649_v24 = vld [vmem:[%s3400_s21 + $0x150] sm:$0xff]  ;;  %v2644_v26 = vld [vmem:[%s3400_s21 + $0x128] sm:$0xff] }
 0x55e   : > { %2444 = vmatpush1.msra.mxu0 %v4848_v27  ;;  %2477 = vmatprep.mubr.f32.mxu0 %v4849_v28  ;;  %v2646_v27 = vld [vmem:[%s3400_s21 + $0x138] sm:$0xff] }
 0x55f   : > { %2515 = vmatpush1.msra.mxu1 %v4850_v29  ;;  %2548 = vmatprep.mubr.f32.mxu1 %v4849_v28  ;;  %v2645_v29 = vld [vmem:[%s3400_s21 + $0x130] sm:$0xff] }
 0x560   : > { %2593 = vperm.xlu0 %3088, %v2591_v33   ;;  %2671 = vmatprep.subr.mxu0 %v2668_v4  ;;  %v2642_v33 = vld [vmem:[%s3400_s21 + $0x118] sm:$0xff]  ;;  %v2608_v4 = vld [vmem:[%s3400_s21 + $0x8] sm:$0xff] }
 0x561   : > { %2742 = vmatprep.subr.mxu1 %v2670_v16  ;;  %v2610_v16 = vld [vmem:[%s3400_s21 + $0x18] sm:$0xff] }
 0x5ff   : > { %v2221_v36 = vpop.f32.mrf.mxu0  ;;  %v2292_v37 = vpop.f32.mrf.mxu1 }
 0x600   : > { %v2297_v39 = vadd.f32 %v2221_v36, %v4853_v38  ;;  %v2299_v41 = vadd.f32 %v2292_v37, %v4854_v40  ;;  %v2639_v36 = vld [vmem:[%s3400_s21 + $0x100] sm:$0xff]  ;;  %v2641_v37 = vld [vmem:[%s3400_s21 + $0x110] sm:$0xff]  ;;  %v2636_v38 = vld [vmem:[%s3400_s21 + $0xe8] sm:$0xff] }
 0x601   : > { %v2223_v42 = vpop.f32.mrf.mxu0  ;;  %v2294_v48 = vpop.f32.mrf.mxu1  ;;  %v2635_v40 = vld [vmem:[%s3400_s21 + $0xe0] sm:$0xff] }
 0x602   : > { %v3048_v44 = vmul.f32 -1.442695, %v2297_v39  ;;  %3170 = vtanh.f32 %v2299_v41  ;;  %v2298_v46 = vadd.f32 %v2223_v42, %v4855_v45  ;;  %v2300_v51 = vadd.f32 %v2294_v48, %v4856_v50  ;;  %v2638_v39 = vld [vmem:[%s3400_s21 + $0xf8] sm:$0xff]  ;;  %v2637_v41 = vld [vmem:[%s3400_s21 + $0xf0] sm:$0xff]  ;;  %v2632_v42 = vld [vmem:[%s3400_s21 + $0xc8] sm:$0xff] }
 0x603   : > { %v2631_v45 = vld [vmem:[%s3400_s21 + $0xc0] sm:$0xff]  ;;  %v2630_v48 = vld [vmem:[%s3400_s21 + $0xb8] sm:$0xff]  ;;  %v2629_v50 = vld [vmem:[%s3400_s21 + $0xb0] sm:$0xff] }
 0x604   : > { %3172 = vpow2.f32 %v3048_v44  ;;  %v3049_v47 = vmul.f32 -1.442695, %v2298_v46  ;;  %v3050_v54 = vmul.f32 -1.442695, %v2300_v51  ;;  %v2634_v44 = vld [vmem:[%s3400_s21 + $0xd8] sm:$0xff]  ;;  %v2633_v46 = vld [vmem:[%s3400_s21 + $0xd0] sm:$0xff] }
 0x605   : > { %v2624_v51 = vld [vmem:[%s3400_s21 + $0x88] sm:$0xff] }
 0x606   : > { %3174 = vpow2.f32 %v3049_v47  ;;  %v2628_v47 = vld [vmem:[%s3400_s21 + $0xa8] sm:$0xff] }
 0x607   : > { %3176 = vpow2.f32 %v3050_v54  ;;  %v2623_v54 = vld [vmem:[%s3400_s21 + $0x80] sm:$0xff] }
 0x60f   : > { %v3171_v53 = vpop.eup %3170 }
 0x610   : > { %v4478_v55 = vsel %vm2337_vm12, %v3171_v53, %v4396_v43 }
 0x611   : > { %v3173_v56 = vpop.eup %3172 }
 0x612   : > { %v2304_v7 = vadd.f32 1.0, %v3173_v56  ;;  %v2625_v56 = vld [vmem:[%s3400_s21 + $0x90] sm:$0xff] }
 0x613   : > { %v3175_v61 = vpop.eup %3174 }
 0x614   : > { %3178 = vrcp.f32 %v2304_v7  ;;  %v2310_v1 = vadd.f32 1.0, %v3175_v61  ;;  %v3177_v63 = vpop.eup %3176  ;;  %v2620_v7 = vld [vmem:[%s3400_s21 + $0x68] sm:$0xff]  ;;  %v2622_v61 = vld [vmem:[%s3400_s21 + $0x78] sm:$0xff] }
 0x615   : > { %v2317_v5 = vadd.f32 1.0, %v3177_v63  ;;  %v2621_v63 = vld [vmem:[%s3400_s21 + $0x70] sm:$0xff] }
 0x616   : > { %3180 = vrcp.f32 %v2310_v1  ;;  %v2619_v1 = vld [vmem:[%s3400_s21 + $0x60] sm:$0xff] }
 0x617   : > { %3182 = vrcp.f32 %v2317_v5  ;;  %v2617_v5 = vld [vmem:[%s3400_s21 + $0x50] sm:$0xff] }
 0x621   : > { %v3179_v2 = vpop.eup %3178 }
 0x622   : > { %v2322_v35 = vmul.f32 %v3179_v2, %v3171_v53  ;;  %v2626_v53 = vld [vmem:[%s3400_s21 + $0x98] sm:$0xff]  ;;  %v2616_v2 = vld [vmem:[%s3400_s21 + $0x48] sm:$0xff] }
 0x623   : > { %v3181_v3 = vpop.eup %3180 }
 0x624   : > { %v2321_v58 = vmul.f32 %v3181_v3, %v4399_v59  ;;  %v3183_v43 = vpop.eup %3182  ;;  %v2664_v59 = vld [vmem:[%s3400_s21 + $0x1c8] sm:$0xff]  ;;  %v2615_v3 = vld [vmem:[%s3400_s21 + $0x40] sm:$0xff] }
 0x626   : > { %v4481_v57 = vadd.f32 %v2322_v35, %v2321_v58  ;;  %v2618_v35 = vld [vmem:[%s3400_s21 + $0x58] sm:$0xff]  ;;  %v2612_v58 = vld [vmem:[%s3400_s21 + $0x28] sm:$0xff] }
 0x628   : > { %3184 = vtanh.f32 %v4481_v57 }
 0x635   : > { %v3185_v6 = vpop.eup %3184 }
 0x636   : > { %v2325_v62 = vmul.f32 %v3185_v6, %v3183_v43  ;;  %v2614_v43 = vld [vmem:[%s3400_s21 + $0x38] sm:$0xff]  ;;  %v2611_v6 = vld [vmem:[%s3400_s21 + $0x20] sm:$0xff] }
 0x638   : > { %v4486_v9 = vsel %vm2337_vm12, %v2325_v62, %v4404_v31  ;;  %2478 = vmatmul.mubr.f32.vlgmr.msra.gmra.mxu0 %v2325_v62  ;;  %2549 = vmatmul.mubr.f32.vlgmr.msra.gmra.mxu1 %v2325_v62  ;;  %v2660_v31 = vld [vmem:[%s3400_s21 + $0x1a8] sm:$0xff]  ;;  %v2613_v62 = vld [vmem:[%s3400_s21 + $0x30] sm:$0xff] }
 0x639   : > { %2735 = vmatprep.mubr.f32.mxu0 %v4849_v28  ;;  %2806 = vmatprep.mubr.f32.mxu1 %v4849_v28  ;;  %v2643_v28 = vld [vmem:[%s3400_s21 + $0x120] sm:$0xff] }
 0x63a   : > { %2672 = vmatpush1.msra.mxu0 %v2667_v52  ;;  %2743 = vmatpush1.msra.mxu1 %v2669_v8  ;;  %v2607_v52 = vld [vmem:[%s3400_s21] sm:$0xff]  ;;  %v2609_v8 = vld [vmem:[%s3400_s21 + $0x10] sm:$0xff] }
 0x63b   : > { %2673 = vmatprep.subr.mxu0 %v2664_v59  ;;  %2744 = vmatprep.subr.mxu1 %v2666_v34  ;;  %v2844_v59 = vld [vmem:[%s4596_s6] sm:$0xff] }
 0x63c   : > { %2674 = vmatpush1.msra.mxu0 %v2663_v60  ;;  %2745 = vmatpush1.msra.mxu1 %v2665_v25  ;;  %vm2847_vm13 = vcmp.eq.s32.totalorder %v2844_v59, 7 }
 0x63d   : > { %2675 = vmatprep.subr.mxu0 %v2660_v31  ;;  %2746 = vmatprep.subr.mxu1 %v2662_v0  ;;  %v2849_v34 = vsel %vm2847_vm13, 1, %v4852_v32  ;;  %v4857_v31 = vld [vmem:[#allocation45_spill] sm:$0xff] }
 0x63e   : > { %2676 = vmatpush1.msra.mxu0 %v2659_v10  ;;  %2747 = vmatpush1.msra.mxu1 %v2661_v11  ;;  %v4858_v10 = vld [vmem:[#allocation46_spill] sm:$0xff] }
 0x63f   : > { %2677 = vmatprep.subr.mxu0 %v2656_v12  ;;  %2748 = vmatprep.subr.mxu1 %v2658_v13 }
 0x640   : > { %2678 = vmatpush1.msra.mxu0 %v2655_v14  ;;  %2749 = vmatpush1.msra.mxu1 %v2657_v15  ;;  %v4859_v14 = vld [vmem:[#allocation47_spill] sm:$0xff] }
 0x641   : > { %2679 = vmatprep.subr.mxu0 %v2652_v17  ;;  %2750 = vmatprep.subr.mxu1 %v2654_v18 }
 0x642   : > { %2680 = vmatpush1.msra.mxu0 %v2651_v19  ;;  %2751 = vmatpush1.msra.mxu1 %v2653_v20  ;;  %v2594_v19 = vpop.permute.xlu0 %2593  ;;  %v4860_v20 = vld [vmem:[#allocation48_spill] sm:$0xff] }
 0x643   : > { %2681 = vmatprep.subr.mxu0 %v2648_v21  ;;  %2752 = vmatprep.subr.mxu1 %v2650_v22  ;;  %vm2595_vm14 = vcmp.eq.s32.totalorder %v2594_v19, 1 }
 0x644   : > { %2682 = vmatpush1.msra.mxu0 %v2647_v23  ;;  %2753 = vmatpush1.msra.mxu1 %v2649_v24 }
 0x645   : > { %2683 = vmatprep.subr.mxu0 %v2644_v26  ;;  %2754 = vmatprep.subr.mxu1 %v2646_v27 }
 0x646   : > { %2684 = vmatpush1.msra.mxu0 %v2643_v28  ;;  %2755 = vmatpush1.msra.mxu1 %v2645_v29 }
 0x647   : > { %2685 = vmatprep.subr.mxu0 %v2640_v30  ;;  %2756 = vmatprep.subr.mxu1 %v2642_v33 }
 0x648   : > { %2686 = vmatpush1.msra.mxu0 %v2639_v36  ;;  %2757 = vmatpush1.msra.mxu1 %v2641_v37 }
 0x649   : > { %2687 = vmatprep.subr.mxu0 %v2636_v38  ;;  %2758 = vmatprep.subr.mxu1 %v2638_v39 }
 0x64a   : > { %2688 = vmatpush1.msra.mxu0 %v2635_v40  ;;  %2759 = vmatpush1.msra.mxu1 %v2637_v41 }
 0x64b   : > { %2689 = vmatprep.subr.mxu0 %v2632_v42  ;;  %2760 = vmatprep.subr.mxu1 %v2634_v44 }
 0x64c   : > { %2690 = vmatpush1.msra.mxu0 %v2631_v45  ;;  %2761 = vmatpush1.msra.mxu1 %v2633_v46  ;;  %v4861_v46 = vld [vmem:[#allocation49_spill] sm:$0xff] }
 0x64d   : > { %2691 = vmatprep.subr.mxu0 %v2628_v47  ;;  %2762 = vmatprep.subr.mxu1 %v2630_v48  ;;  %v4862_v48 = vld [vmem:[#allocation50_spill] sm:$0xff] }
 0x64e   : > { %2692 = vmatpush1.msra.mxu0 %v2627_v49  ;;  %2763 = vmatpush1.msra.mxu1 %v2629_v50 }
 0x64f   : > { %2693 = vmatprep.subr.mxu0 %v2624_v51  ;;  %2764 = vmatprep.subr.mxu1 %v2626_v53  ;;  %v4863_v51 = vld [vmem:[#allocation51_spill] sm:$0xff] }
 0x650   : > { %2694 = vmatpush1.msra.mxu0 %v2623_v54  ;;  %2765 = vmatpush1.msra.mxu1 %v2625_v56 }
 0x651   : > { %2695 = vmatprep.subr.mxu0 %v2620_v7  ;;  %2766 = vmatprep.subr.mxu1 %v2622_v61 }
 0x652   : > { %2696 = vmatpush1.msra.mxu0 %v2619_v1  ;;  %2767 = vmatpush1.msra.mxu1 %v2621_v63 }
 0x653   : > { %2697 = vmatprep.subr.mxu0 %v2616_v2  ;;  %2768 = vmatprep.subr.mxu1 %v2618_v35 }
 0x654   : > { %2698 = vmatpush1.msra.mxu0 %v2615_v3  ;;  %2769 = vmatpush1.msra.mxu1 %v2617_v5 }
 0x655   : > { %2699 = vmatprep.subr.mxu0 %v2612_v58  ;;  %2770 = vmatprep.subr.mxu1 %v2614_v43 }
 0x656   : > { %2700 = vmatpush1.msra.mxu0 %v2611_v6  ;;  %2771 = vmatpush1.msra.mxu1 %v2613_v62 }
 0x657   : > { %2701 = vmatprep.subr.mxu0 %v2608_v4  ;;  %2772 = vmatprep.subr.mxu1 %v2610_v16 }
 0x658   : > { %2702 = vmatpush1.msra.mxu0 %v2607_v52  ;;  %2773 = vmatpush1.msra.mxu1 %v2609_v8 }
 0x659   : > { %2851 = vperm.xlu1 %3089, %v2849_v34  }
 0x6d4   : > { %v2852_v7 = vpop.permute.xlu1 %2851 }
 0x6d5   : > { %vm2853_vm15 = vcmp.eq.s32.totalorder %v2852_v7, 1 }
 0x6f8   : > { %v2479_v60 = vpop.f32.mrf.mxu0  ;;  %v2550_v25 = vpop.f32.mrf.mxu1 }
 0x6f9   : > { %v2555_v0 = vadd.f32 %v2479_v60, %v4857_v31  ;;  %v2557_v11 = vadd.f32 %v2550_v25, %v4858_v10 }
 0x6fa   : > { %v2481_v12 = vpop.f32.mrf.mxu0  ;;  %v2552_v18 = vpop.f32.mrf.mxu1 }
 0x6fb   : > { %v3051_v13 = vmul.f32 -1.442695, %v2555_v0  ;;  %3186 = vtanh.f32 %v2557_v11  ;;  %v2556_v15 = vadd.f32 %v2481_v12, %v4859_v14  ;;  %v2558_v21 = vadd.f32 %v2552_v18, %v4860_v20 }
 0x6fd   : > { %3188 = vpow2.f32 %v3051_v13  ;;  %v3052_v17 = vmul.f32 -1.442695, %v2556_v15  ;;  %v3053_v22 = vmul.f32 -1.442695, %v2558_v21 }
 0x6ff   : > { %3190 = vpow2.f32 %v3052_v17 }
 0x700   : > { %3192 = vpow2.f32 %v3053_v22 }
 0x708   : > { %v3187_v32 = vpop.eup %3186 }
 0x709   : > { %v2599_v23 = vsel %vm2595_vm14, %v3187_v32, %v4478_v55 }
 0x70a   : > { %v3189_v24 = vpop.eup %3188 }
 0x70b   : > { %v2562_v26 = vadd.f32 1.0, %v3189_v24 }
 0x70c   : > { %v3191_v27 = vpop.eup %3190 }
 0x70d   : > { %3194 = vrcp.f32 %v2562_v26  ;;  %v2568_v28 = vadd.f32 1.0, %v3191_v27  ;;  %v3193_v29 = vpop.eup %3192 }
 0x70e   : > { %v2575_v37 = vadd.f32 1.0, %v3193_v29 }
 0x70f   : > { %3196 = vrcp.f32 %v2568_v28 }
 0x710   : > { %3198 = vrcp.f32 %v2575_v37 }
 0x71a   : > { %v3195_v30 = vpop.eup %3194 }
 0x71b   : > { %v2580_v33 = vmul.f32 %v3195_v30, %v3187_v32 }
 0x71c   : > { %v3197_v36 = vpop.eup %3196 }
 0x71d   : > { %v2579_v38 = vmul.f32 %v3197_v36, %v4481_v57  ;;  %v3199_v40 = vpop.eup %3198 }
 0x71f   : > { %v2581_v39 = vadd.f32 %v2580_v33, %v2579_v38 }
 0x721   : > { %3200 = vtanh.f32 %v2581_v39 }
 0x72e   : > { %v3201_v41 = vpop.eup %3200 }
 0x72f   : > { %v2583_v55 = vmul.f32 %v3201_v41, %v3199_v40 }
 0x731   : > { %v2596_v42 = vsel %vm2595_vm14, %v2583_v55, %v4486_v9  ;;  %2736 = vmatmul.mubr.f32.vlgmr.msra.gmra.mxu0 %v2583_v55  ;;  %2807 = vmatmul.mubr.f32.vlgmr.msra.gmra.mxu1 %v2583_v55  ;;  %v4864_v9 = vld [vmem:[#allocation52_spill] sm:$0xff] }
 0x7f1   : > { %v2737_v44 = vpop.f32.mrf.mxu0  ;;  %v2808_v45 = vpop.f32.mrf.mxu1 }
 0x7f2   : > { %v2813_v47 = vadd.f32 %v2737_v44, %v4861_v46  ;;  %v2815_v49 = vadd.f32 %v2808_v45, %v4862_v48 }
 0x7f3   : > { %v2739_v50 = vpop.f32.mrf.mxu0  ;;  %v2810_v56 = vpop.f32.mrf.mxu1 }
 0x7f4   : > { %v3054_v57 = vmul.f32 -1.442695, %v2813_v47  ;;  %3202 = vtanh.f32 %v2815_v49  ;;  %v2814_v53 = vadd.f32 %v2739_v50, %v4863_v51  ;;  %v2816_v61 = vadd.f32 %v2810_v56, %v4864_v9 }
 0x7f6   : > { %3204 = vpow2.f32 %v3054_v57  ;;  %v3055_v54 = vmul.f32 -1.442695, %v2814_v53  ;;  %v3056_v63 = vmul.f32 -1.442695, %v2816_v61 }
 0x7f8   : > { %3206 = vpow2.f32 %v3055_v54 }
 0x7f9   : > { %3208 = vpow2.f32 %v3056_v63 }
 0x801   : > { %v3203_v1 = vpop.eup %3202 }
 0x802   : > { %v2857_v2 = vsel %vm2853_vm15, %v3203_v1, %v2599_v23 }
 0x803   : > { %v3205_v35 = vpop.eup %3204  ;;  %2858 = vst [vmem:[%s433_s23] sm:$0xff] %v2857_v2 }
 0x804   : > { %v2820_v3 = vadd.f32 1.0, %v3205_v35 }
 0x805   : > { %v3207_v5 = vpop.eup %3206 }
 0x806   : > { %3210 = vrcp.f32 %v2820_v3  ;;  %v2826_v58 = vadd.f32 1.0, %v3207_v5  ;;  %v3209_v43 = vpop.eup %3208 }
 0x807   : > { %v2833_v16 = vadd.f32 1.0, %v3209_v43 }
 0x808   : > { %3212 = vrcp.f32 %v2826_v58 }
 0x809   : > { %3214 = vrcp.f32 %v2833_v16 }
 0x813   : > { %v3211_v6 = vpop.eup %3210 }
 0x814   : > { %v2838_v62 = vmul.f32 %v3211_v6, %v3203_v1 }
 0x815   : > { %v3213_v4 = vpop.eup %3212 }
 0x816   : > { %v2837_v52 = vmul.f32 %v3213_v4, %v2581_v39  ;;  %v3215_v59 = vpop.eup %3214 }
 0x818   : > { %v2839_v8 = vadd.f32 %v2838_v62, %v2837_v52 }
 0x81a   : > { %3216 = vtanh.f32 %v2839_v8 }
 0x827   : > { %v3217_v34 = vpop.eup %3216 }
 0x828   : > { %v2841_v60 = vmul.f32 %v3217_v34, %v3215_v59 }
 0x82a   : > { %v2854_v25 = vsel %vm2853_vm15, %v2841_v60, %v2596_v42 }
 0x82b   : > { %2855 = vst [vmem:[%s429_s26] sm:$0xff] %v2854_v25 }
 0x82c PF: > { %s19_s29 = sadd.s32 1, %s3241_s29   ;;  %s4865_s27 = smov %s3237_s28 }
 0x82d   : > { %p16_p5 = scmp.ge.s32.totalorder %s19_s29, 4   ;;  %s4866_s28 = smov %s4868_s30 }
 0x82f   :  { %18 = sbr.rel (!%p16_p5) target bundleno = 2 (0x2), region = 116 }

</bundles_post_ra>
